<compile_context>
chip_gen: v7x
topology: tpu7x:2x2x1
jax: 0.10.0
libtpu: 0.0.40
codegen_flags: <defaults>
</compile_context>

<pallas_src>
import functools

import jax
import jax.numpy as jnp
from jax.experimental import pallas as pl
from jax.experimental.pallas import tpu as pltpu

EPS = 1e-5
LANE = 128


# ----------------------------------------------------------------------------
# helpers
# ----------------------------------------------------------------------------
def _round_up(x, m):
    return (x + m - 1) // m * m


def _pad_axis(a, axis, size):
    pad = [(0, 0)] * a.ndim
    pad[axis] = (0, size - a.shape[axis])
    return jnp.pad(a, pad)


def _fold_bn(gamma, beta, mean, var):
    scale = gamma / jnp.sqrt(var + EPS)
    return scale, beta - mean * scale


def _vmem_budget():
    """Generation-aware VMEM limits (v7x: 64 MiB/TC, v5e/v6e: 128 MiB)."""
    try:
        cap = int(pltpu.get_tpu_info().vmem_capacity_bytes)
    except Exception:                       # conservative (v7x-sized) fallback
        cap = 64 * 1024 * 1024
    limit = min(3 * cap // 4, 64 * 1024 * 1024)   # <=48 MiB on v7x, 64 MiB on v5e/v6e
    budget = cap // 8                             # per-step footprint target (8/16 MiB)
    return limit, budget


def _pick_tile_h(n_imgs, hout, wout, cin_p, cout_p, s, plane_h, plane_w, budget):
    """Largest divisor of hout whose fused-kernel VMEM footprint fits `budget`,
    then shrunk (if possible) so the parallel grid has >= 2 steps (v7x megacore)."""
    # Resident cost: double-buffered input planes + double-buffered weights/biases.
    base = 2 * (s * s * plane_h * plane_w * cin_p * 2)
    base += 2 * (9 * cin_p * cout_p + 9 * cout_p * cout_p + cin_p * cout_p) * 2
    best = 1
    for th in range(hout, 0, -1):
        if hout % th:
            continue
        per = ((th + 2) * (wout + 2) * cout_p * 2      # conv1 scratch (bf16)
               + (th + 2) * wout * cout_p * 4          # conv1 f32 accumulator
               + 2 * th * wout * cout_p * 4            # conv2 acc + shortcut (f32)
               + 2 * th * wout * cout_p * 2)           # double-buffered bf16 out tile
        if base + per <= budget:
            best = th
            break
    if n_imgs * (hout // best) < 2:                    # keep both v7x TensorCores busy
        for th in range(best - 1, 0, -1):
            if hout % th == 0:
                best = th
                break
    return best


# ----------------------------------------------------------------------------
# Fused kernel: conv1(3x3, stride)+bn1+relu -> conv2(3x3)+bn2 + shortcut + relu
# for one (image, row-tile) grid step.  x_ref holds the full parity-split padded
# image (resident across the row-tile axis); c1_ref is the W-padded conv1 scratch.
# ----------------------------------------------------------------------------
def _basic_block_kernel(x_ref, w1_ref, b1_ref, w2_ref, b2_ref, *rest,
                        TH, Wout, stride, has_ds):
    if has_ds:
        wd_ref, bd_ref, o_ref, c1_ref = rest
    else:
        o_ref, c1_ref = rest

    s = stride
    t = pl.program_id(1)
    nt = pl.num_programs(1)
    r0 = pl.multiple_of(t * TH, TH)              # first conv2-output row of this tile
    cin = x_ref.shape[-1]
    cout = w1_ref.shape[-1]

    # ---- conv1 (3x3, stride s) + folded-BN bias + ReLU on TH+2 rows (1-row halo) -----
    acc1 = jnp.zeros(((TH + 2) * Wout, cout), jnp.float32)
    for ky in range(3):
        for kx in range(3):
            plane = (ky % s) * s + (kx % s)      # parity plane: contiguous tap slice
            c0 = kx // s
            patch = x_ref[plane, pl.ds(r0 + ky // s, TH + 2), c0:c0 + Wout, :]
            acc1 = acc1 + jnp.dot(patch.reshape((TH + 2) * Wout, cin),
                                  w1_ref[ky * 3 + kx],
                                  preferred_element_type=jnp.float32)
    y1 = jnp.maximum(acc1 + b1_ref[...], 0.0).astype(c1_ref.dtype)

    # W-padded store (zero edge columns give conv2 its pad-1 in W); direct sub-stores.
    c1_ref[:, 1:Wout + 1, :] = y1.reshape(TH + 2, Wout, cout)
    zcol = jnp.zeros((TH + 2, 1, cout), c1_ref.dtype)
    c1_ref[:, 0:1, :] = zcol
    c1_ref[:, Wout + 1:Wout + 2, :] = zcol

    # conv2's pad-1 in H: zero the halo rows that fall outside the image.
    @pl.when(t == 0)
    def _():
        c1_ref[0] = jnp.zeros((Wout + 2, cout), c1_ref.dtype)

    @pl.when(t == nt - 1)
    def _():
        c1_ref[TH + 1] = jnp.zeros((Wout + 2, cout), c1_ref.dtype)

    # ---- conv2 (3x3, stride 1) + folded-BN bias ---------------------------------------
    acc2 = jnp.zeros((TH * Wout, cout), jnp.float32)
    for ky in range(3):
        for kx in range(3):
            patch = c1_ref[ky:ky + TH, kx:kx + Wout, :]
            acc2 = acc2 + jnp.dot(patch.reshape(TH * Wout, cout),
                                  w2_ref[ky * 3 + kx],
                                  preferred_element_type=jnp.float32)
    y2 = acc2 + b2_ref[...]

    # ---- shortcut: identity or fused (1x1 strided conv + folded BN), read straight
    #      from the resident input planes (no separately materialized strided slice) ----
    sc_plane = ((s + 1) % s) * s + (1 % s)
    sc_row0 = r0 + 1 + 1 // s
    sc_col0 = 1 // s
    xs = x_ref[sc_plane, pl.ds(sc_row0, TH), sc_col0:sc_col0 + Wout, :]
    xs = xs.reshape(TH * Wout, cin)
    if has_ds:
        sc = jnp.dot(xs, wd_ref[...], preferred_element_type=jnp.float32) + bd_ref[...]
    else:
        sc = xs.astype(jnp.float32)

    out = jnp.maximum(y2 + sc, 0.0)
    o_ref[...] = out.reshape(TH, Wout, cout).astype(o_ref.dtype)


# ----------------------------------------------------------------------------
# Parameter construction + full BasicBlock forward
# ----------------------------------------------------------------------------
def init_params(key, in_planes, planes, stride=1):
    ks = jax.random.split(key, 6)

    def bn(k, c):
        k1, k2, k3, k4 = jax.random.split(k, 4)
        gamma = 1.0 + 0.1 * jax.random.normal(k1, (c,), jnp.float32)
        beta = 0.1 * jax.random.normal(k2, (c,), jnp.float32)
        mean = 0.1 * jax.random.normal(k3, (c,), jnp.float32)
        var = 0.5 + jnp.abs(jax.random.normal(k4, (c,), jnp.float32))
        return _fold_bn(gamma, beta, mean, var)

    p = {"w1": 0.2 * jax.random.normal(ks[0], (3, 3, in_planes, planes), jnp.float32)}
    p["s1"], p["b1"] = bn(ks[1], planes)
    p["w2"] = 0.2 * jax.random.normal(ks[2], (3, 3, planes, planes), jnp.float32)
    p["s2"], p["b2"] = bn(ks[3], planes)
    p["has_downsample"] = (stride != 1) or (in_planes != planes)
    if p["has_downsample"]:
        p["wd"] = 0.2 * jax.random.normal(ks[4], (in_planes, planes), jnp.float32)
        p["sd"], p["bd"] = bn(ks[5], planes)
    return p


def basic_block_forward(x_nchw, p, *, stride=1):
    s = stride
    x = jnp.transpose(x_nchw, (0, 2, 3, 1))          # NCHW -> NHWC
    N, H, W, cin = x.shape
    planes = p["w1"].shape[-1]
    has_ds = p["has_downsample"]
    if not has_ds:
        assert s == 1 and cin == planes

    cin_p = _round_up(cin, LANE)
    cout_p = _round_up(planes, LANE)
    hout = (H - 1) // s + 1
    wout = (W - 1) // s + 1

    # --- input prep: bf16 + channel pad, generous spatial zero-pad, parity split -------
    # Parity plane (py,px) holds padded pixel (s*h+py, s*w+px); with top pad s+1 and left
    # pad 1, every 3x3 tap, the 1-row conv1 halo and the strided 1x1 shortcut tap become
    # contiguous slices of one plane inside the kernel.
    plane_h = hout + 2 + 2 // s
    plane_w = wout + 2 // s
    hp_full = s * plane_h
    wp_full = s * plane_w
    xb = _pad_axis(x.astype(jnp.bfloat16), 3, cin_p)
    xp = jnp.pad(xb, ((0, 0), (s + 1, hp_full - (s + 1) - H),
                      (1, wp_full - 1 - W), (0, 0)))
    xp = xp.reshape(N, plane_h, s, plane_w, s, cin_p)
    xp = jnp.transpose(xp, (0, 2, 4, 1, 3, 5)).reshape(N, s * s, plane_h, plane_w, cin_p)

    # --- weights: fold BN scale into conv weights (in f32), lane-pad, cast bf16 --------
    def prep_w(w, scale, cp_in, cp_out):
        w = w * scale
        w = _pad_axis(_pad_axis(w, w.ndim - 2, cp_in), w.ndim - 1, cp_out)
        return w.astype(jnp.bfloat16)

    def prep_b(b, cp_out):
        return _pad_axis(b, 0, cp_out).reshape(1, cp_out).astype(jnp.float32)

    w1 = prep_w(p["w1"], p["s1"], cin_p, cout_p).reshape(9, cin_p, cout_p)
    w2 = prep_w(p["w2"], p["s2"], cout_p, cout_p).reshape(9, cout_p, cout_p)
    b1 = prep_b(p["b1"], cout_p)
    b2 = prep_b(p["b2"], cout_p)

    vmem_limit, budget = _vmem_budget()
    th = _pick_tile_h(N, hout, wout, cin_p, cout_p, s, plane_h, plane_w, budget)
    nt = hout // th

    in_specs = [
        pl.BlockSpec((None, s * s, plane_h, plane_w, cin_p),
                     lambda n, t: (n, 0, 0, 0, 0)),          # resident across row tiles
        pl.BlockSpec((9, cin_p, cout_p), lambda n, t: (0, 0, 0)),
        pl.BlockSpec((1, cout_p), lambda n, t: (0, 0)),
        pl.BlockSpec((9, cout_p, cout_p), lambda n, t: (0, 0, 0)),
        pl.BlockSpec((1, cout_p), lambda n, t: (0, 0)),
    ]
    args = [xp, w1, b1, w2, b2]
    flops = 2 * N * hout * wout * (9 * cin_p * cout_p + 9 * cout_p * cout_p)
    if has_ds:
        wd = prep_w(p["wd"], p["sd"], cin_p, cout_p)
        bd = prep_b(p["bd"], cout_p)
        in_specs += [pl.BlockSpec((cin_p, cout_p), lambda n, t: (0, 0)),
                     pl.BlockSpec((1, cout_p), lambda n, t: (0, 0))]
        args += [wd, bd]
        flops += 2 * N * hout * wout * cin_p * cout_p

    bytes_accessed = sum(int(a.size) * a.dtype.itemsize for a in args)
    bytes_accessed += N * hout * wout * cout_p * 2

    kern = functools.partial(_basic_block_kernel, TH=th, Wout=wout, stride=s,
                             has_ds=has_ds)
    out = pl.pallas_call(
        kern,
        out_shape=jax.ShapeDtypeStruct((N, hout, wout, cout_p), jnp.bfloat16),
        grid=(N, nt),
        in_specs=in_specs,
        out_specs=pl.BlockSpec((None, th, wout, cout_p), lambda n, t: (n, t, 0, 0)),
        scratch_shapes=[pltpu.VMEM((th + 2, wout + 2, cout_p), jnp.bfloat16)],
        compiler_params=pltpu.CompilerParams(
            dimension_semantics=("parallel", "parallel"),
            vmem_limit_bytes=vmem_limit),
        cost_estimate=pl.CostEstimate(flops=flops, transcendentals=0,
                                      bytes_accessed=bytes_accessed),
    )(*args)

    # Module contract is NCHW f32 (padded-NHWC bf16 could be returned directly if the
    # consumer allowed it).
    out = out[..., :planes].astype(jnp.float32)
    return jnp.transpose(out, (0, 3, 1, 2))          # NHWC -> NCHW


# ----------------------------------------------------------------------------
# Pure-JAX reference (un-folded BN, bf16 convs) for a silent correctness check
# ----------------------------------------------------------------------------
def _reference(x_nchw, p, *, stride=1):
    xb = jnp.transpose(x_nchw, (0, 2, 3, 1)).astype(jnp.bfloat16)
    dn = ("NHWC", "HWIO", "NHWC")

    def conv(inp, w, s, pad):
        return jax.lax.conv_general_dilated(
            inp, w.astype(jnp.bfloat16), (s, s), pad,
            dimension_numbers=dn, preferred_element_type=jnp.float32)

    h = conv(xb, p["w1"], stride, [(1, 1), (1, 1)])
    h = jnp.maximum(h * p["s1"] + p["b1"], 0.0)
    h2 = conv(h.astype(jnp.bfloat16), p["w2"], 1, [(1, 1), (1, 1)])
    h2 = h2 * p["s2"] + p["b2"]
    if p["has_downsample"]:
        sc = conv(xb, p["wd"].reshape(1, 1, *p["wd"].shape), stride, "VALID")
        sc = sc * p["sd"] + p["bd"]
    else:
        sc = xb.astype(jnp.float32)
    out = jnp.maximum(h2 + sc, 0.0)
    return jnp.transpose(out, (0, 3, 1, 2))


if __name__ == "__main__":
    key = jax.random.PRNGKey(0)
    ka, kb, kc, kd = jax.random.split(key, 4)

    N, H, W = 2, 16, 16
    # Tolerance note: bf16 weights/activations, bf16 output, and BN scale folded into the
    # bf16 weights give ~0.5-1% relative divergence vs the un-folded f32/bf16 reference.
    ATOL = RTOL = 6e-2

    # Config A: stride=1, in_planes == planes -> identity shortcut.
    xA = jax.random.normal(ka, (N, 4, H, W), jnp.float32)
    pA = init_params(kb, 4, 4, stride=1)
    outA = jax.block_until_ready(basic_block_forward(xA, pA, stride=1))
    refA = _reference(xA, pA, stride=1)
    assert outA.shape == (N, 4, H, W), outA.shape
    assert jnp.allclose(outA, refA, atol=ATOL, rtol=RTOL), "mismatch vs reference (A)"

    # Config B: stride=2, in_planes != planes -> fused 1x1 downsample, parity-split taps.
    xB = jax.random.normal(kc, (N, 4, H, W), jnp.float32)
    pB = init_params(kd, 4, 8, stride=2)
    outB = jax.block_until_ready(basic_block_forward(xB, pB, stride=2))
    refB = _reference(xB, pB, stride=2)
    assert outB.shape == (N, 8, H // 2, W // 2), outB.shape
    assert jnp.allclose(outB, refB, atol=ATOL, rtol=RTOL), "mismatch vs reference (B)"

    print("KERNEL_OK")
</pallas_src>

<mosaic_0001>
module attributes {stable_mosaic.version = 11 : i64} {
  func.func @_basic_block_kernel(%arg0: i32, %arg1: i32, %arg2: memref<1x1x20x18x128xbf16, #tpu.memory_space<vmem>>, %arg3: memref<9x128x128xbf16, #tpu.memory_space<vmem>>, %arg4: memref<1x128xf32, #tpu.memory_space<vmem>>, %arg5: memref<9x128x128xbf16, #tpu.memory_space<vmem>>, %arg6: memref<1x128xf32, #tpu.memory_space<vmem>>, %arg7: memref<1x16x16x128xbf16, #tpu.memory_space<vmem>>, %arg8: memref<18x18x128xbf16, #tpu.memory_space<vmem>>) attributes {dimension_semantics = [#tpu.dimension_semantics<parallel>, #tpu.dimension_semantics<parallel>], iteration_bounds = array<i64: 2, 1>, scalar_prefetch = 0 : i64, scratch_operands = 1 : i64, tpu.core_type = #tpu.core_type<tc>, window_params = [{transform_indices = @transform_0, window_bounds = array<i64: 1, 1, 20, 18, 128>}, {pipeline_mode = #tpu.pipeline_mode<synchronous>, transform_indices = @transform_1, window_bounds = array<i64: 9, 128, 128>}, {pipeline_mode = #tpu.pipeline_mode<synchronous>, transform_indices = @transform_2, window_bounds = array<i64: 1, 128>}, {pipeline_mode = #tpu.pipeline_mode<synchronous>, transform_indices = @transform_3, window_bounds = array<i64: 9, 128, 128>}, {pipeline_mode = #tpu.pipeline_mode<synchronous>, transform_indices = @transform_4, window_bounds = array<i64: 1, 128>}, {transform_indices = @transform_5, window_bounds = array<i64: 1, 16, 16, 128>}]} {
    %c16_i32 = arith.constant 16 : i32
    %0 = arith.muli %arg1, %c16_i32 : i32
    %1 = tpu.assume_multiple %0, 16 : i32
    %cst = arith.constant 0.000000e+00 : f32
    %2 = vector.broadcast %cst : f32 to vector<288x128xf32>
    %c0_i32 = arith.constant 0 : i32
    %3 = arith.addi %1, %c0_i32 : i32
    %c0 = arith.constant 0 : index
    %c0_0 = arith.constant 0 : index
    %4 = arith.index_cast %3 : i32 to index
    %c0_1 = arith.constant 0 : index
    %c0_2 = arith.constant 0 : index
    %5 = vector.load %arg2[%c0, %c0_0, %4, %c0_1, %c0_2] : memref<1x1x20x18x128xbf16, #tpu.memory_space<vmem>>, vector<1x1x18x16x128xbf16>
    %6 = vector.shape_cast %5 : vector<1x1x18x16x128xbf16> to vector<18x16x128xbf16>
    %7 = vector.shape_cast %6 : vector<18x16x128xbf16> to vector<288x128xbf16>
    %c0_3 = arith.constant 0 : index
    %c0_4 = arith.constant 0 : index
    %c0_5 = arith.constant 0 : index
    %8 = vector.load %arg3[%c0_3, %c0_4, %c0_5] : memref<9x128x128xbf16, #tpu.memory_space<vmem>>, vector<1x128x128xbf16>
    %9 = vector.shape_cast %8 : vector<1x128x128xbf16> to vector<128x128xbf16>
    %cst_6 = arith.constant dense<0.000000e+00> : vector<288x128xf32>
    %10 = tpu.matmul %7, %9, %cst_6 {dimension_numbers = #tpu.dot_dimension_numbers<[1], [0], [0], [1], [0, 0, 1, 1], [], []>} : vector<288x128xbf16>, vector<128x128xbf16>, vector<288x128xf32> -> vector<288x128xf32>
    %11 = arith.addf %2, %10 : vector<288x128xf32>
    %c0_i32_7 = arith.constant 0 : i32
    %12 = arith.addi %1, %c0_i32_7 : i32
    %c0_8 = arith.constant 0 : index
    %c0_9 = arith.constant 0 : index
    %13 = arith.index_cast %12 : i32 to index
    %c1 = arith.constant 1 : index
    %c0_10 = arith.constant 0 : index
    %14 = vector.load %arg2[%c0_8, %c0_9, %13, %c1, %c0_10] : memref<1x1x20x18x128xbf16, #tpu.memory_space<vmem>>, vector<1x1x18x16x128xbf16>
    %15 = vector.shape_cast %14 : vector<1x1x18x16x128xbf16> to vector<18x16x128xbf16>
    %16 = vector.shape_cast %15 : vector<18x16x128xbf16> to vector<288x128xbf16>
    %c1_11 = arith.constant 1 : index
    %c0_12 = arith.constant 0 : index
    %c0_13 = arith.constant 0 : index
    %17 = vector.load %arg3[%c1_11, %c0_12, %c0_13] : memref<9x128x128xbf16, #tpu.memory_space<vmem>>, vector<1x128x128xbf16>
    %18 = vector.shape_cast %17 : vector<1x128x128xbf16> to vector<128x128xbf16>
    %cst_14 = arith.constant dense<0.000000e+00> : vector<288x128xf32>
    %19 = tpu.matmul %16, %18, %cst_14 {dimension_numbers = #tpu.dot_dimension_numbers<[1], [0], [0], [1], [0, 0, 1, 1], [], []>} : vector<288x128xbf16>, vector<128x128xbf16>, vector<288x128xf32> -> vector<288x128xf32>
    %20 = arith.addf %11, %19 : vector<288x128xf32>
    %c0_i32_15 = arith.constant 0 : i32
    %21 = arith.addi %1, %c0_i32_15 : i32
    %c0_16 = arith.constant 0 : index
    %c0_17 = arith.constant 0 : index
    %22 = arith.index_cast %21 : i32 to index
    %c2 = arith.constant 2 : index
    %c0_18 = arith.constant 0 : index
    %23 = vector.load %arg2[%c0_16, %c0_17, %22, %c2, %c0_18] : memref<1x1x20x18x128xbf16, #tpu.memory_space<vmem>>, vector<1x1x18x16x128xbf16>
    %24 = vector.shape_cast %23 : vector<1x1x18x16x128xbf16> to vector<18x16x128xbf16>
    %25 = vector.shape_cast %24 : vector<18x16x128xbf16> to vector<288x128xbf16>
    %c2_19 = arith.constant 2 : index
    %c0_20 = arith.constant 0 : index
    %c0_21 = arith.constant 0 : index
    %26 = vector.load %arg3[%c2_19, %c0_20, %c0_21] : memref<9x128x128xbf16, #tpu.memory_space<vmem>>, vector<1x128x128xbf16>
    %27 = vector.shape_cast %26 : vector<1x128x128xbf16> to vector<128x128xbf16>
    %cst_22 = arith.constant dense<0.000000e+00> : vector<288x128xf32>
    %28 = tpu.matmul %25, %27, %cst_22 {dimension_numbers = #tpu.dot_dimension_numbers<[1], [0], [0], [1], [0, 0, 1, 1], [], []>} : vector<288x128xbf16>, vector<128x128xbf16>, vector<288x128xf32> -> vector<288x128xf32>
    %29 = arith.addf %20, %28 : vector<288x128xf32>
    %c1_i32 = arith.constant 1 : i32
    %30 = arith.addi %1, %c1_i32 : i32
    %c0_23 = arith.constant 0 : index
    %c0_24 = arith.constant 0 : index
    %31 = arith.index_cast %30 : i32 to index
    %c0_25 = arith.constant 0 : index
    %c0_26 = arith.constant 0 : index
    %32 = vector.load %arg2[%c0_23, %c0_24, %31, %c0_25, %c0_26] : memref<1x1x20x18x128xbf16, #tpu.memory_space<vmem>>, vector<1x1x18x16x128xbf16>
    %33 = vector.shape_cast %32 : vector<1x1x18x16x128xbf16> to vector<18x16x128xbf16>
    %34 = vector.shape_cast %33 : vector<18x16x128xbf16> to vector<288x128xbf16>
    %c3 = arith.constant 3 : index
    %c0_27 = arith.constant 0 : index
    %c0_28 = arith.constant 0 : index
    %35 = vector.load %arg3[%c3, %c0_27, %c0_28] : memref<9x128x128xbf16, #tpu.memory_space<vmem>>, vector<1x128x128xbf16>
    %36 = vector.shape_cast %35 : vector<1x128x128xbf16> to vector<128x128xbf16>
    %cst_29 = arith.constant dense<0.000000e+00> : vector<288x128xf32>
    %37 = tpu.matmul %34, %36, %cst_29 {dimension_numbers = #tpu.dot_dimension_numbers<[1], [0], [0], [1], [0, 0, 1, 1], [], []>} : vector<288x128xbf16>, vector<128x128xbf16>, vector<288x128xf32> -> vector<288x128xf32>
    %38 = arith.addf %29, %37 : vector<288x128xf32>
    %c1_i32_30 = arith.constant 1 : i32
    %39 = arith.addi %1, %c1_i32_30 : i32
    %c0_31 = arith.constant 0 : index
    %c0_32 = arith.constant 0 : index
    %40 = arith.index_cast %39 : i32 to index
    %c1_33 = arith.constant 1 : index
    %c0_34 = arith.constant 0 : index
    %41 = vector.load %arg2[%c0_31, %c0_32, %40, %c1_33, %c0_34] : memref<1x1x20x18x128xbf16, #tpu.memory_space<vmem>>, vector<1x1x18x16x128xbf16>
    %42 = vector.shape_cast %41 : vector<1x1x18x16x128xbf16> to vector<18x16x128xbf16>
    %43 = vector.shape_cast %42 : vector<18x16x128xbf16> to vector<288x128xbf16>
    %c4 = arith.constant 4 : index
    %c0_35 = arith.constant 0 : index
    %c0_36 = arith.constant 0 : index
    %44 = vector.load %arg3[%c4, %c0_35, %c0_36] : memref<9x128x128xbf16, #tpu.memory_space<vmem>>, vector<1x128x128xbf16>
    %45 = vector.shape_cast %44 : vector<1x128x128xbf16> to vector<128x128xbf16>
    %cst_37 = arith.constant dense<0.000000e+00> : vector<288x128xf32>
    %46 = tpu.matmul %43, %45, %cst_37 {dimension_numbers = #tpu.dot_dimension_numbers<[1], [0], [0], [1], [0, 0, 1, 1], [], []>} : vector<288x128xbf16>, vector<128x128xbf16>, vector<288x128xf32> -> vector<288x128xf32>
    %47 = arith.addf %38, %46 : vector<288x128xf32>
    %c1_i32_38 = arith.constant 1 : i32
    %48 = arith.addi %1, %c1_i32_38 : i32
    %c0_39 = arith.constant 0 : index
    %c0_40 = arith.constant 0 : index
    %49 = arith.index_cast %48 : i32 to index
    %c2_41 = arith.constant 2 : index
    %c0_42 = arith.constant 0 : index
    %50 = vector.load %arg2[%c0_39, %c0_40, %49, %c2_41, %c0_42] : memref<1x1x20x18x128xbf16, #tpu.memory_space<vmem>>, vector<1x1x18x16x128xbf16>
    %51 = vector.shape_cast %50 : vector<1x1x18x16x128xbf16> to vector<18x16x128xbf16>
    %52 = vector.shape_cast %51 : vector<18x16x128xbf16> to vector<288x128xbf16>
    %c5 = arith.constant 5 : index
    %c0_43 = arith.constant 0 : index
    %c0_44 = arith.constant 0 : index
    %53 = vector.load %arg3[%c5, %c0_43, %c0_44] : memref<9x128x128xbf16, #tpu.memory_space<vmem>>, vector<1x128x128xbf16>
    %54 = vector.shape_cast %53 : vector<1x128x128xbf16> to vector<128x128xbf16>
    %cst_45 = arith.constant dense<0.000000e+00> : vector<288x128xf32>
    %55 = tpu.matmul %52, %54, %cst_45 {dimension_numbers = #tpu.dot_dimension_numbers<[1], [0], [0], [1], [0, 0, 1, 1], [], []>} : vector<288x128xbf16>, vector<128x128xbf16>, vector<288x128xf32> -> vector<288x128xf32>
    %56 = arith.addf %47, %55 : vector<288x128xf32>
    %c2_i32 = arith.constant 2 : i32
    %57 = arith.addi %1, %c2_i32 : i32
    %c0_46 = arith.constant 0 : index
    %c0_47 = arith.constant 0 : index
    %58 = arith.index_cast %57 : i32 to index
    %c0_48 = arith.constant 0 : index
    %c0_49 = arith.constant 0 : index
    %59 = vector.load %arg2[%c0_46, %c0_47, %58, %c0_48, %c0_49] : memref<1x1x20x18x128xbf16, #tpu.memory_space<vmem>>, vector<1x1x18x16x128xbf16>
    %60 = vector.shape_cast %59 : vector<1x1x18x16x128xbf16> to vector<18x16x128xbf16>
    %61 = vector.shape_cast %60 : vector<18x16x128xbf16> to vector<288x128xbf16>
    %c6 = arith.constant 6 : index
    %c0_50 = arith.constant 0 : index
    %c0_51 = arith.constant 0 : index
    %62 = vector.load %arg3[%c6, %c0_50, %c0_51] : memref<9x128x128xbf16, #tpu.memory_space<vmem>>, vector<1x128x128xbf16>
    %63 = vector.shape_cast %62 : vector<1x128x128xbf16> to vector<128x128xbf16>
    %cst_52 = arith.constant dense<0.000000e+00> : vector<288x128xf32>
    %64 = tpu.matmul %61, %63, %cst_52 {dimension_numbers = #tpu.dot_dimension_numbers<[1], [0], [0], [1], [0, 0, 1, 1], [], []>} : vector<288x128xbf16>, vector<128x128xbf16>, vector<288x128xf32> -> vector<288x128xf32>
    %65 = arith.addf %56, %64 : vector<288x128xf32>
    %c2_i32_53 = arith.constant 2 : i32
    %66 = arith.addi %1, %c2_i32_53 : i32
    %c0_54 = arith.constant 0 : index
    %c0_55 = arith.constant 0 : index
    %67 = arith.index_cast %66 : i32 to index
    %c1_56 = arith.constant 1 : index
    %c0_57 = arith.constant 0 : index
    %68 = vector.load %arg2[%c0_54, %c0_55, %67, %c1_56, %c0_57] : memref<1x1x20x18x128xbf16, #tpu.memory_space<vmem>>, vector<1x1x18x16x128xbf16>
    %69 = vector.shape_cast %68 : vector<1x1x18x16x128xbf16> to vector<18x16x128xbf16>
    %70 = vector.shape_cast %69 : vector<18x16x128xbf16> to vector<288x128xbf16>
    %c7 = arith.constant 7 : index
    %c0_58 = arith.constant 0 : index
    %c0_59 = arith.constant 0 : index
    %71 = vector.load %arg3[%c7, %c0_58, %c0_59] : memref<9x128x128xbf16, #tpu.memory_space<vmem>>, vector<1x128x128xbf16>
    %72 = vector.shape_cast %71 : vector<1x128x128xbf16> to vector<128x128xbf16>
    %cst_60 = arith.constant dense<0.000000e+00> : vector<288x128xf32>
    %73 = tpu.matmul %70, %72, %cst_60 {dimension_numbers = #tpu.dot_dimension_numbers<[1], [0], [0], [1], [0, 0, 1, 1], [], []>} : vector<288x128xbf16>, vector<128x128xbf16>, vector<288x128xf32> -> vector<288x128xf32>
    %74 = arith.addf %65, %73 : vector<288x128xf32>
    %c2_i32_61 = arith.constant 2 : i32
    %75 = arith.addi %1, %c2_i32_61 : i32
    %c0_62 = arith.constant 0 : index
    %c0_63 = arith.constant 0 : index
    %76 = arith.index_cast %75 : i32 to index
    %c2_64 = arith.constant 2 : index
    %c0_65 = arith.constant 0 : index
    %77 = vector.load %arg2[%c0_62, %c0_63, %76, %c2_64, %c0_65] : memref<1x1x20x18x128xbf16, #tpu.memory_space<vmem>>, vector<1x1x18x16x128xbf16>
    %78 = vector.shape_cast %77 : vector<1x1x18x16x128xbf16> to vector<18x16x128xbf16>
    %79 = vector.shape_cast %78 : vector<18x16x128xbf16> to vector<288x128xbf16>
    %c8 = arith.constant 8 : index
    %c0_66 = arith.constant 0 : index
    %c0_67 = arith.constant 0 : index
    %80 = vector.load %arg3[%c8, %c0_66, %c0_67] : memref<9x128x128xbf16, #tpu.memory_space<vmem>>, vector<1x128x128xbf16>
    %81 = vector.shape_cast %80 : vector<1x128x128xbf16> to vector<128x128xbf16>
    %cst_68 = arith.constant dense<0.000000e+00> : vector<288x128xf32>
    %82 = tpu.matmul %79, %81, %cst_68 {dimension_numbers = #tpu.dot_dimension_numbers<[1], [0], [0], [1], [0, 0, 1, 1], [], []>} : vector<288x128xbf16>, vector<128x128xbf16>, vector<288x128xf32> -> vector<288x128xf32>
    %83 = arith.addf %74, %82 : vector<288x128xf32>
    %c0_69 = arith.constant 0 : index
    %c0_70 = arith.constant 0 : index
    %84 = vector.load %arg4[%c0_69, %c0_70] : memref<1x128xf32, #tpu.memory_space<vmem>>, vector<1x128xf32>
    %85 = vector.broadcast %84 : vector<1x128xf32> to vector<288x128xf32>
    %86 = arith.addf %83, %85 : vector<288x128xf32>
    %cst_71 = arith.constant 0.000000e+00 : f32
    %87 = vector.broadcast %cst_71 : f32 to vector<288x128xf32>
    %88 = arith.maximumf %86, %87 : vector<288x128xf32>
    %89 = arith.truncf %88 : vector<288x128xf32> to vector<288x128xbf16>
    %90 = vector.shape_cast %89 : vector<288x128xbf16> to vector<18x16x128xbf16>
    %c0_72 = arith.constant 0 : index
    %c1_73 = arith.constant 1 : index
    %c0_74 = arith.constant 0 : index
    %91 = vector.load %arg8[%c0_72, %c1_73, %c0_74] : memref<18x18x128xbf16, #tpu.memory_space<vmem>>, vector<18x16x128xbf16>
    tpu.vector_store %arg8[%c0_72, %c1_73, %c0_74], %90 {strides = array<i32>} : memref<18x18x128xbf16, #tpu.memory_space<vmem>>, vector<18x16x128xbf16>,
    %cst_75 = arith.constant 0.000000e+00 : bf16
    %92 = vector.broadcast %cst_75 : bf16 to vector<18x1x128xbf16>
    %c0_76 = arith.constant 0 : index
    %c0_77 = arith.constant 0 : index
    %c0_78 = arith.constant 0 : index
    %93 = vector.load %arg8[%c0_76, %c0_77, %c0_78] : memref<18x18x128xbf16, #tpu.memory_space<vmem>>, vector<18x1x128xbf16>
    tpu.vector_store %arg8[%c0_76, %c0_77, %c0_78], %92 {strides = array<i32>} : memref<18x18x128xbf16, #tpu.memory_space<vmem>>, vector<18x1x128xbf16>,
    %c0_79 = arith.constant 0 : index
    %c17 = arith.constant 17 : index
    %c0_80 = arith.constant 0 : index
    %94 = vector.load %arg8[%c0_79, %c17, %c0_80] : memref<18x18x128xbf16, #tpu.memory_space<vmem>>, vector<18x1x128xbf16>
    tpu.vector_store %arg8[%c0_79, %c17, %c0_80], %92 {strides = array<i32>} : memref<18x18x128xbf16, #tpu.memory_space<vmem>>, vector<18x1x128xbf16>,
    %c0_i32_81 = arith.constant 0 : i32
    %95 = arith.cmpi eq, %arg1, %c0_i32_81 : i32
    %96 = arith.extui %95 : i1 to i32
    %c0_i32_82 = arith.constant 0 : i32
    %97 = arith.cmpi ne, %96, %c0_i32_82 : i32
    scf.if %97 {
      %cst_162 = arith.constant 0.000000e+00 : bf16
      %174 = vector.broadcast %cst_162 : bf16 to vector<18x128xbf16>
      %c0_163 = arith.constant 0 : index
      %c0_164 = arith.constant 0 : index
      %c0_165 = arith.constant 0 : index
      %175 = vector.load %arg8[%c0_163, %c0_164, %c0_165] : memref<18x18x128xbf16, #tpu.memory_space<vmem>>, vector<1x18x128xbf16>
      %176 = vector.shape_cast %175 : vector<1x18x128xbf16> to vector<18x128xbf16>
      %177 = vector.shape_cast %174 : vector<18x128xbf16> to vector<1x18x128xbf16>
      tpu.vector_store %arg8[%c0_163, %c0_164, %c0_165], %177 {strides = array<i32>} : memref<18x18x128xbf16, #tpu.memory_space<vmem>>, vector<1x18x128xbf16>,
    } else {
    }
    %c0_i32_83 = arith.constant 0 : i32
    %98 = arith.cmpi eq, %arg1, %c0_i32_83 : i32
    %99 = arith.extui %98 : i1 to i32
    %c0_i32_84 = arith.constant 0 : i32
    %100 = arith.cmpi ne, %99, %c0_i32_84 : i32
    scf.if %100 {
      %cst_162 = arith.constant 0.000000e+00 : bf16
      %174 = vector.broadcast %cst_162 : bf16 to vector<18x128xbf16>
      %c17_163 = arith.constant 17 : index
      %c0_164 = arith.constant 0 : index
      %c0_165 = arith.constant 0 : index
      %175 = vector.load %arg8[%c17_163, %c0_164, %c0_165] : memref<18x18x128xbf16, #tpu.memory_space<vmem>>, vector<1x18x128xbf16>
      %176 = vector.shape_cast %175 : vector<1x18x128xbf16> to vector<18x128xbf16>
      %177 = vector.shape_cast %174 : vector<18x128xbf16> to vector<1x18x128xbf16>
      tpu.vector_store %arg8[%c17_163, %c0_164, %c0_165], %177 {strides = array<i32>} : memref<18x18x128xbf16, #tpu.memory_space<vmem>>, vector<1x18x128xbf16>,
    } else {
    }
    %cst_85 = arith.constant 0.000000e+00 : f32
    %101 = vector.broadcast %cst_85 : f32 to vector<256x128xf32>
    %c0_86 = arith.constant 0 : index
    %c0_87 = arith.constant 0 : index
    %c0_88 = arith.constant 0 : index
    %102 = vector.load %arg8[%c0_86, %c0_87, %c0_88] : memref<18x18x128xbf16, #tpu.memory_space<vmem>>, vector<16x16x128xbf16>
    %103 = vector.shape_cast %102 : vector<16x16x128xbf16> to vector<256x128xbf16>
    %c0_89 = arith.constant 0 : index
    %c0_90 = arith.constant 0 : index
    %c0_91 = arith.constant 0 : index
    %104 = vector.load %arg5[%c0_89, %c0_90, %c0_91] : memref<9x128x128xbf16, #tpu.memory_space<vmem>>, vector<1x128x128xbf16>
    %105 = vector.shape_cast %104 : vector<1x128x128xbf16> to vector<128x128xbf16>
    %cst_92 = arith.constant dense<0.000000e+00> : vector<256x128xf32>
    %106 = tpu.matmul %103, %105, %cst_92 {dimension_numbers = #tpu.dot_dimension_numbers<[1], [0], [0], [1], [0, 0, 1, 1], [], []>} : vector<256x128xbf16>, vector<128x128xbf16>, vector<256x128xf32> -> vector<256x128xf32>
    %107 = arith.addf %101, %106 : vector<256x128xf32>
    %c0_93 = arith.constant 0 : index
    %c1_94 = arith.constant 1 : index
    %c0_95 = arith.constant 0 : index
    %108 = vector.load %arg8[%c0_93, %c1_94, %c0_95] : memref<18x18x128xbf16, #tpu.memory_space<vmem>>, vector<16x16x128xbf16>
    %109 = vector.shape_cast %108 : vector<16x16x128xbf16> to vector<256x128xbf16>
    %c1_96 = arith.constant 1 : index
    %c0_97 = arith.constant 0 : index
    %c0_98 = arith.constant 0 : index
    %110 = vector.load %arg5[%c1_96, %c0_97, %c0_98] : memref<9x128x128xbf16, #tpu.memory_space<vmem>>, vector<1x128x128xbf16>
    %111 = vector.shape_cast %110 : vector<1x128x128xbf16> to vector<128x128xbf16>
    %cst_99 = arith.constant dense<0.000000e+00> : vector<256x128xf32>
    %112 = tpu.matmul %109, %111, %cst_99 {dimension_numbers = #tpu.dot_dimension_numbers<[1], [0], [0], [1], [0, 0, 1, 1], [], []>} : vector<256x128xbf16>, vector<128x128xbf16>, vector<256x128xf32> -> vector<256x128xf32>
    %113 = arith.addf %107, %112 : vector<256x128xf32>
    %c0_100 = arith.constant 0 : index
    %c2_101 = arith.constant 2 : index
    %c0_102 = arith.constant 0 : index
    %114 = vector.load %arg8[%c0_100, %c2_101, %c0_102] : memref<18x18x128xbf16, #tpu.memory_space<vmem>>, vector<16x16x128xbf16>
    %115 = vector.shape_cast %114 : vector<16x16x128xbf16> to vector<256x128xbf16>
    %c2_103 = arith.constant 2 : index
    %c0_104 = arith.constant 0 : index
    %c0_105 = arith.constant 0 : index
    %116 = vector.load %arg5[%c2_103, %c0_104, %c0_105] : memref<9x128x128xbf16, #tpu.memory_space<vmem>>, vector<1x128x128xbf16>
    %117 = vector.shape_cast %116 : vector<1x128x128xbf16> to vector<128x128xbf16>
    %cst_106 = arith.constant dense<0.000000e+00> : vector<256x128xf32>
    %118 = tpu.matmul %115, %117, %cst_106 {dimension_numbers = #tpu.dot_dimension_numbers<[1], [0], [0], [1], [0, 0, 1, 1], [], []>} : vector<256x128xbf16>, vector<128x128xbf16>, vector<256x128xf32> -> vector<256x128xf32>
    %119 = arith.addf %113, %118 : vector<256x128xf32>
    %c1_107 = arith.constant 1 : index
    %c0_108 = arith.constant 0 : index
    %c0_109 = arith.constant 0 : index
    %120 = vector.load %arg8[%c1_107, %c0_108, %c0_109] : memref<18x18x128xbf16, #tpu.memory_space<vmem>>, vector<16x16x128xbf16>
    %121 = vector.shape_cast %120 : vector<16x16x128xbf16> to vector<256x128xbf16>
    %c3_110 = arith.constant 3 : index
    %c0_111 = arith.constant 0 : index
    %c0_112 = arith.constant 0 : index
    %122 = vector.load %arg5[%c3_110, %c0_111, %c0_112] : memref<9x128x128xbf16, #tpu.memory_space<vmem>>, vector<1x128x128xbf16>
    %123 = vector.shape_cast %122 : vector<1x128x128xbf16> to vector<128x128xbf16>
    %cst_113 = arith.constant dense<0.000000e+00> : vector<256x128xf32>
    %124 = tpu.matmul %121, %123, %cst_113 {dimension_numbers = #tpu.dot_dimension_numbers<[1], [0], [0], [1], [0, 0, 1, 1], [], []>} : vector<256x128xbf16>, vector<128x128xbf16>, vector<256x128xf32> -> vector<256x128xf32>
    %125 = arith.addf %119, %124 : vector<256x128xf32>
    %c1_114 = arith.constant 1 : index
    %c1_115 = arith.constant 1 : index
    %c0_116 = arith.constant 0 : index
    %126 = vector.load %arg8[%c1_114, %c1_115, %c0_116] : memref<18x18x128xbf16, #tpu.memory_space<vmem>>, vector<16x16x128xbf16>
    %127 = vector.shape_cast %126 : vector<16x16x128xbf16> to vector<256x128xbf16>
    %c4_117 = arith.constant 4 : index
    %c0_118 = arith.constant 0 : index
    %c0_119 = arith.constant 0 : index
    %128 = vector.load %arg5[%c4_117, %c0_118, %c0_119] : memref<9x128x128xbf16, #tpu.memory_space<vmem>>, vector<1x128x128xbf16>
    %129 = vector.shape_cast %128 : vector<1x128x128xbf16> to vector<128x128xbf16>
    %cst_120 = arith.constant dense<0.000000e+00> : vector<256x128xf32>
    %130 = tpu.matmul %127, %129, %cst_120 {dimension_numbers = #tpu.dot_dimension_numbers<[1], [0], [0], [1], [0, 0, 1, 1], [], []>} : vector<256x128xbf16>, vector<128x128xbf16>, vector<256x128xf32> -> vector<256x128xf32>
    %131 = arith.addf %125, %130 : vector<256x128xf32>
    %c1_121 = arith.constant 1 : index
    %c2_122 = arith.constant 2 : index
    %c0_123 = arith.constant 0 : index
    %132 = vector.load %arg8[%c1_121, %c2_122, %c0_123] : memref<18x18x128xbf16, #tpu.memory_space<vmem>>, vector<16x16x128xbf16>
    %133 = vector.shape_cast %132 : vector<16x16x128xbf16> to vector<256x128xbf16>
    %c5_124 = arith.constant 5 : index
    %c0_125 = arith.constant 0 : index
    %c0_126 = arith.constant 0 : index
    %134 = vector.load %arg5[%c5_124, %c0_125, %c0_126] : memref<9x128x128xbf16, #tpu.memory_space<vmem>>, vector<1x128x128xbf16>
    %135 = vector.shape_cast %134 : vector<1x128x128xbf16> to vector<128x128xbf16>
    %cst_127 = arith.constant dense<0.000000e+00> : vector<256x128xf32>
    %136 = tpu.matmul %133, %135, %cst_127 {dimension_numbers = #tpu.dot_dimension_numbers<[1], [0], [0], [1], [0, 0, 1, 1], [], []>} : vector<256x128xbf16>, vector<128x128xbf16>, vector<256x128xf32> -> vector<256x128xf32>
    %137 = arith.addf %131, %136 : vector<256x128xf32>
    %c2_128 = arith.constant 2 : index
    %c0_129 = arith.constant 0 : index
    %c0_130 = arith.constant 0 : index
    %138 = vector.load %arg8[%c2_128, %c0_129, %c0_130] : memref<18x18x128xbf16, #tpu.memory_space<vmem>>, vector<16x16x128xbf16>
    %139 = vector.shape_cast %138 : vector<16x16x128xbf16> to vector<256x128xbf16>
    %c6_131 = arith.constant 6 : index
    %c0_132 = arith.constant 0 : index
    %c0_133 = arith.constant 0 : index
    %140 = vector.load %arg5[%c6_131, %c0_132, %c0_133] : memref<9x128x128xbf16, #tpu.memory_space<vmem>>, vector<1x128x128xbf16>
    %141 = vector.shape_cast %140 : vector<1x128x128xbf16> to vector<128x128xbf16>
    %cst_134 = arith.constant dense<0.000000e+00> : vector<256x128xf32>
    %142 = tpu.matmul %139, %141, %cst_134 {dimension_numbers = #tpu.dot_dimension_numbers<[1], [0], [0], [1], [0, 0, 1, 1], [], []>} : vector<256x128xbf16>, vector<128x128xbf16>, vector<256x128xf32> -> vector<256x128xf32>
    %143 = arith.addf %137, %142 : vector<256x128xf32>
    %c2_135 = arith.constant 2 : index
    %c1_136 = arith.constant 1 : index
    %c0_137 = arith.constant 0 : index
    %144 = vector.load %arg8[%c2_135, %c1_136, %c0_137] : memref<18x18x128xbf16, #tpu.memory_space<vmem>>, vector<16x16x128xbf16>
    %145 = vector.shape_cast %144 : vector<16x16x128xbf16> to vector<256x128xbf16>
    %c7_138 = arith.constant 7 : index
    %c0_139 = arith.constant 0 : index
    %c0_140 = arith.constant 0 : index
    %146 = vector.load %arg5[%c7_138, %c0_139, %c0_140] : memref<9x128x128xbf16, #tpu.memory_space<vmem>>, vector<1x128x128xbf16>
    %147 = vector.shape_cast %146 : vector<1x128x128xbf16> to vector<128x128xbf16>
    %cst_141 = arith.constant dense<0.000000e+00> : vector<256x128xf32>
    %148 = tpu.matmul %145, %147, %cst_141 {dimension_numbers = #tpu.dot_dimension_numbers<[1], [0], [0], [1], [0, 0, 1, 1], [], []>} : vector<256x128xbf16>, vector<128x128xbf16>, vector<256x128xf32> -> vector<256x128xf32>
    %149 = arith.addf %143, %148 : vector<256x128xf32>
    %c2_142 = arith.constant 2 : index
    %c2_143 = arith.constant 2 : index
    %c0_144 = arith.constant 0 : index
    %150 = vector.load %arg8[%c2_142, %c2_143, %c0_144] : memref<18x18x128xbf16, #tpu.memory_space<vmem>>, vector<16x16x128xbf16>
    %151 = vector.shape_cast %150 : vector<16x16x128xbf16> to vector<256x128xbf16>
    %c8_145 = arith.constant 8 : index
    %c0_146 = arith.constant 0 : index
    %c0_147 = arith.constant 0 : index
    %152 = vector.load %arg5[%c8_145, %c0_146, %c0_147] : memref<9x128x128xbf16, #tpu.memory_space<vmem>>, vector<1x128x128xbf16>
    %153 = vector.shape_cast %152 : vector<1x128x128xbf16> to vector<128x128xbf16>
    %cst_148 = arith.constant dense<0.000000e+00> : vector<256x128xf32>
    %154 = tpu.matmul %151, %153, %cst_148 {dimension_numbers = #tpu.dot_dimension_numbers<[1], [0], [0], [1], [0, 0, 1, 1], [], []>} : vector<256x128xbf16>, vector<128x128xbf16>, vector<256x128xf32> -> vector<256x128xf32>
    %155 = arith.addf %149, %154 : vector<256x128xf32>
    %c0_149 = arith.constant 0 : index
    %c0_150 = arith.constant 0 : index
    %156 = vector.load %arg6[%c0_149, %c0_150] : memref<1x128xf32, #tpu.memory_space<vmem>>, vector<1x128xf32>
    %157 = vector.broadcast %156 : vector<1x128xf32> to vector<256x128xf32>
    %158 = arith.addf %155, %157 : vector<256x128xf32>
    %c1_i32_151 = arith.constant 1 : i32
    %159 = arith.addi %1, %c1_i32_151 : i32
    %c1_i32_152 = arith.constant 1 : i32
    %160 = arith.addi %159, %c1_i32_152 : i32
    %c0_153 = arith.constant 0 : index
    %c0_154 = arith.constant 0 : index
    %161 = arith.index_cast %160 : i32 to index
    %c1_155 = arith.constant 1 : index
    %c0_156 = arith.constant 0 : index
    %162 = vector.load %arg2[%c0_153, %c0_154, %161, %c1_155, %c0_156] : memref<1x1x20x18x128xbf16, #tpu.memory_space<vmem>>, vector<1x1x16x16x128xbf16>
    %163 = vector.shape_cast %162 : vector<1x1x16x16x128xbf16> to vector<16x16x128xbf16>
    %164 = vector.shape_cast %163 : vector<16x16x128xbf16> to vector<256x128xbf16>
    %165 = arith.extf %164 : vector<256x128xbf16> to vector<256x128xf32>
    %166 = arith.addf %158, %165 : vector<256x128xf32>
    %cst_157 = arith.constant 0.000000e+00 : f32
    %167 = vector.broadcast %cst_157 : f32 to vector<256x128xf32>
    %168 = arith.maximumf %166, %167 : vector<256x128xf32>
    %169 = vector.shape_cast %168 : vector<256x128xf32> to vector<16x16x128xf32>
    %170 = arith.truncf %169 : vector<16x16x128xf32> to vector<16x16x128xbf16>
    %c0_158 = arith.constant 0 : index
    %c0_159 = arith.constant 0 : index
    %c0_160 = arith.constant 0 : index
    %c0_161 = arith.constant 0 : index
    %171 = vector.load %arg7[%c0_158, %c0_159, %c0_160, %c0_161] : memref<1x16x16x128xbf16, #tpu.memory_space<vmem>>, vector<1x16x16x128xbf16>
    %172 = vector.shape_cast %171 : vector<1x16x16x128xbf16> to vector<16x16x128xbf16>
    %173 = vector.shape_cast %170 : vector<16x16x128xbf16> to vector<1x16x16x128xbf16>
    tpu.vector_store %arg7[%c0_158, %c0_159, %c0_160, %c0_161], %173 {strides = array<i32>} : memref<1x16x16x128xbf16, #tpu.memory_space<vmem>>, vector<1x16x16x128xbf16>,
    return
  }
  func.func @transform_0(%arg0: i32, %arg1: i32) -> (i32, i32, i32, i32, i32) {
    %c0_i32 = arith.constant 0 : i32
    %c0_i32_0 = arith.constant 0 : i32
    %c0_i32_1 = arith.constant 0 : i32
    %c0_i32_2 = arith.constant 0 : i32
    %c0_i32_3 = arith.constant 0 : i32
    return %arg0, %c0_i32, %c0_i32_0, %c0_i32_1, %c0_i32_2 : i32, i32, i32, i32, i32
  }
  func.func @transform_1(%arg0: i32, %arg1: i32) -> (i32, i32, i32) {
    %c0_i32 = arith.constant 0 : i32
    %c0_i32_0 = arith.constant 0 : i32
    %c0_i32_1 = arith.constant 0 : i32
    %c0_i32_2 = arith.constant 0 : i32
    return %c0_i32, %c0_i32_0, %c0_i32_1 : i32, i32, i32
  }
  func.func @transform_2(%arg0: i32, %arg1: i32) -> (i32, i32) {
    %c0_i32 = arith.constant 0 : i32
    %c0_i32_0 = arith.constant 0 : i32
    %c0_i32_1 = arith.constant 0 : i32
    return %c0_i32, %c0_i32_0 : i32, i32
  }
  func.func @transform_3(%arg0: i32, %arg1: i32) -> (i32, i32, i32) {
    %c0_i32 = arith.constant 0 : i32
    %c0_i32_0 = arith.constant 0 : i32
    %c0_i32_1 = arith.constant 0 : i32
    %c0_i32_2 = arith.constant 0 : i32
    return %c0_i32, %c0_i32_0, %c0_i32_1 : i32, i32, i32
  }
  func.func @transform_4(%arg0: i32, %arg1: i32) -> (i32, i32) {
    %c0_i32 = arith.constant 0 : i32
    %c0_i32_0 = arith.constant 0 : i32
    %c0_i32_1 = arith.constant 0 : i32
    return %c0_i32, %c0_i32_0 : i32, i32
  }
  func.func @transform_5(%arg0: i32, %arg1: i32) -> (i32, i32, i32, i32) {
    %c0_i32 = arith.constant 0 : i32
    %c0_i32_0 = arith.constant 0 : i32
    %c0_i32_1 = arith.constant 0 : i32
    return %arg0, %arg1, %c0_i32, %c0_i32_0 : i32, i32, i32, i32
  }
}

</mosaic_0001>

<bundles_post_ra>
// kernel: tpu_custom_call.1
= control target key start
LH: loop header
LB: loop body
LE: loop exit
PB: predicated region body
PF: predicated region fallthrough
CT: control target
= control target key end

     0   :  { %10 = vsyncpa [#allocation4], 0  ;;  %s19704_s0 = inlined_call_operand.vmem [shape: bf16[2,1,20,18,128], index: 0, kind: input, shape index: {}]   ;;  %s19705_s1 = inlined_call_operand.vmem [shape: bf16[9,128,128], index: 1, kind: input, shape index: {}]   ;;  %s19706_s2 = inlined_call_operand.vmem [shape: f32[1,128], index: 2, kind: input, shape index: {}]   ;;  %s19707_s3 = inlined_call_operand.hbm [shape: bf16[9,128,128], index: 3, kind: input, shape index: {}]   ;;  %s19708_s4 = inlined_call_operand.vmem [shape: f32[1,128], index: 4, kind: input, shape index: {}]   ;;  %s19709_s5 = inlined_call_operand.hbm [shape: bf16[2,16,16,128], index: 5, kind: output, shape index: {}]  }
   0x1   :  { %11 = vsyncpa [#allocation5], 0 }
   0x2   :  { %13 = vsyncpa [#allocation5 + $0x1], 0  ;;  %s15699_s18 = smov 0   ;;  %s15701_s19 = smov 0  }
   0x3   :  { %s15703_s20 = smov 0   ;;  %s15705_s21 = smov 0  }
   0x4   :  { %s15707_s22 = smov 0   ;;  %s15709_s23 = smov 0  }
   0x5 LB: > { %s12038_s24 = sadd.s32 4294967295, %s15660_s23   ;;  %s12039_s25 = sadd.s32 4294967294, %s15660_s23   ;;  %s15660_s23 = sphi %s15709_s23, %s19_s23   ;;  %s15656_s22 = sphi %s15707_s22, %s19969_s22   ;;  %s15652_s21 = sphi %s15705_s21, %s19968_s21   ;;  %s15648_s20 = sphi %s15703_s20, %s19967_s20   ;;  %s15644_s19 = sphi %s15701_s19, %s19966_s19   ;;  %s15640_s18 = sphi %s15699_s18, %s19965_s18  }
   0x6   : > { %s31_s26 = sadd.s32 1, %s15656_s22  ;;  %s150_s27 = sadd.s32 1, %s15648_s20 }
   0x7   : > { %p33_p0 = scmp.ge.s32.totalorder %s31_s26, 2  ;;  %p160_p1 = scmp.ne.s32.totalorder %s15648_s20, %s15644_s19 }
   0x8   : > { %p161_p2 = scmp.eq.s32.totalorder %s12038_s24, 1  ;;  %p166_p3 = scmp.ne.s32.totalorder %s15644_s19, %s15640_s18 }
   0x9   : > { %s19971_s26 = smov (%p33_p0, %s31_s26), 0  ;;  %p167_p5 = scmp.eq.s32.totalorder %s12039_s25, 1 }
   0xa   : > { %p15739_p4 = por %p161_p2, %p160_p1  ;;  %s145_s29 = ssub.s32 %s15656_s22, %s19971_s26 }
   0xb   : > { %p12040_p6 = scmp.ge.s32.totalorder %s15660_s23, 1  ;;  %p148_p7 = scmp.eq.s32.totalorder %s145_s29, 0 }
   0xc   : > { %s19776_s28 = scalar_select %p15739_p4, 1, 0 }
   0xd   : > { %p15746_p8 = por %p167_p5, %p166_p3  ;;  %p174_p9 = scmp.lt.s32.totalorder %s15660_s23, 3 }
   0xe   : > { %s15752_s6 = scalar_select %p148_p7, %s15648_s20, %s150_s27  }
   0xf   : > { %s19777_s30 = scalar_select %p15746_p8, 1, 0 }
  0x10   : > { %p15754_p10 = pnand %p12040_p6, %p174_p9  ;;  %p15758_p11 = scmp.eq.s32.totalorder %s12038_s24, 0 }
  0x11   : > { %s15662_s9 = smov [#allocation3]   ;;  %s15550_s14 = scalar_lea.hbm %s19707_s3, 9216 }
  0x12   : > { %s19778_s7 = scalar_select %p15754_p10, 1, 0 }
  0x13   : > { %s19779_s8 = scalar_select %p15758_p11, 1, 0 }
  0x14   : > { %p15147_p12 = pneg %p15754_p10  ;;  %s192_s10 = sshll.u32 %s15662_s9, 4  ;;  %s193_s10 = int_to_ptr.vmem [resolvable:$true] %s192_s10 }
  0x15   : > { %p15551_p0 = scmp.ne.s32.totalorder %s19707_s3, %s15550_s14  ;;  %p15557_p5 = scmp.lt.u32.totalorder %s15550_s14, %s19707_s3 }
  0x16   : > { %p15766_p13 = pnand %p15758_p11, %p15147_p12 }
  0x18   : > { %p15552_p1 = pneg %p15766_p13 }
  0x1a   : > { %p15553_p2 = pnand %p15552_p1, %p15551_p0 }
  0x1c   : > { %p15554_p3 = pneg %p15553_p2 }
  0x1e   : > { %p15559_p6 = pnand %p15557_p5, %p15554_p3 }
  0x20   : > { %15562 = shalt.err (!%p15559_p6)
}
  0x21   : > { %s15563_s25 = scalar_lea.vmem %s193_s10, 9216  ;;  %p15571_p8 = scmp.lt.s32.totalorder %s193_s10, %s193_s10 }
  0x22   : > { %p15564_p7 = scmp.ne.s32.totalorder %s193_s10, %s15563_s25  ;;  %p15572_p4 = scmp.lt.s32.totalorder %s15563_s25, %s15563_s25 }
  0x24   : > { %p15566_p9 = pnand %p15564_p7, %p15552_p1  ;;  %p15573_p11 = por %p15572_p4, %p15571_p8 }
  0x26   : > { %p15567_p12 = pneg %p15566_p9 }
  0x28   : > { %p15574_p10 = pnand %p15573_p11, %p15567_p12 }
  0x2a   : > { %15577 = shalt.err (!%p15574_p10)
}
  0x2b   : > { %s15663_s27 = smov 64   ;;  %s15664_s29 = smov 4  }
  0x2c   : > { %15150 = dma.hbm_to_vmem [thread:$0]  (!%p15766_p13), %s19707_s3, 9216, %s193_s10, [#allocation4], %s15663_s27, %s15663_s27, %s15664_s29  }
  0x2d   : > { %p19781_p0 = scmp.ne.s32.totalorder %s19778_s7, 0 }
  0x2f   : > { %219 = sbr.rel (%p19781_p0) target bundleno = 1775 (0x6ef), region = 40 }
  0x36   : > { %p19782_p2 = scmp.ne.s32.totalorder %s19779_s8, 0 }
  0x38   : > { %15631 = dma.done.wait (%p19782_p2), [#allocation4], 9216  }
  0x39   : > { %15633 = vsyncadd (%p19782_p2), [#allocation4], 4294958080  ;;  %p247_p4 = scmp.lt.s32.totalorder %s15652_s21, 1  ;;  %v15212_v0 = vld [vmem:[%s19705_s1 + $0x40] sm:$0xff]   ;;  %v15213_v1 = vld [vmem:[%s19705_s1 + $0x48] sm:$0xff]   ;;  %vm1464_vm3 = vcmask 1042432  }
  0x3a   : > { %13680 = vmatprep.subr.bf16.mxu0 %v15212_v0  ;;  %14580 = vmatprep.subr.bf16.mxu1 %v15212_v0  ;;  %v15214_v2 = vld [vmem:[%s19705_s1 + $0x50] sm:$0xff]   ;;  %vm328_vm0 = vsmask.f32 3328  ;;  %vm329_vm1 = vsmask.f32 7440  ;;  %v15215_v3 = vld [vmem:[%s19705_s1 + $0x58] sm:$0xff]  }
  0x3b   : > { %s248_s13 = scalar_select %p247_p4, %s15652_s21, 1  ;;  %13681 = vmatpush3.bf16.msra.mxu0 %v15212_v0  ;;  %14588 = vmatpush3.bf16.msra.mxu1 %v15212_v0  ;;  %v15216_v12 = vld [vmem:[%s19705_s1 + $0x60] sm:$0xff]   ;;  %v15217_v28 = vld [vmem:[%s19705_s1 + $0x68] sm:$0xff]   ;;  %vm15847_vm2 = vmor %vm328_vm0, %vm329_vm1  ;;  %vm1465_vm4 = vcmask 1046532   ;;  %vm5750_vm6 = vsmask.f32 256 }
  0x3c   : > { %13682 = vmatprep.subr.bf16.mxu0 %v15213_v1  ;;  %14581 = vmatprep.subr.bf16.mxu1 %v15213_v1  ;;  %v15218_v48 = vld [vmem:[%s19705_s1 + $0x70] sm:$0xff]   ;;  %vm16013_vm5 = vmor %vm1464_vm3, %vm1465_vm4  ;;  %vm6113_vm7 = vcmask 1043456   ;;  %vm6114_vm8 = vsmask.f32 7938  ;;  %vm6120_vm9 = vcmask 1040384   ;;  %p19963_p10 = scmp.ne.s32.totalorder %s19776_s28, 0 }
  0x3d   : > { %s15140_s7 = smul.u32 240, %s248_s13  ;;  %vm5751_vm10 = vsmask.f32 4368  ;;  %vm17689_vm11 = vmand %vm6113_vm7, %vm6114_vm8  ;;  %s244_s13 = sand.u32 1, %s15644_s19  }
  0x3e   : > { %vm17698_vm12 = vmand %vm6120_vm9, %vm5750_vm6  ;;  %s12045_s14 = sshll.u32 %s244_s13, 7  ;;  %s15666_s17 = smov [#allocation6]  }
  0x3f   : > { %s15806_s25 = scalar_lea.vmem %s19704_s0, %s15140_s7  ;;  %13683 = vmatpush3.bf16.msra.mxu0 %v15213_v1  ;;  %14589 = vmatpush3.bf16.msra.mxu1 %v15213_v1  ;;  %vm17704_vm13 = vmor %vm5750_vm6, %vm5751_vm10  ;;  %s19505_s15 = scalar_lea.vmem [#allocation6], %s12045_s14 }
  0x40   : > { %13684 = vmatprep.subr.bf16.mxu0 %v15214_v2  ;;  %v15812_v4 = vld [vmem:[%s15806_s25] sm:$0xf]  ;;  %v15815_v5 = vld [vmem:[%s15806_s25 + $0x4] sm:$0xf]  ;;  %v15818_v6 = vld [vmem:[%s15806_s25 + $0x8] sm:$0x1]  ;;  %14582 = vmatprep.subr.bf16.mxu1 %v15214_v2 }
  0x41   : > { %v332_v7 = vshrl.u32 %v15812_v4, 16  ;;  %v335_v8 = vshll.u32 %v15812_v4, 16  ;;  %v341_v9 = vshll.u32 %v15815_v5, 16  ;;  %v345_v10 = vshrl.u32 %v15815_v5, 16  ;;  %v15825_v11 = vld [vmem:[%s15806_s25 + $0xc] sm:$0xf]  ;;  %vm17739_vm14 = vmand %vm6120_vm9, %vm6114_vm8 }
  0x42   : > { %v351_v13 = vshll.u32 %v15818_v6, 16  ;;  %v15832_v14 = vld [vmem:[%s15806_s25 + $0x10] sm:$0xf]  ;;  %v15835_v15 = vld [vmem:[%s15806_s25 + $0x14] sm:$0x1]  ;;  %v356_v21 = vshrl.u32 %v15825_v11, 16 }
  0x43   : > { %13685 = vmatpush3.bf16.msra.mxu0 %v15214_v2  ;;  %v334_v16 = vrot.slane %v332_v7, 4  ;;  %v337_v17 = vrot.slane %v335_v8, 5  ;;  %v343_v18 = vrot.slane %v341_v9, 5  ;;  %v347_v19 = vrot.slane %v345_v10, 4  ;;  %14590 = vmatpush3.bf16.msra.mxu1 %v15214_v2  ;;  %v15854_v37 = vld [vmem:[%s15806_s25 + $0x18] sm:$0xf] }
  0x44   : > { %13686 = vmatprep.subr.bf16.mxu0 %v15215_v3  ;;  %v353_v20 = vrot.slane %v351_v13, 5  ;;  %v359_v22 = vshll.u32 %v15825_v11, 16  ;;  %v365_v23 = vshll.u32 %v15832_v14, 16  ;;  %14583 = vmatprep.subr.bf16.mxu1 %v15215_v3  ;;  %v369_v26 = vshrl.u32 %v15832_v14, 16  ;;  %v15857_v39 = vld [vmem:[%s15806_s25 + $0x1c] sm:$0xf] }
  0x45   : > { %v338_v24 = vor.u32 %v337_v17, %v334_v16  ;;  %v348_v25 = vor.u32 %v347_v19, %v343_v18  ;;  %v375_v27 = vshll.u32 %v15835_v15, 16  ;;  %v358_v30 = vrot.slane %v356_v21, 4  ;;  %v15860_v40 = vld [vmem:[%s15806_s25 + $0x20] sm:$0x1]  ;;  %v15871_v47 = vld [vmem:[%s15806_s25 + $0x24] sm:$0xf] }
  0x46   : > { %v361_v31 = vrot.slane %v359_v22, 5  ;;  %v15851_v32 = vrot.slane %v365_v23, 5  ;;  %v371_v35 = vrot.slane %v369_v26, 4  ;;  %v380_v41 = vshrl.u32 %v15854_v37, 16  ;;  %v15877_v53 = vld [vmem:[%s15806_s25 + $0x28] sm:$0xf] }
  0x47   : > { %13687 = vmatpush3.bf16.msra.mxu0 %v15215_v3  ;;  %v339_v33 = vrot.slane %v338_v24, 4  ;;  %v349_v34 = vrot.slane %v348_v25, 4  ;;  %v377_v36 = vrot.slane %v375_v27, 5  ;;  %14591 = vmatpush3.bf16.msra.mxu1 %v15215_v3  ;;  %v383_v42 = vshll.u32 %v15854_v37, 16  ;;  %v15889_v63 = vld [vmem:[%s15806_s25 + $0x2c] sm:$0x1] }
  0x48   : > { %13688 = vmatprep.subr.bf16.mxu0 %v15216_v12  ;;  %v362_v38 = vor.u32 %v361_v31, %v358_v30  ;;  %14584 = vmatprep.subr.bf16.mxu1 %v15216_v12  ;;  %v372_v45 = vor.u32 %v371_v35, %v15851_v32  ;;  %v389_v46 = vshll.u32 %v15857_v39, 16  ;;  %v382_v51 = vrot.slane %v380_v41, 4  ;;  %v15895_v8 = vld [vmem:[%s15806_s25 + $0x30] sm:$0xf]  ;;  %v15902_v16 = vld [vmem:[%s15806_s25 + $0x34] sm:$0xf] }
  0x49   : > { %v344_v43 = vsel %vm15847_vm2, %v339_v33, %v343_v18  ;;  %v354_v44 = vsel %vm15847_vm2, %v349_v34, %v353_v20  ;;  %v385_v52 = vrot.slane %v383_v42, 5  ;;  %v393_v56 = vshrl.u32 %v15857_v39, 16  ;;  %v15219_v17 = vld [vmem:[%s19705_s1 + $0x78] sm:$0xff]   ;;  %v15922_v34 = vld [vmem:[%s15806_s25 + $0x40] sm:$0xf]  ;;  %s11943_s11 = sshll.u32 %s19505_s15, 4  ;;  %s19652_s11 = int_to_ptr.vmem [resolvable:$true] %s11943_s11 }
  0x4a   : > { %v12063_v49 = vcombine.low %v344_v43, %v354_v44  ;;  %v363_v50 = vrot.slane %v362_v38, 4  ;;  %v373_v54 = vrot.slane %v372_v45, 4  ;;  %v15879_v55 = vrot.slane %v389_v46, 5  ;;  %v15909_v20 = vld [vmem:[%s15806_s25 + $0x38] sm:$0x1]  ;;  %s15578_s10 = scalar_lea.vmem %s19652_s11, 2048 }
  0x4b   : > { %13689 = vmatpush3.bf16.msra.mxu0 %v15216_v12  ;;  %v399_v57 = vshll.u32 %v15860_v40, 16  ;;  %14592 = vmatpush3.bf16.msra.mxu1 %v15216_v12  ;;  %v386_v58 = vor.u32 %v385_v52, %v382_v51  ;;  %v404_v59 = vshrl.u32 %v15871_v47, 16  ;;  %v407_v60 = vshll.u32 %v15871_v47, 16  ;;  %v15915_v27 = vld [vmem:[%s15806_s25 + $0x3c] sm:$0xf]  ;;  %p15579_p8 = scmp.ne.s32.totalorder %s19652_s11, %s15578_s10  ;;  %s15582_s24 = sshll.u32 %s15666_s17, 4  ;;  %s15583_s24 = int_to_ptr.vmem [resolvable:$false] %s15582_s24 }
  0x4c   : > { %13690 = vmatprep.subr.bf16.mxu0 %v15217_v28  ;;  %13696 = vmatprep.mubr.bf16.mxu0 %v12063_v49  ;;  %v368_v61 = vsel %vm15847_vm2, %v363_v50, %v15851_v32  ;;  %v395_v62 = vrot.slane %v393_v56, 4  ;;  %v413_v0 = vshll.u32 %v15877_v53, 16  ;;  %v378_v1 = vsel %vm15847_vm2, %v373_v54, %v377_v36  ;;  %v15932_v50 = vld [vmem:[%s15806_s25 + $0x44] sm:$0x1]  ;;  %s15584_s27 = scalar_lea.vmem %s15583_s24, 4096  ;;  %p15585_p1 = scmp.lt.s32.totalorder %s19652_s11, %s15583_s24 }
  0x4d   : > { %14585 = vmatprep.subr.bf16.mxu1 %v15217_v28  ;;  %v401_v2 = vrot.slane %v399_v57, 5  ;;  %v406_v3 = vrot.slane %v404_v59, 4  ;;  %v409_v7 = vrot.slane %v407_v60, 5  ;;  %v387_v9 = vrot.slane %v386_v58, 4  ;;  %v15939_v57 = vld [vmem:[%s15806_s25 + $0x48] sm:$0xf]  ;;  %p15580_p11 = pnand %p15579_p8, %p19963_p10  ;;  %p15586_p3 = scmp.lt.s32.totalorder %s15584_s27, %s15578_s10 }
  0x4e   : > { %v396_v10 = vor.u32 %v395_v62, %v15879_v55  ;;  %v15898_v12 = vrot.slane %v413_v0, 5  ;;  %v417_v13 = vshrl.u32 %v15877_v53, 16  ;;  %v423_v19 = vshll.u32 %v15889_v63, 16  ;;  %v15945_v62 = vld [vmem:[%s15806_s25 + $0x4c] sm:$0xf] }
  0x4f   : > { %13691 = vmatpush3.bf16.msra.mxu0 %v15217_v28  ;;  %14593 = vmatpush3.bf16.msra.mxu1 %v15217_v28  ;;  %v410_v18 = vor.u32 %v409_v7, %v406_v3  ;;  %v428_v21 = vshrl.u32 %v15895_v8, 16  ;;  %v431_v22 = vshll.u32 %v15895_v8, 16  ;;  %v12064_v23 = vcombine.low %v368_v61, %v378_v1  ;;  %v15220_v28 = vld [vmem:[%s19705_s1] sm:$0xff]   ;;  %v15221_v0 = vld [vmem:[%s19705_s1 + $0x8] sm:$0xff]   ;;  %p15581_p13 = pneg %p15580_p11  ;;  %p15587_p5 = por %p15586_p3, %p15585_p1 }
  0x50   : > { %13692 = vmatprep.subr.bf16.mxu0 %v15218_v48  ;;  %14586 = vmatprep.subr.bf16.mxu1 %v15218_v48  ;;  %v397_v24 = vrot.slane %v396_v10, 4  ;;  %v419_v25 = vrot.slane %v417_v13, 4  ;;  %v437_v26 = vshll.u32 %v15902_v16, 16  ;;  %v441_v33 = vshrl.u32 %v15902_v16, 16 }
  0x51   : > { %v411_v30 = vrot.slane %v410_v18, 4  ;;  %v430_v31 = vrot.slane %v428_v21, 4  ;;  %v433_v32 = vrot.slane %v431_v22, 5  ;;  %v392_v35 = vsel %vm15847_vm2, %v387_v9, %v15879_v55  ;;  %v15954_v9 = vld [vmem:[%s15806_s25 + $0x50] sm:$0x1]  ;;  %p15588_p6 = pnand %p15587_p5, %p15581_p13 }
  0x52   : > { %v420_v36 = vor.u32 %v419_v25, %v15898_v12  ;;  %v439_v38 = vrot.slane %v437_v26, 5  ;;  %v447_v41 = vshll.u32 %v15909_v20, 16  ;;  %v402_v42 = vsel %vm15847_vm2, %v397_v24, %v401_v2  ;;  %v15960_v18 = vld [vmem:[%s15806_s25 + $0x54] sm:$0xf] }
  0x53   : > { %13693 = vmatpush3.bf16.msra.mxu0 %v15218_v48  ;;  %14594 = vmatpush3.bf16.msra.mxu1 %v15218_v48  ;;  %v425_v43 = vrot.slane %v423_v19, 5  ;;  %v434_v44 = vor.u32 %v433_v32, %v430_v31  ;;  %v443_v45 = vrot.slane %v441_v33, 4  ;;  %v452_v51 = vshrl.u32 %v15915_v27, 16  ;;  %v15963_v19 = vld [vmem:[%s15806_s25 + $0x58] sm:$0xf] }
  0x54   : > { %13694 = vmatprep.subr.bf16.mxu0 %v15219_v17  ;;  %14587 = vmatprep.subr.bf16.mxu1 %v15219_v17  ;;  %v421_v46 = vrot.slane %v420_v36, 4  ;;  %v449_v49 = vrot.slane %v447_v41, 5  ;;  %v455_v52 = vshll.u32 %v15915_v27, 16  ;;  %v461_v55 = vshll.u32 %v15922_v34, 16 }
  0x55   : > { %v435_v54 = vrot.slane %v434_v44, 4  ;;  %v444_v48 = vor.u32 %v443_v45, %v439_v38  ;;  %v465_v56 = vshrl.u32 %v15922_v34, 16  ;;  %v12065_v58 = vcombine.low %v392_v35, %v402_v42 }
  0x56   : > { %v416_v59 = vsel %vm15847_vm2, %v411_v30, %v15898_v12  ;;  %v454_v60 = vrot.slane %v452_v51, 4  ;;  %v457_v61 = vrot.slane %v455_v52, 5  ;;  %v426_v1 = vsel %vm15847_vm2, %v421_v46, %v425_v43  ;;  %v15222_v30 = vld [vmem:[%s19705_s1 + $0x10] sm:$0xff]   ;;  %v15223_v43 = vld [vmem:[%s19705_s1 + $0x18] sm:$0xff]  }
  0x57   : > { %13695 = vmatpush3.bf16.msra.mxu0 %v15219_v17  ;;  %14595 = vmatpush3.bf16.msra.mxu1 %v15219_v17  ;;  %v445_v2 = vrot.slane %v444_v48, 4  ;;  %v463_v3 = vrot.slane %v461_v55, 5  ;;  %v471_v7 = vshll.u32 %v15932_v50, 16  ;;  %v440_v10 = vsel %vm15847_vm2, %v435_v54, %v439_v38 }
  0x58   : > { %13732 = vmatprep.subr.bf16.mxu0 %v15220_v28  ;;  %v458_v12 = vor.u32 %v457_v61, %v454_v60  ;;  %v467_v13 = vrot.slane %v465_v56, 4  ;;  %v476_v17 = vshrl.u32 %v15939_v57, 16  ;;  %v479_v22 = vshll.u32 %v15939_v57, 16 }
  0x59   : > { %v450_v21 = vsel %vm15847_vm2, %v445_v2, %v449_v49  ;;  %v485_v24 = vshll.u32 %v15945_v62, 16  ;;  %v489_v25 = vshrl.u32 %v15945_v62, 16  ;;  %v12066_v26 = vcombine.low %v416_v59, %v426_v1  ;;  %v15980_v49 = vld [vmem:[%s15806_s25 + $0x5c] sm:$0x1] }
  0x5a   : > { %13697 = vmatmul.mubr.bf16.vlgmr.msra.gmra.mrb[0].mxu0 %v12064_v23  ;;  %v468_v31 = vor.u32 %v467_v13, %v463_v3  ;;  %v478_v32 = vrot.slane %v476_v17, 4  ;;  %v481_v23 = vrot.slane %v479_v22, 5  ;;  %v495_v36 = vshll.u32 %v15954_v9, 16 }
  0x5b   : > { %13733 = vmatpush3.bf16.msra.mxu0 %v15220_v28  ;;  %13700 = vmatprep.mubr.bf16.mxu0 %v12065_v58  ;;  %v487_v33 = vrot.slane %v485_v24, 5  ;;  %v491_v35 = vrot.slane %v489_v25, 4  ;;  %v12067_v38 = vcombine.low %v440_v10, %v450_v21  ;;  %v473_v41 = vrot.slane %v471_v7, 5 }
  0x5c   : > { %13734 = vmatprep.subr.bf16.mxu0 %v15221_v0  ;;  %v500_v42 = vshrl.u32 %v15960_v18, 16  ;;  %v503_v28 = vshll.u32 %v15960_v18, 16  ;;  %v459_v44 = vrot.slane %v458_v12, 4  ;;  %v482_v45 = vor.u32 %v481_v23, %v478_v32  ;;  %v15224_v12 = vld [vmem:[%s19705_s1 + $0x20] sm:$0xff]   ;;  %v15226_v32 = vld [vmem:[%s19705_s1 + $0x30] sm:$0xff]  }
  0x5d   : > { %v492_v46 = vor.u32 %v491_v35, %v487_v33  ;;  %v509_v51 = vshll.u32 %v15963_v19, 16  ;;  %v469_v52 = vrot.slane %v468_v31, 4  ;;  %v513_v55 = vshrl.u32 %v15963_v19, 16 }
  0x5e   : > { %v502_v54 = vrot.slane %v500_v42, 4  ;;  %v505_v48 = vrot.slane %v503_v28, 5  ;;  %v483_v56 = vrot.slane %v482_v45, 4  ;;  %v497_v59 = vrot.slane %v495_v36, 5  ;;  %v1411_v45 = vld [vmem:[%s15806_s25 + $0xc] sm:$0xe] }
  0x5f   : > { %13735 = vmatpush3.bf16.msra.mxu0 %v15221_v0  ;;  %v493_v58 = vrot.slane %v492_v46, 4  ;;  %v511_v60 = vrot.slane %v509_v51, 5  ;;  %v515_v61 = vrot.slane %v513_v55, 4  ;;  %v464_v1 = vsel %vm15847_vm2, %v459_v44, %v463_v3  ;;  %v1412_v55 = vld [vmem:[%s15806_s25 + $0x18] sm:$0xe] }
  0x60   : > { %13736 = vmatprep.subr.bf16.mxu0 %v15222_v30  ;;  %v474_v0 = vsel %vm15847_vm2, %v469_v52, %v473_v41  ;;  %v506_v2 = vor.u32 %v505_v48, %v502_v54  ;;  %v519_v10 = vshll.u32 %v15980_v49, 16  ;;  %v488_v13 = vsel %vm15847_vm2, %v483_v56, %v487_v33  ;;  %v15227_v41 = vld [vmem:[%s19705_s1 + $0x38] sm:$0xff]   ;;  %v15233_v54 = vld [vmem:[%s19705_s1 + $0x88] sm:$0xff]  }
  0x61   : > { %v516_v7 = vor.u32 %v515_v61, %v511_v60  ;;  %v498_v3 = vsel %vm15847_vm2, %v493_v58, %v497_v59  ;;  %v12068_v17 = vcombine.low %v464_v1, %v474_v0  ;;  %v1469_v23 = vrot.slane %v15815_v5, 5  ;;  %v1413_v59 = vld [vmem:[%s15806_s25 + $0x24] sm:$0xe]  ;;  %v15236_v0 = vld [vmem:[%s19705_s1 + $0x90] sm:$0xff]  }
  0x62   : > { %13701 = vmatmul.mubr.bf16.gmra.mrb[4].mxu0 %v12066_v26  ;;  %v12069_v21 = vcombine.low %v488_v13, %v498_v3  ;;  %v507_v22 = vrot.slane %v506_v2, 4  ;;  %v521_v25 = vrot.slane %v519_v10, 5  ;;  %v15225_v26 = vld [vmem:[%s19705_s1 + $0x28] sm:$0xff]   ;;  %v1472_v35 = vrot.slane %v15818_v6, 5 }
  0x63   : > { %13737 = vmatpush3.bf16.msra.mxu0 %v15222_v30  ;;  %13704 = vmatprep.mubr.bf16.mxu0 %v12067_v38  ;;  %v517_v24 = vrot.slane %v516_v7, 4  ;;  %v12089_v36 = vcombine.low %v15812_v4, %v15815_v5  ;;  %v1471_v38 = vrot.slane %v1469_v23, 4  ;;  %v19785_v42 = vmov 0  ;;  %v15230_v4 = vld [vmem:[%s19705_s1 + $0x80] sm:$0xff]  }
  0x64   : > { %13738 = vmatprep.subr.bf16.mxu0 %v15223_v43  ;;  %v512_v30 = vsel %vm15847_vm2, %v507_v22, %v511_v60  ;;  %v19786_v42 = vsel %vm16013_vm5, 4294967295, %v19785_v42  ;;  %v1410_v5 = vld [vmem:[%s15806_s25] sm:$0xe]  ;;  %v1479_v28 = vrot.slane %v15835_v15, 5  ;;  %v1476_v46 = vrot.slane %v15832_v14, 5 }
  0x65   : > { %v522_v31 = vsel %vm15847_vm2, %v517_v24, %v521_v25  ;;  %19787 = vst [vmem:[#allocation9_spill] sm:$0xff] %v19786_v42  ;;  %v16019_v6 = vsel %vm16013_vm5, %v1471_v38, %v1472_v35  ;;  %v12115_v44 = vrot.slane %v1410_v5, 9  ;;  %v12091_v51 = vcombine.low %v15854_v37, %v15857_v39 }
  0x66   : > { %v12070_v33 = vcombine.low %v512_v30, %v522_v31  ;;  %v12092_v52 = vcombine.low %v15871_v47, %v15877_v53  ;;  %v12116_v48 = vrot.slane %v1411_v45, 9  ;;  %v1483_v15 = vrot.slane %v15857_v39, 5 }
  0x67   : > { %13739 = vmatpush3.bf16.msra.mxu0 %v15223_v43  ;;  %v12090_v43 = vcombine.low %v15825_v11, %v15832_v14  ;;  %v12093_v11 = vcombine.low %v15895_v8, %v15902_v16  ;;  %v16042_v14 = vsel %vm16013_vm5, %v12115_v44, %v1469_v23  ;;  %v1478_v37 = vrot.slane %v1476_v46, 4 }
  0x68   : > { %13740 = vmatprep.subr.bf16.mxu0 %v15224_v12  ;;  %v1486_v56 = vrot.slane %v15860_v40, 5  ;;  %v12149_v47 = vcombine.low %v16042_v14, %v16019_v6  ;;  %v16050_v39 = vsel %vm16013_vm5, %v12116_v48, %v1476_v46  ;;  %v12117_v58 = vrot.slane %v1412_v55, 9  ;;  %v15256_v6 = vld [vmem:[%s19705_s1 + $0xd0] sm:$0xff]   ;;  %v15257_v14 = vld [vmem:[%s19705_s1 + $0xd8] sm:$0xff]  }
  0x69   : > { %v1485_v8 = vrot.slane %v1483_v15, 4  ;;  %v16055_v60 = vsel %vm16013_vm5, %v1478_v37, %v1479_v28  ;;  %v12118_v61 = vrot.slane %v1413_v59, 9  ;;  %v1490_v40 = vrot.slane %v15877_v53, 5  ;;  %v1414_v53 = vld [vmem:[%s15806_s25 + $0x30] sm:$0xe]  ;;  %v15239_v28 = vld [vmem:[%s19705_s1 + $0x98] sm:$0xff]  }
  0x6a   : > { %13705 = vmatmul.mubr.bf16.gmra.mrb[8].mxu0 %v12068_v17  ;;  %v1493_v1 = vrot.slane %v15889_v63, 5  ;;  %v12150_v2 = vcombine.low %v16050_v39, %v16055_v60  ;;  %v16066_v7 = vsel %vm16013_vm5, %v12117_v58, %v1483_v15  ;;  %v1497_v63 = vrot.slane %v15902_v16, 5  ;;  %v15242_v15 = vld [vmem:[%s19705_s1 + $0xa0] sm:$0xff]   ;;  %v15245_v58 = vld [vmem:[%s19705_s1 + $0xa8] sm:$0xff]  }
  0x6b   : > { %13741 = vmatpush3.bf16.msra.mxu0 %v15224_v12  ;;  %13708 = vmatprep.mubr.bf16.mxu0 %v12069_v21  ;;  %v16070_v10 = vsel %vm16013_vm5, %v1485_v8, %v1486_v56  ;;  %v1415_v12 = vld [vmem:[%s15806_s25 + $0x3c] sm:$0xe]  ;;  %v16079_v3 = vsel %vm16013_vm5, %v12118_v61, %v1490_v40  ;;  %v1492_v17 = vrot.slane %v1490_v40, 4  ;;  %v12119_v21 = vrot.slane %v1414_v53, 9  ;;  %v274_v8 = vld [vmem:[%s15806_s25 + $0x60] sm:$0xf] }
  0x6c   : > { %13742 = vmatprep.subr.bf16.mxu0 %v15225_v26  ;;  %v12151_v13 = vcombine.low %v16066_v7, %v16070_v10  ;;  %v1499_v22 = vrot.slane %v1497_v63, 4  ;;  %v1500_v24 = vrot.slane %v15909_v20, 5  ;;  %v12120_v25 = vrot.slane %v1415_v12, 9  ;;  %v16151_v59 = vld [vmem:[%s15806_s25 + $0x64] sm:$0xf] }
  0x6d   : > { %v1504_v16 = vrot.slane %v15922_v34, 5  ;;  %v16086_v30 = vsel %vm16013_vm5, %v1492_v17, %v1493_v1  ;;  %v16090_v31 = vsel %vm16013_vm5, %v12119_v21, %v1497_v63  ;;  %v1518_v44 = vrot.slane %v15963_v19, 5  ;;  %v276_v61 = vld [vmem:[%s15806_s25 + $0x6c] sm:$0xf]  ;;  %v16164_v40 = vld [vmem:[%s15806_s25 + $0x70] sm:$0xf] }
  0x6e   : > { %v12152_v35 = vcombine.low %v16079_v3, %v16086_v30  ;;  %v16098_v20 = vsel %vm16013_vm5, %v1499_v22, %v1500_v24  ;;  %v1521_v45 = vrot.slane %v15980_v49, 5  ;;  %v12094_v55 = vcombine.low %v15915_v27, %v15922_v34  ;;  %v15248_v27 = vld [vmem:[%s19705_s1 + $0xb0] sm:$0xff]   ;;  %v278_v1 = vld [vmem:[%s15806_s25 + $0x78] sm:$0xf]  ;;  %v280_v63 = vld [vmem:[%s15806_s25 + $0x84] sm:$0xf] }
  0x6f   : > { %13743 = vmatpush3.bf16.msra.mxu0 %v15225_v26  ;;  %v1416_v26 = vld [vmem:[%s15806_s25 + $0x48] sm:$0xe]  ;;  %v1506_v38 = vrot.slane %v1504_v16, 4  ;;  %v1520_v48 = vrot.slane %v1518_v44, 4  ;;  %v12095_v56 = vcombine.low %v15939_v57, %v15945_v62  ;;  %v12096_v34 = vcombine.low %v15960_v18, %v15963_v19  ;;  %v15254_v18 = vld [vmem:[%s19705_s1 + $0xc0] sm:$0xff]  }
  0x70   : > { %13744 = vmatprep.subr.bf16.mxu0 %v15226_v32  ;;  %v12121_v23 = vrot.slane %v1416_v26, 9  ;;  %v12097_v57 = vcombine.low %v274_v8, %v16151_v59  ;;  %v12098_v19 = vcombine.low %v276_v61, %v16164_v40  ;;  %v16177_v12 = vld [vmem:[%s15806_s25 + $0x88] sm:$0xf]  ;;  %v282_v17 = vld [vmem:[%s15806_s25 + $0x90] sm:$0xf]  ;;  %v15258_v39 = vld [vmem:[%s19705_s1 + $0xe0] sm:$0xff]  }
  0x71   : > { %v16138_v37 = vsel %vm16013_vm5, %v1520_v48, %v1521_v45  ;;  %v16181_v21 = vld [vmem:[%s15806_s25 + $0x94] sm:$0xf]  ;;  %v12100_v22 = vcombine.low %v280_v63, %v16177_v12  ;;  %v286_v26 = vld [vmem:[%s15806_s25 + $0xa8] sm:$0xf]  ;;  %v292_v45 = vld [vmem:[%s15806_s25 + $0xcc] sm:$0xf] }
  0x72   : > { %13709 = vmatmul.mubr.bf16.gmra.mrb[12].mxu0 %v12070_v33  ;;  %v1417_v33 = vld [vmem:[%s15806_s25 + $0x54] sm:$0xe]  ;;  %v12101_v24 = vcombine.low %v282_v17, %v16181_v21  ;;  %v318_v60 = vld [vmem:[%s15806_s25 + $0x68] sm:$0x1]  ;;  %v319_v30 = vld [vmem:[%s15806_s25 + $0x74] sm:$0x1] }
  0x73   : > { %13745 = vmatpush3.bf16.msra.mxu0 %v15226_v32  ;;  %13748 = vmatprep.mubr.bf16.mxu0 %v12089_v36  ;;  %v1507_v32 = vrot.slane %v15932_v50, 5  ;;  %v16102_v36 = vsel %vm16013_vm5, %v12120_v25, %v1504_v16  ;;  %v1511_v50 = vrot.slane %v15945_v62, 5  ;;  %v12122_v5 = vrot.slane %v1417_v33, 9  ;;  %v15252_v62 = vld [vmem:[%s19705_s1 + $0xb8] sm:$0xff]   ;;  %v16187_v16 = vld [vmem:[%s15806_s25 + $0xa0] sm:$0xf] }
  0x74   : > { %13746 = vmatprep.subr.bf16.mxu0 %v15227_v41  ;;  %v284_v25 = vld [vmem:[%s15806_s25 + $0x9c] sm:$0xf]  ;;  %v15259_v3 = vld [vmem:[%s19705_s1 + $0xe8] sm:$0xff]  }
  0x77   : > { %13747 = vmatpush3.bf16.msra.mxu0 %v15227_v41  ;;  %v12153_v41 = vcombine.low %v16090_v31, %v16098_v20  ;;  %v1532_v31 = vrot.slane %v16164_v40, 5  ;;  %v1546_v40 = vrot.slane %v16177_v12, 5 }
  0x78   : > { %13784 = vmatprep.subr.bf16.mxu0 %v15230_v4 }
  0x79   : > { %v1548_v12 = vrot.slane %v1546_v40, 4 }
  0x7a   : > { %13749 = vmatmul.mubr.bf16.vlgmr.msra.gmra.mrb[0].mxu0 %v12090_v43  ;;  %v16113_v43 = vsel %vm16013_vm5, %v1506_v38, %v1507_v32  ;;  %v16191_v32 = vld [vmem:[%s15806_s25 + $0xac] sm:$0xf]  ;;  %v288_v38 = vld [vmem:[%s15806_s25 + $0xb4] sm:$0xf] }
  0x7b   : > { %13785 = vmatpush3.bf16.msra.mxu0 %v15230_v4  ;;  %13752 = vmatprep.mubr.bf16.mxu0 %v12091_v51  ;;  %v1514_v4 = vrot.slane %v15954_v9, 5  ;;  %v12154_v46 = vcombine.low %v16102_v36, %v16113_v43  ;;  %v16121_v9 = vsel %vm16013_vm5, %v12121_v23, %v1511_v50  ;;  %v1513_v51 = vrot.slane %v1511_v50, 4  ;;  %v16197_v50 = vld [vmem:[%s15806_s25 + $0xb8] sm:$0xf]  ;;  %v15260_v36 = vld [vmem:[%s19705_s1 + $0xf0] sm:$0xff]  }
  0x7c   : > { %13786 = vmatprep.subr.bf16.mxu0 %v15233_v54  ;;  %v12102_v23 = vcombine.low %v284_v25, %v16187_v16  ;;  %v12103_v33 = vcombine.low %v286_v26, %v16191_v32  ;;  %v320_v43 = vld [vmem:[%s15806_s25 + $0x80] sm:$0x1] }
  0x7d   : > { %v16129_v49 = vsel %vm16013_vm5, %v1513_v51, %v1514_v4  ;;  %v290_v4 = vld [vmem:[%s15806_s25 + $0xc0] sm:$0xf]  ;;  %v16207_v51 = vld [vmem:[%s15806_s25 + $0xd0] sm:$0xf] }
  0x7e   : > { %v12106_v48 = vcombine.low %v292_v45, %v16207_v51  ;;  %v324_v45 = vld [vmem:[%s15806_s25 + $0xb0] sm:$0x1] }
  0x7f   : > { %13787 = vmatpush3.bf16.msra.mxu0 %v15233_v54  ;;  %v16125_v54 = vsel %vm16013_vm5, %v12122_v5, %v1518_v44  ;;  %v16201_v5 = vld [vmem:[%s15806_s25 + $0xc4] sm:$0xf] }
  0x80   : > { %13788 = vmatprep.subr.bf16.mxu0 %v15236_v0  ;;  %v12105_v44 = vcombine.low %v290_v4, %v16201_v5 }
  0x82   : > { %13753 = vmatmul.mubr.bf16.gmra.mrb[4].mxu0 %v12092_v52  ;;  %v12155_v52 = vcombine.low %v16121_v9, %v16129_v49 }
  0x83   : > { %13756 = vmatprep.mubr.bf16.mxu0 %v12093_v11  ;;  %13789 = vmatpush3.bf16.msra.mxu0 %v15236_v0  ;;  %v12156_v11 = vcombine.low %v16125_v54, %v16138_v37  ;;  %v16168_v0 = vld [vmem:[%s15806_s25 + $0x7c] sm:$0xf]  ;;  %v1553_v54 = vrot.slane %v16181_v21, 5  ;;  %v16283_v37 = vld [vmem:[%s19705_s1 + $0x100] sm:$0xff]  }
  0x84   : > { %13790 = vmatprep.subr.bf16.mxu0 %v15239_v28  ;;  %v12099_v53 = vcombine.low %v278_v1, %v16168_v0 }
  0x85   : > { %v1555_v21 = vrot.slane %v1553_v54, 4 }
  0x87   : > { %13791 = vmatpush3.bf16.msra.mxu0 %v15239_v28  ;;  %v12104_v28 = vcombine.low %v288_v38, %v16197_v50 }
  0x88   : > { %13792 = vmatprep.subr.bf16.mxu0 %v15242_v15 }
  0x8a   : > { %13757 = vmatmul.mubr.bf16.gmra.mrb[8].mxu0 %v12094_v55  ;;  %v1539_v55 = vrot.slane %v16168_v0, 5 }
  0x8b   : > { %13760 = vmatprep.mubr.bf16.mxu0 %v12095_v56  ;;  %13793 = vmatpush3.bf16.msra.mxu0 %v15242_v15  ;;  %v15255_v15 = vld [vmem:[%s19705_s1 + $0xc8] sm:$0xff]   ;;  %v1535_v56 = vrot.slane %v319_v30, 5 }
  0x8c   : > { %13794 = vmatprep.subr.bf16.mxu0 %v15245_v58  ;;  %v1541_v8 = vrot.slane %v1539_v55, 4 }
  0x8f   : > { %13795 = vmatpush3.bf16.msra.mxu0 %v15245_v58 }
  0x90   : > { %13796 = vmatprep.subr.bf16.mxu0 %v15248_v27 }
  0x92   : > { %13761 = vmatmul.mubr.bf16.gmra.mrb[12].mxu0 %v12096_v34  ;;  %v321_v34 = vld [vmem:[%s15806_s25 + $0x8c] sm:$0x1] }
  0x93   : > { %13764 = vmatprep.mubr.bf16.mxu0 %v12097_v57  ;;  %13797 = vmatpush3.bf16.msra.mxu0 %v15248_v27  ;;  %v15261_v27 = vld [vmem:[%s19705_s1 + $0xf8] sm:$0xff]   ;;  %v1421_v57 = vld [vmem:[%s15806_s25 + $0x84] sm:$0xe]  ;;  %v1549_v17 = vrot.slane %v321_v34, 5  ;;  %v1427_v34 = vld [vmem:[%s15806_s25 + $0xcc] sm:$0xe] }
  0x94   : > { %13798 = vmatprep.subr.bf16.mxu0 %v15252_v62  ;;  %v12126_v63 = vrot.slane %v1421_v57, 9 }
  0x95   : > { %v1550_v26 = vsel %vm16013_vm5, %v1548_v12, %v1549_v17  ;;  %v15266_v12 = vld [vmem:[%s15806_s25 + $0x30] sm:$0xff]   ;;  %v15268_v17 = vld [vmem:[%s15806_s25 + $0x3c] sm:$0xff]  }
  0x96   : > { %v1547_v25 = vsel %vm16013_vm5, %v12126_v63, %v1546_v40  ;;  %v15270_v63 = vld [vmem:[%s19705_s1 + $0x110] sm:$0xff]  }
  0x97   : > { %13799 = vmatpush3.bf16.msra.mxu0 %v15252_v62 }
  0x98   : > { %13836 = vmatprep.subr.bf16.mxu0 %v15254_v18 }
  0x9a   : > { %13765 = vmatmul.mubr.bf16.gmra.mrb[16].mxu0 %v12098_v19 }
  0x9b   : > { %13768 = vmatprep.mubr.bf16.mxu0 %v12099_v53 }
  0xa2   : > { %13769 = vmatmul.mubr.bf16.gmra.mrb[20].mxu0 %v12100_v22 }
  0xa3   : > { %13772 = vmatprep.mubr.bf16.mxu0 %v12101_v24 }
  0xaa   : > { %13773 = vmatmul.mubr.bf16.gmra.mrb[24].mxu0 %v12102_v23  ;;  %v323_v23 = vld [vmem:[%s15806_s25 + $0xa4] sm:$0x1] }
  0xab   : > { %13776 = vmatprep.mubr.bf16.mxu0 %v12103_v33  ;;  %v1560_v33 = vrot.slane %v16187_v16, 5  ;;  %v1563_v16 = vrot.slane %v323_v23, 5 }
  0xb2   : > { %13777 = vmatmul.mubr.bf16.gmra.mrb[28].mxu0 %v12104_v28  ;;  %v1423_v28 = vld [vmem:[%s15806_s25 + $0x9c] sm:$0xe] }
  0xb3   : > { %13780 = vmatprep.mubr.bf16.mxu0 %v12105_v44  ;;  %v1567_v44 = vrot.slane %v16191_v32, 5 }
  0xba   : > { %13781 = vmatmul.mubr.bf16.gmra.mrb[32].mxu0 %v12106_v48  ;;  %v1424_v48 = vld [vmem:[%s15806_s25 + $0xa8] sm:$0xe] }
  0xbb   : > { %13800 = vmatprep.mubr.bf16.mxu0 %v12149_v47  ;;  %v1525_v47 = vrot.slane %v16151_v59, 5  ;;  %v1542_v59 = vrot.slane %v320_v43, 5 }
  0xbd   : > { %v1527_v10 = vrot.slane %v1525_v47, 4  ;;  %v1543_v0 = vsel %vm16013_vm5, %v1541_v8, %v1542_v59  ;;  %v1588_v8 = vrot.slane %v16207_v51, 5 }
  0xbf   : > { %v1590_v40 = vrot.slane %v1588_v8, 4 }
  0xc2   : > { %13801 = vmatmul.mubr.bf16.vlgmr.msra.gmra.mrb[0].mxu0 %v12150_v2  ;;  %v1418_v2 = vld [vmem:[%s15806_s25 + $0x60] sm:$0xe] }
  0xc3   : > { %13837 = vmatpush3.bf16.msra.mxu0 %v15254_v18  ;;  %13804 = vmatprep.mubr.bf16.mxu0 %v12151_v13  ;;  %v12123_v7 = vrot.slane %v1418_v2, 9  ;;  %v1528_v13 = vrot.slane %v318_v60, 5  ;;  %v1422_v18 = vld [vmem:[%s15806_s25 + $0x90] sm:$0xe]  ;;  %v1569_v60 = vrot.slane %v1567_v44, 4  ;;  %v1570_v2 = vrot.slane %v324_v45, 5 }
  0xc4   : > { %13838 = vmatprep.subr.bf16.mxu0 %v15255_v15  ;;  %v12127_v22 = vrot.slane %v1422_v18, 9  ;;  %v15263_v18 = vld [vmem:[%s15806_s25 + $0x18] sm:$0xff]  }
  0xc5   : > { %v1529_v20 = vsel %vm16013_vm5, %v1527_v10, %v1528_v13  ;;  %v1425_v13 = vld [vmem:[%s15806_s25 + $0xb4] sm:$0xe]  ;;  %v12257_v45 = vld [vmem:[%s15806_s25 + $0x1c] sm:$0xf] }
  0xc6   : > { %v1554_v38 = vsel %vm16013_vm5, %v12127_v22, %v1553_v54  ;;  %v12130_v43 = vrot.slane %v1425_v13, 9  ;;  %v15273_v22 = vld [vmem:[%s19705_s1 + $0x118] sm:$0xff]  }
  0xc7   : > { %13839 = vmatpush3.bf16.msra.mxu0 %v15255_v15  ;;  %v12160_v15 = vcombine.low %v1547_v25, %v1550_v26  ;;  %v15276_v25 = vld [vmem:[%s19705_s1 + $0x120] sm:$0xff]   ;;  %v15271_v26 = vld [vmem:[%s15806_s25 + $0x54] sm:$0xff]  }
  0xc8   : > { %13840 = vmatprep.subr.bf16.mxu0 %v15256_v6  ;;  %v15286_v13 = vld [vmem:[%s19705_s1 + $0x138] sm:$0xff]  }
  0xca   : > { %13805 = vmatmul.mubr.bf16.gmra.mrb[4].mxu0 %v12152_v35  ;;  %v1526_v35 = vsel %vm16013_vm5, %v12123_v7, %v1525_v47  ;;  %v1562_v47 = vrot.slane %v1560_v33, 4  ;;  %v325_v7 = vld [vmem:[%s15806_s25 + $0xbc] sm:$0x1] }
  0xcb   : > { %13808 = vmatprep.mubr.bf16.mxu0 %v12153_v41  ;;  %13841 = vmatpush3.bf16.msra.mxu0 %v15256_v6  ;;  %v1419_v41 = vld [vmem:[%s15806_s25 + $0x6c] sm:$0xe]  ;;  %v12157_v9 = vcombine.low %v1526_v35, %v1529_v20  ;;  %v1581_v35 = vrot.slane %v16201_v5, 5  ;;  %v326_v20 = vld [vmem:[%s15806_s25 + $0xc8] sm:$0x1] }
  0xcc   : > { %13842 = vmatprep.subr.bf16.mxu0 %v15257_v14  ;;  %v12124_v49 = vrot.slane %v1419_v41, 9  ;;  %v1564_v32 = vsel %vm16013_vm5, %v1562_v47, %v1563_v16  ;;  %v1426_v41 = vld [vmem:[%s15806_s25 + $0xc0] sm:$0xe]  ;;  %v327_v5 = vld [vmem:[%s15806_s25 + $0xd4] sm:$0x1] }
  0xce   : > { %v1533_v62 = vsel %vm16013_vm5, %v12124_v49, %v1532_v31  ;;  %v12131_v49 = vrot.slane %v1426_v41, 9 }
  0xcf   : > { %13843 = vmatpush3.bf16.msra.mxu0 %v15257_v14  ;;  %v12128_v14 = vrot.slane %v1423_v28, 9 }
  0xd0   : > { %13844 = vmatprep.subr.bf16.mxu0 %v15258_v39  ;;  %v1582_v59 = vsel %vm16013_vm5, %v12131_v49, %v1581_v35 }
  0xd1   : > { %v1561_v10 = vsel %vm16013_vm5, %v12128_v14, %v1560_v33  ;;  %v15272_v14 = vld [vmem:[%s15806_s25 + $0x60] sm:$0xff]  }
  0xd2   : > { %13809 = vmatmul.mubr.bf16.gmra.mrb[8].mxu0 %v12154_v46  ;;  %v1420_v46 = vld [vmem:[%s15806_s25 + $0x78] sm:$0xe] }
  0xd3   : > { %13812 = vmatprep.mubr.bf16.mxu0 %v12155_v52  ;;  %13845 = vmatpush3.bf16.msra.mxu0 %v15258_v39  ;;  %v1534_v52 = vrot.slane %v1532_v31, 4  ;;  %v12125_v58 = vrot.slane %v1420_v46, 9  ;;  %v12129_v39 = vrot.slane %v1424_v48, 9  ;;  %v1571_v31 = vsel %vm16013_vm5, %v1569_v60, %v1570_v2  ;;  %v15282_v48 = vld [vmem:[%s19705_s1 + $0x130] sm:$0xff]  }
  0xd4   : > { %13846 = vmatprep.subr.bf16.mxu0 %v15259_v3  ;;  %v15274_v2 = vld [vmem:[%s15806_s25 + $0x6c] sm:$0xff]  }
  0xd5   : > { %v1536_v61 = vsel %vm16013_vm5, %v1534_v52, %v1535_v56  ;;  %v1540_v1 = vsel %vm16013_vm5, %v12125_v58, %v1539_v55  ;;  %v1568_v30 = vsel %vm16013_vm5, %v12129_v39, %v1567_v44  ;;  %v12162_v55 = vcombine.low %v1561_v10, %v1564_v32  ;;  %v12256_v44 = vld [vmem:[%s15806_s25 + $0x18] sm:$0xf] }
  0xd6   : > { %v12158_v19 = vcombine.low %v1533_v62, %v1536_v61  ;;  %v12159_v53 = vcombine.low %v1540_v1, %v1543_v0  ;;  %v1583_v52 = vrot.slane %v1581_v35, 4  ;;  %v12132_v61 = vrot.slane %v1427_v34, 9  ;;  %v12262_v34 = vld [vmem:[%s15806_s25 + $0x30] sm:$0xf] }
  0xd7   : > { %13847 = vmatpush3.bf16.msra.mxu0 %v15259_v3  ;;  %v1574_v3 = vrot.slane %v16197_v50, 5  ;;  %v1584_v50 = vrot.slane %v326_v20, 5  ;;  %v1591_v1 = vrot.slane %v327_v5, 5  ;;  %v2448_v39 = vshrl.u32 %v12256_v44, 16 }
  0xd8   : > { %13848 = vmatprep.subr.bf16.mxu0 %v15260_v36  ;;  %v1589_v51 = vsel %vm16013_vm5, %v12132_v61, %v1588_v8  ;;  %v2451_v60 = vshll.u32 %v12256_v44, 16  ;;  %v2457_v10 = vshll.u32 %v12257_v45, 16  ;;  %v2461_v32 = vshrl.u32 %v12257_v45, 16 }
  0xd9   : > { %v1576_v46 = vrot.slane %v1574_v3, 4  ;;  %v1575_v56 = vsel %vm16013_vm5, %v12130_v43, %v1574_v3  ;;  %v1592_v0 = vsel %vm16013_vm5, %v1590_v40, %v1591_v1  ;;  %v12258_v3 = vld [vmem:[%s15806_s25 + $0x20] sm:$0x1]  ;;  %v2450_v20 = vrot.slane %v2448_v39, 4  ;;  %v16403_v1 = vld [vmem:[%s15806_s25 + $0x2c] sm:$0x1] }
  0xda   : > { %13813 = vmatmul.mubr.bf16.gmra.mrb[12].mxu0 %v12156_v11  ;;  %v322_v11 = vld [vmem:[%s15806_s25 + $0x98] sm:$0x1]  ;;  %v12166_v54 = vcombine.low %v1589_v51, %v1592_v0  ;;  %v2453_v41 = vrot.slane %v2451_v60, 5  ;;  %v16434_v39 = vld [vmem:[%s15806_s25 + $0x40] sm:$0xf] }
  0xdb   : > { %13816 = vmatprep.mubr.bf16.mxu0 %v12157_v9  ;;  %13849 = vmatpush3.bf16.msra.mxu0 %v15260_v36  ;;  %v1556_v24 = vrot.slane %v322_v11, 5  ;;  %v12163_v36 = vcombine.low %v1568_v30, %v1571_v31  ;;  %v1577_v9 = vrot.slane %v325_v7, 5  ;;  %v15262_v11 = vld [vmem:[%s15806_s25 + $0xc] sm:$0xff]   ;;  %v16366_v7 = vld [vmem:[%s15806_s25 + $0x14] sm:$0x1] }
  0xdc   : > { %13850 = vmatprep.subr.bf16.mxu0 %v15261_v27  ;;  %v12259_v30 = vld [vmem:[%s15806_s25 + $0x24] sm:$0xf]  ;;  %v2443_v35 = vshll.u32 %v16366_v7, 16 }
  0xdd   : > { %v1557_v4 = vsel %vm16013_vm5, %v1555_v21, %v1556_v24  ;;  %v1578_v58 = vsel %vm16013_vm5, %v1576_v46, %v1577_v9  ;;  %v12253_v21 = vld [vmem:[%s15806_s25 + $0xc] sm:$0xf]  ;;  %v2463_v46 = vrot.slane %v2461_v32, 4  ;;  %v2467_v9 = vshll.u32 %v12258_v3, 16  ;;  %v12268_v32 = vld [vmem:[%s15806_s25 + $0x48] sm:$0xf] }
  0xde   : > { %v12161_v6 = vcombine.low %v1554_v38, %v1557_v4  ;;  %v12164_v57 = vcombine.low %v1575_v56, %v1578_v58  ;;  %v15269_v24 = vld [vmem:[%s15806_s25 + $0x48] sm:$0xff]   ;;  %v2424_v23 = vshrl.u32 %v12253_v21, 16  ;;  %v2427_v33 = vshll.u32 %v12253_v21, 16 }
  0xdf   : > { %13851 = vmatpush3.bf16.msra.mxu0 %v15261_v27  ;;  %v1585_v27 = vsel %vm16013_vm5, %v1583_v52, %v1584_v50  ;;  %v15279_v38 = vld [vmem:[%s19705_s1 + $0x128] sm:$0xff]   ;;  %v2472_v49 = vshrl.u32 %v12259_v30, 16  ;;  %v15275_v52 = vld [vmem:[%s15806_s25 + $0x78] sm:$0xff]   ;;  %v16385_v50 = vld [vmem:[%s19705_s1 + $0x140] sm:$0xff]   ;;  %v2475_v56 = vshll.u32 %v12259_v30, 16  ;;  %v16398_v61 = vrot.slane %v2443_v35, 5 }
  0xe0   : > { %13888 = vmatprep.subr.bf16.mxu0 %v16283_v37  ;;  %v12165_v62 = vcombine.low %v1582_v59, %v1585_v27  ;;  %v15277_v58 = vld [vmem:[%s15806_s25 + $0x84] sm:$0xff]   ;;  %v2454_v27 = vor.u32 %v2453_v41, %v2450_v20  ;;  %v2529_v35 = vshll.u32 %v16434_v39, 16  ;;  %v12271_v20 = vld [vmem:[%s15806_s25 + $0x54] sm:$0xf] }
  0xe1   : > { %v2474_v51 = vrot.slane %v2472_v49, 4  ;;  %v2477_v0 = vrot.slane %v2475_v56, 5  ;;  %v2547_v49 = vshll.u32 %v12268_v32, 16 }
  0xe2   : > { %13817 = vmatmul.mubr.bf16.gmra.mrb[16].mxu0 %v12158_v19  ;;  %v15265_v19 = vld [vmem:[%s15806_s25 + $0x24] sm:$0xff]   ;;  %v16400_v40 = vrot.slane %v2454_v27, 4  ;;  %v2571_v27 = vshll.u32 %v12271_v20, 16 }
  0xe3   : > { %13820 = vmatprep.mubr.bf16.mxu0 %v12159_v53  ;;  %v15267_v53 = vld [vmem:[%s19705_s1 + $0x108] sm:$0xff]  }
  0xea   : > { %13821 = vmatmul.mubr.bf16.gmra.mrb[20].mxu0 %v12160_v15  ;;  %v2426_v15 = vrot.slane %v2424_v23, 4  ;;  %v16419_v23 = vrot.slane %v2467_v9, 5  ;;  %v2544_v9 = vshrl.u32 %v12268_v32, 16 }
  0xeb   : > { %13824 = vmatprep.mubr.bf16.mxu0 %v12161_v6  ;;  %v2429_v6 = vrot.slane %v2427_v33, 5 }
  0xed   : > { %v2430_v31 = vor.u32 %v2429_v6, %v2426_v15  ;;  %v15281_v15 = vld [vmem:[%s15806_s25 + $0xa8] sm:$0xff]  }
  0xef   : > { %v16379_v43 = vrot.slane %v2430_v31, 4 }
  0xf2   : > { %13825 = vmatmul.mubr.bf16.gmra.mrb[24].mxu0 %v12162_v55  ;;  %v16374_v55 = vrot.slane %v2457_v10, 5 }
  0xf3   : > { %13828 = vmatprep.mubr.bf16.mxu0 %v12163_v36  ;;  %v16377_v36 = vld [vmem:[%s15806_s25 + $0x28] sm:$0xf] }
  0xf4   : > { %v2481_v5 = vshll.u32 %v16377_v36, 16  ;;  %v2485_v8 = vshrl.u32 %v16377_v36, 16  ;;  %v2464_v21 = vor.u32 %v2463_v46, %v16374_v55  ;;  %v2533_v46 = vshrl.u32 %v16434_v39, 16 }
  0xfa   : > { %13829 = vmatmul.mubr.bf16.gmra.mrb[28].mxu0 %v12164_v57  ;;  %v16393_v57 = vld [vmem:[%s15806_s25 + $0x34] sm:$0xf] }
  0xfb   : > { %13832 = vmatprep.mubr.bf16.mxu0 %v12165_v62 }
 0x102   : > { %13833 = vmatmul.mubr.bf16.gmra.mrb[32].mxu0 %v12166_v54  ;;  %v16405_v54 = vrot.slane %v2481_v5, 5  ;;  %v15285_v5 = vld [vmem:[%s15806_s25 + $0xcc] sm:$0xff]  }
 0x103   : > { %13852 = vmatprep.mubr.bf16.mxu0 %v15262_v11  ;;  %v2496_v11 = vshrl.u32 %v12262_v34, 16 }
 0x105   : > { %v2498_v33 = vrot.slane %v2496_v11, 4 }
 0x10a   : > { %13853 = vmatmul.mubr.bf16.vlgmr.msra.gmra.mrb[0].mxu0 %v15263_v18  ;;  %v2499_v18 = vshll.u32 %v12262_v34, 16  ;;  %v16455_v34 = vld [vmem:[%s15806_s25 + $0x50] sm:$0x1] }
 0x10b   : > { %13889 = vmatpush3.bf16.msra.mxu0 %v16283_v37  ;;  %13856 = vmatprep.mubr.bf16.mxu0 %v15265_v19  ;;  %v12254_v37 = vld [vmem:[%s15806_s25 + $0x10] sm:$0xf] }
 0x10c   : > { %13890 = vmatprep.subr.bf16.mxu0 %v15267_v53  ;;  %v2433_v4 = vshll.u32 %v12254_v37, 16  ;;  %v2437_v28 = vshrl.u32 %v12254_v37, 16  ;;  %v15278_v19 = vld [vmem:[%s15806_s25 + $0x90] sm:$0xff]   ;;  %v16414_v37 = vld [vmem:[%s15806_s25 + $0x38] sm:$0x1] }
 0x10e   : > { %v16362_v47 = vrot.slane %v2433_v4, 5  ;;  %v2439_v16 = vrot.slane %v2437_v28, 4  ;;  %v12265_v4 = vld [vmem:[%s15806_s25 + $0x3c] sm:$0xf] }
 0x10f   : > { %13891 = vmatpush3.bf16.msra.mxu0 %v15267_v53  ;;  %v2487_v53 = vrot.slane %v2485_v8, 4  ;;  %v2520_v60 = vshrl.u32 %v12265_v4, 16  ;;  %v16452_v8 = vld [vmem:[%s15806_s25 + $0x44] sm:$0x1] }
 0x110   : > { %13892 = vmatprep.subr.bf16.mxu0 %v15270_v63  ;;  %v2440_v59 = vor.u32 %v2439_v16, %v16362_v47  ;;  %v15283_v16 = vld [vmem:[%s15806_s25 + $0xb4] sm:$0xff]   ;;  %v2539_v11 = vshll.u32 %v16452_v8, 16 }
 0x111   : > { %v2522_v31 = vrot.slane %v2520_v60, 4 }
 0x112   : > { %13857 = vmatmul.mubr.bf16.gmra.mrb[4].mxu0 %v15266_v12  ;;  %v16396_v62 = vrot.slane %v2440_v59, 4  ;;  %v15280_v12 = vld [vmem:[%s15806_s25 + $0x9c] sm:$0xff]   ;;  %v2568_v59 = vshrl.u32 %v12271_v20, 16  ;;  %v12277_v20 = vld [vmem:[%s15806_s25 + $0x6c] sm:$0xf] }
 0x113   : > { %13860 = vmatprep.mubr.bf16.mxu0 %v15268_v17  ;;  %13893 = vmatpush3.bf16.msra.mxu0 %v15270_v63  ;;  %v2505_v63 = vshll.u32 %v16393_v57, 16  ;;  %v2491_v17 = vshll.u32 %v16403_v1, 16 }
 0x114   : > { %13894 = vmatprep.subr.bf16.mxu0 %v15273_v22 }
 0x115   : > { %v16424_v44 = vrot.slane %v2491_v17, 5  ;;  %v16426_v45 = vrot.slane %v2505_v63, 5  ;;  %v2563_v17 = vshll.u32 %v16455_v34, 16 }
 0x117   : > { %13895 = vmatpush3.bf16.msra.mxu0 %v15273_v22  ;;  %v2509_v22 = vshrl.u32 %v16393_v57, 16 }
 0x118   : > { %13896 = vmatprep.subr.bf16.mxu0 %v15276_v25 }
 0x11a   : > { %13861 = vmatmul.mubr.bf16.gmra.mrb[8].mxu0 %v15269_v24  ;;  %v2478_v24 = vor.u32 %v2477_v0, %v2474_v51  ;;  %v16457_v51 = vrot.slane %v2529_v35, 5  ;;  %v2535_v0 = vrot.slane %v2533_v46, 4 }
 0x11b   : > { %13864 = vmatprep.mubr.bf16.mxu0 %v15271_v26  ;;  %13897 = vmatpush3.bf16.msra.mxu0 %v15276_v25  ;;  %v2488_v25 = vor.u32 %v2487_v53, %v16405_v54  ;;  %v16417_v26 = vrot.slane %v2464_v21, 4  ;;  %v2549_v53 = vrot.slane %v2547_v49, 5  ;;  %v2436_v21 = vsel %vm15847_vm2, %v16379_v43, %v16362_v47 }
 0x11c   : > { %13898 = vmatprep.subr.bf16.mxu0 %v15279_v38  ;;  %v16422_v28 = vrot.slane %v2478_v24, 4  ;;  %v2446_v24 = vsel %vm15847_vm2, %v16396_v62, %v16398_v61  ;;  %v2460_v47 = vsel %vm15847_vm2, %v16400_v40, %v16374_v55  ;;  %v2536_v60 = vor.u32 %v2535_v0, %v16457_v51 }
 0x11d   : > { %v16430_v6 = vrot.slane %v2488_v25, 4  ;;  %v2570_v25 = vrot.slane %v2568_v59, 4  ;;  %v2470_v43 = vsel %vm15847_vm2, %v16417_v26, %v16419_v23  ;;  %v16498_v40 = vrot.slane %v2539_v11, 5  ;;  %v15289_v11 = vld [vmem:[%s19705_s1 + $0x148] sm:$0xff]  }
 0x11e   : > { %v2484_v62 = vsel %vm15847_vm2, %v16422_v28, %v16405_v54  ;;  %v12324_v54 = vcombine.low %v2460_v47, %v2470_v43  ;;  %v16502_v28 = vld [vmem:[%s15806_s25 + $0x5c] sm:$0x1]  ;;  %v2537_v46 = vrot.slane %v2536_v60, 4  ;;  %v16558_v60 = vld [vmem:[%s15806_s25 + $0x74] sm:$0x1] }
 0x11f   : > { %13899 = vmatpush3.bf16.msra.mxu0 %v15279_v38  ;;  %v2501_v38 = vrot.slane %v2499_v18, 5  ;;  %v2546_v18 = vrot.slane %v2544_v9, 4  ;;  %v2494_v61 = vsel %vm15847_vm2, %v16430_v6, %v16424_v44  ;;  %v16507_v44 = vld [vmem:[%s15806_s25 + $0x64] sm:$0xf]  ;;  %v2565_v9 = vrot.slane %v2563_v17, 5 }
 0x120   : > { %13900 = vmatprep.subr.bf16.mxu0 %v15282_v48  ;;  %v2601_v59 = vshll.u32 %v16507_v44, 16  ;;  %v2605_v0 = vshrl.u32 %v16507_v44, 16 }
 0x121   : > { %v2502_v10 = vor.u32 %v2501_v38, %v2498_v33  ;;  %v2573_v33 = vrot.slane %v2571_v27, 5  ;;  %v2550_v26 = vor.u32 %v2549_v53, %v2546_v18  ;;  %v16525_v53 = vld [vmem:[%s15806_s25 + $0x68] sm:$0x1] }
 0x122   : > { %13865 = vmatmul.mubr.bf16.gmra.mrb[12].mxu0 %v15272_v14  ;;  %v2511_v14 = vrot.slane %v2509_v22, 4  ;;  %v15287_v22 = vld [vmem:[%s15806_s25 + $0xd8] sm:$0xff]   ;;  %v2611_v47 = vshll.u32 %v16525_v53, 16 }
 0x123   : > { %13868 = vmatprep.mubr.bf16.mxu0 %v15274_v2  ;;  %13901 = vmatpush3.bf16.msra.mxu0 %v15282_v48  ;;  %v2515_v48 = vshll.u32 %v16414_v37, 16  ;;  %v2523_v2 = vshll.u32 %v12265_v4, 16  ;;  %v16440_v3 = vrot.slane %v2502_v10, 4  ;;  %v12325_v10 = vcombine.low %v2484_v62, %v2494_v61 }
 0x124   : > { %13902 = vmatprep.subr.bf16.mxu0 %v15286_v13  ;;  %v2574_v49 = vor.u32 %v2573_v33, %v2570_v25  ;;  %v2542_v25 = vsel %vm15847_vm2, %v2537_v46, %v16498_v40  ;;  %v2635_v46 = vshll.u32 %v16558_v60, 16 }
 0x125   : > { %v16442_v30 = vrot.slane %v2515_v48, 5  ;;  %v2525_v41 = vrot.slane %v2523_v2, 5  ;;  %v2512_v48 = vor.u32 %v2511_v14, %v16426_v45  ;;  %v2508_v32 = vsel %vm15847_vm2, %v16440_v3, %v16426_v45 }
 0x126   : > { %v2616_v45 = vshrl.u32 %v12277_v20, 16  ;;  %v2619_v3 = vshll.u32 %v12277_v20, 16  ;;  %v16539_v33 = vrot.slane %v2574_v49, 4  ;;  %v16574_v49 = vld [vmem:[%s15806_s25 + $0x88] sm:$0xf] }
 0x127   : > { %13903 = vmatpush3.bf16.msra.mxu0 %v15286_v13  ;;  %v16438_v13 = vld [vmem:[%s15806_s25 + $0x4c] sm:$0xf]  ;;  %v2526_v14 = vor.u32 %v2525_v41, %v2522_v31  ;;  %v16496_v55 = vrot.slane %v2512_v48, 4  ;;  %v16546_v48 = vrot.slane %v2601_v59, 5  ;;  %v12286_v59 = vld [vmem:[%s15806_s25 + $0x90] sm:$0xf] }
 0x128   : > { %13940 = vmatprep.subr.bf16.mxu0 %v16385_v50  ;;  %v2553_v56 = vshll.u32 %v16438_v13, 16  ;;  %v2618_v43 = vrot.slane %v2616_v45, 4  ;;  %v2621_v62 = vrot.slane %v2619_v3, 5 }
 0x129   : > { %v2527_v41 = vrot.slane %v2526_v14, 4 }
 0x12a   : > { %13869 = vmatmul.mubr.bf16.gmra.mrb[16].mxu0 %v15275_v52  ;;  %v15284_v52 = vld [vmem:[%s15806_s25 + $0xc0] sm:$0xff]   ;;  %v16463_v63 = vrot.slane %v2553_v56, 5  ;;  %v2551_v56 = vrot.slane %v2550_v26, 4 }
 0x12b   : > { %13872 = vmatprep.mubr.bf16.mxu0 %v15277_v58  ;;  %v2557_v58 = vshrl.u32 %v16438_v13, 16 }
 0x132   : > { %13873 = vmatmul.mubr.bf16.gmra.mrb[20].mxu0 %v15278_v19  ;;  %v16461_v19 = vld [vmem:[%s15806_s25 + $0x58] sm:$0xf] }
 0x133   : > { %13876 = vmatprep.mubr.bf16.mxu0 %v15280_v12  ;;  %v2559_v12 = vrot.slane %v2557_v58, 4  ;;  %v2577_v38 = vshll.u32 %v16461_v19, 16  ;;  %v2581_v4 = vshrl.u32 %v16461_v19, 16 }
 0x135   : > { %v2560_v23 = vor.u32 %v2559_v12, %v16463_v63  ;;  %v16504_v2 = vrot.slane %v2577_v38, 5  ;;  %v2583_v31 = vrot.slane %v2581_v4, 4  ;;  %v2556_v38 = vsel %vm15847_vm2, %v2551_v56, %v16463_v63  ;;  %v15290_v63 = vld [vmem:[%s19705_s1 + $0x150] sm:$0xff]  }
 0x137   : > { %v2561_v58 = vrot.slane %v2560_v23, 4  ;;  %v2584_v18 = vor.u32 %v2583_v31, %v16504_v2 }
 0x139   : > { %v2566_v4 = vsel %vm15847_vm2, %v2561_v58, %v2565_v9  ;;  %v2585_v61 = vrot.slane %v2584_v18, 4  ;;  %v12283_v9 = vld [vmem:[%s15806_s25 + $0x84] sm:$0xf]  ;;  %v16580_v58 = vrot.slane %v2611_v47, 5  ;;  %v16593_v18 = vld [vmem:[%s15806_s25 + $0x80] sm:$0x1] }
 0x13a   : > { %13877 = vmatmul.mubr.bf16.gmra.mrb[24].mxu0 %v15281_v15  ;;  %v12274_v15 = vld [vmem:[%s15806_s25 + $0x60] sm:$0xf]  ;;  %v16564_v31 = vcombine.low %v2556_v38, %v2566_v4  ;;  %v2688_v38 = vshrl.u32 %v12286_v59, 16 }
 0x13b   : > { %13880 = vmatprep.mubr.bf16.mxu0 %v15283_v16  ;;  %v12323_v16 = vcombine.low %v2436_v21, %v2446_v24  ;;  %v2592_v6 = vshrl.u32 %v12274_v15, 16  ;;  %v2595_v35 = vshll.u32 %v12274_v15, 16  ;;  %v2518_v21 = vsel %vm15847_vm2, %v16496_v55, %v16442_v30  ;;  %v12280_v15 = vld [vmem:[%s15806_s25 + $0x78] sm:$0xf] }
 0x13c   : > { %v2532_v24 = vsel %vm15847_vm2, %v2527_v41, %v16457_v51  ;;  %v16550_v51 = vld [vmem:[%s15806_s25 + $0x7c] sm:$0xf]  ;;  %v2640_v40 = vshrl.u32 %v12280_v15, 16  ;;  %v2643_v26 = vshll.u32 %v12280_v15, 16  ;;  %v2622_v41 = vor.u32 %v2621_v62, %v2618_v43 }
 0x13d   : > { %v2594_v27 = vrot.slane %v2592_v6, 4  ;;  %v2597_v12 = vrot.slane %v2595_v35, 5  ;;  %v2649_v23 = vshll.u32 %v16550_v51, 16  ;;  %v12326_v6 = vcombine.low %v2508_v32, %v2518_v21 }
 0x13e   : > { %v2580_v35 = vsel %vm15847_vm2, %v16539_v33, %v16504_v2  ;;  %v15291_v2 = vld [vmem:[%s19705_s1 + $0x158] sm:$0xff]   ;;  %v2677_v21 = vshrl.u32 %v16574_v49, 16  ;;  %v2637_v33 = vrot.slane %v2635_v46, 5  ;;  %v2691_v15 = vshll.u32 %v12286_v59, 16 }
 0x13f   : > { %v2598_v14 = vor.u32 %v2597_v12, %v2594_v27  ;;  %v2642_v27 = vrot.slane %v2640_v40, 4  ;;  %v16587_v45 = vrot.slane %v2649_v23, 5  ;;  %v2664_v12 = vshrl.u32 %v12283_v9, 16  ;;  %v16638_v59 = vld [vmem:[%s15806_s25 + $0x98] sm:$0x1] }
 0x140   : > { %v2679_v23 = vrot.slane %v2677_v21, 4  ;;  %v2693_v46 = vrot.slane %v2691_v15, 5 }
 0x141   : > { %v16578_v56 = vrot.slane %v2598_v14, 4  ;;  %v16605_v14 = vld [vmem:[%s15806_s25 + $0x8c] sm:$0x1] }
 0x142   : > { %13881 = vmatmul.mubr.bf16.gmra.mrb[28].mxu0 %v15284_v52  ;;  %v16515_v52 = vld [vmem:[%s15806_s25 + $0x70] sm:$0xf] }
 0x143   : > { %13884 = vmatprep.mubr.bf16.mxu0 %v15285_v5  ;;  %v2587_v5 = vshll.u32 %v16502_v28, 16  ;;  %v2625_v17 = vshll.u32 %v16515_v52, 16 }
 0x145   : > { %v2589_v30 = vrot.slane %v2587_v5, 5  ;;  %v16560_v55 = vrot.slane %v2625_v17, 5  ;;  %v2667_v17 = vshll.u32 %v12283_v9, 16 }
 0x147   : > { %v2590_v32 = vsel %vm15847_vm2, %v2585_v61, %v2589_v30  ;;  %v15292_v30 = vld [vmem:[%s19705_s1 + $0x160] sm:$0xff]   ;;  %v2659_v61 = vshll.u32 %v16593_v18, 16  ;;  %v2669_v40 = vrot.slane %v2667_v17, 5 }
 0x148   : > { %v12329_v43 = vcombine.low %v2580_v35, %v2590_v32  ;;  %v2690_v35 = vrot.slane %v2688_v38, 4  ;;  %v15293_v32 = vld [vmem:[%s19705_s1 + $0x168] sm:$0xff]   ;;  %v15294_v38 = vld [vmem:[%s19705_s1 + $0x170] sm:$0xff]  }
 0x14a   : > { %13885 = vmatmul.mubr.bf16.gmra.mrb[32].mxu0 %v15287_v22  ;;  %v2629_v22 = vshrl.u32 %v16515_v52, 16 }
 0x14b   : > { %13904 = vmatprep.mubr.bf16.mxu0 %v12323_v16  ;;  %v2607_v16 = vrot.slane %v2605_v0, 4  ;;  %v2645_v0 = vrot.slane %v2643_v26, 5 }
 0x14d   : > { %v2608_v20 = vor.u32 %v2607_v16, %v16546_v48  ;;  %v2646_v62 = vor.u32 %v2645_v0, %v2642_v27 }
 0x152   : > { %13905 = vmatmul.mubr.bf16.vlgmr.msra.gmra.mrb[0].mxu0 %v12324_v54  ;;  %v2653_v54 = vshrl.u32 %v16550_v51, 16 }
 0x153   : > { %13941 = vmatpush3.bf16.msra.mxu0 %v16385_v50  ;;  %13908 = vmatprep.mubr.bf16.mxu0 %v12325_v10  ;;  %v2631_v50 = vrot.slane %v2629_v22, 4  ;;  %v12327_v10 = vcombine.low %v2532_v24, %v2542_v25  ;;  %v2673_v22 = vshll.u32 %v16574_v49, 16  ;;  %v2609_v24 = vrot.slane %v2608_v20, 4  ;;  %v12289_v20 = vld [vmem:[%s15806_s25 + $0x9c] sm:$0xf] }
 0x154   : > { %13942 = vmatprep.subr.bf16.mxu0 %v15289_v11  ;;  %v2655_v3 = vrot.slane %v2653_v54, 4  ;;  %v2623_v25 = vrot.slane %v2622_v41, 4  ;;  %v2604_v54 = vsel %vm15847_vm2, %v16578_v56, %v16546_v48  ;;  %v16628_v56 = vld [vmem:[%s15806_s25 + $0xa0] sm:$0xf] }
 0x155   : > { %v2632_v5 = vor.u32 %v2631_v50, %v16560_v55  ;;  %v2666_v50 = vrot.slane %v2664_v12, 4  ;;  %v16607_v26 = vrot.slane %v2673_v22, 5  ;;  %v2715_v12 = vshll.u32 %v12289_v20, 16 }
 0x156   : > { %v2721_v17 = vshll.u32 %v16628_v56, 16  ;;  %v2725_v22 = vshrl.u32 %v16628_v56, 16 }
 0x157   : > { %13943 = vmatpush3.bf16.msra.mxu0 %v15289_v11  ;;  %v16590_v11 = vld [vmem:[%s15806_s25 + $0x94] sm:$0xf]  ;;  %v2633_v4 = vrot.slane %v2632_v5, 4  ;;  %v2683_v5 = vshll.u32 %v16605_v14, 16  ;;  %v2670_v27 = vor.u32 %v2669_v40, %v2666_v50  ;;  %v2680_v0 = vor.u32 %v2679_v23, %v16607_v26 }
 0x158   : > { %13944 = vmatprep.subr.bf16.mxu0 %v15290_v63  ;;  %v2697_v16 = vshll.u32 %v16590_v11, 16  ;;  %v2701_v47 = vshrl.u32 %v16590_v11, 16  ;;  %v2717_v50 = vrot.slane %v2715_v12, 5  ;;  %v12295_v40 = vld [vmem:[%s15806_s25 + $0xb4] sm:$0xf]  ;;  %v16665_v23 = vrot.slane %v2721_v17, 5 }
 0x159   : > { %v2638_v41 = vsel %vm15847_vm2, %v2633_v4, %v2637_v33  ;;  %v12292_v33 = vld [vmem:[%s15806_s25 + $0xa8] sm:$0xf] }
 0x15a   : > { %13909 = vmatmul.mubr.bf16.gmra.mrb[4].mxu0 %v12326_v6  ;;  %v2614_v6 = vsel %vm15847_vm2, %v2609_v24, %v16580_v58  ;;  %v16622_v9 = vrot.slane %v2697_v16, 5  ;;  %v2703_v48 = vrot.slane %v2701_v47, 4  ;;  %v16630_v58 = vrot.slane %v2646_v62, 4  ;;  %v16659_v47 = vld [vmem:[%s15806_s25 + $0xa4] sm:$0x1] }
 0x15b   : > { %13912 = vmatprep.mubr.bf16.mxu0 %v12327_v10  ;;  %13945 = vmatpush3.bf16.msra.mxu0 %v15290_v63  ;;  %v2656_v63 = vor.u32 %v2655_v3, %v16587_v45  ;;  %v2628_v10 = vsel %vm15847_vm2, %v2623_v25, %v16560_v55  ;;  %v16634_v55 = vrot.slane %v2659_v61, 5  ;;  %v2712_v3 = vshrl.u32 %v12289_v20, 16 }
 0x15c   : > { %13946 = vmatprep.subr.bf16.mxu0 %v15291_v2  ;;  %v12330_v21 = vcombine.low %v2604_v54, %v2614_v6  ;;  %v2694_v24 = vor.u32 %v2693_v46, %v2690_v35  ;;  %v2704_v25 = vor.u32 %v2703_v48, %v16622_v9  ;;  %v12331_v4 = vcombine.low %v2628_v10, %v2638_v41  ;;  %v16668_v10 = vld [vmem:[%s15806_s25 + $0xb8] sm:$0xf] }
 0x15d   : > { %v2685_v16 = vrot.slane %v2683_v5, 5  ;;  %v2671_v62 = vrot.slane %v2670_v27, 4  ;;  %v2714_v61 = vrot.slane %v2712_v3, 4  ;;  %v2727_v54 = vrot.slane %v2725_v22, 4  ;;  %v15295_v48 = vld [vmem:[%s19705_s1 + $0x178] sm:$0xff]  }
 0x15e   : > { %v2739_v6 = vshll.u32 %v12292_v33, 16  ;;  %v2695_v35 = vrot.slane %v2694_v24, 4  ;;  %v2705_v20 = vrot.slane %v2704_v25, 4  ;;  %v2731_v46 = vshll.u32 %v16659_v47, 16 }
 0x15f   : > { %13947 = vmatpush3.bf16.msra.mxu0 %v15291_v2  ;;  %v16632_v2 = vrot.slane %v2656_v63, 4  ;;  %v2681_v63 = vrot.slane %v2680_v0, 4  ;;  %v2676_v5 = vsel %vm15847_vm2, %v2671_v62, %v16607_v26  ;;  %v2769_v0 = vshll.u32 %v16668_v10, 16 }
 0x160   : > { %13948 = vmatprep.subr.bf16.mxu0 %v15292_v30  ;;  %v2773_v3 = vshrl.u32 %v16668_v10, 16  ;;  %v2718_v12 = vor.u32 %v2717_v50, %v2714_v61  ;;  %v2728_v17 = vor.u32 %v2727_v54, %v16665_v23  ;;  %v2741_v24 = vrot.slane %v2739_v6, 5  ;;  %v16700_v61 = vld [vmem:[%s15806_s25 + $0xbc] sm:$0x1]  ;;  %v12298_v54 = vld [vmem:[%s15806_s25 + $0xc0] sm:$0xf] }
 0x161   : > { %v2662_v15 = vsel %vm15847_vm2, %v16632_v2, %v16634_v55  ;;  %v2760_v2 = vshrl.u32 %v12295_v40, 16  ;;  %v2763_v55 = vshll.u32 %v12295_v40, 16  ;;  %v2686_v27 = vsel %vm15847_vm2, %v2681_v63, %v2685_v16  ;;  %19789 = vst [vmem:[#allocation11_spill] sm:$0xff] %v16700_v61 }
 0x162   : > { %13913 = vmatmul.mubr.bf16.gmra.mrb[8].mxu0 %v16564_v31  ;;  %v2707_v31 = vshll.u32 %v16638_v59, 16  ;;  %v2700_v26 = vsel %vm15847_vm2, %v2695_v35, %v16622_v9  ;;  %v2733_v25 = vrot.slane %v2731_v46, 5  ;;  %v12333_v9 = vcombine.low %v2676_v5, %v2686_v27 }
 0x163   : > { %13916 = vmatprep.mubr.bf16.mxu0 %v12329_v43  ;;  %13949 = vmatpush3.bf16.msra.mxu0 %v15292_v30  ;;  %v2652_v30 = vsel %vm15847_vm2, %v16630_v58, %v16587_v45  ;;  %v16662_v43 = vld [vmem:[%s15806_s25 + $0xac] sm:$0xf]  ;;  %v2736_v45 = vshrl.u32 %v12292_v33, 16  ;;  %v16695_v33 = vld [vmem:[%s19705_s1 + $0x180] sm:$0xff]   ;;  %v2762_v16 = vrot.slane %v2760_v2, 4  ;;  %v2765_v62 = vrot.slane %v2763_v55, 5 }
 0x164   : > { %13950 = vmatprep.subr.bf16.mxu0 %v15293_v32  ;;  %v2709_v41 = vrot.slane %v2707_v31, 5  ;;  %v2745_v58 = vshll.u32 %v16662_v43, 16  ;;  %v16690_v31 = vld [vmem:[%s15806_s25 + $0xb0] sm:$0x1]  ;;  %v12332_v63 = vcombine.low %v2652_v30, %v2662_v15  ;;  %v16702_v50 = vrot.slane %v2769_v0, 5 }
 0x165   : > { %v2738_v22 = vrot.slane %v2736_v45, 4  ;;  %19788 = vst [vmem:[#allocation10_spill] sm:$0xff] %v16690_v31  ;;  %v2775_v40 = vrot.slane %v2773_v3, 4  ;;  %v2719_v45 = vrot.slane %v2718_v12, 4  ;;  %v2729_v6 = vrot.slane %v2728_v17, 4 }
 0x166   : > { %v2766_v15 = vor.u32 %v2765_v62, %v2762_v16  ;;  %v12301_v2 = vld [vmem:[%s15806_s25 + $0xcc] sm:$0xf]  ;;  %v16714_v55 = vld [vmem:[%s15806_s25 + $0xd0] sm:$0xf]  ;;  %v2787_v27 = vshll.u32 %v12298_v54, 16 }
 0x167   : > { %13951 = vmatpush3.bf16.msra.mxu0 %v15293_v32  ;;  %v2749_v32 = vshrl.u32 %v16662_v43, 16  ;;  %v2742_v35 = vor.u32 %v2741_v24, %v2738_v22  ;;  %v2776_v5 = vor.u32 %v2775_v40, %v16702_v50  ;;  %v2724_v3 = vsel %vm15847_vm2, %v2719_v45, %v16665_v23  ;;  %v16727_v23 = vld [vmem:[%s15806_s25 + $0xc8] sm:$0x1] }
 0x168   : > { %13952 = vmatprep.subr.bf16.mxu0 %v15294_v38  ;;  %v2734_v12 = vsel %vm15847_vm2, %v2729_v6, %v2733_v25  ;;  %v2808_v24 = vshrl.u32 %v12301_v2, 16  ;;  %v2767_v62 = vrot.slane %v2766_v15, 4 }
 0x169   : > { %v2743_v17 = vrot.slane %v2742_v35, 4  ;;  %v2777_v40 = vrot.slane %v2776_v5, 4  ;;  %v12335_v6 = vcombine.low %v2724_v3, %v2734_v12  ;;  %v12304_v35 = vld [vmem:[%s15806_s25 + $0xd8] sm:$0xf] }
 0x16a   : > { %13917 = vmatmul.mubr.bf16.gmra.mrb[12].mxu0 %v12330_v21  ;;  %v2710_v21 = vsel %vm15847_vm2, %v2705_v20, %v2709_v41  ;;  %v2755_v20 = vshll.u32 %v16690_v31, 16  ;;  %v16707_v41 = vld [vmem:[%s15806_s25 + $0xc4] sm:$0xf]  ;;  %v16731_v31 = vld [vmem:[%s15806_s25 + $0xdc] sm:$0xf]  ;;  %v2772_v5 = vsel %vm15847_vm2, %v2767_v62, %v16702_v50  ;;  %v2832_v3 = vshrl.u32 %v12304_v35, 16 }
 0x16b   : > { %13920 = vmatprep.mubr.bf16.mxu0 %v12331_v4  ;;  %13953 = vmatpush3.bf16.msra.mxu0 %v15294_v38  ;;  %v16697_v4 = vrot.slane %v2745_v58, 5  ;;  %v2751_v38 = vrot.slane %v2749_v32, 4  ;;  %19790 = vst [vmem:[#allocation12_spill] sm:$0xff] %v16707_v41  ;;  %v12334_v46 = vcombine.low %v2700_v26, %v2710_v21  ;;  %v2779_v58 = vshll.u32 %v16700_v61, 16 }
 0x16c   : > { %13954 = vmatprep.subr.bf16.mxu0 %v15295_v48  ;;  %v2784_v32 = vshrl.u32 %v12298_v54, 16  ;;  %v2793_v0 = vshll.u32 %v16707_v41, 16  ;;  %v2757_v22 = vrot.slane %v2755_v20, 5  ;;  %v2811_v26 = vshll.u32 %v12301_v2, 16 }
 0x16d   : > { %v2752_v30 = vor.u32 %v2751_v38, %v16697_v4  ;;  %v2817_v21 = vshll.u32 %v16714_v55, 16  ;;  %v2821_v38 = vshrl.u32 %v16714_v55, 16  ;;  %v2789_v54 = vrot.slane %v2787_v27, 5 }
 0x16e   : > { %v2795_v25 = vrot.slane %v2793_v0, 5  ;;  %v2810_v20 = vrot.slane %v2808_v24, 4  ;;  %v2813_v2 = vrot.slane %v2811_v26, 5  ;;  %v2841_v12 = vshll.u32 %v16731_v31, 16 }
 0x16f   : > { %13955 = vmatpush3.bf16.msra.mxu0 %v15295_v48  ;;  %v2797_v48 = vshrl.u32 %v16707_v41, 16  ;;  %v2753_v16 = vrot.slane %v2752_v30, 4  ;;  %v2819_v41 = vrot.slane %v2817_v21, 5  ;;  %v2823_v61 = vrot.slane %v2821_v38, 4 }
 0x170   : > { %13992 = vmatprep.subr.bf16.mxu0 %v16695_v33  ;;  %v2748_v30 = vsel %vm15847_vm2, %v2743_v17, %v16697_v4  ;;  %v2835_v4 = vshll.u32 %v12304_v35, 16  ;;  %v2845_v17 = vshrl.u32 %v16731_v31, 16  ;;  %v2834_v62 = vrot.slane %v2832_v3, 4  ;;  %v16751_v35 = vld [vmem:[%s15806_s25 + $0xe0] sm:$0x1] }
 0x171   : > { %v2799_v45 = vrot.slane %v2797_v48, 4  ;;  %v2758_v15 = vsel %vm15847_vm2, %v2753_v16, %v2757_v22  ;;  %v2814_v22 = vor.u32 %v2813_v2, %v2810_v20  ;;  %v2824_v24 = vor.u32 %v2823_v61, %v2819_v41 }
 0x172   : > { %13921 = vmatmul.mubr.bf16.gmra.mrb[16].mxu0 %v12332_v63  ;;  %v2781_v63 = vrot.slane %v2779_v58, 5  ;;  %v2803_v58 = vshll.u32 %v16727_v23, 16  ;;  %v12336_v26 = vcombine.low %v2748_v30, %v2758_v15  ;;  %v2851_v15 = vshll.u32 %v16751_v35, 16 }
 0x173   : > { %13924 = vmatprep.mubr.bf16.mxu0 %v12333_v9  ;;  %v2786_v9 = vrot.slane %v2784_v32, 4  ;;  %v16740_v32 = vld [vmem:[%s15806_s25 + $0xd4] sm:$0x1]  ;;  %v2800_v48 = vor.u32 %v2799_v45, %v2795_v25  ;;  %v2825_v45 = vrot.slane %v2824_v24, 4 }
 0x174   : > { %v2782_v27 = vsel %vm15847_vm2, %v2777_v40, %v2781_v63  ;;  %v2805_v16 = vrot.slane %v2803_v58, 5  ;;  %v2837_v63 = vrot.slane %v2835_v4, 5  ;;  %v2847_v40 = vrot.slane %v2845_v17, 4 }
 0x175   : > { %v2790_v0 = vor.u32 %v2789_v54, %v2786_v9  ;;  %v12337_v21 = vcombine.low %v2772_v5, %v2782_v27  ;;  %v2801_v38 = vrot.slane %v2800_v48, 4  ;;  %v2843_v9 = vrot.slane %v2841_v12, 5  ;;  %v15458_v27 = vld [vmem:[%s15806_s25 + $0x10] sm:$0xf]  ;;  %v12349_v48 = vld [vmem:[%s15806_s25 + $0xc] sm:$0xe] }
 0x176   : > { %v2815_v54 = vrot.slane %v2814_v22, 4  ;;  %v2838_v2 = vor.u32 %v2837_v63, %v2834_v62  ;;  %v2853_v17 = vrot.slane %v2851_v15, 5  ;;  %v12367_v22 = vrot.slane %v12349_v48, 9  ;;  %v12350_v62 = vld [vmem:[%s15806_s25 + $0x18] sm:$0xe] }
 0x177   : > { %v2791_v50 = vrot.slane %v2790_v0, 4  ;;  %v2806_v20 = vsel %vm15847_vm2, %v2801_v38, %v2805_v16  ;;  %v2848_v30 = vor.u32 %v2847_v40, %v2843_v9  ;;  %v3279_v0 = vrot.slane %v15458_v27, 5  ;;  %v12351_v63 = vld [vmem:[%s15806_s25 + $0x24] sm:$0xe] }
 0x178   : > { %v2820_v58 = vsel %vm15847_vm2, %v2815_v54, %v2819_v41  ;;  %v2839_v4 = vrot.slane %v2838_v2, 4  ;;  %v3307_v48 = vrot.slane %v16434_v39, 5 }
 0x179   : > { %v2796_v61 = vsel %vm15847_vm2, %v2791_v50, %v2795_v25  ;;  %v2849_v12 = vrot.slane %v2848_v30, 4  ;;  %v3281_v24 = vrot.slane %v3279_v0, 4  ;;  %v3280_v38 = vsel %vm16013_vm5, %v12367_v22, %v3279_v0  ;;  %v12352_v0 = vld [vmem:[%s15806_s25 + $0x30] sm:$0xe] }
 0x17a   : > { %13925 = vmatmul.mubr.bf16.gmra.mrb[20].mxu0 %v12334_v46  ;;  %v2827_v46 = vshll.u32 %v16740_v32, 16  ;;  %v12338_v3 = vcombine.low %v2796_v61, %v2806_v20  ;;  %v2844_v41 = vsel %vm15847_vm2, %v2839_v4, %v2843_v9  ;;  %v12369_v20 = vrot.slane %v12351_v63, 9 }
 0x17b   : > { %13928 = vmatprep.mubr.bf16.mxu0 %v12335_v6  ;;  %v3296_v30 = vrot.slane %v16403_v1, 5  ;;  %v12353_v1 = vld [vmem:[%s15806_s25 + $0x3c] sm:$0xe]  ;;  %v12370_v4 = vrot.slane %v12352_v0, 9  ;;  %v3317_v63 = vrot.slane %v16455_v34, 5  ;;  %v3328_v34 = vrot.slane %v16507_v44, 5 }
 0x17c   : > { %v2829_v6 = vrot.slane %v2827_v46, 5  ;;  %v3282_v46 = vrot.slane %v16366_v7, 5  ;;  %v3293_v7 = vrot.slane %v16377_v36, 5  ;;  %v12371_v22 = vrot.slane %v12353_v1, 9 }
 0x17d   : > { %v3331_v44 = vrot.slane %v16525_v53, 5  ;;  %v3338_v1 = vrot.slane %v16558_v60, 5  ;;  %v3342_v53 = vrot.slane %v16550_v51, 5 }
 0x17e   : > { %v2830_v5 = vsel %vm15847_vm2, %v2825_v45, %v2829_v6  ;;  %v3283_v16 = vsel %vm16013_vm5, %v3281_v24, %v3282_v46  ;;  %v12368_v45 = vrot.slane %v12350_v62, 9  ;;  %v15460_v6 = vld [vmem:[%s15806_s25 + $0x20] sm:$0x1]  ;;  %v3295_v2 = vrot.slane %v3293_v7, 4 }
 0x17f   : > { %v12339_v25 = vcombine.low %v2820_v58, %v2830_v5  ;;  %v12401_v54 = vcombine.low %v3280_v38, %v3283_v16  ;;  %v3289_v61 = vrot.slane %v15460_v6, 5  ;;  %v3300_v58 = vrot.slane %v16393_v57, 5  ;;  %v15297_v57 = vld [vmem:[%s19705_s1 + $0x188] sm:$0xff]   ;;  %v12355_v38 = vld [vmem:[%s15806_s25 + $0x54] sm:$0xe] }
 0x180   : > { %v3294_v5 = vsel %vm16013_vm5, %v12369_v20, %v3293_v7  ;;  %v3297_v27 = vsel %vm16013_vm5, %v3295_v2, %v3296_v30  ;;  %v3309_v24 = vrot.slane %v3307_v48, 4  ;;  %v3310_v46 = vrot.slane %v16452_v8, 5  ;;  %v12354_v8 = vld [vmem:[%s15806_s25 + $0x48] sm:$0xe]  ;;  %v12356_v20 = vld [vmem:[%s15806_s25 + $0x60] sm:$0xe] }
 0x181   : > { %v3301_v39 = vsel %vm16013_vm5, %v12370_v4, %v3300_v58  ;;  %v12372_v7 = vrot.slane %v12354_v8, 9  ;;  %v3335_v2 = vrot.slane %v16515_v52, 5  ;;  %v15300_v30 = vld [vmem:[%s19705_s1 + $0x1a0] sm:$0xff]   ;;  %v15301_v52 = vld [vmem:[%s19705_s1 + $0x1a8] sm:$0xff]   ;;  %v3344_v51 = vrot.slane %v3342_v53, 4 }
 0x182   : > { %13929 = vmatmul.mubr.bf16.gmra.mrb[24].mxu0 %v12336_v26  ;;  %v2854_v26 = vsel %vm15847_vm2, %v2849_v12, %v2853_v17  ;;  %v3302_v12 = vrot.slane %v3300_v58, 4  ;;  %v3303_v17 = vrot.slane %v16414_v37, 5  ;;  %v3314_v37 = vrot.slane %v16438_v13, 5 }
 0x183   : > { %13932 = vmatprep.mubr.bf16.mxu0 %v12337_v21  ;;  %v15459_v21 = vld [vmem:[%s15806_s25 + $0x1c] sm:$0xf]  ;;  %v12340_v40 = vcombine.low %v2844_v41, %v2854_v26  ;;  %v3308_v26 = vsel %vm16013_vm5, %v12371_v22, %v3307_v48  ;;  %v3337_v48 = vrot.slane %v3335_v2, 4  ;;  %v12359_v22 = vld [vmem:[%s15806_s25 + $0x84] sm:$0xe] }
 0x184   : > { %v3286_v50 = vrot.slane %v15459_v21, 5  ;;  %v3304_v41 = vsel %vm16013_vm5, %v3302_v12, %v3303_v17  ;;  %v3311_v21 = vsel %vm16013_vm5, %v3309_v24, %v3310_v46  ;;  %v3316_v13 = vrot.slane %v3314_v37, 4  ;;  %v12358_v12 = vld [vmem:[%s15806_s25 + $0x78] sm:$0xe] }
 0x185   : > { %v12404_v16 = vcombine.low %v3301_v39, %v3304_v41  ;;  %v12405_v62 = vcombine.low %v3308_v26, %v3311_v21  ;;  %v3339_v60 = vsel %vm16013_vm5, %v3337_v48, %v3338_v1  ;;  %v3349_v17 = vrot.slane %v16574_v49, 5  ;;  %v15303_v49 = vld [vmem:[%s19705_s1 + $0x1b8] sm:$0xff]   ;;  %v19793_v1 = vld [vmem:[#allocation12_spill] sm:$0xff] }
 0x186   : > { %v3288_v9 = vrot.slane %v3286_v50, 4  ;;  %v3287_v15 = vsel %vm16013_vm5, %v12368_v45, %v3286_v50  ;;  %v3321_v50 = vrot.slane %v16461_v19, 5  ;;  %v3324_v45 = vrot.slane %v16502_v28, 5 }
 0x187   : > { %v3315_v19 = vsel %vm16013_vm5, %v12372_v7, %v3314_v37  ;;  %v3318_v6 = vsel %vm16013_vm5, %v3316_v13, %v3317_v63  ;;  %v12376_v39 = vrot.slane %v12358_v12, 9  ;;  %v3345_v41 = vrot.slane %v16593_v18, 5  ;;  %v12361_v7 = vld [vmem:[%s15806_s25 + $0x9c] sm:$0xe] }
 0x188   : > { %v3290_v36 = vsel %vm16013_vm5, %v3288_v9, %v3289_v61  ;;  %v15299_v9 = vld [vmem:[%s19705_s1 + $0x198] sm:$0xff]   ;;  %v12377_v37 = vrot.slane %v12359_v22, 9  ;;  %v3351_v26 = vrot.slane %v3349_v17, 4  ;;  %v3352_v21 = vrot.slane %v16605_v14, 5 }
 0x189   : > { %v3343_v8 = vsel %vm16013_vm5, %v12376_v39, %v3342_v53  ;;  %v3356_v18 = vrot.slane %v16590_v11, 5  ;;  %v12364_v53 = vld [vmem:[%s15806_s25 + $0xc0] sm:$0xe] }
 0x18a   : > { %13933 = vmatmul.mubr.bf16.gmra.mrb[28].mxu0 %v12338_v3  ;;  %v12402_v3 = vcombine.low %v3287_v15, %v3290_v36  ;;  %v12357_v15 = vld [vmem:[%s15806_s25 + $0x6c] sm:$0xe]  ;;  %v12406_v36 = vcombine.low %v3315_v19, %v3318_v6  ;;  %v3353_v14 = vsel %vm16013_vm5, %v3351_v26, %v3352_v21  ;;  %v12366_v21 = vld [vmem:[%s15806_s25 + $0xd8] sm:$0xe] }
 0x18b   : > { %13936 = vmatprep.mubr.bf16.mxu0 %v12339_v25  ;;  %v12403_v25 = vcombine.low %v3294_v5, %v3297_v27  ;;  %v12374_v5 = vrot.slane %v12356_v20, 9  ;;  %v3330_v27 = vrot.slane %v3328_v34, 4  ;;  %v12375_v0 = vrot.slane %v12357_v15, 9  ;;  %v12363_v20 = vld [vmem:[%s15806_s25 + $0xb4] sm:$0xe] }
 0x18d   : > { %v3336_v4 = vsel %vm16013_vm5, %v12375_v0, %v3335_v2 }
 0x18e   : > { %v12409_v46 = vcombine.low %v3336_v4, %v3339_v60  ;;  %v3391_v4 = vrot.slane %v16714_v55, 5  ;;  %v12365_v60 = vld [vmem:[%s15806_s25 + $0xcc] sm:$0xe] }
 0x190   : > { %v3393_v39 = vrot.slane %v3391_v4, 4 }
 0x192   : > { %13937 = vmatmul.mubr.bf16.gmra.mrb[32].mxu0 %v12340_v40  ;;  %v12373_v40 = vrot.slane %v12355_v38, 9  ;;  %v12360_v38 = vld [vmem:[%s15806_s25 + $0x90] sm:$0xe] }
 0x193   : > { %13956 = vmatprep.mubr.bf16.mxu0 %v12401_v54  ;;  %v3323_v54 = vrot.slane %v3321_v50, 4  ;;  %v12378_v11 = vrot.slane %v12360_v38, 9  ;;  %v15304_v38 = vld [vmem:[%s15806_s25 + $0x18] sm:$0xff]  }
 0x194   : > { %v3322_v61 = vsel %vm16013_vm5, %v12373_v40, %v3321_v50  ;;  %v3350_v50 = vsel %vm16013_vm5, %v12377_v37, %v3349_v17  ;;  %v3358_v40 = vrot.slane %v3356_v18, 4  ;;  %v3398_v37 = vrot.slane %v16731_v31, 5 }
 0x195   : > { %v3325_v28 = vsel %vm16013_vm5, %v3323_v54, %v3324_v45  ;;  %v12411_v63 = vcombine.low %v3350_v50, %v3353_v14  ;;  %v3359_v54 = vrot.slane %v16638_v59, 5  ;;  %v12379_v45 = vrot.slane %v12361_v7, 9 }
 0x196   : > { %v12407_v58 = vcombine.low %v3322_v61, %v3325_v28  ;;  %v3357_v19 = vsel %vm16013_vm5, %v12378_v11, %v3356_v18  ;;  %v12362_v28 = vld [vmem:[%s15806_s25 + $0xa8] sm:$0xe]  ;;  %v3401_v18 = vrot.slane %v16751_v35, 5 }
 0x197   : > { %v3360_v6 = vsel %vm16013_vm5, %v3358_v40, %v3359_v54  ;;  %v12380_v15 = vrot.slane %v12362_v28, 9  ;;  %v15305_v35 = vld [vmem:[%s15806_s25 + $0x24] sm:$0xff]   ;;  %v15307_v54 = vld [vmem:[%s15806_s25 + $0x30] sm:$0xff]  }
 0x198   : > { %v12412_v2 = vcombine.low %v3357_v19, %v3360_v6  ;;  %v15464_v6 = vld [vmem:[%s15806_s25 + $0x90] sm:$0xf] }
 0x199   : > { %v16935_v28 = vld [vmem:[%s15806_s25 + $0x70] sm:$0xf] }
 0x19a   : > { %13957 = vmatmul.mubr.bf16.vlgmr.msra.gmra.mrb[0].mxu0 %v12402_v3  ;;  %v3329_v3 = vsel %vm16013_vm5, %v12374_v5, %v3328_v34  ;;  %v3370_v34 = vrot.slane %v16662_v43, 5 }
 0x19b   : > { %13993 = vmatpush3.bf16.msra.mxu0 %v16695_v33  ;;  %13960 = vmatprep.mubr.bf16.mxu0 %v12403_v25  ;;  %v15298_v33 = vld [vmem:[%s19705_s1 + $0x190] sm:$0xff]   ;;  %v3332_v25 = vsel %vm16013_vm5, %v3330_v27, %v3331_v44  ;;  %v12381_v27 = vrot.slane %v12363_v20, 9  ;;  %v19792_v44 = vld [vmem:[#allocation11_spill] sm:$0xff]  ;;  %v623_v20 = vshll.u32 %v15464_v6, 16 }
 0x19c   : > { %13994 = vmatprep.subr.bf16.mxu0 %v15297_v57  ;;  %v12408_v24 = vcombine.low %v3329_v3, %v3332_v25  ;;  %v3380_v0 = vrot.slane %v19792_v44, 5  ;;  %v3371_v48 = vsel %vm16013_vm5, %v12380_v15, %v3370_v34  ;;  %v16943_v15 = vld [vmem:[%s15806_s25 + $0x7c] sm:$0xf] }
 0x19f   : > { %13995 = vmatpush3.bf16.msra.mxu0 %v15297_v57  ;;  %v15302_v57 = vld [vmem:[%s19705_s1 + $0x1b0] sm:$0xff]  }
 0x1a0   : > { %13996 = vmatprep.subr.bf16.mxu0 %v15298_v33 }
 0x1a2   : > { %13961 = vmatmul.mubr.bf16.gmra.mrb[4].mxu0 %v12404_v16  ;;  %v3363_v16 = vrot.slane %v16628_v56, 5  ;;  %v3366_v56 = vrot.slane %v16659_v47, 5  ;;  %v3377_v47 = vrot.slane %v16668_v10, 5 }
 0x1a3   : > { %13964 = vmatprep.mubr.bf16.mxu0 %v12405_v62  ;;  %13997 = vmatpush3.bf16.msra.mxu0 %v15298_v33  ;;  %v3346_v33 = vsel %vm16013_vm5, %v3344_v51, %v3345_v41  ;;  %v16871_v62 = vld [vmem:[%s19705_s1 + $0x1c0] sm:$0xff]   ;;  %v3394_v51 = vrot.slane %v16740_v32, 5 }
 0x1a4   : > { %13998 = vmatprep.subr.bf16.mxu0 %v15299_v9  ;;  %v12410_v13 = vcombine.low %v3343_v8, %v3346_v33  ;;  %v3364_v59 = vsel %vm16013_vm5, %v12379_v45, %v3363_v16  ;;  %v3379_v43 = vrot.slane %v3377_v47, 4  ;;  %v3378_v3 = vsel %vm16013_vm5, %v12381_v27, %v3377_v47  ;;  %v15463_v45 = vld [vmem:[%s15806_s25 + $0x84] sm:$0xf] }
 0x1a5   : > { %v12384_v8 = vrot.slane %v12366_v21, 9  ;;  %v3400_v33 = vrot.slane %v3398_v37, 4  ;;  %v599_v19 = vshll.u32 %v15463_v45, 16  ;;  %v12516_v47 = vld [vmem:[%s15806_s25 + $0x44] sm:$0x1] }
 0x1a6   : > { %v3381_v25 = vsel %vm16013_vm5, %v3379_v43, %v3380_v0  ;;  %v15468_v43 = vld [vmem:[%s15806_s25 + $0x9c] sm:$0xf] }
 0x1a7   : > { %13999 = vmatpush3.bf16.msra.mxu0 %v15299_v9  ;;  %v3365_v9 = vrot.slane %v3363_v16, 4  ;;  %v12415_v17 = vcombine.low %v3378_v3, %v3381_v25  ;;  %v3399_v31 = vsel %vm16013_vm5, %v12384_v8, %v3398_v37  ;;  %v3402_v50 = vsel %vm16013_vm5, %v3400_v33, %v3401_v18  ;;  %v15461_v16 = vld [vmem:[%s15806_s25 + $0x6c] sm:$0xf]  ;;  %v16963_v3 = vld [vmem:[%s15806_s25 + $0x94] sm:$0xf]  ;;  %v15315_v8 = vld [vmem:[%s19705_s1 + $0x1d8] sm:$0xff]  }
 0x1a8   : > { %14000 = vmatprep.subr.bf16.mxu0 %v15300_v30  ;;  %v12418_v14 = vcombine.low %v3399_v31, %v3402_v50  ;;  %v548_v7 = vshrl.u32 %v15461_v16, 16  ;;  %v644_v44 = vshrl.u32 %v15468_v43, 16  ;;  %v647_v0 = vshll.u32 %v15468_v43, 16  ;;  %v12506_v37 = vld [vmem:[%s15806_s25 + $0x1c] sm:$0xf] }
 0x1a9   : > { %v3367_v61 = vsel %vm16013_vm5, %v3365_v9, %v3366_v56  ;;  %v596_v9 = vshrl.u32 %v15463_v45, 16  ;;  %v15309_v56 = vld [vmem:[%s19705_s1 + $0x1c8] sm:$0xff]   ;;  %v16994_v18 = vld [vmem:[%s15806_s25 + $0xb8] sm:$0xf]  ;;  %v15318_v45 = vld [vmem:[%s19705_s1 + $0x1e0] sm:$0xff]  }
 0x1aa   : > { %13965 = vmatmul.mubr.bf16.gmra.mrb[8].mxu0 %v12406_v36  ;;  %v3372_v36 = vrot.slane %v3370_v34, 4  ;;  %v620_v34 = vshrl.u32 %v15464_v6, 16  ;;  %v12511_v6 = vld [vmem:[%s15806_s25 + $0x30] sm:$0xf]  ;;  %v12518_v25 = vld [vmem:[%s15806_s25 + $0x4c] sm:$0xf] }
 0x1ab   : > { %13968 = vmatprep.mubr.bf16.mxu0 %v12407_v58  ;;  %14001 = vmatpush3.bf16.msra.mxu0 %v15300_v30  ;;  %v12413_v30 = vcombine.low %v3364_v59, %v3367_v61  ;;  %v19791_v58 = vld [vmem:[#allocation10_spill] sm:$0xff]  ;;  %v16930_v59 = vrot.slane %v548_v7, 4  ;;  %v16951_v27 = vrot.slane %v596_v9, 4  ;;  %v12509_v9 = vld [vmem:[%s15806_s25 + $0x28] sm:$0xf] }
 0x1ac   : > { %14002 = vmatprep.subr.bf16.mxu0 %v15301_v52  ;;  %v3373_v5 = vrot.slane %v19791_v58, 5  ;;  %v16947_v58 = vld [vmem:[%s15806_s25 + $0x88] sm:$0xf] }
 0x1ae   : > { %v3374_v10 = vsel %vm16013_vm5, %v3372_v36, %v3373_v5 }
 0x1af   : > { %14003 = vmatpush3.bf16.msra.mxu0 %v15301_v52  ;;  %v3384_v52 = vrot.slane %v19793_v1, 5  ;;  %v12414_v12 = vcombine.low %v3371_v48, %v3374_v10  ;;  %v15469_v48 = vld [vmem:[%s15806_s25 + $0xa8] sm:$0xf]  ;;  %v15312_v1 = vld [vmem:[%s19705_s1 + $0x1d0] sm:$0xff]  }
 0x1b0   : > { %14004 = vmatprep.subr.bf16.mxu0 %v15302_v57  ;;  %v668_v10 = vshrl.u32 %v15469_v48, 16 }
 0x1b1   : > { %v3386_v22 = vrot.slane %v3384_v52, 4 }
 0x1b2   : > { %13969 = vmatmul.mubr.bf16.gmra.mrb[12].mxu0 %v12408_v24  ;;  %v3387_v24 = vrot.slane %v16727_v23, 5  ;;  %v3395_v23 = vsel %vm16013_vm5, %v3393_v39, %v3394_v51  ;;  %v15473_v39 = vld [vmem:[%s15806_s25 + $0xc0] sm:$0xf]  ;;  %v16982_v21 = vrot.slane %v668_v10, 4 }
 0x1b3   : > { %13972 = vmatprep.mubr.bf16.mxu0 %v12409_v46  ;;  %14005 = vmatpush3.bf16.msra.mxu0 %v15302_v57  ;;  %v12382_v57 = vrot.slane %v12364_v53, 9  ;;  %v12383_v46 = vrot.slane %v12365_v60, 9  ;;  %v671_v53 = vshll.u32 %v15469_v48, 16  ;;  %v15471_v60 = vld [vmem:[%s15806_s25 + $0xb4] sm:$0xf]  ;;  %v716_v51 = vshrl.u32 %v15473_v39, 16 }
 0x1b4   : > { %14006 = vmatprep.subr.bf16.mxu0 %v15303_v49  ;;  %v3388_v55 = vsel %vm16013_vm5, %v3386_v22, %v3387_v24  ;;  %v12505_v22 = vld [vmem:[%s15806_s25 + $0x18] sm:$0xf]  ;;  %v16972_v24 = vld [vmem:[%s15806_s25 + $0xa0] sm:$0xf] }
 0x1b5   : > { %v3385_v41 = vsel %vm16013_vm5, %v12382_v57, %v3384_v52  ;;  %v3392_v26 = vsel %vm16013_vm5, %v12383_v46, %v3391_v4  ;;  %v16958_v52 = vrot.slane %v599_v19, 5  ;;  %v16966_v4 = vrot.slane %v623_v20, 5  ;;  %v15308_v57 = vld [vmem:[%s15806_s25 + $0x3c] sm:$0xff]   ;;  %v15311_v48 = vld [vmem:[%s15806_s25 + $0x54] sm:$0xff]  }
 0x1b6   : > { %v12416_v32 = vcombine.low %v3385_v41, %v3388_v55  ;;  %v719_v41 = vshll.u32 %v15473_v39, 16  ;;  %v15310_v55 = vld [vmem:[%s15806_s25 + $0x48] sm:$0xff]   ;;  %v16991_v33 = vrot.slane %v671_v53, 5  ;;  %v4234_v50 = vshrl.u32 %v12505_v22, 16 }
 0x1b7   : > { %14007 = vmatpush3.bf16.msra.mxu0 %v15303_v49  ;;  %v12417_v49 = vcombine.low %v3392_v26, %v3395_v23  ;;  %v16978_v26 = vrot.slane %v644_v44, 4  ;;  %v16980_v23 = vrot.slane %v647_v0, 5  ;;  %v12514_v44 = vld [vmem:[%s15806_s25 + $0x3c] sm:$0xf]  ;;  %v12515_v0 = vld [vmem:[%s15806_s25 + $0x40] sm:$0xf] }
 0x1b8   : > { %14044 = vmatprep.subr.bf16.mxu0 %v16871_v62  ;;  %v4236_v20 = vrot.slane %v4234_v50, 4  ;;  %v4267_v53 = vshll.u32 %v12509_v9, 16  ;;  %v4319_v50 = vshrl.u32 %v12515_v0, 16 }
 0x1ba   : > { %13973 = vmatmul.mubr.bf16.gmra.mrb[16].mxu0 %v12410_v13  ;;  %v551_v13 = vshll.u32 %v15461_v16, 16 }
 0x1bb   : > { %13976 = vmatprep.mubr.bf16.mxu0 %v12411_v63  ;;  %v15462_v63 = vld [vmem:[%s15806_s25 + $0x78] sm:$0xf] }
 0x1bc   : > { %v572_v11 = vshrl.u32 %v15462_v63, 16  ;;  %v575_v40 = vshll.u32 %v15462_v63, 16  ;;  %v16932_v61 = vrot.slane %v551_v13, 5  ;;  %v4243_v13 = vshll.u32 %v12506_v37, 16 }
 0x1bd   : > { %v17002_v63 = vrot.slane %v716_v51, 4  ;;  %v15321_v51 = vld [vmem:[%s19705_s1 + $0x1e8] sm:$0xff]  }
 0x1be   : > { %v17019_v10 = vrot.slane %v4243_v13, 5  ;;  %v12507_v13 = vld [vmem:[%s15806_s25 + $0x20] sm:$0x1] }
 0x1c2   : > { %13977 = vmatmul.mubr.bf16.gmra.mrb[20].mxu0 %v12412_v2  ;;  %v16938_v2 = vrot.slane %v572_v11, 4  ;;  %v17004_v11 = vrot.slane %v719_v41, 5  ;;  %v4306_v41 = vshrl.u32 %v12514_v44, 16 }
 0x1c3   : > { %13980 = vmatprep.mubr.bf16.mxu0 %v12413_v30  ;;  %v16940_v30 = vrot.slane %v575_v40, 5  ;;  %v17007_v40 = vld [vmem:[%s15806_s25 + $0xc4] sm:$0xf] }
 0x1c4   : > { %19794 = vst [vmem:[#allocation10_spill] sm:$0xff] %v17007_v40 }
 0x1ca   : > { %13981 = vmatmul.mubr.bf16.gmra.mrb[24].mxu0 %v12414_v12  ;;  %v692_v12 = vshrl.u32 %v15471_v60, 16 }
 0x1cb   : > { %13984 = vmatprep.mubr.bf16.mxu0 %v12415_v17  ;;  %v695_v17 = vshll.u32 %v15471_v60, 16  ;;  %v4271_v60 = vshrl.u32 %v12509_v9, 16 }
 0x1cc   : > { %v16998_v16 = vrot.slane %v692_v12, 4  ;;  %v15313_v12 = vld [vmem:[%s15806_s25 + $0x60] sm:$0xff]  }
 0x1cd   : > { %v17000_v7 = vrot.slane %v695_v17, 5  ;;  %v4282_v17 = vshrl.u32 %v12511_v6, 16  ;;  %v4273_v31 = vrot.slane %v4271_v60, 4  ;;  %v4253_v60 = vshll.u32 %v12507_v13, 16 }
 0x1ce   : > { %v4325_v13 = vshll.u32 %v12516_v47, 16 }
 0x1d2   : > { %13985 = vmatmul.mubr.bf16.gmra.mrb[28].mxu0 %v12416_v32  ;;  %v16985_v32 = vld [vmem:[%s15806_s25 + $0xac] sm:$0xf] }
 0x1d3   : > { %13988 = vmatprep.mubr.bf16.mxu0 %v12417_v49  ;;  %v12517_v49 = vld [vmem:[%s15806_s25 + $0x48] sm:$0xf] }
 0x1da   : > { %13989 = vmatmul.mubr.bf16.gmra.mrb[32].mxu0 %v12418_v14  ;;  %v4237_v14 = vshll.u32 %v12505_v22, 16 }
 0x1db   : > { %14008 = vmatprep.mubr.bf16.mxu0 %v15304_v38  ;;  %v12508_v38 = vld [vmem:[%s15806_s25 + $0x24] sm:$0xf] }
 0x1dc   : > { %v4261_v19 = vshll.u32 %v12508_v38, 16  ;;  %v4239_v43 = vrot.slane %v4237_v14, 5  ;;  %v17026_v14 = vld [vmem:[%s15806_s25 + $0xcc] sm:$0xf] }
 0x1de   : > { %v4263_v9 = vrot.slane %v4261_v19, 5 }
 0x1e2   : > { %14009 = vmatmul.mubr.bf16.vlgmr.msra.gmra.mrb[0].mxu0 %v15305_v35  ;;  %v4247_v35 = vshrl.u32 %v12506_v37, 16  ;;  %v4315_v37 = vshll.u32 %v12515_v0, 16  ;;  %v12510_v0 = vld [vmem:[%s15806_s25 + $0x2c] sm:$0x1] }
 0x1e3   : > { %14045 = vmatpush3.bf16.msra.mxu0 %v16871_v62  ;;  %14012 = vmatprep.mubr.bf16.mxu0 %v15307_v54  ;;  %v16960_v62 = vrot.slane %v620_v34, 4  ;;  %v12512_v34 = vld [vmem:[%s15806_s25 + $0x34] sm:$0xf]  ;;  %v17036_v54 = vrot.slane %v4267_v53, 5  ;;  %v4321_v53 = vrot.slane %v4319_v50, 4 }
 0x1e4   : > { %14046 = vmatprep.subr.bf16.mxu0 %v15309_v56  ;;  %v4291_v22 = vshll.u32 %v12512_v34, 16  ;;  %v4295_v39 = vshrl.u32 %v12512_v34, 16  ;;  %v4240_v34 = vor.u32 %v4239_v43, %v4236_v20  ;;  %v12513_v20 = vld [vmem:[%s15806_s25 + $0x38] sm:$0x1]  ;;  %v4308_v43 = vrot.slane %v4306_v41, 4 }
 0x1e5   : > { %v17043_v5 = vrot.slane %v4315_v37, 5 }
 0x1e6   : > { %v4297_v46 = vrot.slane %v4295_v39, 4  ;;  %v4343_v39 = vshrl.u32 %v12518_v25, 16  ;;  %v4241_v42 = vrot.slane %v4240_v34, 4 }
 0x1e7   : > { %14047 = vmatpush3.bf16.msra.mxu0 %v15309_v56  ;;  %v4258_v56 = vshrl.u32 %v12508_v38, 16  ;;  %v15316_v38 = vld [vmem:[%s15806_s25 + $0x78] sm:$0xff]  }
 0x1e8   : > { %14048 = vmatprep.subr.bf16.mxu0 %v15312_v1 }
 0x1ea   : > { %14013 = vmatmul.mubr.bf16.gmra.mrb[4].mxu0 %v15308_v57  ;;  %v4285_v57 = vshll.u32 %v12511_v6, 16  ;;  %v15324_v6 = vld [vmem:[%s19705_s1 + $0x1f0] sm:$0xff]  }
 0x1eb   : > { %14016 = vmatprep.mubr.bf16.mxu0 %v15310_v55  ;;  %14049 = vmatpush3.bf16.msra.mxu0 %v15312_v1  ;;  %v4249_v1 = vrot.slane %v4247_v35, 4  ;;  %v4309_v55 = vshll.u32 %v12514_v44, 16  ;;  %v4260_v35 = vrot.slane %v4258_v56, 4  ;;  %v4284_v56 = vrot.slane %v4282_v17, 4  ;;  %v15314_v17 = vld [vmem:[%s15806_s25 + $0x6c] sm:$0xff]  }
 0x1ec   : > { %14050 = vmatprep.subr.bf16.mxu0 %v15315_v8  ;;  %v4287_v19 = vrot.slane %v4285_v57, 5  ;;  %v4274_v57 = vor.u32 %v4273_v31, %v17036_v54  ;;  %v4322_v31 = vor.u32 %v4321_v53, %v17043_v5  ;;  %v17068_v53 = vld [vmem:[%s19705_s1 + $0x200] sm:$0xff]  }
 0x1ed   : > { %v4250_v44 = vor.u32 %v4249_v1, %v17019_v10  ;;  %v4311_v1 = vrot.slane %v4309_v55, 5  ;;  %v4264_v36 = vor.u32 %v4263_v9, %v4260_v35  ;;  %v4301_v55 = vshll.u32 %v12513_v20, 16  ;;  %v17058_v20 = vld [vmem:[%s15806_s25 + $0xd0] sm:$0xf] }
 0x1ee   : > { %v4288_v40 = vor.u32 %v4287_v19, %v4284_v56  ;;  %v4345_v56 = vrot.slane %v4343_v39, 4  ;;  %v12520_v19 = vld [vmem:[%s15806_s25 + $0x54] sm:$0xf] }
 0x1ef   : > { %14051 = vmatpush3.bf16.msra.mxu0 %v15315_v8  ;;  %v4339_v8 = vshll.u32 %v12518_v25, 16  ;;  %v4251_v37 = vrot.slane %v4250_v44, 4  ;;  %v4312_v50 = vor.u32 %v4311_v1, %v4308_v43  ;;  %v4255_v25 = vrot.slane %v4253_v60, 5  ;;  %v12519_v1 = vld [vmem:[%s15806_s25 + $0x50] sm:$0x1] }
 0x1f0   : > { %14052 = vmatprep.subr.bf16.mxu0 %v15318_v45  ;;  %v4265_v35 = vrot.slane %v4264_v36, 4  ;;  %v753_v44 = vshrl.u32 %v17058_v20, 16  ;;  %v4289_v47 = vrot.slane %v4288_v40, 4  ;;  %v4303_v43 = vrot.slane %v4301_v55, 5 }
 0x1f1   : > { %v4313_v60 = vrot.slane %v4312_v50, 4  ;;  %v4256_v40 = vsel %vm15847_vm2, %v4251_v37, %v4255_v25  ;;  %v19795_v55 = vshrl.u32 %v17026_v14, 16  ;;  %v19796_v50 = vshll.u32 %v17026_v14, 16 }
 0x1f2   : > { %14017 = vmatmul.mubr.bf16.gmra.mrb[8].mxu0 %v15311_v48  ;;  %v17039_v48 = vrot.slane %v4291_v22, 5  ;;  %v4277_v22 = vshll.u32 %v12510_v0, 16  ;;  %v17054_v0 = vrot.slane %v4339_v8, 5  ;;  %v4246_v8 = vsel %vm15847_vm2, %v4241_v42, %v17019_v10 }
 0x1f3   : > { %14020 = vmatprep.mubr.bf16.mxu0 %v15313_v12  ;;  %14053 = vmatpush3.bf16.msra.mxu0 %v15318_v45  ;;  %v4330_v12 = vshrl.u32 %v12517_v49, 16  ;;  %v4333_v45 = vshll.u32 %v12517_v49, 16  ;;  %v15328_v49 = vld [vmem:[%s19705_s1 + $0x1f8] sm:$0xff]   ;;  %v4270_v42 = vsel %vm15847_vm2, %v4265_v35, %v17036_v54  ;;  %v17082_v37 = vrot.slane %v19795_v55, 4 }
 0x1f4   : > { %14054 = vmatprep.subr.bf16.mxu0 %v15321_v51  ;;  %v4298_v41 = vor.u32 %v4297_v46, %v17039_v48  ;;  %v4275_v46 = vrot.slane %v4274_v57, 4  ;;  %v4279_v34 = vrot.slane %v4277_v22, 5  ;;  %v4357_v57 = vshll.u32 %v12520_v19, 16  ;;  %v15317_v22 = vld [vmem:[%s15806_s25 + $0x84] sm:$0xff]   ;;  %v15320_v55 = vld [vmem:[%s15806_s25 + $0x9c] sm:$0xff]  }
 0x1f5   : > { %v4335_v9 = vrot.slane %v4333_v45, 5  ;;  %v12521_v45 = vld [vmem:[%s15806_s25 + $0x58] sm:$0xf]  ;;  %v4346_v39 = vor.u32 %v4345_v56, %v17054_v0  ;;  %v4294_v54 = vsel %vm15847_vm2, %v4289_v47, %v17039_v48  ;;  %v17094_v35 = vcombine.low %v4246_v8, %v4256_v40 }
 0x1f6   : > { %v4299_v36 = vrot.slane %v4298_v41, 4  ;;  %v4280_v10 = vsel %vm15847_vm2, %v4275_v46, %v4279_v34  ;;  %v4349_v41 = vshll.u32 %v12519_v1, 16  ;;  %v17106_v34 = vld [vmem:[%s15806_s25 + $0x5c] sm:$0x1] }
 0x1f7   : > { %14055 = vmatpush3.bf16.msra.mxu0 %v15321_v51  ;;  %v4332_v51 = vrot.slane %v4330_v12, 4  ;;  %v4323_v12 = vrot.slane %v4322_v31, 4  ;;  %v17086_v31 = vrot.slane %v19796_v50, 5  ;;  %v17103_v46 = vcombine.low %v4270_v42, %v4280_v10  ;;  %v17121_v10 = vld [vmem:[%s15806_s25 + $0x64] sm:$0xf] }
 0x1f8   : > { %14056 = vmatprep.subr.bf16.mxu0 %v15324_v6  ;;  %v4304_v25 = vsel %vm15847_vm2, %v4299_v36, %v4303_v43  ;;  %v4347_v36 = vrot.slane %v4346_v39, 4  ;;  %v4367_v43 = vshrl.u32 %v12521_v45, 16 }
 0x1f9   : > { %v17108_v47 = vcombine.low %v4294_v54, %v4304_v25 }
 0x1fa   : > { %14021 = vmatmul.mubr.bf16.gmra.mrb[12].mxu0 %v15314_v17  ;;  %v4354_v17 = vshrl.u32 %v12520_v19, 16  ;;  %v4359_v19 = vrot.slane %v4357_v57, 5  ;;  %v15480_v57 = vld [vmem:[%s15806_s25 + $0x64] sm:$0xf] }
 0x1fb   : > { %14024 = vmatprep.mubr.bf16.mxu0 %v15316_v38  ;;  %14057 = vmatpush3.bf16.msra.mxu0 %v15324_v6  ;;  %v4327_v38 = vrot.slane %v4325_v13, 5  ;;  %v4336_v6 = vor.u32 %v4335_v9, %v4332_v51  ;;  %v15319_v13 = vld [vmem:[%s15806_s25 + $0x90] sm:$0xff]   ;;  %v4318_v51 = vsel %vm15847_vm2, %v4313_v60, %v17043_v5  ;;  %v4363_v9 = vshll.u32 %v12521_v45, 16 }
 0x1fc   : > { %14058 = vmatprep.subr.bf16.mxu0 %v15328_v49  ;;  %v4356_v56 = vrot.slane %v4354_v17, 4  ;;  %v4351_v5 = vrot.slane %v4349_v41, 5  ;;  %v537_v41 = vshrl.u32 %v15480_v57, 16 }
 0x1fd   : > { %v4328_v14 = vsel %vm15847_vm2, %v4323_v12, %v4327_v38  ;;  %v4337_v48 = vrot.slane %v4336_v6, 4  ;;  %v15479_v12 = vld [vmem:[%s15806_s25 + $0x60] sm:$0xf]  ;;  %v17113_v40 = vrot.slane %v4363_v9, 5  ;;  %v4373_v6 = vshll.u32 %v17106_v34, 16 }
 0x1fe   : > { %v17110_v1 = vcombine.low %v4318_v51, %v4328_v14  ;;  %v524_v38 = vshrl.u32 %v15479_v12, 16  ;;  %v527_v17 = vshll.u32 %v15479_v12, 16  ;;  %v4360_v42 = vor.u32 %v4359_v19, %v4356_v56  ;;  %v15322_v51 = vld [vmem:[%s15806_s25 + $0xa8] sm:$0xff]  }
 0x1ff   : > { %14059 = vmatpush3.bf16.msra.mxu0 %v15328_v49  ;;  %v12523_v49 = vld [vmem:[%s15806_s25 + $0x60] sm:$0xf]  ;;  %v4342_v45 = vsel %vm15847_vm2, %v4337_v48, %v17054_v0  ;;  %v4352_v50 = vsel %vm15847_vm2, %v4347_v36, %v4351_v5  ;;  %v15481_v12 = vld [vmem:[%s15806_s25 + $0x68] sm:$0x1]  ;;  %v4387_v48 = vshll.u32 %v17121_v10, 16  ;;  %v554_v19 = vor.u32 %v16932_v61, %v16930_v59 }
 0x200   : > { %14096 = vmatprep.subr.bf16.mxu0 %v17068_v53  ;;  %v4378_v8 = vshrl.u32 %v12523_v49, 16  ;;  %v4381_v60 = vshll.u32 %v12523_v49, 16  ;;  %v526_v39 = vrot.slane %v524_v38, 4  ;;  %v529_v54 = vrot.slane %v527_v17, 5 }
 0x201   : > { %v539_v49 = vrot.slane %v537_v41, 4  ;;  %v543_v0 = vshll.u32 %v15481_v12, 16  ;;  %v557_v38 = vshll.u32 %v16935_v28, 16  ;;  %v4361_v59 = vrot.slane %v4360_v42, 4 }
 0x202   : > { %14025 = vmatmul.mubr.bf16.gmra.mrb[16].mxu0 %v15317_v22  ;;  %v533_v22 = vshll.u32 %v15480_v57, 16  ;;  %v4380_v14 = vrot.slane %v4378_v8, 4  ;;  %v4383_v9 = vrot.slane %v4381_v60, 5  ;;  %v530_v56 = vor.u32 %v529_v54, %v526_v39  ;;  %v15482_v8 = vld [vmem:[%s15806_s25 + $0x74] sm:$0x1] }
 0x203   : > { %14028 = vmatprep.mubr.bf16.mxu0 %v15319_v13  ;;  %v4369_v13 = vrot.slane %v4367_v43, 4  ;;  %v545_v5 = vrot.slane %v543_v0, 5  ;;  %v19797_v43 = vshrl.u32 %v16935_v28, 16  ;;  %v567_v57 = vshll.u32 %v15482_v8, 16  ;;  %v12526_v28 = vld [vmem:[%s15806_s25 + $0x6c] sm:$0xf] }
 0x204   : > { %v535_v25 = vrot.slane %v533_v22, 5  ;;  %v17135_v60 = vrot.slane %v4373_v6, 5  ;;  %v17138_v22 = vld [vmem:[%s15806_s25 + $0x68] sm:$0x1]  ;;  %v531_v41 = vrot.slane %v530_v56, 4  ;;  %v555_v39 = vrot.slane %v554_v19, 4 }
 0x205   : > { %v563_v17 = vrot.slane %v19797_v43, 4  ;;  %v559_v54 = vrot.slane %v557_v38, 5  ;;  %v4370_v61 = vor.u32 %v4369_v13, %v17113_v40  ;;  %v17143_v0 = vcombine.low %v4342_v45, %v4352_v50  ;;  %v17162_v8 = vld [vmem:[%s15806_s25 + $0x70] sm:$0xf] }
 0x206   : > { %v540_v36 = vor.u32 %v539_v49, %v535_v25  ;;  %v4391_v49 = vshrl.u32 %v17121_v10, 16  ;;  %v536_v6 = vsel %vm15847_vm2, %v531_v41, %v535_v25  ;;  %v569_v56 = vrot.slane %v567_v57, 5  ;;  %v15325_v25 = vld [vmem:[%s15806_s25 + $0xc0] sm:$0xff]  }
 0x207   : > { %v4384_v19 = vor.u32 %v4383_v9, %v4380_v14  ;;  %v17147_v43 = vrot.slane %v4387_v48, 5  ;;  %v4397_v42 = vshll.u32 %v17138_v22, 16  ;;  %v4402_v38 = vshrl.u32 %v12526_v28, 16 }
 0x208   : > { %v541_v12 = vrot.slane %v540_v36, 4  ;;  %v560_v45 = vsel %vm15847_vm2, %v555_v39, %v559_v54  ;;  %v4366_v14 = vsel %vm15847_vm2, %v4361_v59, %v17113_v40  ;;  %v4371_v9 = vrot.slane %v4370_v61, 4 }
 0x209   : > { %v4393_v48 = vrot.slane %v4391_v49, 4  ;;  %v581_v57 = vshll.u32 %v16943_v15, 16  ;;  %v19798_v41 = vshrl.u32 %v16943_v15, 16  ;;  %v17170_v40 = vrot.slane %v4384_v19, 4 }
 0x20a   : > { %14029 = vmatmul.mubr.bf16.gmra.mrb[20].mxu0 %v15320_v55  ;;  %v564_v55 = vor.u32 %v563_v17, %v559_v54  ;;  %v546_v13 = vsel %vm15847_vm2, %v541_v12, %v545_v5  ;;  %v578_v17 = vor.u32 %v16940_v30, %v16938_v2  ;;  %v15483_v54 = vld [vmem:[%s15806_s25 + $0x80] sm:$0x1]  ;;  %v4405_v59 = vshll.u32 %v12526_v28, 16 }
 0x20b   : > { %14032 = vmatprep.mubr.bf16.mxu0 %v15322_v51  ;;  %v15323_v51 = vld [vmem:[%s15806_s25 + $0xb4] sm:$0xff]   ;;  %v12071_v36 = vcombine.low %v536_v6, %v546_v13  ;;  %v587_v39 = vrot.slane %v19798_v41, 4  ;;  %v591_v12 = vshll.u32 %v15483_v54, 16  ;;  %v602_v2 = vor.u32 %v16958_v52, %v16951_v27  ;;  %v15484_v13 = vld [vmem:[%s15806_s25 + $0x8c] sm:$0x1] }
 0x20c   : > { %v565_v50 = vrot.slane %v564_v55, 4  ;;  %v17174_v30 = vrot.slane %v4397_v42, 5  ;;  %v579_v49 = vrot.slane %v578_v17, 4  ;;  %v583_v6 = vrot.slane %v581_v57, 5  ;;  %v17188_v57 = vld [vmem:[%s15806_s25 + $0x74] sm:$0x1] }
 0x20d   : > { %13712 = vmatprep.mubr.bf16.mxu1 %v12071_v36  ;;  %v605_v55 = vshll.u32 %v16947_v58, 16  ;;  %v4411_v15 = vshll.u32 %v17162_v8, 16  ;;  %v19799_v28 = vshrl.u32 %v16947_v58, 16  ;;  %v615_v27 = vshll.u32 %v15484_v13, 16 }
 0x20e   : > { %v570_v5 = vsel %vm15847_vm2, %v565_v50, %v569_v56  ;;  %v603_v56 = vrot.slane %v602_v2, 4  ;;  %v4376_v52 = vsel %vm15847_vm2, %v4371_v9, %v17135_v60  ;;  %v588_v42 = vor.u32 %v587_v39, %v583_v6  ;;  %v15327_v60 = vld [vmem:[%s15806_s25 + $0xd8] sm:$0xff]  }
 0x20f   : > { %v12072_v61 = vcombine.low %v560_v45, %v570_v5  ;;  %v611_v19 = vrot.slane %v19799_v28, 4  ;;  %v607_v36 = vrot.slane %v605_v55, 5  ;;  %v4394_v45 = vor.u32 %v4393_v48, %v17147_v43  ;;  %v15326_v5 = vld [vmem:[%s15806_s25 + $0xcc] sm:$0xff]  }
 0x210   : > { %v4404_v50 = vrot.slane %v4402_v38, 4  ;;  %v4415_v17 = vshrl.u32 %v17162_v8, 16  ;;  %v584_v58 = vsel %vm15847_vm2, %v579_v49, %v583_v6  ;;  %v589_v41 = vrot.slane %v588_v42, 4 }
 0x211   : > { %13713 = vmatmul.mubr.bf16.vlgmr.msra.gmra.mrb[0].mxu1 %v12072_v61  ;;  %v612_v54 = vor.u32 %v611_v19, %v607_v36  ;;  %v617_v61 = vrot.slane %v615_v27, 5  ;;  %v17193_v9 = vcombine.low %v4366_v14, %v4376_v52  ;;  %v4390_v38 = vsel %vm15847_vm2, %v17170_v40, %v17147_v43  ;;  %v12529_v43 = vld [vmem:[%s15806_s25 + $0x78] sm:$0xf] }
 0x212   : > { %14033 = vmatmul.mubr.bf16.gmra.mrb[24].mxu0 %v15323_v51  ;;  %v593_v51 = vrot.slane %v591_v12, 5  ;;  %v17199_v48 = vrot.slane %v4411_v15, 5  ;;  %v608_v39 = vsel %vm15847_vm2, %v603_v56, %v607_v36  ;;  %v626_v2 = vor.u32 %v16966_v4, %v16960_v62  ;;  %v17215_v62 = vld [vmem:[%s15806_s25 + $0x7c] sm:$0xf]  ;;  %v15485_v52 = vld [vmem:[%s15806_s25 + $0x98] sm:$0x1] }
 0x213   : > { %14036 = vmatprep.mubr.bf16.mxu0 %v15325_v25  ;;  %v4407_v25 = vrot.slane %v4405_v59, 5  ;;  %v613_v59 = vrot.slane %v612_v54, 4  ;;  %v629_v14 = vshll.u32 %v16963_v3, 16  ;;  %v4395_v49 = vrot.slane %v4394_v45, 4 }
 0x214   : > { %v594_v12 = vsel %vm15847_vm2, %v589_v41, %v593_v51  ;;  %v4421_v6 = vshll.u32 %v17188_v57, 16  ;;  %v19800_v55 = vshrl.u32 %v16963_v3, 16  ;;  %v4417_v28 = vrot.slane %v4415_v17, 4 }
 0x215   : > { %v12073_v40 = vcombine.low %v584_v58, %v594_v12  ;;  %v4408_v56 = vor.u32 %v4407_v25, %v4404_v50  ;;  %v618_v19 = vsel %vm15847_vm2, %v613_v59, %v617_v61  ;;  %v627_v13 = vrot.slane %v626_v2, 4  ;;  %v15486_v25 = vld [vmem:[%s15806_s25 + $0xa4] sm:$0x1] }
 0x216   : > { %v635_v15 = vrot.slane %v19800_v55, 4  ;;  %v12074_v4 = vcombine.low %v608_v39, %v618_v19  ;;  %v631_v27 = vrot.slane %v629_v14, 5  ;;  %v639_v42 = vshll.u32 %v15485_v52, 16  ;;  %v15329_v61 = vld [vmem:[%s15806_s25 + $0xe4] sm:$0xff]  }
 0x217   : > { %13716 = vmatprep.mubr.bf16.mxu1 %v12073_v40  ;;  %v650_v3 = vor.u32 %v16980_v23, %v16978_v26  ;;  %v4426_v51 = vshrl.u32 %v12529_v43, 16  ;;  %v653_v36 = vshll.u32 %v16972_v24, 16  ;;  %v19801_v45 = vshrl.u32 %v16972_v24, 16 }
 0x218   : > { %v663_v17 = vshll.u32 %v15486_v25, 16  ;;  %v4429_v58 = vshll.u32 %v12529_v43, 16  ;;  %v636_v41 = vor.u32 %v635_v15, %v631_v27  ;;  %v641_v54 = vrot.slane %v639_v42, 5  ;;  %v17259_v42 = vld [vmem:[%s15806_s25 + $0x80] sm:$0x1] }
 0x219   : > { %v659_v50 = vrot.slane %v19801_v45, 4  ;;  %13717 = vmatmul.mubr.bf16.gmra.mrb[4].mxu1 %v12074_v4  ;;  %v4435_v26 = vshll.u32 %v17215_v62, 16  ;;  %v651_v23 = vrot.slane %v650_v3, 4  ;;  %v655_v39 = vrot.slane %v653_v36, 5  ;;  %v15487_v36 = vld [vmem:[%s15806_s25 + $0xb0] sm:$0x1] }
 0x21a   : > { %14037 = vmatmul.mubr.bf16.gmra.mrb[28].mxu0 %v15326_v5  ;;  %v17224_v5 = vrot.slane %v4421_v6, 5  ;;  %v17231_v12 = vrot.slane %v4408_v56, 4  ;;  %v4439_v24 = vshrl.u32 %v17215_v62, 16  ;;  %v632_v59 = vsel %vm15847_vm2, %v627_v13, %v631_v27 }
 0x21b   : > { %14040 = vmatprep.mubr.bf16.mxu0 %v15327_v60  ;;  %v4400_v60 = vsel %vm15847_vm2, %v4395_v49, %v17174_v30  ;;  %v637_v2 = vrot.slane %v636_v41, 4  ;;  %v4418_v14 = vor.u32 %v4417_v28, %v17199_v48  ;;  %v4428_v6 = vrot.slane %v4426_v51, 4 }
 0x21c   : > { %v660_v43 = vor.u32 %v659_v50, %v655_v39  ;;  %v665_v40 = vrot.slane %v663_v17, 5  ;;  %v17237_v30 = vcombine.low %v4390_v38, %v4400_v60  ;;  %v4431_v49 = vrot.slane %v4429_v58, 5 }
 0x21d   : > { %v642_v55 = vsel %vm15847_vm2, %v637_v2, %v641_v54  ;;  %v674_v15 = vor.u32 %v16991_v33, %v16982_v21  ;;  %v656_v28 = vsel %vm15847_vm2, %v651_v23, %v655_v39  ;;  %v677_v13 = vshll.u32 %v16985_v32, 16  ;;  %v12532_v33 = vld [vmem:[%s15806_s25 + $0x84] sm:$0xf]  ;;  %v17272_v54 = vld [vmem:[%s15806_s25 + $0x88] sm:$0xf] }
 0x21e   : > { %v12075_v56 = vcombine.low %v632_v59, %v642_v55  ;;  %v661_v19 = vrot.slane %v660_v43, 4  ;;  %v4414_v38 = vsel %vm15847_vm2, %v17231_v12, %v17199_v48  ;;  %v17251_v4 = vrot.slane %v4435_v26, 5  ;;  %v15488_v26 = vld [vmem:[%s15806_s25 + $0xbc] sm:$0x1] }
 0x21f   : > { %v17253_v21 = vrot.slane %v4439_v24, 4  ;;  %v19802_v27 = vshrl.u32 %v16985_v32, 16  ;;  %v675_v3 = vrot.slane %v674_v15, 4  ;;  %v679_v51 = vrot.slane %v677_v13, 5 }
 0x220   : > { %13720 = vmatprep.mubr.bf16.mxu1 %v12075_v56  ;;  %v687_v45 = vshll.u32 %v15487_v36, 16  ;;  %v698_v25 = vor.u32 %v17000_v7, %v16998_v16  ;;  %v701_v17 = vshll.u32 %v16994_v18, 16  ;;  %v19803_v32 = vshrl.u32 %v16994_v18, 16  ;;  %v15331_v16 = vld [vmem:[%s19705_s1 + $0x208] sm:$0xff]  }
 0x221   : > { %v683_v52 = vrot.slane %v19802_v27, 4  ;;  %v17269_v41 = vrot.slane %v4418_v14, 4  ;;  %v711_v23 = vshll.u32 %v15488_v26, 16  ;;  %v4445_v39 = vshll.u32 %v17259_v42, 16  ;;  %v19804_v27 = vld [vmem:[#allocation10_spill] sm:$0xff] }
 0x222   : > { %14041 = vmatmul.mubr.bf16.gmra.mrb[32].mxu0 %v15329_v61  ;;  %v707_v58 = vrot.slane %v19803_v32, 4  ;;  %v689_v60 = vrot.slane %v687_v45, 5  ;;  %v4450_v24 = vshrl.u32 %v12532_v33, 16  ;;  %v699_v59 = vrot.slane %v698_v25, 4  ;;  %v15489_v25 = vld [vmem:[%s15806_s25 + $0xc8] sm:$0x1] }
 0x223   : > { %14060 = vmatprep.mubr.bf16.mxu0 %v17094_v35  ;;  %v666_v35 = vsel %vm15847_vm2, %v661_v19, %v665_v40  ;;  %v684_v61 = vor.u32 %v683_v52, %v679_v51  ;;  %v703_v2 = vrot.slane %v701_v17, 5  ;;  %v4432_v18 = vor.u32 %v4431_v49, %v4428_v6 }
 0x224   : > { %v12076_v50 = vcombine.low %v656_v28, %v666_v35  ;;  %v4442_v7 = vor.u32 %v17253_v21, %v17251_v4  ;;  %v680_v14 = vsel %vm15847_vm2, %v675_v3, %v679_v51  ;;  %v4453_v40 = vshll.u32 %v12532_v33, 16  ;;  %v12535_v3 = vld [vmem:[%s15806_s25 + $0x90] sm:$0xf] }
 0x225   : > { %v685_v43 = vrot.slane %v684_v61, 4  ;;  %v4459_v55 = vshll.u32 %v17272_v54, 16  ;;  %v708_v15 = vor.u32 %v707_v58, %v703_v2  ;;  %v713_v56 = vrot.slane %v711_v23, 5 }
 0x226   : > { %13721 = vmatmul.mubr.bf16.gmra.mrb[8].mxu1 %v12076_v50  ;;  %v4424_v6 = vsel %vm15847_vm2, %v17269_v41, %v17224_v5  ;;  %v4463_v49 = vshrl.u32 %v17272_v54, 16  ;;  %v722_v19 = vor.u32 %v17004_v11, %v17002_v63  ;;  %v704_v21 = vsel %vm15847_vm2, %v699_v59, %v703_v2  ;;  %v17307_v11 = vld [vmem:[%s15806_s25 + $0x8c] sm:$0x1]  ;;  %v15333_v2 = vld [vmem:[%s19705_s1 + $0x218] sm:$0xff]   ;;  %v17416_v41 = vld [vmem:[%s15806_s25 + $0xb0] sm:$0x1] }
 0x227   : > { %v690_v28 = vsel %vm15847_vm2, %v685_v43, %v689_v60  ;;  %v709_v33 = vrot.slane %v708_v15, 4  ;;  %v725_v52 = vshll.u32 %v19804_v27, 16  ;;  %v17302_v35 = vrot.slane %v4432_v18, 4  ;;  %v12538_v43 = vld [vmem:[%s15806_s25 + $0x9c] sm:$0xf] }
 0x228   : > { %v12077_v13 = vcombine.low %v680_v14, %v690_v28  ;;  %v17304_v63 = vrot.slane %v4445_v39, 5  ;;  %v19805_v45 = vshrl.u32 %v19804_v27, 16  ;;  %v735_v17 = vshll.u32 %v15489_v25, 16  ;;  %v17321_v39 = vld [vmem:[%s15806_s25 + $0x94] sm:$0xf] }
 0x229   : > { %v714_v51 = vsel %vm15847_vm2, %v709_v33, %v713_v56  ;;  %v727_v36 = vrot.slane %v725_v52, 5  ;;  %v4455_v32 = vrot.slane %v4453_v40, 5  ;;  %v17315_v58 = vrot.slane %v4459_v55, 5  ;;  %v17332_v40 = vld [vmem:[%s15806_s25 + $0xa0] sm:$0xf] }
 0x22a   : > { %14061 = vmatmul.mubr.bf16.vlgmr.msra.gmra.mrb[0].mxu0 %v17103_v46  ;;  %v15332_v46 = vld [vmem:[%s19705_s1 + $0x210] sm:$0xff]   ;;  %13724 = vmatprep.mubr.bf16.mxu1 %v12077_v13  ;;  %v731_v50 = vrot.slane %v19805_v45, 4  ;;  %v4465_v61 = vrot.slane %v4463_v49, 4  ;;  %v12078_v60 = vcombine.low %v704_v21, %v714_v51  ;;  %v17317_v26 = vrot.slane %v4442_v7, 4 }
 0x22b   : > { %14097 = vmatpush3.bf16.msra.mxu0 %v17068_v53  ;;  %14064 = vmatprep.mubr.bf16.mxu0 %v17108_v47  ;;  %v4452_v53 = vrot.slane %v4450_v24, 4  ;;  %v723_v47 = vrot.slane %v722_v19, 4  ;;  %v4469_v23 = vshll.u32 %v17307_v11, 16  ;;  %v737_v59 = vrot.slane %v735_v17, 5  ;;  %v15490_v49 = vld [vmem:[%s15806_s25 + $0xd4] sm:$0x1] }
 0x22c   : > { %14098 = vmatprep.subr.bf16.mxu0 %v15331_v16  ;;  %v732_v24 = vor.u32 %v731_v50, %v727_v36  ;;  %v4474_v18 = vshrl.u32 %v12535_v3, 16  ;;  %v4477_v14 = vshll.u32 %v12535_v3, 16  ;;  %v746_v7 = vor.u32 %v17086_v31, %v17082_v37  ;;  %v17357_v50 = vld [vmem:[%s15806_s25 + $0x98] sm:$0x1] }
 0x22d   : > { %v749_v15 = vshll.u32 %v17058_v20, 16  ;;  %v755_v56 = vrot.slane %v753_v44, 4  ;;  %v759_v28 = vshll.u32 %v15490_v49, 16  ;;  %v4456_v19 = vor.u32 %v4455_v32, %v4452_v53 }
 0x22e   : > { %13725 = vmatmul.mubr.bf16.gmra.mrb[12].mxu1 %v12078_v60  ;;  %v733_v55 = vrot.slane %v732_v24, 4  ;;  %v4466_v13 = vor.u32 %v4465_v61, %v17315_v58  ;;  %v4483_v21 = vshll.u32 %v17321_v39, 16  ;;  %v4487_v33 = vshrl.u32 %v17321_v39, 16  ;;  %v12541_v60 = vld [vmem:[%s15806_s25 + $0xa8] sm:$0xf] }
 0x22f   : > { %14099 = vmatpush3.bf16.msra.mxu0 %v15331_v16  ;;  %v728_v16 = vsel %vm15847_vm2, %v723_v47, %v727_v36  ;;  %v4498_v37 = vshrl.u32 %v12538_v43, 16  ;;  %v747_v44 = vrot.slane %v746_v7, 4  ;;  %v751_v31 = vrot.slane %v749_v15, 5 }
 0x230   : > { %14100 = vmatprep.subr.bf16.mxu0 %v15332_v46  ;;  %v738_v20 = vsel %vm15847_vm2, %v733_v55, %v737_v59  ;;  %v4501_v27 = vshll.u32 %v12538_v43, 16  ;;  %v4507_v52 = vshll.u32 %v17332_v40, 16  ;;  %v4511_v53 = vshrl.u32 %v17332_v40, 16  ;;  %v17382_v55 = vld [vmem:[%s15806_s25 + $0xa4] sm:$0x1] }
 0x231   : > { %v4479_v47 = vrot.slane %v4477_v14, 5  ;;  %v756_v3 = vor.u32 %v755_v56, %v751_v31  ;;  %v761_v51 = vrot.slane %v759_v28, 5  ;;  %v4438_v36 = vsel %vm15847_vm2, %v17302_v35, %v17251_v4  ;;  %v17376_v14 = vld [vmem:[%s15806_s25 + $0xac] sm:$0xf] }
 0x232   : > { %14065 = vmatmul.mubr.bf16.gmra.mrb[4].mxu0 %v17110_v1  ;;  %v15334_v1 = vld [vmem:[%s19705_s1 + $0x220] sm:$0xff]   ;;  %v17354_v45 = vrot.slane %v4469_v23, 5  ;;  %v17359_v25 = vrot.slane %v4483_v21, 5  ;;  %v4489_v17 = vrot.slane %v4487_v33, 4  ;;  %v17361_v32 = vrot.slane %v4456_v19, 4 }
 0x233   : > { %14068 = vmatprep.mubr.bf16.mxu0 %v17143_v0  ;;  %14101 = vmatpush3.bf16.msra.mxu0 %v15332_v46  ;;  %v12079_v0 = vcombine.low %v728_v16, %v738_v20  ;;  %v4476_v46 = vrot.slane %v4474_v18, 4  ;;  %v4500_v61 = vrot.slane %v4498_v37, 4  ;;  %v752_v24 = vsel %vm15847_vm2, %v747_v44, %v751_v31  ;;  %v12544_v33 = vld [vmem:[%s15806_s25 + $0xb4] sm:$0xf] }
 0x234   : > { %14102 = vmatprep.subr.bf16.mxu0 %v15333_v2  ;;  %v757_v59 = vrot.slane %v756_v3, 4  ;;  %v4448_v4 = vsel %vm15847_vm2, %v17317_v26, %v17304_v63  ;;  %v4503_v35 = vrot.slane %v4501_v27, 5  ;;  %v17370_v23 = vrot.slane %v4507_v52, 5  ;;  %v15336_v37 = vld [vmem:[%s19705_s1 + $0x230] sm:$0xff]   ;;  %v12547_v27 = vld [vmem:[%s15806_s25 + $0xc0] sm:$0xf] }
 0x235   : > { %13728 = vmatprep.mubr.bf16.mxu1 %v12079_v0  ;;  %v4513_v18 = vrot.slane %v4511_v53, 4  ;;  %v17378_v43 = vrot.slane %v4466_v13, 4  ;;  %v4480_v16 = vor.u32 %v4479_v47, %v4476_v46  ;;  %v4493_v7 = vshll.u32 %v17357_v50, 16  ;;  %v17425_v46 = vld [vmem:[%s15806_s25 + $0xc4] sm:$0xf] }
 0x236   : > { %v762_v63 = vsel %vm15847_vm2, %v757_v59, %v761_v51  ;;  %v4490_v26 = vor.u32 %v4489_v17, %v17359_v25  ;;  %v4522_v15 = vshrl.u32 %v12541_v60, 16  ;;  %v4525_v56 = vshll.u32 %v12541_v60, 16 }
 0x237   : > { %14103 = vmatpush3.bf16.msra.mxu0 %v15333_v2  ;;  %v15335_v2 = vld [vmem:[%s19705_s1 + $0x228] sm:$0xff]   ;;  %v12080_v49 = vcombine.low %v752_v24, %v762_v63  ;;  %v4531_v28 = vshll.u32 %v17376_v14, 16  ;;  %v4535_v19 = vshrl.u32 %v17376_v14, 16  ;;  %v4504_v13 = vor.u32 %v4503_v35, %v4500_v61 }
 0x238   : > { %14104 = vmatprep.subr.bf16.mxu0 %v15334_v1  ;;  %v4517_v21 = vshll.u32 %v17382_v55, 16  ;;  %v12583_v5 = vcombine.low %v4438_v36, %v4448_v4  ;;  %v4462_v48 = vsel %vm15847_vm2, %v17361_v32, %v17315_v58  ;;  %v4472_v12 = vsel %vm15847_vm2, %v17378_v43, %v17354_v45  ;;  %v15337_v45 = vld [vmem:[%s19705_s1 + $0x238] sm:$0xff]  }
 0x239   : > { %13729 = vmatmul.mubr.bf16.gmra.mrb[16].mxu1 %v12080_v49  ;;  %v4481_v20 = vrot.slane %v4480_v16, 4  ;;  %v4491_v44 = vrot.slane %v4490_v26, 4  ;;  %v4524_v31 = vrot.slane %v4522_v15, 4  ;;  %v17422_v52 = vrot.slane %v4531_v28, 5  ;;  %v17447_v26 = vld [vmem:[%s15806_s25 + $0xbc] sm:$0x1] }
 0x23a   : > { %14069 = vmatmul.mubr.bf16.gmra.mrb[8].mxu0 %v17193_v9  ;;  %v12582_v9 = vcombine.low %v4414_v38, %v4424_v6  ;;  %v4495_v38 = vrot.slane %v4493_v7, 5  ;;  %v17419_v6 = vld [vmem:[%s15806_s25 + $0xb8] sm:$0xf]  ;;  %v4537_v53 = vrot.slane %v4535_v19, 4  ;;  %v4546_v58 = vshrl.u32 %v12544_v33, 16 }
 0x23b   : > { %14072 = vmatprep.mubr.bf16.mxu0 %v17237_v30  ;;  %14105 = vmatpush3.bf16.msra.mxu0 %v15334_v1  ;;  %v4514_v30 = vor.u32 %v4513_v18, %v17370_v23  ;;  %v4527_v1 = vrot.slane %v4525_v56, 5  ;;  %v4549_v0 = vshll.u32 %v12544_v33, 16  ;;  %v4505_v47 = vrot.slane %v4504_v13, 4  ;;  %v17452_v13 = vld [vmem:[%s15806_s25 + $0xc8] sm:$0x1] }
 0x23c   : > { %14106 = vmatprep.subr.bf16.mxu0 %v15335_v2  ;;  %v4519_v51 = vrot.slane %v4517_v21, 5  ;;  %v4541_v36 = vshll.u32 %v17416_v41, 16  ;;  %v4555_v17 = vshll.u32 %v17419_v6, 16  ;;  %v4559_v32 = vshrl.u32 %v17419_v6, 16  ;;  %v12550_v21 = vld [vmem:[%s15806_s25 + $0xcc] sm:$0xf] }
 0x23d   : > { %v4515_v3 = vrot.slane %v4514_v30, 4  ;;  %v4570_v61 = vshrl.u32 %v12547_v27, 16  ;;  %v4573_v60 = vshll.u32 %v12547_v27, 16  ;;  %v4486_v24 = vsel %vm15847_vm2, %v4481_v20, %v17359_v25  ;;  %v17459_v20 = vld [vmem:[%s15806_s25 + $0xd0] sm:$0xf] }
 0x23e   : > { %v4496_v59 = vsel %vm15847_vm2, %v4491_v44, %v4495_v38  ;;  %v4579_v4 = vshll.u32 %v17425_v46, 16  ;;  %v4583_v35 = vshrl.u32 %v17425_v46, 16  ;;  %v4528_v18 = vor.u32 %v4527_v1, %v4524_v31  ;;  %v12553_v27 = vld [vmem:[%s15806_s25 + $0xd8] sm:$0xf] }
 0x23f   : > { %14107 = vmatpush3.bf16.msra.mxu0 %v15335_v2  ;;  %v4538_v2 = vor.u32 %v4537_v53, %v17422_v52  ;;  %v4548_v43 = vrot.slane %v4546_v58, 4  ;;  %v4551_v16 = vrot.slane %v4549_v0, 5  ;;  %v4510_v25 = vsel %vm15847_vm2, %v4505_v47, %v17370_v23  ;;  %v17465_v53 = vld [vmem:[%s15806_s25 + $0xdc] sm:$0xf] }
 0x240   : > { %14108 = vmatprep.subr.bf16.mxu0 %v15336_v37  ;;  %v4520_v7 = vsel %vm15847_vm2, %v4515_v3, %v4519_v51  ;;  %v4543_v63 = vrot.slane %v4541_v36, 5  ;;  %v17449_v15 = vrot.slane %v4555_v17, 5  ;;  %v4561_v56 = vrot.slane %v4559_v32, 4 }
 0x241   : > { %v4572_v49 = vrot.slane %v4570_v61, 4  ;;  %v4575_v28 = vrot.slane %v4573_v60, 5  ;;  %v12584_v19 = vcombine.low %v4462_v48, %v4472_v12  ;;  %v17454_v23 = vrot.slane %v4579_v4, 5 }
 0x242   : > { %14073 = vmatmul.mubr.bf16.gmra.mrb[12].mxu0 %v12582_v9  ;;  %v12585_v9 = vcombine.low %v4486_v24, %v4496_v59  ;;  %v4585_v30 = vrot.slane %v4583_v35, 4  ;;  %v4529_v33 = vrot.slane %v4528_v18, 4  ;;  %v4565_v38 = vshll.u32 %v17447_v26, 16 }
 0x243   : > { %14076 = vmatprep.mubr.bf16.mxu0 %v12583_v5  ;;  %14109 = vmatpush3.bf16.msra.mxu0 %v15336_v37  ;;  %v4539_v37 = vrot.slane %v4538_v2, 4  ;;  %v4552_v5 = vor.u32 %v4551_v16, %v4548_v43  ;;  %v12586_v44 = vcombine.low %v4510_v25, %v4520_v7  ;;  %v4562_v48 = vor.u32 %v4561_v56, %v17449_v15 }
 0x244   : > { %14110 = vmatprep.subr.bf16.mxu0 %v15337_v45  ;;  %v4576_v12 = vor.u32 %v4575_v28, %v4572_v49  ;;  %v4589_v31 = vshll.u32 %v17452_v13, 16  ;;  %v4594_v1 = vshrl.u32 %v12550_v21, 16  ;;  %v4586_v58 = vor.u32 %v4585_v30, %v17454_v23 }
 0x245   : > { %v4597_v0 = vshll.u32 %v12550_v21, 16  ;;  %v4603_v47 = vshll.u32 %v17459_v20, 16  ;;  %v4607_v3 = vshrl.u32 %v17459_v20, 16  ;;  %v4534_v51 = vsel %vm15847_vm2, %v4529_v33, %v17422_v52  ;;  %v17478_v52 = vld [vmem:[%s15806_s25 + $0xd4] sm:$0x1] }
 0x246   : > { %v4544_v36 = vsel %vm15847_vm2, %v4539_v37, %v4543_v63  ;;  %v4567_v17 = vrot.slane %v4565_v38, 5  ;;  %v4618_v32 = vshrl.u32 %v12553_v27, 16  ;;  %v4621_v61 = vshll.u32 %v12553_v27, 16  ;;  %v12556_v63 = vld [vmem:[%s15806_s25 + $0xe4] sm:$0xf] }
 0x247   : > { %14111 = vmatpush3.bf16.msra.mxu0 %v15337_v45  ;;  %v4553_v45 = vrot.slane %v4552_v5, 4  ;;  %v4627_v60 = vshll.u32 %v17465_v53, 16  ;;  %v4631_v24 = vshrl.u32 %v17465_v53, 16  ;;  %v4563_v59 = vrot.slane %v4562_v48, 4  ;;  %v17491_v37 = vld [vmem:[%s15806_s25 + $0xe0] sm:$0x1] }
 0x248   : > { %v4577_v4 = vrot.slane %v4576_v12, 4  ;;  %v4591_v35 = vrot.slane %v4589_v31, 5  ;;  %v4596_v18 = vrot.slane %v4594_v1, 4  ;;  %v4587_v2 = vrot.slane %v4586_v58, 4 }
 0x249   : > { %v4599_v43 = vrot.slane %v4597_v0, 5  ;;  %v4605_v16 = vrot.slane %v4603_v47, 5  ;;  %v4609_v25 = vrot.slane %v4607_v3, 4  ;;  %v12587_v7 = vcombine.low %v4534_v51, %v4544_v36 }
 0x24a   : > { %14077 = vmatmul.mubr.bf16.gmra.mrb[16].mxu0 %v12584_v19  ;;  %v4620_v56 = vrot.slane %v4618_v32, 4  ;;  %v4623_v49 = vrot.slane %v4621_v61, 5  ;;  %v4629_v28 = vrot.slane %v4627_v60, 5  ;;  %v4633_v19 = vrot.slane %v4631_v24, 4 }
 0x24b   : > { %14080 = vmatprep.mubr.bf16.mxu0 %v12585_v9  ;;  %v17482_v9 = vld [vmem:[%s15806_s25 + $0xe8] sm:$0xf]  ;;  %v4558_v30 = vsel %vm15847_vm2, %v4553_v45, %v17449_v15  ;;  %v4568_v21 = vsel %vm15847_vm2, %v4563_v59, %v4567_v17  ;;  %v4613_v33 = vshll.u32 %v17478_v52, 16  ;;  %v4582_v5 = vsel %vm15847_vm2, %v4577_v4, %v17454_v23  ;;  %v17502_v4 = vld [vmem:[%s15806_s25 + $0xec] sm:$0x1] }
 0x24c   : > { %v4592_v38 = vsel %vm15847_vm2, %v4587_v2, %v4591_v35  ;;  %v4600_v48 = vor.u32 %v4599_v43, %v4596_v18  ;;  %v4610_v12 = vor.u32 %v4609_v25, %v4605_v16  ;;  %v4642_v31 = vshrl.u32 %v12556_v63, 16 }
 0x24d   : > { %v4645_v15 = vshll.u32 %v12556_v63, 16  ;;  %v4651_v1 = vshll.u32 %v17482_v9, 16  ;;  %v4655_v27 = vshrl.u32 %v17482_v9, 16  ;;  %v4624_v58 = vor.u32 %v4623_v49, %v4620_v56  ;;  %v15491_v56 = vld [vmem:[%s15806_s25 + $0x1c] sm:$0xf] }
 0x24e   : > { %v4634_v0 = vor.u32 %v4633_v19, %v4629_v28  ;;  %v12588_v47 = vcombine.low %v4558_v30, %v4568_v21  ;;  %v12589_v3 = vcombine.low %v4582_v5, %v4592_v38  ;;  %v4601_v23 = vrot.slane %v4600_v48, 4  ;;  %v12601_v19 = vld [vmem:[%s15806_s25 + $0x18] sm:$0xe] }
 0x24f   : > { %v4611_v51 = vrot.slane %v4610_v12, 4  ;;  %v4615_v36 = vrot.slane %v4613_v33, 5  ;;  %v4644_v45 = vrot.slane %v4642_v31, 4  ;;  %v4647_v17 = vrot.slane %v4645_v15, 5  ;;  %v15492_v12 = vld [vmem:[%s15806_s25 + $0x20] sm:$0x1] }
 0x250   : > { %v4653_v32 = vrot.slane %v4651_v1, 5  ;;  %v4657_v61 = vrot.slane %v4655_v27, 4  ;;  %v4625_v60 = vrot.slane %v4624_v58, 4  ;;  %v4635_v24 = vrot.slane %v4634_v0, 4  ;;  %v15493_v1 = vld [vmem:[%s15806_s25 + $0x28] sm:$0xf] }
 0x251   : > { %v4606_v35 = vsel %vm15847_vm2, %v4601_v23, %v4605_v16  ;;  %v4616_v18 = vsel %vm15847_vm2, %v4611_v51, %v4615_v36  ;;  %v4648_v2 = vor.u32 %v4647_v17, %v4644_v45  ;;  %v4661_v25 = vshll.u32 %v17502_v4, 16  ;;  %v12603_v51 = vld [vmem:[%s15806_s25 + $0x30] sm:$0xe] }
 0x252   : > { %14081 = vmatmul.mubr.bf16.gmra.mrb[20].mxu0 %v12586_v44  ;;  %v4637_v44 = vshll.u32 %v17491_v37, 16  ;;  %v4658_v43 = vor.u32 %v4657_v61, %v4653_v32  ;;  %v5089_v49 = vrot.slane %v15491_v56, 5  ;;  %v12590_v16 = vcombine.low %v4606_v35, %v4616_v18  ;;  %v15495_v61 = vld [vmem:[%s15806_s25 + $0x2c] sm:$0x1]  ;;  %v15496_v35 = vld [vmem:[%s15806_s25 + $0x38] sm:$0x1] }
 0x253   : > { %14084 = vmatprep.mubr.bf16.mxu0 %v12587_v7  ;;  %v4630_v7 = vsel %vm15847_vm2, %v4625_v60, %v4629_v28  ;;  %v4649_v21 = vrot.slane %v4648_v2, 4  ;;  %v4663_v5 = vrot.slane %v4661_v25, 5  ;;  %v12619_v38 = vrot.slane %v12601_v19, 9  ;;  %v15497_v25 = vld [vmem:[%s15806_s25 + $0x40] sm:$0xf] }
 0x254   : > { %v4639_v59 = vrot.slane %v4637_v44, 5  ;;  %v4659_v33 = vrot.slane %v4658_v43, 4  ;;  %v5091_v48 = vrot.slane %v5089_v49, 4  ;;  %v5092_v31 = vrot.slane %v15492_v12, 5  ;;  %v15498_v19 = vld [vmem:[%s15806_s25 + $0x4c] sm:$0xf] }
 0x255   : > { %v4654_v28 = vsel %vm15847_vm2, %v4649_v21, %v4653_v32  ;;  %v5096_v27 = vrot.slane %v15493_v1, 5  ;;  %v5090_v0 = vsel %vm16013_vm5, %v12619_v38, %v5089_v49  ;;  %v5099_v60 = vrot.slane %v15495_v61, 5  ;;  %v12604_v49 = vld [vmem:[%s15806_s25 + $0x3c] sm:$0xe] }
 0x256   : > { %v4640_v63 = vsel %vm15847_vm2, %v4635_v24, %v4639_v59  ;;  %v4664_v15 = vsel %vm15847_vm2, %v4659_v33, %v4663_v5  ;;  %v5093_v44 = vsel %vm16013_vm5, %v5091_v48, %v5092_v31  ;;  %v12621_v24 = vrot.slane %v12603_v51, 9  ;;  %v15499_v48 = vld [vmem:[%s15806_s25 + $0x44] sm:$0x1]  ;;  %v12606_v51 = vld [vmem:[%s15806_s25 + $0x54] sm:$0xe] }
 0x257   : > { %v12591_v30 = vcombine.low %v4630_v7, %v4640_v63  ;;  %v12592_v36 = vcombine.low %v4654_v28, %v4664_v15  ;;  %v12653_v45 = vcombine.low %v5090_v0, %v5093_v44  ;;  %v5098_v32 = vrot.slane %v5096_v27, 4  ;;  %v15500_v15 = vld [vmem:[%s15806_s25 + $0x50] sm:$0x1]  ;;  %v15501_v44 = vld [vmem:[%s15806_s25 + $0x58] sm:$0xf] }
 0x258   : > { %v5106_v18 = vrot.slane %v15496_v35, 5  ;;  %v5110_v7 = vrot.slane %v15497_v25, 5  ;;  %v12622_v5 = vrot.slane %v12604_v49, 9  ;;  %v5113_v12 = vrot.slane %v15499_v48, 5 }
 0x259   : > { %v5100_v43 = vsel %vm16013_vm5, %v5098_v32, %v5099_v60  ;;  %v5120_v1 = vrot.slane %v15500_v15, 5  ;;  %v12624_v61 = vrot.slane %v12606_v51, 9 }
 0x25a   : > { %14085 = vmatmul.mubr.bf16.gmra.mrb[24].mxu0 %v12588_v47  ;;  %v12602_v47 = vld [vmem:[%s15806_s25 + $0x24] sm:$0xe]  ;;  %v5112_v38 = vrot.slane %v5110_v7, 4 }
 0x25b   : > { %14088 = vmatprep.mubr.bf16.mxu0 %v12589_v3  ;;  %v15494_v3 = vld [vmem:[%s15806_s25 + $0x34] sm:$0xf]  ;;  %v12620_v17 = vrot.slane %v12602_v47, 9  ;;  %v5124_v47 = vrot.slane %v15501_v44, 5 }
 0x25c   : > { %v5103_v23 = vrot.slane %v15494_v3, 5  ;;  %v5114_v0 = vsel %vm16013_vm5, %v5112_v38, %v5113_v12  ;;  %v5152_v38 = vrot.slane %v17272_v54, 5  ;;  %v12610_v12 = vld [vmem:[%s15806_s25 + $0x84] sm:$0xe] }
 0x25d   : > { %v5097_v2 = vsel %vm16013_vm5, %v12620_v17, %v5096_v27  ;;  %v5111_v27 = vsel %vm16013_vm5, %v12622_v5, %v5110_v7  ;;  %v5126_v60 = vrot.slane %v5124_v47, 4  ;;  %v12608_v7 = vld [vmem:[%s15806_s25 + $0x6c] sm:$0xe] }
 0x25e   : > { %v5105_v59 = vrot.slane %v5103_v23, 4  ;;  %v5104_v63 = vsel %vm16013_vm5, %v12621_v24, %v5103_v23  ;;  %v12654_v21 = vcombine.low %v5097_v2, %v5100_v43  ;;  %v12656_v17 = vcombine.low %v5111_v27, %v5114_v0 }
 0x25f   : > { %v5127_v24 = vrot.slane %v17106_v34, 5  ;;  %v5125_v2 = vsel %vm16013_vm5, %v12624_v61, %v5124_v47  ;;  %v5138_v43 = vrot.slane %v17162_v8, 5  ;;  %v5154_v27 = vrot.slane %v5152_v38, 4 }
 0x260   : > { %v5107_v56 = vsel %vm16013_vm5, %v5105_v59, %v5106_v18  ;;  %v5134_v18 = vrot.slane %v17138_v22, 5  ;;  %v12609_v22 = vld [vmem:[%s15806_s25 + $0x78] sm:$0xe]  ;;  %v5155_v0 = vrot.slane %v17307_v11, 5  ;;  %v5162_v47 = vrot.slane %v17357_v50, 5 }
 0x261   : > { %v12655_v33 = vcombine.low %v5104_v63, %v5107_v56  ;;  %v5145_v63 = vrot.slane %v17215_v62, 5  ;;  %v12613_v50 = vld [vmem:[%s15806_s25 + $0xa8] sm:$0xe] }
 0x262   : > { %14089 = vmatmul.mubr.bf16.gmra.mrb[28].mxu0 %v12590_v16  ;;  %v5117_v16 = vrot.slane %v15498_v19, 5  ;;  %v12626_v19 = vrot.slane %v12608_v7, 9 }
 0x263   : > { %14092 = vmatprep.mubr.bf16.mxu0 %v12591_v30  ;;  %v12605_v30 = vld [vmem:[%s15806_s25 + $0x48] sm:$0xe]  ;;  %v5147_v8 = vrot.slane %v5145_v63, 4 }
 0x264   : > { %v12623_v31 = vrot.slane %v12605_v30, 9  ;;  %v5119_v28 = vrot.slane %v5117_v16, 4  ;;  %v5141_v30 = vrot.slane %v17188_v57, 5  ;;  %v5139_v5 = vsel %vm16013_vm5, %v12626_v19, %v5138_v43 }
 0x265   : > { %v5190_v19 = vrot.slane %v17452_v13, 5  ;;  %v12617_v13 = vld [vmem:[%s15806_s25 + $0xd8] sm:$0xe] }
 0x266   : > { %v5118_v3 = vsel %vm16013_vm5, %v12623_v31, %v5117_v16  ;;  %v5121_v23 = vsel %vm16013_vm5, %v5119_v28, %v5120_v1  ;;  %v5140_v16 = vrot.slane %v5138_v43, 4  ;;  %v5159_v31 = vrot.slane %v17321_v39, 5  ;;  %v12614_v43 = vld [vmem:[%s15806_s25 + $0xb4] sm:$0xe] }
 0x267   : > { %v12657_v32 = vcombine.low %v5118_v3, %v5121_v23  ;;  %v12628_v1 = vrot.slane %v12610_v12, 9  ;;  %v5156_v39 = vsel %vm16013_vm5, %v5154_v27, %v5155_v0  ;;  %v5166_v23 = vrot.slane %v17332_v40, 5 }
 0x268   : > { %v5142_v62 = vsel %vm16013_vm5, %v5140_v16, %v5141_v30  ;;  %v5161_v54 = vrot.slane %v5159_v31, 4  ;;  %v5194_v30 = vrot.slane %v17459_v20, 5  ;;  %v12635_v12 = vrot.slane %v12617_v13, 9 }
 0x269   : > { %v12660_v28 = vcombine.low %v5139_v5, %v5142_v62  ;;  %v5153_v3 = vsel %vm16013_vm5, %v12628_v1, %v5152_v38  ;;  %v5204_v20 = vrot.slane %v17491_v37, 5  ;;  %v12618_v1 = vld [vmem:[%s15806_s25 + $0xe4] sm:$0xe] }
 0x26a   : > { %14093 = vmatmul.mubr.bf16.gmra.mrb[32].mxu0 %v12592_v36  ;;  %v5131_v36 = vrot.slane %v17121_v10, 5  ;;  %v5128_v10 = vsel %vm16013_vm5, %v5126_v60, %v5127_v24  ;;  %v5163_v11 = vsel %vm16013_vm5, %v5161_v54, %v5162_v47  ;;  %v5168_v60 = vrot.slane %v5166_v23, 4 }
 0x26b   : > { %14112 = vmatprep.mubr.bf16.mxu0 %v12653_v45  ;;  %v12607_v45 = vld [vmem:[%s15806_s25 + $0x60] sm:$0xe]  ;;  %v12658_v56 = vcombine.low %v5125_v2, %v5128_v10  ;;  %v5169_v24 = vrot.slane %v17382_v55, 5  ;;  %v5180_v2 = vrot.slane %v17419_v6, 5  ;;  %v12636_v37 = vrot.slane %v12618_v1, 9 }
 0x26c   : > { %v12625_v59 = vrot.slane %v12607_v45, 9  ;;  %v5133_v35 = vrot.slane %v5131_v36, 4  ;;  %v5173_v45 = vrot.slane %v17376_v14, 5  ;;  %v5211_v54 = vrot.slane %v17502_v4, 5  ;;  %v15341_v4 = vld [vmem:[#allocation3 + $0x58] sm:$0xff]  }
 0x26d   : > { %v5170_v14 = vsel %vm16013_vm5, %v5168_v60, %v5169_v24 }
 0x26e   : > { %v5132_v25 = vsel %vm16013_vm5, %v12625_v59, %v5131_v36  ;;  %v5135_v34 = vsel %vm16013_vm5, %v5133_v35, %v5134_v18  ;;  %v12612_v36 = vld [vmem:[%s15806_s25 + $0x9c] sm:$0xe]  ;;  %v12631_v59 = vrot.slane %v12613_v50, 9  ;;  %v5175_v40 = vrot.slane %v5173_v45, 4  ;;  %v15343_v50 = vld [vmem:[#allocation3 + $0x68] sm:$0xff]  }
 0x26f   : > { %v12659_v49 = vcombine.low %v5132_v25, %v5135_v34  ;;  %v12630_v61 = vrot.slane %v12612_v36, 9  ;;  %v5176_v35 = vrot.slane %v17416_v41, 5  ;;  %v5187_v25 = vrot.slane %v17425_v46, 5  ;;  %v12615_v41 = vld [vmem:[%s15806_s25 + $0xc0] sm:$0xe] }
 0x270   : > { %v5174_v10 = vsel %vm16013_vm5, %v12631_v59, %v5173_v45 }
 0x271   : > { %v5167_v18 = vsel %vm16013_vm5, %v12630_v61, %v5166_v23  ;;  %v5177_v55 = vsel %vm16013_vm5, %v5175_v40, %v5176_v35  ;;  %v5189_v6 = vrot.slane %v5187_v25, 4  ;;  %v15339_v23 = vld [vmem:[#allocation3 + $0x48] sm:$0xff]   ;;  %v15344_v61 = vld [vmem:[#allocation3 + $0x70] sm:$0xff]   ;;  %v15345_v40 = vld [vmem:[#allocation3 + $0x78] sm:$0xff]  }
 0x272   : > { %14113 = vmatmul.mubr.bf16.vlgmr.msra.gmra.mrb[0].mxu0 %v12654_v21  ;;  %v12627_v21 = vrot.slane %v12609_v22, 9  ;;  %v12664_v34 = vcombine.low %v5167_v18, %v5170_v14  ;;  %v12665_v7 = vcombine.low %v5174_v10, %v5177_v55  ;;  %v5182_v22 = vrot.slane %v5180_v2, 4  ;;  %v15346_v14 = vld [vmem:[#allocation3] sm:$0xff]  }
 0x273   : > { %14116 = vmatprep.mubr.bf16.mxu0 %v12655_v33  ;;  %v5148_v33 = vrot.slane %v17259_v42, 5  ;;  %v12611_v42 = vld [vmem:[%s15806_s25 + $0x90] sm:$0xe] }
 0x274   : > { %v5146_v48 = vsel %vm16013_vm5, %v12627_v21, %v5145_v63  ;;  %v12629_v44 = vrot.slane %v12611_v42, 9  ;;  %v12632_v63 = vrot.slane %v12614_v43, 9 }
 0x275   : > { %v5149_v57 = vsel %vm16013_vm5, %v5147_v8, %v5148_v33  ;;  %v12616_v8 = vld [vmem:[%s15806_s25 + $0xcc] sm:$0xe]  ;;  %v5201_v33 = vrot.slane %v17465_v53, 5 }
 0x276   : > { %v12661_v15 = vcombine.low %v5146_v48, %v5149_v57  ;;  %v5160_v51 = vsel %vm16013_vm5, %v12629_v44, %v5159_v31  ;;  %v5181_v16 = vsel %vm16013_vm5, %v12632_v63, %v5180_v2  ;;  %v12634_v38 = vrot.slane %v12616_v8, 9 }
 0x277   : > { %v5196_v48 = vrot.slane %v5194_v30, 4  ;;  %v5197_v57 = vrot.slane %v17478_v52, 5  ;;  %v5203_v31 = vrot.slane %v5201_v33, 4 }
 0x278   : > { %v5195_v42 = vsel %vm16013_vm5, %v12634_v38, %v5194_v30 }
 0x279   : > { %v5198_v53 = vsel %vm16013_vm5, %v5196_v48, %v5197_v57  ;;  %v5205_v52 = vsel %vm16013_vm5, %v5203_v31, %v5204_v20 }
 0x27a   : > { %14117 = vmatmul.mubr.bf16.gmra.mrb[4].mxu0 %v12656_v17  ;;  %v12662_v17 = vcombine.low %v5153_v3, %v5156_v39  ;;  %v12668_v27 = vcombine.low %v5195_v42, %v5198_v53  ;;  %v15338_v39 = vld [vmem:[#allocation3 + $0x40] sm:$0xff]   ;;  %v6125_v53 = vld [vmem:[#allocation2 + $0xc] sm:$0xf] }
 0x27b   : > { %14120 = vmatprep.mubr.bf16.mxu0 %v12657_v32  ;;  %v12663_v32 = vcombine.low %v5160_v51, %v5163_v11  ;;  %14148 = vmatprep.subr.bf16.mxu1 %v15338_v39  ;;  %v15340_v51 = vld [vmem:[#allocation3 + $0x50] sm:$0xff]   ;;  %v15342_v11 = vld [vmem:[#allocation3 + $0x60] sm:$0xff]  }
 0x27c   : > { %14149 = vmatpush3.bf16.msra.mxu1 %v15338_v39 }
 0x27d   : > { %14150 = vmatprep.subr.bf16.mxu1 %v15339_v23 }
 0x280   : > { %14151 = vmatpush3.bf16.msra.mxu1 %v15339_v23 }
 0x281   : > { %14152 = vmatprep.subr.bf16.mxu1 %v15340_v51 }
 0x282   : > { %14121 = vmatmul.mubr.bf16.gmra.mrb[8].mxu0 %v12658_v56  ;;  %v5183_v56 = vrot.slane %v17447_v26, 5  ;;  %v5191_v26 = vsel %vm16013_vm5, %v5189_v6, %v5190_v19 }
 0x283   : > { %14124 = vmatprep.mubr.bf16.mxu0 %v12659_v49  ;;  %v12633_v49 = vrot.slane %v12615_v41, 9 }
 0x284   : > { %v5184_v46 = vsel %vm16013_vm5, %v5182_v22, %v5183_v56  ;;  %14153 = vmatpush3.bf16.msra.mxu1 %v15340_v51  ;;  %v6116_v51 = vld [vmem:[#allocation2] sm:$0xf] }
 0x285   : > { %v5188_v21 = vsel %vm16013_vm5, %v12633_v49, %v5187_v25  ;;  %v12666_v5 = vcombine.low %v5181_v16, %v5184_v46  ;;  %14154 = vmatprep.subr.bf16.mxu1 %v15341_v4 }
 0x286   : > { %v12667_v62 = vcombine.low %v5188_v21, %v5191_v26 }
 0x288   : > { %14155 = vmatpush3.bf16.msra.mxu1 %v15341_v4 }
 0x289   : > { %14156 = vmatprep.subr.bf16.mxu1 %v15342_v11 }
 0x28a   : > { %14125 = vmatmul.mubr.bf16.gmra.mrb[12].mxu0 %v12660_v28  ;;  %v5208_v28 = vrot.slane %v17482_v9, 5 }
 0x28b   : > { %14128 = vmatprep.mubr.bf16.mxu0 %v12661_v15  ;;  %v5202_v15 = vsel %vm16013_vm5, %v12635_v12, %v5201_v33 }
 0x28c   : > { %v12669_v0 = vcombine.low %v5202_v15, %v5205_v52  ;;  %v5210_v44 = vrot.slane %v5208_v28, 4  ;;  %v5209_v47 = vsel %vm16013_vm5, %v12636_v37, %v5208_v28  ;;  %14157 = vmatpush3.bf16.msra.mxu1 %v15342_v11 }
 0x28d   : > { %14158 = vmatprep.subr.bf16.mxu1 %v15343_v50 }
 0x28e   : > { %v5212_v9 = vsel %vm16013_vm5, %v5210_v44, %v5211_v54 }
 0x28f   : > { %v12670_v3 = vcombine.low %v5209_v47, %v5212_v9 }
 0x290   : > { %14159 = vmatpush3.bf16.msra.mxu1 %v15343_v50 }
 0x291   : > { %14160 = vmatprep.subr.bf16.mxu1 %v15344_v61 }
 0x292   : > { %14129 = vmatmul.mubr.bf16.gmra.mrb[16].mxu0 %v12662_v17 }
 0x293   : > { %14132 = vmatprep.mubr.bf16.mxu0 %v12663_v32 }
 0x294   : > { %14161 = vmatpush3.bf16.msra.mxu1 %v15344_v61 }
 0x295   : > { %14162 = vmatprep.subr.bf16.mxu1 %v15345_v40 }
 0x298   : > { %14163 = vmatpush3.bf16.msra.mxu1 %v15345_v40 }
 0x299   : > { %14196 = vmatprep.subr.bf16.mxu1 %v15346_v14 }
 0x29a   : > { %14133 = vmatmul.mubr.bf16.gmra.mrb[20].mxu0 %v12664_v34 }
 0x29b   : > { %14136 = vmatprep.mubr.bf16.mxu0 %v12665_v7  ;;  %v17678_v7 = vld [vmem:[%s19706_s2] ss:$0 sm:$0xff] }
 0x2a2   : > { %14137 = vmatmul.mubr.bf16.gmra.mrb[24].mxu0 %v12666_v5 }
 0x2a3   : > { %14140 = vmatprep.mubr.bf16.mxu0 %v12667_v62 }
 0x2aa   : > { %14141 = vmatmul.mubr.bf16.gmra.mrb[28].mxu0 %v12668_v27 }
 0x2ab   : > { %14144 = vmatprep.mubr.bf16.mxu0 %v12669_v0 }
 0x2b2   : > { %14145 = vmatmul.mubr.bf16.gmra.mrb[32].mxu0 %v12670_v3 }
 0x2e4   : > { %v17643_v36 = vpop.f32.mrb[0].mxu1 }
 0x2e5   : > { %v17645_v45 = vpop.f32.mrb[1].mxu1 }
 0x2e6   : > { %v17647_v17 = vpop.f32.mrb[2].mxu1 }
 0x2e7   : > { %v17649_v32 = vpop.f32.mrb[3].mxu1 }
 0x2ec   : > { %v17651_v60 = vpop.f32.mrb[4].mxu1 }
 0x2ed   : > { %v17653_v24 = vpop.f32.mrb[5].mxu1 }
 0x2ee   : > { %v17655_v59 = vpop.f32.mrb[6].mxu1 }
 0x2ef   : > { %v17657_v35 = vpop.f32.mrb[7].mxu1 }
 0x2f9   : > { %v17659_v18 = vpop.f32.mrb[8].mxu1 }
 0x2fa   : > { %v17661_v2 = vpop.f32.mrb[9].mxu1 }
 0x2fb   : > { %v17663_v10 = vpop.f32.mrb[10].mxu1 }
 0x2fc   : > { %v17665_v55 = vpop.f32.mrb[11].mxu1 }
 0x301   : > { %v17667_v43 = vpop.f32.mrb[12].mxu1 }
 0x302   : > { %v17669_v25 = vpop.f32.mrb[13].mxu1 }
 0x303   : > { %v17671_v41 = vpop.f32.mrb[14].mxu1 }
 0x304   : > { %v17673_v34 = vpop.f32.mrb[15].mxu1 }
 0x30c   : > { %v17680_v63 = vpop.f32.mrb[16].mxu1 }
 0x30d   : > { %v17694_v9 = vpop.f32.mrb[17].mxu1 }
 0x345   : > { %v14114_v22 = vpop.f32.mrb[0].mxu0 }
 0x346   : > { %v5572_v56 = vadd.f32 %v14114_v22, %v17678_v7  ;;  %v5384_v49 = vpop.f32.mrb[1].mxu0  ;;  %v6129_v22 = vld [vmem:[#allocation2 + $0x14] sm:$0x1] }
 0x347   : > { %v5570_v6 = vadd.f32 %v17678_v7, %v5384_v49  ;;  %v14115_v19 = vpop.f32.mrb[2].mxu0 }
 0x348   : > { %v5608_v16 = vmax.f32 %v5572_v56, 0.0  ;;  %v5573_v46 = vadd.f32 %v14115_v19, %v17678_v7  ;;  %v5387_v30 = vpop.f32.mrb[3].mxu0 }
 0x349   : > { %v5606_v21 = vmax.f32 %v5570_v6, 0.0  ;;  %v5571_v26 = vadd.f32 %v17678_v7, %v5387_v30  ;;  %v17708_v6 = vpop.f32.mrb[18].mxu1  ;;  %v6122_v30 = vld [vmem:[#allocation2 + $0x8] sm:$0x1] }
 0x34a   : > { %v13068_v8 = vpack.c.bf16 %v5608_v16, %v5608_v16  ;;  %v5609_v33 = vmax.f32 %v5573_v46, 0.0 }
 0x34b   : > { %v13066_v13 = vpack.c.bf16 %v5606_v21, %v5606_v21  ;;  %v5607_v5 = vmax.f32 %v5571_v26, 0.0  ;;  %v17712_v26 = vpop.f32.mrb[19].mxu1 }
 0x34c   : > { %v5771_v62 = vshrl.u32 %v13068_v8, 16  ;;  %v13069_v38 = vpack.c.bf16 %v5609_v33, %v5609_v33  ;;  %v5774_v48 = vshll.u32 %v13068_v8, 16 }
 0x34d   : > { %v5754_v57 = vshrl.u32 %v13066_v13, 16  ;;  %v5757_v12 = vshll.u32 %v13066_v13, 16  ;;  %v13067_v31 = vpack.c.bf16 %v5607_v5, %v5607_v5  ;;  %v14118_v20 = vpop.f32.mrb[4].mxu0 }
 0x34e   : > { %v5773_v42 = vrot.slane %v5771_v62, 7  ;;  %v5779_v28 = vshrl.u32 %v13069_v38, 16  ;;  %v5782_v15 = vshll.u32 %v13069_v38, 16  ;;  %v5576_v52 = vadd.f32 %v14118_v20, %v17678_v7  ;;  %v5400_v1 = vpop.f32.mrb[5].mxu0 }
 0x34f   : > { %v5756_v0 = vrot.slane %v5754_v57, 7  ;;  %v5762_v37 = vshrl.u32 %v13067_v31, 16  ;;  %v5765_v44 = vshll.u32 %v13067_v31, 16  ;;  %v5574_v54 = vadd.f32 %v17678_v7, %v5400_v1  ;;  %v14119_v47 = vpop.f32.mrb[6].mxu0 }
 0x350   : > { %v5776_v3 = vor.u32 %v5774_v48, %v5773_v42  ;;  %v5777_v39 = vrot.slane %v5773_v42, 4  ;;  %v5781_v4 = vrot.slane %v5779_v28, 7  ;;  %v5612_v11 = vmax.f32 %v5576_v52, 0.0  ;;  %v5403_v50 = vpop.f32.mrb[7].mxu0 }
 0x351   : > { %v5759_v61 = vor.u32 %v5757_v12, %v5756_v0  ;;  %v5760_v40 = vrot.slane %v5756_v0, 4  ;;  %v5764_v56 = vrot.slane %v5762_v37, 7  ;;  %v5610_v49 = vmax.f32 %v5574_v54, 0.0  ;;  %v6139_v37 = vld [vmem:[#allocation2 + $0x24] sm:$0xf] }
 0x352   : > { %v6126_v19 = vsel %vm17689_vm11, %v5776_v3, %v6125_v53  ;;  %v5784_v16 = vor.u32 %v5782_v15, %v5781_v4  ;;  %v5786_v46 = vrot.slane %v5781_v4, 4  ;;  %v13072_v21 = vpack.c.bf16 %v5612_v11, %v5612_v11 }
 0x353   : > { %6127 = vst [vmem:[#allocation2 + $0xc] sm:$0xf] %v6126_v19  ;;  %v6117_v8 = vsel %vm17689_vm11, %v5759_v61, %v6116_v51  ;;  %v5767_v33 = vor.u32 %v5765_v44, %v5764_v56  ;;  %v5769_v13 = vrot.slane %v5764_v56, 4  ;;  %v13070_v5 = vpack.c.bf16 %v5610_v49, %v5610_v49 }
 0x354   : > { %6118 = vst [vmem:[#allocation2] sm:$0xf] %v6117_v8  ;;  %v5785_v62 = vsel %vm17704_vm13, %v5777_v39, %v5784_v16  ;;  %v6130_v38 = vsel %vm17698_vm12, %v5786_v46, %v6129_v22  ;;  %v5805_v48 = vshrl.u32 %v13072_v21, 16  ;;  %v5808_v31 = vshll.u32 %v13072_v21, 16 }
 0x355   : > { %6128 = vst [vmem:[#allocation2 + $0x10] sm:$0xf] %v5785_v62  ;;  %6131 = vst [vmem:[#allocation2 + $0x14] sm:$0x1] %v6130_v38  ;;  %v5768_v57 = vsel %vm17704_vm13, %v5760_v40, %v5767_v33  ;;  %v6123_v12 = vsel %vm17698_vm12, %v5769_v13, %v6122_v30  ;;  %v5788_v20 = vshrl.u32 %v13070_v5, 16  ;;  %v14122_v42 = vpop.f32.mrb[8].mxu0  ;;  %v5577_v28 = vadd.f32 %v14119_v47, %v17678_v7 }
 0x356   : > { %6119 = vst [vmem:[#allocation2 + $0x4] sm:$0xf] %v5768_v57  ;;  %6124 = vst [vmem:[#allocation2 + $0x8] sm:$0x1] %v6123_v12  ;;  %v17724_v53 = vrot.slane %v5805_v48, 7  ;;  %v5575_v15 = vadd.f32 %v17678_v7, %v5403_v50  ;;  %v5580_v52 = vadd.f32 %v14122_v42, %v17678_v7  ;;  %v5416_v1 = vpop.f32.mrb[9].mxu0 }
 0x357   : > { %v15665_v0 = vmov 0   ;;  %v17730_v44 = vrot.slane %v5788_v20, 7  ;;  %v5791_v54 = vshll.u32 %v13070_v5, 16  ;;  %v5578_v3 = vadd.f32 %v17678_v7, %v5416_v1  ;;  %v14123_v39 = vpop.f32.mrb[10].mxu0  ;;  %v6132_v47 = vld [vmem:[#allocation2 + $0x18] sm:$0xf] }
 0x358   : > { %6358 = vst [vmem:[#allocation2 + $0x4] sm:$0xf] %v15665_v0  ;;  %v5810_v51 = vor.u32 %v5808_v31, %v17724_v53  ;;  %v5811_v4 = vrot.slane %v17724_v53, 4  ;;  %v5613_v11 = vmax.f32 %v5577_v28, 0.0  ;;  %v5611_v50 = vmax.f32 %v5575_v15, 0.0  ;;  %v5419_v61 = vpop.f32.mrb[11].mxu0 }
 0x359   : > { %v5793_v40 = vor.u32 %v5791_v54, %v17730_v44  ;;  %v5794_v22 = vrot.slane %v17730_v44, 4  ;;  %v5616_v56 = vmax.f32 %v5580_v52, 0.0  ;;  %v5614_v49 = vmax.f32 %v5578_v3, 0.0  ;;  %v6143_v15 = vld [vmem:[#allocation2 + $0x2c] sm:$0x1] }
 0x35a   : > { %v6247_v19 = vld [vmem:[#allocation2 + $0xc] sm:$0x1]  ;;  %v6140_v46 = vsel %vm17689_vm11, %v5810_v51, %v6139_v37  ;;  %v13073_v30 = vpack.c.bf16 %v5613_v11, %v5613_v11  ;;  %v13071_v21 = vpack.c.bf16 %v5611_v50, %v5611_v50  ;;  %v5581_v8 = vadd.f32 %v14123_v39, %v17678_v7 }
 0x35b   : > { %v6248_v33 = vsel %vm17698_vm12, 0, %v6247_v19  ;;  %v6244_v13 = vld [vmem:[#allocation2] sm:$0x1]  ;;  %6141 = vst [vmem:[#allocation2 + $0x24] sm:$0xf] %v6140_v46  ;;  %v6133_v5 = vsel %vm17689_vm11, %v5793_v40, %v6132_v47  ;;  %v13076_v62 = vpack.c.bf16 %v5616_v56, %v5616_v56  ;;  %v13074_v38 = vpack.c.bf16 %v5614_v49, %v5614_v49 }
 0x35c   : > { %6249 = vst [vmem:[#allocation2 + $0xc] sm:$0x1] %v6248_v33  ;;  %v6245_v48 = vsel %vm17698_vm12, 0, %v6244_v13  ;;  %v6302_v57 = vld [vmem:[#allocation2 + $0x14] sm:$0x1]  ;;  %v5813_v12 = vshrl.u32 %v13073_v30, 16  ;;  %v5579_v56 = vadd.f32 %v17678_v7, %v5419_v61 }
 0x35d   : > { %6134 = vst [vmem:[#allocation2 + $0x18] sm:$0xf] %v6133_v5  ;;  %v5816_v31 = vshll.u32 %v13073_v30, 16  ;;  %v5796_v20 = vshrl.u32 %v13071_v21, 16  ;;  %6246 = vst [vmem:[#allocation2] sm:$0x1] %v6245_v48 }
 0x35e   : > { %v6303_v42 = vsel %vm17739_vm14, 0, %v6302_v57  ;;  %v6299_v28 = vld [vmem:[#allocation2 + $0x8] sm:$0x1]  ;;  %v5799_v52 = vshll.u32 %v13071_v21, 16  ;;  %v5839_v1 = vshrl.u32 %v13076_v62, 16  ;;  %v5842_v37 = vshll.u32 %v13076_v62, 16 }
 0x35f   : > { %6357 = vst [vmem:[#allocation2] sm:$0xf] %v15665_v0  ;;  %6304 = vst [vmem:[#allocation2 + $0x14] sm:$0x1] %v6303_v42  ;;  %v6300_v44 = vsel %vm17739_vm14, 0, %v6299_v28  ;;  %v5815_v54 = vrot.slane %v5813_v12, 7 }
 0x360   : > { %v5798_v3 = vrot.slane %v5796_v20, 7  ;;  %v5822_v39 = vshrl.u32 %v13074_v38, 16  ;;  %v14126_v51 = vpop.f32.mrb[12].mxu0  ;;  %6301 = vst [vmem:[#allocation2 + $0x8] sm:$0x1] %v6300_v44  ;;  %v17757_v11 = vrot.slane %v5839_v1, 7 }
 0x361   : > { %v6136_v47 = vld [vmem:[#allocation2 + $0x20] sm:$0x1]  ;;  %v5825_v50 = vshll.u32 %v13074_v38, 16  ;;  %v5617_v40 = vmax.f32 %v5581_v8, 0.0  ;;  %v5432_v49 = vpop.f32.mrb[13].mxu0  ;;  %v5818_v19 = vor.u32 %v5816_v31, %v5815_v54  ;;  %v5820_v46 = vrot.slane %v5815_v54, 4 }
 0x362   : > { %6359 = vst [vmem:[#allocation2 + $0x8] sm:$0x1] %v15665_v0  ;;  %v5801_v30 = vor.u32 %v5799_v52, %v5798_v3  ;;  %v5803_v21 = vrot.slane %v5798_v3, 4  ;;  %v6153_v33 = vld [vmem:[#allocation2 + $0x3c] sm:$0xf]  ;;  %v14127_v13 = vpop.f32.mrb[14].mxu0  ;;  %v5844_v5 = vor.u32 %v5842_v37, %v17757_v11  ;;  %v5584_v3 = vadd.f32 %v14126_v51, %v17678_v7 }
 0x363   : > { %v5845_v62 = vrot.slane %v17757_v11, 4  ;;  %v17763_v48 = vrot.slane %v5822_v39, 7  ;;  %v13077_v57 = vpack.c.bf16 %v5617_v40, %v5617_v40  ;;  %v5435_v38 = vpop.f32.mrb[15].mxu0  ;;  %v6253_v8 = vld [vmem:[#allocation2 + $0x24] sm:$0x1]  ;;  %v5819_v61 = vsel %vm17704_vm13, %v5811_v4, %v5818_v19 }
 0x364   : > { %v6144_v12 = vsel %vm17698_vm12, %v5820_v46, %v6143_v15  ;;  %v5802_v31 = vsel %vm17704_vm13, %v5794_v22, %v5801_v30  ;;  %v6137_v20 = vsel %vm17698_vm12, %v5803_v21, %v6136_v47  ;;  %v6146_v42 = vld [vmem:[#allocation2 + $0x30] sm:$0xf]  ;;  %v6254_v28 = vsel %vm17698_vm12, 0, %v6253_v8  ;;  %v6250_v52 = vld [vmem:[#allocation2 + $0x18] sm:$0x1] }
 0x365   : > { %6142 = vst [vmem:[#allocation2 + $0x28] sm:$0xf] %v5819_v61  ;;  %6145 = vst [vmem:[#allocation2 + $0x2c] sm:$0x1] %v6144_v12  ;;  %v6154_v53 = vsel %vm17689_vm11, %v5844_v5, %v6153_v33  ;;  %v5827_v4 = vor.u32 %v5825_v50, %v17763_v48  ;;  %v5828_v15 = vrot.slane %v17763_v48, 4  ;;  %v6251_v22 = vsel %vm17698_vm12, 0, %v6250_v52 }
 0x366   : > { %6135 = vst [vmem:[#allocation2 + $0x1c] sm:$0xf] %v5802_v31  ;;  %6138 = vst [vmem:[#allocation2 + $0x20] sm:$0x1] %v6137_v20  ;;  %v5847_v1 = vshrl.u32 %v13077_v57, 16  ;;  %v5850_v37 = vshll.u32 %v13077_v57, 16  ;;  %v5582_v39 = vadd.f32 %v17678_v7, %v5432_v49  ;;  %v5585_v47 = vadd.f32 %v14127_v13, %v17678_v7 }
 0x367   : > { %6255 = vst [vmem:[#allocation2 + $0x24] sm:$0x1] %v6254_v28  ;;  %6155 = vst [vmem:[#allocation2 + $0x3c] sm:$0xf] %v6154_v53  ;;  %v5615_v44 = vmax.f32 %v5579_v56, 0.0  ;;  %v6147_v54 = vsel %vm17689_vm11, %v5827_v4, %v6146_v42  ;;  %v14130_v11 = vpop.f32.mrb[16].mxu0  ;;  %v5583_v19 = vadd.f32 %v17678_v7, %v5435_v38 }
 0x368   : > { %6252 = vst [vmem:[#allocation2 + $0x18] sm:$0x1] %v6251_v22  ;;  %6148 = vst [vmem:[#allocation2 + $0x30] sm:$0xf] %v6147_v54  ;;  %v5849_v50 = vrot.slane %v5847_v1, 7  ;;  %v14596_v46 = vadd.f32 %v14130_v11, %v17643_v36  ;;  %v5448_v30 = vpop.f32.mrb[17].mxu0 }
 0x369   : > { %v13075_v40 = vpack.c.bf16 %v5615_v44, %v5615_v44  ;;  %v6157_v56 = vld [vmem:[#allocation2 + $0x44] sm:$0x1]  ;;  %v5620_v21 = vmax.f32 %v5584_v3, 0.0  ;;  %v5618_v33 = vmax.f32 %v5582_v39, 0.0  ;;  %v5621_v5 = vmax.f32 %v5585_v47, 0.0  ;;  %v17791_v51 = vpop.f32.mrb[18].mxu0 }
 0x36a   : > { %v14597_v48 = vadd.f32 %v5448_v30, %v17645_v45  ;;  %v5852_v49 = vor.u32 %v5850_v37, %v5849_v50  ;;  %v5854_v57 = vrot.slane %v5849_v50, 4  ;;  %v17793_v61 = vpop.f32.mrb[19].mxu0  ;;  %v6150_v12 = vld [vmem:[#allocation2 + $0x38] sm:$0x1]  ;;  %v5619_v36 = vmax.f32 %v5583_v19, 0.0 }
 0x36b   : > { %v5830_v13 = vshrl.u32 %v13075_v40, 16  ;;  %v5833_v8 = vshll.u32 %v13075_v40, 16  ;;  %v13080_v31 = vpack.c.bf16 %v5620_v21, %v5620_v21  ;;  %v13078_v38 = vpack.c.bf16 %v5618_v33, %v5618_v33  ;;  %v6167_v33 = vld [vmem:[#allocation2 + $0x54] sm:$0xf] }
 0x36c   : > { %v13081_v20 = vpack.c.bf16 %v5621_v5, %v5621_v5  ;;  %v6308_v42 = vld [vmem:[#allocation2 + $0x2c] sm:$0x1]  ;;  %v5853_v52 = vsel %vm17704_vm13, %v5845_v62, %v5852_v49  ;;  %v6158_v45 = vsel %vm17698_vm12, %v5854_v57, %v6157_v56  ;;  %v5588_v4 = vadd.f32 %v14596_v46, %v17678_v7 }
 0x36d   : > { %v6305_v28 = vld [vmem:[#allocation2 + $0x20] sm:$0x1]  ;;  %v5832_v53 = vrot.slane %v5830_v13, 7  ;;  %v6309_v22 = vsel %vm17739_vm14, 0, %v6308_v42  ;;  %6156 = vst [vmem:[#allocation2 + $0x40] sm:$0xf] %v5853_v52 }
 0x36e   : > { %v6306_v1 = vsel %vm17739_vm14, 0, %v6305_v28  ;;  %v6259_v37 = vld [vmem:[#allocation2 + $0x3c] sm:$0x1]  ;;  %6159 = vst [vmem:[#allocation2 + $0x44] sm:$0x1] %v6158_v45  ;;  %v5873_v44 = vshrl.u32 %v13080_v31, 16 }
 0x36f   : > { %v5876_v54 = vshll.u32 %v13080_v31, 16  ;;  %6310 = vst [vmem:[#allocation2 + $0x2c] sm:$0x1] %v6309_v22  ;;  %6307 = vst [vmem:[#allocation2 + $0x20] sm:$0x1] %v6306_v1  ;;  %v6260_v62 = vsel %vm17698_vm12, 0, %v6259_v37  ;;  %v5835_v3 = vor.u32 %v5833_v8, %v5832_v53 }
 0x370   : > { %v5837_v39 = vrot.slane %v5832_v53, 4  ;;  %v5856_v47 = vshrl.u32 %v13078_v38, 16  ;;  %6261 = vst [vmem:[#allocation2 + $0x3c] sm:$0x1] %v6260_v62  ;;  %v6256_v11 = vld [vmem:[#allocation2 + $0x30] sm:$0x1] }
 0x371   : > { %v5875_v50 = vrot.slane %v5873_v44, 7  ;;  %v5859_v40 = vshll.u32 %v13078_v38, 16  ;;  %v5881_v19 = vshrl.u32 %v13081_v20, 16  ;;  %v5884_v46 = vshll.u32 %v13081_v20, 16  ;;  %v14134_v49 = vpop.f32.mrb[20].mxu0 }
 0x372   : > { %v6257_v30 = vsel %vm17698_vm12, 0, %v6256_v11  ;;  %v5836_v56 = vsel %vm17704_vm13, %v5828_v15, %v5835_v3  ;;  %v6151_v21 = vsel %vm17698_vm12, %v5837_v39, %v6150_v12  ;;  %v5858_v5 = vrot.slane %v5856_v47, 7  ;;  %v6160_v8 = vld [vmem:[#allocation2 + $0x48] sm:$0xf]  ;;  %v5464_v20 = vpop.f32.mrb[21].mxu0 }
 0x373   : > { %6258 = vst [vmem:[#allocation2 + $0x30] sm:$0x1] %v6257_v30  ;;  %6149 = vst [vmem:[#allocation2 + $0x34] sm:$0xf] %v5836_v56  ;;  %v5878_v57 = vor.u32 %v5876_v54, %v5875_v50  ;;  %v5879_v13 = vrot.slane %v5875_v50, 4  ;;  %v5883_v31 = vrot.slane %v5881_v19, 7  ;;  %v13079_v38 = vpack.c.bf16 %v5619_v36, %v5619_v36 }
 0x374   : > { %6152 = vst [vmem:[#allocation2 + $0x38] sm:$0x1] %v6151_v21  ;;  %v5861_v42 = vor.u32 %v5859_v40, %v5858_v5  ;;  %v5862_v28 = vrot.slane %v5858_v5, 4  ;;  %v6171_v52 = vld [vmem:[#allocation2 + $0x5c] sm:$0x1]  ;;  %v5624_v45 = vmax.f32 %v5588_v4, 0.0  ;;  %v5586_v15 = vadd.f32 %v14597_v48, %v17678_v7 }
 0x375   : > { %v14135_v53 = vpop.f32.mrb[22].mxu0  ;;  %v6168_v12 = vsel %vm17689_vm11, %v5878_v57, %v6167_v33  ;;  %v5886_v22 = vor.u32 %v5884_v46, %v5883_v31  ;;  %v5888_v1 = vrot.slane %v5883_v31, 4  ;;  %v5864_v37 = vshrl.u32 %v13079_v38, 16  ;;  %v6314_v54 = vld [vmem:[#allocation2 + $0x44] sm:$0x1] }
 0x376   : > { %v17815_v44 = vpop.f32.mrb[23].mxu0  ;;  %6169 = vst [vmem:[#allocation2 + $0x54] sm:$0xf] %v6168_v12  ;;  %v6161_v36 = vsel %vm17689_vm11, %v5861_v42, %v6160_v8  ;;  %v5867_v62 = vshll.u32 %v13079_v38, 16  ;;  %v13084_v3 = vpack.c.bf16 %v5624_v45, %v5624_v45  ;;  %v5622_v39 = vmax.f32 %v5586_v15, 0.0 }
 0x377   : > { %v6315_v48 = vsel %vm17739_vm14, 0, %v6314_v54  ;;  %6162 = vst [vmem:[#allocation2 + $0x48] sm:$0xf] %v6161_v36  ;;  %v5887_v4 = vsel %vm17704_vm13, %v5879_v13, %v5886_v22  ;;  %v6172_v47 = vsel %vm17698_vm12, %v5888_v1, %v6171_v52  ;;  %v5866_v11 = vrot.slane %v5864_v37, 7  ;;  %v6164_v50 = vld [vmem:[#allocation2 + $0x50] sm:$0x1] }
 0x378   : > { %6316 = vst [vmem:[#allocation2 + $0x44] sm:$0x1] %v6315_v48  ;;  %6170 = vst [vmem:[#allocation2 + $0x58] sm:$0xf] %v5887_v4  ;;  %v5907_v40 = vshrl.u32 %v13084_v3, 16  ;;  %v5910_v19 = vshll.u32 %v13084_v3, 16  ;;  %v13082_v46 = vpack.c.bf16 %v5622_v39, %v5622_v39  ;;  %v14598_v30 = vadd.f32 %v17791_v51, %v17647_v17 }
 0x379   : > { %6173 = vst [vmem:[#allocation2 + $0x5c] sm:$0x1] %v6172_v47  ;;  %v5869_v56 = vor.u32 %v5867_v62, %v5866_v11  ;;  %v5871_v21 = vrot.slane %v5866_v11, 4  ;;  %v14599_v33 = vadd.f32 %v17793_v61, %v17649_v32  ;;  %v14600_v5 = vadd.f32 %v14134_v49, %v17651_v60  ;;  %v17830_v57 = vpop.f32.mrb[24].mxu0  ;;  %v6181_v60 = vld [vmem:[#allocation2 + $0x6c] sm:$0xf] }
 0x37a   : > { %v17832_v8 = vrot.slane %v5907_v40, 7  ;;  %v5890_v31 = vshrl.u32 %v13082_v46, 16  ;;  %v5893_v38 = vshll.u32 %v13082_v46, 16  ;;  %v5589_v42 = vadd.f32 %v14598_v30, %v17678_v7  ;;  %v17835_v52 = vpop.f32.mrb[25].mxu0  ;;  %v6174_v61 = vld [vmem:[#allocation2 + $0x60] sm:$0xf] }
 0x37b   : > { %v6311_v13 = vld [vmem:[#allocation2 + $0x38] sm:$0x1]  ;;  %v5870_v51 = vsel %vm17704_vm13, %v5862_v28, %v5869_v56  ;;  %v6165_v32 = vsel %vm17698_vm12, %v5871_v21, %v6164_v50  ;;  %v5587_v49 = vadd.f32 %v14599_v33, %v17678_v7  ;;  %v17844_v45 = vpop.f32.mrb[26].mxu0  ;;  %v5592_v36 = vadd.f32 %v14600_v5, %v17678_v7  ;;  %v17869_v56 = vld [vmem:[#allocation2] sm:$0xf] }
 0x37c   : > { %v6312_v17 = vsel %vm17739_vm14, 0, %v6311_v13  ;;  %6163 = vst [vmem:[#allocation2 + $0x4c] sm:$0xf] %v5870_v51  ;;  %6166 = vst [vmem:[#allocation2 + $0x50] sm:$0x1] %v6165_v32  ;;  %v5912_v15 = vor.u32 %v5910_v19, %v17832_v8  ;;  %v5913_v12 = vrot.slane %v17832_v8, 4  ;;  %v14601_v62 = vadd.f32 %v5464_v20, %v17653_v24 }
 0x37d   : > { %6313 = vst [vmem:[#allocation2 + $0x38] sm:$0x1] %v6312_v17  ;;  %v17848_v22 = vrot.slane %v5890_v31, 7  ;;  %v5625_v1 = vmax.f32 %v5589_v42, 0.0  ;;  %v17850_v28 = vpop.f32.mrb[27].mxu0  ;;  %v5623_v54 = vmax.f32 %v5587_v49, 0.0  ;;  %v14602_v3 = vadd.f32 %v14135_v53, %v17655_v59 }
 0x37e   : > { %v6265_v37 = vld [vmem:[#allocation2 + $0x54] sm:$0x1]  ;;  %v6262_v48 = vld [vmem:[#allocation2 + $0x48] sm:$0x1]  ;;  %v6182_v4 = vsel %vm17689_vm11, %v5912_v15, %v6181_v60  ;;  %v5628_v59 = vmax.f32 %v5592_v36, 0.0  ;;  %v5590_v46 = vadd.f32 %v14601_v62, %v17678_v7  ;;  %v17871_v31 = vpop.f32.mrb[28].mxu0  ;;  %v14603_v32 = vadd.f32 %v17815_v44, %v17657_v35 }
 0x37f   : > { %v6266_v39 = vsel %vm17698_vm12, 0, %v6265_v37  ;;  %v5895_v47 = vor.u32 %v5893_v38, %v17848_v22  ;;  %v5896_v11 = vrot.slane %v17848_v22, 4  ;;  %v6263_v50 = vsel %vm17698_vm12, 0, %v6262_v48  ;;  %6183 = vst [vmem:[#allocation2 + $0x6c] sm:$0xf] %v6182_v4  ;;  %v17875_v60 = vpop.f32.mrb[29].mxu0 }
 0x380   : > { %6267 = vst [vmem:[#allocation2 + $0x54] sm:$0x1] %v6266_v39  ;;  %v6320_v40 = vld [vmem:[#allocation2 + $0x5c] sm:$0x1]  ;;  %v13085_v24 = vpack.c.bf16 %v5625_v1, %v5625_v1  ;;  %v13083_v20 = vpack.c.bf16 %v5623_v54, %v5623_v54  ;;  %6264 = vst [vmem:[#allocation2 + $0x48] sm:$0x1] %v6263_v50  ;;  %v5593_v30 = vadd.f32 %v14602_v3, %v17678_v7 }
 0x381   : > { %v6321_v53 = vsel %vm17739_vm14, 0, %v6320_v40  ;;  %v6175_v19 = vsel %vm17689_vm11, %v5895_v47, %v6174_v61  ;;  %v6185_v38 = vld [vmem:[#allocation2 + $0x74] sm:$0x1]  ;;  %v13088_v42 = vpack.c.bf16 %v5628_v59, %v5628_v59  ;;  %v5626_v17 = vmax.f32 %v5590_v46, 0.0  ;;  %v6178_v54 = vld [vmem:[#allocation2 + $0x68] sm:$0x1] }
 0x382   : > { %6322 = vst [vmem:[#allocation2 + $0x5c] sm:$0x1] %v6321_v53  ;;  %6176 = vst [vmem:[#allocation2 + $0x60] sm:$0xf] %v6175_v19  ;;  %v5915_v21 = vshrl.u32 %v13085_v24, 16  ;;  %v5918_v33 = vshll.u32 %v13085_v24, 16 }
 0x383   : > { %v5898_v5 = vshrl.u32 %v13083_v20, 16  ;;  %v5901_v13 = vshll.u32 %v13083_v20, 16  ;;  %v5629_v51 = vmax.f32 %v5593_v30, 0.0  ;;  %v6317_v61 = vld [vmem:[#allocation2 + $0x50] sm:$0x1]  ;;  %v6429_v22 = vshrl.u32 %v17869_v56, 16 }
 0x384   : > { %v5917_v49 = vrot.slane %v5915_v21, 7  ;;  %v6432_v1 = vshll.u32 %v17869_v56, 16  ;;  %v6318_v37 = vsel %vm17739_vm14, 0, %v6317_v61  ;;  %v5941_v36 = vshrl.u32 %v13088_v42, 16  ;;  %v17881_v39 = vpop.f32.mrb[30].mxu0 }
 0x385   : > { %v5900_v15 = vrot.slane %v5898_v5, 7  ;;  %v5944_v62 = vshll.u32 %v13088_v42, 16  ;;  %v13086_v3 = vpack.c.bf16 %v5626_v17, %v5626_v17  ;;  %6319 = vst [vmem:[#allocation2 + $0x50] sm:$0x1] %v6318_v37  ;;  %v6195_v47 = vld [vmem:[#allocation2 + $0x84] sm:$0xf]  ;;  %v13089_v53 = vpack.c.bf16 %v5629_v51, %v5629_v51 }
 0x386   : > { %v5920_v35 = vor.u32 %v5918_v33, %v5917_v49  ;;  %v5922_v44 = vrot.slane %v5917_v49, 4  ;;  %v17883_v50 = vpop.f32.mrb[31].mxu0  ;;  %v6271_v40 = vld [vmem:[#allocation2 + $0x6c] sm:$0x1]  ;;  %v5943_v24 = vrot.slane %v5941_v36, 7  ;;  %v5591_v61 = vadd.f32 %v14603_v32, %v17678_v7 }
 0x387   : > { %v5903_v48 = vor.u32 %v5901_v13, %v5900_v15  ;;  %v5905_v4 = vrot.slane %v5900_v15, 4  ;;  %v5924_v20 = vshrl.u32 %v13086_v3, 16  ;;  %v5927_v59 = vshll.u32 %v13086_v3, 16  ;;  %v6188_v21 = vld [vmem:[#allocation2 + $0x78] sm:$0xf]  ;;  %v17902_v15 = vpop.f32.mrb[32].mxu0 }
 0x388   : > { %v6272_v19 = vsel %vm17698_vm12, 0, %v6271_v40  ;;  %v5921_v46 = vsel %vm17704_vm13, %v5913_v12, %v5920_v35  ;;  %v6186_v30 = vsel %vm17698_vm12, %v5922_v44, %v6185_v38  ;;  %v6365_v33 = vld [vmem:[#allocation2 + $0x4] sm:$0xf]  ;;  %v5946_v8 = vor.u32 %v5944_v62, %v5943_v24  ;;  %v6366_v12 = vld [vmem:[#allocation2 + $0xc] sm:$0xf]  ;;  %v17908_v3 = vpop.f32.mrb[33].mxu0 }
 0x389   : > { %v5904_v56 = vsel %vm17704_vm13, %v5896_v11, %v5903_v48  ;;  %6273 = vst [vmem:[#allocation2 + $0x6c] sm:$0x1] %v6272_v19  ;;  %v6268_v5 = vld [vmem:[#allocation2 + $0x60] sm:$0x1]  ;;  %6184 = vst [vmem:[#allocation2 + $0x70] sm:$0xf] %v5921_v46  ;;  %v6179_v13 = vsel %vm17698_vm12, %v5905_v4, %v6178_v54 }
 0x38a   : > { %6187 = vst [vmem:[#allocation2 + $0x74] sm:$0x1] %v6186_v30  ;;  %6177 = vst [vmem:[#allocation2 + $0x64] sm:$0xf] %v5904_v56  ;;  %v5947_v42 = vrot.slane %v5943_v24, 4  ;;  %v17897_v17 = vrot.slane %v5924_v20, 7  ;;  %v6196_v37 = vsel %vm17689_vm11, %v5946_v8, %v6195_v47 }
 0x38b   : > { %v6269_v38 = vsel %vm17698_vm12, 0, %v6268_v5  ;;  %6180 = vst [vmem:[#allocation2 + $0x68] sm:$0x1] %v6179_v13  ;;  %v5949_v11 = vshrl.u32 %v13089_v53, 16  ;;  %v5952_v51 = vshll.u32 %v13089_v53, 16  ;;  %v6431_v62 = vrot.slane %v6429_v22, 4 }
 0x38c   : > { %v6412_v49 = vld [vmem:[#allocation2 + $0x8] sm:$0x1]  ;;  %6270 = vst [vmem:[#allocation2 + $0x60] sm:$0x1] %v6269_v38  ;;  %v5929_v54 = vor.u32 %v5927_v59, %v17897_v17  ;;  %v5930_v36 = vrot.slane %v17897_v17, 4  ;;  %v5627_v44 = vmax.f32 %v5591_v61, 0.0  ;;  %v14606_v17 = vadd.f32 %v17844_v45, %v17663_v10 }
 0x38d   : > { %6197 = vst [vmem:[#allocation2 + $0x84] sm:$0xf] %v6196_v37  ;;  %v5951_v35 = vrot.slane %v5949_v11, 7  ;;  %v6434_v48 = vrot.slane %v6432_v1, 5  ;;  %v6438_v4 = vshll.u32 %v6365_v33, 16  ;;  %v17910_v32 = vpop.f32.mrb[34].mxu0 }
 0x38e   : > { %v6189_v40 = vsel %vm17689_vm11, %v5929_v54, %v6188_v21  ;;  %v6199_v24 = vld [vmem:[#allocation2 + $0x8c] sm:$0x1]  ;;  %v6442_v20 = vshrl.u32 %v6365_v33, 16  ;;  %v6448_v47 = vshll.u32 %v6412_v49, 16  ;;  %v6453_v53 = vshrl.u32 %v6366_v12, 16  ;;  %v17914_v59 = vpop.f32.mrb[35].mxu0 }
 0x38f   : > { %6190 = vst [vmem:[#allocation2 + $0x78] sm:$0xf] %v6189_v40  ;;  %v5954_v22 = vor.u32 %v5952_v51, %v5951_v35  ;;  %v5956_v19 = vrot.slane %v5951_v35, 4  ;;  %v13087_v46 = vpack.c.bf16 %v5627_v44, %v5627_v44  ;;  %v6435_v30 = vor.u32 %v6434_v48, %v6431_v62  ;;  %v6367_v56 = vld [vmem:[#allocation2 + $0x10] sm:$0xf] }
 0x390   : > { %v6440_v5 = vrot.slane %v6438_v4, 5  ;;  %v6444_v1 = vrot.slane %v6442_v20, 4  ;;  %v6450_v13 = vrot.slane %v6448_v47, 5  ;;  %v6455_v8 = vrot.slane %v6453_v53, 4  ;;  %v6413_v49 = vld [vmem:[#allocation2 + $0x14] sm:$0x1] }
 0x391   : > { %v6326_v38 = vld [vmem:[#allocation2 + $0x74] sm:$0x1]  ;;  %v5955_v21 = vsel %vm17704_vm13, %v5947_v42, %v5954_v22  ;;  %v6200_v33 = vsel %vm17698_vm12, %v5956_v19, %v6199_v24  ;;  %v5932_v11 = vshrl.u32 %v13087_v46, 16  ;;  %v5935_v61 = vshll.u32 %v13087_v46, 16  ;;  %v6192_v48 = vld [vmem:[#allocation2 + $0x80] sm:$0x1] }
 0x392   : > { %v6327_v51 = vsel %vm17739_vm14, 0, %v6326_v38  ;;  %v6323_v37 = vld [vmem:[#allocation2 + $0x68] sm:$0x1]  ;;  %6198 = vst [vmem:[#allocation2 + $0x88] sm:$0xf] %v5955_v21  ;;  %v6436_v54 = vrot.slane %v6435_v30, 4  ;;  %v6445_v62 = vor.u32 %v6444_v1, %v6440_v5  ;;  %v5597_v10 = vadd.f32 %v14606_v17, %v17678_v7 }
 0x393   : > { %6201 = vst [vmem:[#allocation2 + $0x8c] sm:$0x1] %v6200_v33  ;;  %v6456_v35 = vshll.u32 %v6366_v12, 16  ;;  %6328 = vst [vmem:[#allocation2 + $0x74] sm:$0x1] %v6327_v51  ;;  %v6324_v44 = vsel %vm17739_vm14, 0, %v6323_v37  ;;  %v14604_v37 = vadd.f32 %v17830_v57, %v17659_v18 }
 0x394   : > { %v5934_v42 = vrot.slane %v5932_v11, 7  ;;  %v6462_v4 = vshll.u32 %v6367_v56, 16  ;;  %v6466_v40 = vshrl.u32 %v6367_v56, 16  ;;  %6325 = vst [vmem:[#allocation2 + $0x68] sm:$0x1] %v6324_v44  ;;  %v6441_v20 = vsel %vm15847_vm2, %v6436_v54, %v6440_v5 }
 0x395   : > { %v6277_v24 = vld [vmem:[#allocation2 + $0x84] sm:$0x1]  ;;  %v6446_v47 = vrot.slane %v6445_v62, 4  ;;  %v6458_v53 = vrot.slane %v6456_v35, 5  ;;  %v6472_v22 = vshll.u32 %v6413_v49, 16  ;;  %v14605_v54 = vadd.f32 %v17835_v52, %v17661_v2 }
 0x396   : > { %v6278_v19 = vsel %vm17698_vm12, 0, %v6277_v24  ;;  %v5937_v12 = vor.u32 %v5935_v61, %v5934_v42  ;;  %v5939_v46 = vrot.slane %v5934_v42, 4  ;;  %v6464_v30 = vrot.slane %v6462_v4, 5  ;;  %v6274_v1 = vld [vmem:[#allocation2 + $0x78] sm:$0x1] }
 0x397   : > { %6279 = vst [vmem:[#allocation2 + $0x84] sm:$0x1] %v6278_v19  ;;  %v6451_v38 = vsel %vm15847_vm2, %v6446_v47, %v6450_v13  ;;  %v6459_v56 = vor.u32 %v6458_v53, %v6455_v8  ;;  %v6468_v21 = vrot.slane %v6466_v40, 4  ;;  %v6474_v33 = vrot.slane %v6472_v22, 5  ;;  %v6368_v11 = vld [vmem:[#allocation2 + $0x18] sm:$0xf] }
 0x398   : > { %v6275_v5 = vsel %vm17698_vm12, 0, %v6274_v1  ;;  %v5938_v49 = vsel %vm17704_vm13, %v5930_v36, %v5937_v12  ;;  %v6193_v61 = vsel %vm17698_vm12, %v5939_v46, %v6192_v48  ;;  %v12716_v51 = vcombine.low %v6441_v20, %v6451_v38  ;;  %v6369_v35 = vld [vmem:[#allocation2 + $0x1c] sm:$0xf]  ;;  %v15347_v12 = vld [vmem:[#allocation3 + $0x8] sm:$0xff]  }
 0x399   : > { %6276 = vst [vmem:[#allocation2 + $0x78] sm:$0x1] %v6275_v5  ;;  %6191 = vst [vmem:[#allocation2 + $0x7c] sm:$0xf] %v5938_v49  ;;  %v6460_v13 = vrot.slane %v6459_v56, 4  ;;  %v6469_v8 = vor.u32 %v6468_v21, %v6464_v30  ;;  %v14607_v36 = vadd.f32 %v17850_v28, %v17665_v55  ;;  %v6477_v44 = vshrl.u32 %v6368_v11, 16 }
 0x39a   : > { %6194 = vst [vmem:[#allocation2 + $0x80] sm:$0x1] %v6193_v61  ;;  %v6332_v62 = vld [vmem:[#allocation2 + $0x8c] sm:$0x1]  ;;  %14164 = vmatprep.mubr.bf16.mxu1 %v12716_v51  ;;  %v6480_v42 = vshll.u32 %v6368_v11, 16  ;;  %v5596_v2 = vadd.f32 %v14604_v37, %v17678_v7  ;;  %v5594_v52 = vadd.f32 %v14605_v54, %v17678_v7  ;;  %v6486_v20 = vshll.u32 %v6369_v35, 16 }
 0x39b   : > { %v6333_v48 = vsel %vm17739_vm14, 0, %v6332_v62  ;;  %v6465_v18 = vsel %vm15847_vm2, %v6460_v13, %v6464_v30  ;;  %v6470_v57 = vrot.slane %v6469_v8, 4  ;;  %v5595_v45 = vadd.f32 %v14607_v36, %v17678_v7  ;;  %v6414_v55 = vld [vmem:[#allocation2 + $0x20] sm:$0x1]  ;;  %v15502_v61 = vld [vmem:[#allocation3] sm:$0xff]  }
 0x39c   : > { %6334 = vst [vmem:[#allocation2 + $0x8c] sm:$0x1] %v6333_v48  ;;  %v6479_v28 = vrot.slane %v6477_v44, 4  ;;  %v5632_v40 = vmax.f32 %v5596_v2, 0.0  ;;  %v6482_v24 = vrot.slane %v6480_v42, 5  ;;  %v5630_v53 = vmax.f32 %v5594_v52, 0.0 }
 0x39d   : > { %v6475_v4 = vsel %vm15847_vm2, %v6470_v57, %v6474_v33  ;;  %v5633_v22 = vmax.f32 %v5597_v10, 0.0  ;;  %v5631_v19 = vmax.f32 %v5595_v45, 0.0  ;;  %v17956_v1 = vrot.slane %v6486_v20, 5  ;;  %v15348_v33 = vld [vmem:[#allocation3 + $0x10] sm:$0xff]   ;;  %v6370_v37 = vld [vmem:[#allocation2 + $0x24] sm:$0xf] }
 0x39e   : > { %v12717_v47 = vcombine.low %v6465_v18, %v6475_v4  ;;  %v13092_v46 = vpack.c.bf16 %v5632_v40, %v5632_v40  ;;  %v6483_v30 = vor.u32 %v6482_v24, %v6479_v28  ;;  %v6490_v38 = vshrl.u32 %v6369_v35, 16  ;;  %v6209_v54 = vld [vmem:[#allocation2 + $0x9c] sm:$0xf]  ;;  %v6202_v42 = vld [vmem:[#allocation2 + $0x90] sm:$0xf] }
 0x39f   : > { %v13090_v7 = vpack.c.bf16 %v5630_v53, %v5630_v53  ;;  %v13093_v21 = vpack.c.bf16 %v5633_v22, %v5633_v22  ;;  %v13091_v11 = vpack.c.bf16 %v5631_v19, %v5631_v19  ;;  %v6496_v5 = vshll.u32 %v6414_v55, 16  ;;  %v6213_v48 = vld [vmem:[#allocation2 + $0xa4] sm:$0x1]  ;;  %v6206_v45 = vld [vmem:[#allocation2 + $0x98] sm:$0x1] }
 0x3a0   : > { %14165 = vmatmul.mubr.bf16.vlgmr.msra.gmra.mrb[20].mxu1 %v12717_v47  ;;  %v5975_v51 = vshrl.u32 %v13092_v46, 16  ;;  %v5978_v13 = vshll.u32 %v13092_v46, 16  ;;  %v17960_v8 = vrot.slane %v6483_v30, 4  ;;  %v6492_v55 = vrot.slane %v6490_v38, 4  ;;  %v15349_v47 = vld [vmem:[#allocation3 + $0x18] sm:$0xff]  }
 0x3a1   : > { %v6329_v56 = vld [vmem:[#allocation2 + $0x80] sm:$0x1]  ;;  %14197 = vmatpush3.bf16.msra.mxu1 %v15502_v61  ;;  %v5958_v62 = vshrl.u32 %v13090_v7, 16  ;;  %v5961_v17 = vshll.u32 %v13090_v7, 16  ;;  %v5983_v36 = vshrl.u32 %v13093_v21, 16  ;;  %v5986_v35 = vshll.u32 %v13093_v21, 16 }
 0x3a2   : > { %v6330_v49 = vsel %vm17739_vm14, 0, %v6329_v56  ;;  %14198 = vmatprep.subr.bf16.mxu1 %v15347_v12  ;;  %v5977_v44 = vrot.slane %v5975_v51, 7  ;;  %v5966_v18 = vshrl.u32 %v13091_v11, 16  ;;  %v5969_v57 = vshll.u32 %v13091_v11, 16  ;;  %v6371_v30 = vld [vmem:[#allocation2 + $0x28] sm:$0xf] }
 0x3a3   : > { %6331 = vst [vmem:[#allocation2 + $0x80] sm:$0x1] %v6330_v49  ;;  %v6489_v2 = vsel %vm15847_vm2, %v17960_v8, %v17956_v1  ;;  %v5960_v52 = vrot.slane %v5958_v62, 7  ;;  %v5985_v10 = vrot.slane %v5983_v36, 7  ;;  %v6498_v28 = vrot.slane %v6496_v5, 5 }
 0x3a4   : > { %v5980_v4 = vor.u32 %v5978_v13, %v5977_v44  ;;  %v5981_v40 = vrot.slane %v5977_v44, 4  ;;  %v5968_v24 = vrot.slane %v5966_v18, 7  ;;  %v6501_v20 = vshrl.u32 %v6370_v37, 16  ;;  %v6415_v11 = vld [vmem:[#allocation2 + $0x2c] sm:$0x1] }
 0x3a5   : > { %14199 = vmatpush3.bf16.msra.mxu1 %v15347_v12  ;;  %v5963_v53 = vor.u32 %v5961_v17, %v5960_v52  ;;  %v5964_v22 = vrot.slane %v5960_v52, 4  ;;  %v5988_v19 = vor.u32 %v5986_v35, %v5985_v10  ;;  %v5990_v46 = vrot.slane %v5985_v10, 4  ;;  %v15350_v35 = vld [vmem:[#allocation3 + $0x20] sm:$0xff]  }
 0x3a6   : > { %14200 = vmatprep.subr.bf16.mxu1 %v15348_v33  ;;  %v6210_v56 = vsel %vm17689_vm11, %v5980_v4, %v6209_v54  ;;  %v5971_v7 = vor.u32 %v5969_v57, %v5968_v24  ;;  %v5973_v21 = vrot.slane %v5968_v24, 4  ;;  %v6493_v38 = vor.u32 %v6492_v55, %v17956_v1 }
 0x3a7   : > { %6211 = vst [vmem:[#allocation2 + $0x9c] sm:$0xf] %v6210_v56  ;;  %v6203_v5 = vsel %vm17689_vm11, %v5963_v53, %v6202_v42  ;;  %v5989_v12 = vsel %vm17704_vm13, %v5981_v40, %v5988_v19  ;;  %v6214_v49 = vsel %vm17698_vm12, %v5990_v46, %v6213_v48  ;;  %v6503_v61 = vrot.slane %v6501_v20, 4 }
 0x3a8   : > { %6204 = vst [vmem:[#allocation2 + $0x90] sm:$0xf] %v6203_v5  ;;  %6212 = vst [vmem:[#allocation2 + $0xa0] sm:$0xf] %v5989_v12  ;;  %v5972_v51 = vsel %vm17704_vm13, %v5964_v22, %v5971_v7  ;;  %v6207_v1 = vsel %vm17698_vm12, %v5973_v21, %v6206_v45  ;;  %v6494_v13 = vrot.slane %v6493_v38, 4  ;;  %v6504_v8 = vshll.u32 %v6370_v37, 16 }
 0x3a9   : > { %6215 = vst [vmem:[#allocation2 + $0xa4] sm:$0x1] %v6214_v49  ;;  %14201 = vmatpush3.bf16.msra.mxu1 %v15348_v33  ;;  %6205 = vst [vmem:[#allocation2 + $0x94] sm:$0xf] %v5972_v51  ;;  %v6510_v54 = vshll.u32 %v6371_v30, 16  ;;  %v6514_v62 = vshrl.u32 %v6371_v30, 16  ;;  %v14608_v36 = vadd.f32 %v17871_v31, %v17667_v43  ;;  %v14609_v48 = vadd.f32 %v17875_v60, %v17669_v25 }
 0x3aa   : > { %6208 = vst [vmem:[#allocation2 + $0x98] sm:$0x1] %v6207_v1  ;;  %v6520_v17 = vshll.u32 %v6415_v11, 16  ;;  %14202 = vmatprep.subr.bf16.mxu1 %v15349_v47  ;;  %v6499_v44 = vsel %vm15847_vm2, %v6494_v13, %v6498_v28  ;;  %v6506_v42 = vrot.slane %v6504_v8, 5  ;;  %v14610_v33 = vadd.f32 %v17881_v39, %v17671_v41  ;;  %v17987_v37 = vld [vmem:[#allocation2 + $0x30] sm:$0xf] }
 0x3ab   : > { %v12718_v18 = vcombine.low %v6489_v2, %v6499_v44  ;;  %v6512_v57 = vrot.slane %v6510_v54, 5  ;;  %v6516_v52 = vrot.slane %v6514_v62, 4  ;;  %v17992_v43 = vld [vmem:[%s19706_s2] ss:$0 sm:$0xff]  ;;  %v14611_v60 = vadd.f32 %v17883_v50, %v17673_v34  ;;  %v18018_v1 = vld [vmem:[#allocation2 + $0x34] sm:$0xf] }
 0x3ac   : > { %v6522_v10 = vrot.slane %v6520_v17, 5  ;;  %v6507_v45 = vor.u32 %v6506_v42, %v6503_v61  ;;  %v5600_v31 = vadd.f32 %v17992_v43, %v14608_v36  ;;  %v5598_v55 = vadd.f32 %v17992_v43, %v14609_v48  ;;  %v15351_v28 = vld [vmem:[#allocation3 + $0x28] sm:$0xff]   ;;  %v15352_v13 = vld [vmem:[#allocation3 + $0x30] sm:$0xff]   ;;  %v6223_v8 = vld [vmem:[#allocation2 + $0xb4] sm:$0xf] }
 0x3ad   : > { %v5601_v25 = vadd.f32 %v17992_v43, %v14610_v33  ;;  %14203 = vmatpush3.bf16.msra.mxu1 %v15349_v47  ;;  %14168 = vmatprep.mubr.bf16.mxu1 %v12718_v18  ;;  %v6517_v41 = vor.u32 %v6516_v52, %v6512_v57  ;;  %v6525_v39 = vshrl.u32 %v17987_v37, 16  ;;  %v6528_v2 = vshll.u32 %v17987_v37, 16  ;;  %v6216_v44 = vld [vmem:[#allocation2 + $0xa8] sm:$0xf] }
 0x3ae   : > { %14204 = vmatprep.subr.bf16.mxu1 %v15350_v35  ;;  %v6283_v4 = vld [vmem:[#allocation2 + $0x9c] sm:$0x1]  ;;  %v6508_v40 = vrot.slane %v6507_v45, 4  ;;  %v5636_v24 = vmax.f32 %v5600_v31, 0.0  ;;  %v5634_v20 = vmax.f32 %v5598_v55, 0.0  ;;  %v5599_v30 = vadd.f32 %v17992_v43, %v14611_v60  ;;  %v15353_v60 = vld [vmem:[#allocation3 + $0x38] sm:$0xff]  }
 0x3af   : > { %v5637_v53 = vmax.f32 %v5601_v25, 0.0  ;;  %v6284_v22 = vsel %vm17698_vm12, 0, %v6283_v4  ;;  %v6280_v47 = vld [vmem:[#allocation2 + $0x90] sm:$0x1]  ;;  %v6518_v46 = vrot.slane %v6517_v41, 4  ;;  %v18006_v34 = vadd.f32 %v17902_v15, %v17680_v63 }
 0x3b0   : > { %v6338_v19 = vld [vmem:[#allocation2 + $0xa4] sm:$0x1]  ;;  %6285 = vst [vmem:[#allocation2 + $0x9c] sm:$0x1] %v6284_v22  ;;  %v6281_v50 = vsel %vm17698_vm12, 0, %v6280_v47  ;;  %v6513_v21 = vsel %vm15847_vm2, %v6508_v40, %v6512_v57  ;;  %v13096_v38 = vpack.c.bf16 %v5636_v24, %v5636_v24  ;;  %v13094_v15 = vpack.c.bf16 %v5634_v20, %v5634_v20 }
 0x3b1   : > { %v6339_v56 = vsel %vm17739_vm14, 0, %v6338_v19  ;;  %v6335_v7 = vld [vmem:[#allocation2 + $0x98] sm:$0x1]  ;;  %14205 = vmatpush3.bf16.msra.mxu1 %v15350_v35  ;;  %6282 = vst [vmem:[#allocation2 + $0x90] sm:$0x1] %v6281_v50  ;;  %v6523_v63 = vsel %vm15847_vm2, %v6518_v46, %v6522_v10  ;;  %v13097_v5 = vpack.c.bf16 %v5637_v53, %v5637_v53  ;;  %v5635_v51 = vmax.f32 %v5599_v30, 0.0 }
 0x3b2   : > { %6340 = vst [vmem:[#allocation2 + $0xa4] sm:$0x1] %v6339_v56  ;;  %v6336_v11 = vsel %vm17739_vm14, 0, %v6335_v7  ;;  %14206 = vmatprep.subr.bf16.mxu1 %v15351_v28  ;;  %v12719_v12 = vcombine.low %v6513_v21, %v6523_v63  ;;  %v6009_v49 = vshrl.u32 %v13096_v38, 16  ;;  %v6012_v61 = vshll.u32 %v13096_v38, 16 }
 0x3b3   : > { %6337 = vst [vmem:[#allocation2 + $0x98] sm:$0x1] %v6336_v11  ;;  %v5992_v54 = vshrl.u32 %v13094_v15, 16  ;;  %v5995_v62 = vshll.u32 %v13094_v15, 16  ;;  %v6017_v17 = vshrl.u32 %v13097_v5, 16  ;;  %v6020_v36 = vshll.u32 %v13097_v5, 16 }
 0x3b4   : > { %14169 = vmatmul.mubr.bf16.gmra.mrb[24].mxu1 %v12719_v12  ;;  %v6011_v35 = vrot.slane %v6009_v49, 7  ;;  %v13095_v42 = vpack.c.bf16 %v5635_v51, %v5635_v51  ;;  %v6527_v48 = vrot.slane %v6525_v39, 4  ;;  %v6530_v33 = vrot.slane %v6528_v2, 5  ;;  %v6227_v55 = vld [vmem:[#allocation2 + $0xbc] sm:$0x1] }
 0x3b5   : > { %v5994_v18 = vrot.slane %v5992_v54, 7  ;;  %v6019_v57 = vrot.slane %v6017_v17, 7  ;;  %v6534_v52 = vshll.u32 %v18018_v1, 16  ;;  %v6538_v10 = vshrl.u32 %v18018_v1, 16  ;;  %14207 = vmatpush3.bf16.msra.mxu1 %v15351_v28  ;;  %v6416_v39 = vld [vmem:[#allocation2 + $0x38] sm:$0x1] }
 0x3b6   : > { %v6014_v45 = vor.u32 %v6012_v61, %v6011_v35  ;;  %v6015_v31 = vrot.slane %v6011_v35, 4  ;;  %v6000_v25 = vshrl.u32 %v13095_v42, 16  ;;  %v6003_v41 = vshll.u32 %v13095_v42, 16  ;;  %14208 = vmatprep.subr.bf16.mxu1 %v15352_v13  ;;  %v18024_v19 = vld [vmem:[#allocation2 + $0x3c] sm:$0xf] }
 0x3b7   : > { %v5997_v4 = vor.u32 %v5995_v62, %v5994_v18  ;;  %v5998_v40 = vrot.slane %v5994_v18, 4  ;;  %v6022_v24 = vor.u32 %v6020_v36, %v6019_v57  ;;  %v6024_v20 = vrot.slane %v6019_v57, 4  ;;  %v18026_v28 = vld [vmem:[#allocation2 + $0x40] sm:$0xf]  ;;  %v6220_v56 = vld [vmem:[#allocation2 + $0xb0] sm:$0x1] }
 0x3b8   : > { %v6224_v2 = vsel %vm17689_vm11, %v6014_v45, %v6223_v8  ;;  %v6002_v53 = vrot.slane %v6000_v25, 7  ;;  %v6531_v22 = vor.u32 %v6530_v33, %v6527_v48  ;;  %v6536_v47 = vrot.slane %v6534_v52, 5  ;;  %v18034_v15 = vld [vmem:[#allocation3 + $0x80] sm:$0xff]   ;;  %v6417_v12 = vld [vmem:[#allocation2 + $0x44] sm:$0x1] }
 0x3b9   : > { %6225 = vst [vmem:[#allocation2 + $0xb4] sm:$0xf] %v6224_v2  ;;  %v6217_v46 = vsel %vm17689_vm11, %v5997_v4, %v6216_v44  ;;  %v6023_v30 = vsel %vm17704_vm13, %v6015_v31, %v6022_v24  ;;  %v6228_v50 = vsel %vm17698_vm12, %v6024_v20, %v6227_v55  ;;  %v6540_v7 = vrot.slane %v6538_v10, 4  ;;  %14209 = vmatpush3.bf16.msra.mxu1 %v15352_v13  ;;  %v18057_v31 = vld [vmem:[#allocation2 + $0x48] sm:$0xf] }
 0x3ba   : > { %6218 = vst [vmem:[#allocation2 + $0xa8] sm:$0xf] %v6217_v46  ;;  %6226 = vst [vmem:[#allocation2 + $0xb8] sm:$0xf] %v6023_v30  ;;  %v6005_v21 = vor.u32 %v6003_v41, %v6002_v53  ;;  %v6007_v38 = vrot.slane %v6002_v53, 4  ;;  %v6532_v11 = vrot.slane %v6531_v22, 4  ;;  %14210 = vmatprep.subr.bf16.mxu1 %v15353_v60  ;;  %v5604_v33 = vadd.f32 %v17992_v43, %v18006_v34 }
 0x3bb   : > { %6229 = vst [vmem:[#allocation2 + $0xbc] sm:$0x1] %v6228_v50  ;;  %v6544_v63 = vshll.u32 %v6416_v39, 16  ;;  %v6541_v5 = vor.u32 %v6540_v7, %v6536_v47  ;;  %v6549_v49 = vshrl.u32 %v18024_v19, 16  ;;  %v6552_v61 = vshll.u32 %v18024_v19, 16 }
 0x3bc   : > { %v6558_v51 = vshll.u32 %v18026_v28, 16  ;;  %v6006_v13 = vsel %vm17704_vm13, %v5998_v40, %v6005_v21  ;;  %v6221_v8 = vsel %vm17698_vm12, %v6007_v38, %v6220_v56  ;;  %v6537_v54 = vsel %vm15847_vm2, %v6532_v11, %v6536_v47 }
 0x3bd   : > { %v6546_v62 = vrot.slane %v6544_v63, 5  ;;  %6219 = vst [vmem:[#allocation2 + $0xac] sm:$0xf] %v6006_v13  ;;  %6222 = vst [vmem:[#allocation2 + $0xb0] sm:$0x1] %v6221_v8  ;;  %v6542_v17 = vrot.slane %v6541_v5, 4  ;;  %14211 = vmatpush3.bf16.msra.mxu1 %v15353_v60  ;;  %v14613_v18 = vadd.f32 %v17908_v3, %v17694_v9  ;;  %v14614_v10 = vadd.f32 %v17910_v32, %v17708_v6 }
 0x3be   : > { %v6551_v36 = vrot.slane %v6549_v49, 4  ;;  %v6554_v35 = vrot.slane %v6552_v61, 5  ;;  %v6560_v44 = vrot.slane %v6558_v51, 5  ;;  %v6562_v42 = vshrl.u32 %v18026_v28, 16  ;;  %14244 = vmatprep.subr.bf16.mxu1 %v18034_v15  ;;  %v6237_v51 = vld [vmem:[#allocation2 + $0xcc] sm:$0xf] }
 0x3bf   : > { %v6568_v48 = vshll.u32 %v6417_v12, 16  ;;  %v6547_v57 = vsel %vm15847_vm2, %v6542_v17, %v6546_v62  ;;  %v14615_v45 = vadd.f32 %v17914_v59, %v17712_v26  ;;  %v5640_v60 = vmax.f32 %v5604_v33, 0.0  ;;  %v18075_v12 = vld [vmem:[#allocation2 + $0x4c] sm:$0xf]  ;;  %v6241_v33 = vld [vmem:[#allocation2 + $0xd4] sm:$0x1] }
 0x3c0   : > { %v6555_v52 = vor.u32 %v6554_v35, %v6551_v36  ;;  %v6289_v55 = vld [vmem:[#allocation2 + $0xb4] sm:$0x1]  ;;  %v12720_v25 = vcombine.low %v6537_v54, %v6547_v57  ;;  %v6564_v34 = vrot.slane %v6562_v42, 4  ;;  %v5602_v24 = vadd.f32 %v17992_v43, %v14613_v18  ;;  %v6230_v36 = vld [vmem:[#allocation2 + $0xc0] sm:$0xf] }
 0x3c1   : > { %v6570_v41 = vrot.slane %v6568_v48, 5  ;;  %v6290_v9 = vsel %vm17698_vm12, 0, %v6289_v55  ;;  %v6286_v3 = vld [vmem:[#allocation2 + $0xa8] sm:$0x1]  ;;  %v5605_v6 = vadd.f32 %v17992_v43, %v14614_v10  ;;  %v13100_v20 = vpack.c.bf16 %v5640_v60, %v5640_v60  ;;  %v18081_v55 = vld [vmem:[#allocation2 + $0x50] sm:$0x1] }
 0x3c2   : > { %v6344_v4 = vld [vmem:[#allocation2 + $0xbc] sm:$0x1]  ;;  %v6556_v40 = vrot.slane %v6555_v52, 4  ;;  %6291 = vst [vmem:[#allocation2 + $0xb4] sm:$0x1] %v6290_v9  ;;  %v6287_v26 = vsel %vm17698_vm12, 0, %v6286_v3  ;;  %14172 = vmatprep.mubr.bf16.mxu1 %v12720_v25  ;;  %v6565_v59 = vor.u32 %v6564_v34, %v6560_v44  ;;  %v5603_v22 = vadd.f32 %v17992_v43, %v14615_v45 }
 0x3c3   : > { %v6345_v32 = vsel %vm17739_vm14, 0, %v6344_v4  ;;  %6288 = vst [vmem:[#allocation2 + $0xa8] sm:$0x1] %v6287_v26  ;;  %v5638_v2 = vmax.f32 %v5602_v24, 0.0  ;;  %v5641_v53 = vmax.f32 %v5605_v6, 0.0  ;;  %v6043_v30 = vshrl.u32 %v13100_v20, 16 }
 0x3c4   : > { %6346 = vst [vmem:[#allocation2 + $0xbc] sm:$0x1] %v6345_v32  ;;  %v6561_v39 = vsel %vm15847_vm2, %v6556_v40, %v6560_v44  ;;  %v6341_v47 = vld [vmem:[#allocation2 + $0xb0] sm:$0x1]  ;;  %v6566_v46 = vrot.slane %v6565_v59, 4  ;;  %v6046_v50 = vshll.u32 %v13100_v20, 16 }
 0x3c5   : > { %v6573_v56 = vshrl.u32 %v18057_v31, 16  ;;  %v6342_v7 = vsel %vm17739_vm14, 0, %v6341_v47  ;;  %v13098_v21 = vpack.c.bf16 %v5638_v2, %v5638_v2  ;;  %v13101_v38 = vpack.c.bf16 %v5641_v53, %v5641_v53  ;;  %v18084_v34 = vld [vmem:[#allocation2 + $0x58] sm:$0xf]  ;;  %v18086_v4 = vld [vmem:[#allocation2 + $0x54] sm:$0xf] }
 0x3c6   : > { %v5639_v11 = vmax.f32 %v5603_v22, 0.0  ;;  %6343 = vst [vmem:[#allocation2 + $0xb0] sm:$0x1] %v6342_v7  ;;  %v6571_v63 = vsel %vm15847_vm2, %v6566_v46, %v6570_v41  ;;  %v6045_v5 = vrot.slane %v6043_v30, 7  ;;  %v6576_v49 = vshll.u32 %v18057_v31, 16 }
 0x3c7   : > { %v6575_v43 = vrot.slane %v6573_v56, 4  ;;  %v12721_v61 = vcombine.low %v6561_v39, %v6571_v63  ;;  %v6026_v13 = vshrl.u32 %v13098_v21, 16  ;;  %v6029_v8 = vshll.u32 %v13098_v21, 16  ;;  %v6234_v39 = vld [vmem:[#allocation2 + $0xc8] sm:$0x1] }
 0x3c8   : > { %v6051_v54 = vshrl.u32 %v13101_v38, 16  ;;  %v6048_v62 = vor.u32 %v6046_v50, %v6045_v5  ;;  %v6049_v17 = vrot.slane %v6045_v5, 4  ;;  %v6054_v35 = vshll.u32 %v13101_v38, 16  ;;  %v18095_v30 = vld [vmem:[#allocation2 + $0x5c] sm:$0x1] }
 0x3c9   : > { %v13099_v44 = vpack.c.bf16 %v5639_v11, %v5639_v11  ;;  %14173 = vmatmul.mubr.bf16.gmra.mrb[28].mxu1 %v12721_v61  ;;  %v6028_v42 = vrot.slane %v6026_v13, 7  ;;  %v6578_v18 = vrot.slane %v6576_v49, 5  ;;  %v6582_v57 = vshll.u32 %v18075_v12, 16  ;;  %v18101_v21 = vld [vmem:[#allocation2 + $0x60] sm:$0xf] }
 0x3ca   : > { %v6053_v48 = vrot.slane %v6051_v54, 7  ;;  %v6238_v52 = vsel %vm17689_vm11, %v6048_v62, %v6237_v51  ;;  %v6586_v25 = vshrl.u32 %v18075_v12, 16  ;;  %v6592_v2 = vshll.u32 %v18081_v55, 16  ;;  %v18110_v13 = vld [vmem:[#allocation2 + $0x64] sm:$0xf] }
 0x3cb   : > { %v6034_v10 = vshrl.u32 %v13099_v44, 16  ;;  %v6037_v45 = vshll.u32 %v13099_v44, 16  ;;  %6239 = vst [vmem:[#allocation2 + $0xcc] sm:$0xf] %v6238_v52  ;;  %v6031_v41 = vor.u32 %v6029_v8, %v6028_v42  ;;  %v6032_v60 = vrot.slane %v6028_v42, 4 }
 0x3cc   : > { %v6056_v9 = vor.u32 %v6054_v35, %v6053_v48  ;;  %v6058_v3 = vrot.slane %v6053_v48, 4  ;;  %v6579_v24 = vor.u32 %v6578_v18, %v6575_v43  ;;  %v6584_v6 = vrot.slane %v6582_v57, 5  ;;  %v18119_v48 = vld [vmem:[#allocation2 + $0x6c] sm:$0xf]  ;;  %v18123_v57 = vld [vmem:[#allocation2 + $0x68] sm:$0x1] }
 0x3cd   : > { %v6036_v40 = vrot.slane %v6034_v10, 7  ;;  %v6588_v26 = vrot.slane %v6586_v25, 4  ;;  %v6231_v32 = vsel %vm17689_vm11, %v6031_v41, %v6230_v36  ;;  %v6594_v27 = vrot.slane %v6592_v2, 5 }
 0x3ce   : > { %v6057_v59 = vsel %vm17704_vm13, %v6049_v17, %v6056_v9  ;;  %v6242_v20 = vsel %vm17698_vm12, %v6058_v3, %v6241_v33  ;;  %6232 = vst [vmem:[#allocation2 + $0xc0] sm:$0xf] %v6231_v32  ;;  %v6580_v47 = vrot.slane %v6579_v24, 4  ;;  %v6597_v50 = vshrl.u32 %v18086_v4, 16  ;;  %v18121_v33 = vld [vmem:[#allocation2 + $0x70] sm:$0xf] }
 0x3cf   : > { %6240 = vst [vmem:[#allocation2 + $0xd0] sm:$0xf] %v6057_v59  ;;  %6243 = vst [vmem:[#allocation2 + $0xd4] sm:$0x1] %v6242_v20  ;;  %v6039_v53 = vor.u32 %v6037_v45, %v6036_v40  ;;  %v6041_v22 = vrot.slane %v6036_v40, 4  ;;  %v6589_v46 = vor.u32 %v6588_v26, %v6584_v6  ;;  %v6600_v56 = vshll.u32 %v18086_v4, 16 }
 0x3d0   : > { %6362 = vst [vmem:[#allocation2 + $0xd0] sm:$0xf] %v15665_v0  ;;  %v6606_v7 = vshll.u32 %v18084_v34, 16  ;;  %v6585_v63 = vsel %vm15847_vm2, %v6580_v47, %v6584_v6  ;;  %v6599_v43 = vrot.slane %v6597_v50, 4  ;;  %v6610_v51 = vshrl.u32 %v18084_v34, 16 }
 0x3d1   : > { %v6040_v38 = vsel %vm17704_vm13, %v6032_v60, %v6039_v53  ;;  %v6235_v11 = vsel %vm17698_vm12, %v6041_v22, %v6234_v39  ;;  %v6590_v5 = vrot.slane %v6589_v46, 4  ;;  %v6602_v49 = vrot.slane %v6600_v56, 5  ;;  %v18132_v32 = vld [vmem:[#allocation2 + $0x74] sm:$0x1]  ;;  %v18137_v53 = vld [vmem:[#allocation2 + $0x78] sm:$0xf] }
 0x3d2   : > { %6233 = vst [vmem:[#allocation2 + $0xc4] sm:$0xf] %v6040_v38  ;;  %6236 = vst [vmem:[#allocation2 + $0xc8] sm:$0x1] %v6235_v11  ;;  %v6608_v61 = vrot.slane %v6606_v7, 5  ;;  %v6616_v54 = vshll.u32 %v18095_v30, 16 }
 0x3d3   : > { %v6295_v8 = vld [vmem:[#allocation2 + $0xcc] sm:$0x1]  ;;  %v6595_v14 = vsel %vm15847_vm2, %v6590_v5, %v6594_v27  ;;  %v6621_v62 = vshrl.u32 %v18101_v21, 16  ;;  %v6624_v17 = vshll.u32 %v18101_v21, 16  ;;  %v6603_v44 = vor.u32 %v6602_v49, %v6599_v43  ;;  %v18147_v11 = vld [vmem:[#allocation2 + $0x7c] sm:$0xf] }
 0x3d4   : > { %v6296_v36 = vsel %vm17698_vm12, 0, %v6295_v8  ;;  %v12722_v35 = vcombine.low %v6585_v63, %v6595_v14  ;;  %v6612_v42 = vrot.slane %v6610_v51, 4  ;;  %v6618_v18 = vrot.slane %v6616_v54, 5  ;;  %v18153_v14 = vld [vmem:[#allocation2 + $0x80] sm:$0x1] }
 0x3d5   : > { %6297 = vst [vmem:[#allocation2 + $0xcc] sm:$0x1] %v6296_v36  ;;  %v6623_v52 = vrot.slane %v6621_v62, 4  ;;  %v6626_v10 = vrot.slane %v6624_v17, 5  ;;  %v6630_v45 = vshll.u32 %v18110_v13, 16  ;;  %v6604_v60 = vrot.slane %v6603_v44, 4 }
 0x3d6   : > { %6361 = vst [vmem:[#allocation2 + $0xcc] sm:$0xf] %v15665_v0  ;;  %v6292_v25 = vld [vmem:[#allocation2 + $0xc0] sm:$0x1]  ;;  %v6350_v41 = vld [vmem:[#allocation2 + $0xd4] sm:$0x1]  ;;  %14176 = vmatprep.mubr.bf16.mxu1 %v12722_v35  ;;  %v6613_v9 = vor.u32 %v6612_v42, %v6608_v61 }
 0x3d7   : > { %v6634_v3 = vshrl.u32 %v18110_v13, 16  ;;  %v6293_v40 = vsel %vm17698_vm12, 0, %v6292_v25  ;;  %v6351_v24 = vsel %vm17739_vm14, 0, %v6350_v41  ;;  %v6627_v6 = vor.u32 %v6626_v10, %v6623_v52  ;;  %v18158_v36 = vld [vmem:[#allocation2 + $0x88] sm:$0xf] }
 0x3d8   : > { %v6632_v26 = vrot.slane %v6630_v45, 5  ;;  %6294 = vst [vmem:[#allocation2 + $0xc0] sm:$0x1] %v6293_v40  ;;  %6352 = vst [vmem:[#allocation2 + $0xd4] sm:$0x1] %v6351_v24  ;;  %v6609_v59 = vsel %vm15847_vm2, %v6604_v60, %v6608_v61  ;;  %v6614_v20 = vrot.slane %v6613_v9, 4 }
 0x3d9   : > { %v6636_v39 = vrot.slane %v6634_v3, 4  ;;  %v6640_v2 = vshll.u32 %v18123_v57, 16  ;;  %6363 = vst [vmem:[#allocation2 + $0xd4] sm:$0x1] %v15665_v0  ;;  %v6347_v23 = vld [vmem:[#allocation2 + $0xc8] sm:$0x1] }
 0x3da   : > { %v6628_v22 = vrot.slane %v6627_v6, 4  ;;  %v6645_v47 = vshrl.u32 %v18119_v48, 16  ;;  %v6648_v46 = vshll.u32 %v18119_v48, 16  ;;  %v6654_v27 = vshll.u32 %v18121_v33, 16  ;;  %v18163_v52 = vld [vmem:[#allocation2 + $0x84] sm:$0xf] }
 0x3db   : > { %v6348_v50 = vsel %vm17739_vm14, 0, %v6347_v23  ;;  %v6619_v56 = vsel %vm15847_vm2, %v6614_v20, %v6618_v18  ;;  %v6637_v7 = vor.u32 %v6636_v39, %v6632_v26  ;;  %v6642_v38 = vrot.slane %v6640_v2, 5 }
 0x3dc   : > { %6349 = vst [vmem:[#allocation2 + $0xc8] sm:$0x1] %v6348_v50  ;;  %v12723_v0 = vcombine.low %v6609_v59, %v6619_v56  ;;  %v6633_v63 = vsel %vm15847_vm2, %v6628_v22, %v6632_v26  ;;  %v6647_v5 = vrot.slane %v6645_v47, 4  ;;  %v6650_v43 = vrot.slane %v6648_v46, 5  ;;  %v18168_v26 = vld [vmem:[#allocation2 + $0x8c] sm:$0x1] }
 0x3dd   : > { %v6638_v49 = vrot.slane %v6637_v7, 4  ;;  %v6656_v61 = vrot.slane %v6654_v27, 5  ;;  %v6658_v51 = vshrl.u32 %v18121_v33, 16  ;;  %v6664_v16 = vshll.u32 %v18132_v32, 16  ;;  %v18174_v56 = vld [vmem:[#allocation2 + $0x90] sm:$0xf] }
 0x3de   : > { %14177 = vmatmul.mubr.bf16.gmra.mrb[32].mxu1 %v12723_v0  ;;  %v6651_v8 = vor.u32 %v6650_v43, %v6647_v5  ;;  %v6669_v54 = vshrl.u32 %v18137_v53, 16  ;;  %v6672_v62 = vshll.u32 %v18137_v53, 16  ;;  %v6678_v17 = vshll.u32 %v18147_v11, 16  ;;  %v18179_v5 = vld [vmem:[#allocation2 + $0x94] sm:$0xf] }
 0x3df   : > { %v6643_v35 = vsel %vm15847_vm2, %v6638_v49, %v6642_v38  ;;  %v6660_v44 = vrot.slane %v6658_v51, 4  ;;  %v6666_v42 = vrot.slane %v6664_v16, 5  ;;  %v6682_v18 = vshrl.u32 %v18147_v11, 16  ;;  %v18183_v16 = vld [vmem:[#allocation2 + $0x98] sm:$0x1] }
 0x3e0   : > { %v12724_v10 = vcombine.low %v6633_v63, %v6643_v35  ;;  %v6652_v45 = vrot.slane %v6651_v8, 4  ;;  %v6671_v25 = vrot.slane %v6669_v54, 4  ;;  %v6674_v41 = vrot.slane %v6672_v62, 5  ;;  %v18189_v35 = vld [vmem:[#allocation2 + $0x9c] sm:$0xf] }
 0x3e1   : > { %v6661_v60 = vor.u32 %v6660_v44, %v6656_v61  ;;  %v6680_v9 = vrot.slane %v6678_v17, 5  ;;  %v6684_v3 = vrot.slane %v6682_v18, 4  ;;  %v6688_v40 = vshll.u32 %v18153_v14, 16 }
 0x3e2   : > { %14180 = vmatprep.mubr.bf16.mxu1 %v12724_v10  ;;  %v6657_v24 = vsel %vm15847_vm2, %v6652_v45, %v6656_v61  ;;  %v6675_v6 = vor.u32 %v6674_v41, %v6671_v25  ;;  %v6693_v59 = vshrl.u32 %v18163_v52, 16  ;;  %v6696_v20 = vshll.u32 %v18163_v52, 16 }
 0x3e3   : > { %v6662_v39 = vrot.slane %v6661_v60, 4  ;;  %v6685_v2 = vor.u32 %v6684_v3, %v6680_v9  ;;  %v6690_v23 = vrot.slane %v6688_v40, 5  ;;  %v6702_v22 = vshll.u32 %v18158_v36, 16 }
 0x3e4   : > { %v6676_v47 = vrot.slane %v6675_v6, 4  ;;  %v6695_v46 = vrot.slane %v6693_v59, 4  ;;  %v6698_v27 = vrot.slane %v6696_v20, 5  ;;  %v6706_v50 = vshrl.u32 %v18158_v36, 16  ;;  %v18198_v6 = vld [vmem:[#allocation2 + $0xa4] sm:$0x1] }
 0x3e5   : > { %v6667_v7 = vsel %vm15847_vm2, %v6662_v39, %v6666_v42  ;;  %v6686_v38 = vrot.slane %v6685_v2, 4  ;;  %v6704_v0 = vrot.slane %v6702_v22, 5  ;;  %v6712_v63 = vshll.u32 %v18168_v26, 16  ;;  %v18202_v22 = vld [vmem:[#allocation2 + $0xa8] sm:$0xf] }
 0x3e6   : > { %v12725_v43 = vcombine.low %v6657_v24, %v6667_v7  ;;  %v6681_v49 = vsel %vm15847_vm2, %v6676_v47, %v6680_v9  ;;  %v6699_v61 = vor.u32 %v6698_v27, %v6695_v46  ;;  %v6708_v51 = vrot.slane %v6706_v50, 4  ;;  %v18194_v9 = vld [vmem:[#allocation2 + $0xa0] sm:$0xf]  ;;  %v18204_v47 = vld [vmem:[#allocation2 + $0xac] sm:$0xf] }
 0x3e7   : > { %v6691_v8 = vsel %vm15847_vm2, %v6686_v38, %v6690_v23  ;;  %v6714_v54 = vrot.slane %v6712_v63, 5  ;;  %v6717_v62 = vshrl.u32 %v18174_v56, 16  ;;  %v6720_v17 = vshll.u32 %v18174_v56, 16 }
 0x3e8   : > { %14181 = vmatmul.mubr.bf16.gmra.mrb[36].mxu1 %v12725_v43  ;;  %v12726_v44 = vcombine.low %v6681_v49, %v6691_v8  ;;  %v6700_v42 = vrot.slane %v6699_v61, 4  ;;  %v6709_v18 = vor.u32 %v6708_v51, %v6704_v0  ;;  %v6726_v10 = vshll.u32 %v18179_v5, 16  ;;  %v18210_v49 = vld [vmem:[#allocation2 + $0xb0] sm:$0x1] }
 0x3e9   : > { %v6719_v45 = vrot.slane %v6717_v62, 4  ;;  %v6722_v25 = vrot.slane %v6720_v17, 5  ;;  %v6730_v41 = vshrl.u32 %v18179_v5, 16  ;;  %v6736_v60 = vshll.u32 %v18183_v16, 16  ;;  %v18214_v17 = vld [vmem:[#allocation2 + $0xb4] sm:$0xf] }
 0x3ea   : > { %14184 = vmatprep.mubr.bf16.mxu1 %v12726_v44  ;;  %v6705_v3 = vsel %vm15847_vm2, %v6700_v42, %v6704_v0  ;;  %v6710_v40 = vrot.slane %v6709_v18, 4  ;;  %v6728_v24 = vrot.slane %v6726_v10, 5  ;;  %v6741_v59 = vshrl.u32 %v18189_v35, 16  ;;  %v18219_v10 = vld [vmem:[#allocation2 + $0xb8] sm:$0xf] }
 0x3eb   : > { %v6723_v20 = vor.u32 %v6722_v25, %v6719_v45  ;;  %v6732_v39 = vrot.slane %v6730_v41, 4  ;;  %v6738_v2 = vrot.slane %v6736_v60, 5  ;;  %v6744_v23 = vshll.u32 %v18189_v35, 16 }
 0x3ec   : > { %v6715_v46 = vsel %vm15847_vm2, %v6710_v40, %v6714_v54  ;;  %v6743_v27 = vrot.slane %v6741_v59, 4  ;;  %v6750_v50 = vshll.u32 %v18194_v9, 16  ;;  %v6754_v7 = vshrl.u32 %v18194_v9, 16 }
 0x3ed   : > { %v12727_v38 = vcombine.low %v6705_v3, %v6715_v46  ;;  %v6724_v0 = vrot.slane %v6723_v20, 4  ;;  %v6733_v63 = vor.u32 %v6732_v39, %v6728_v24  ;;  %v6746_v43 = vrot.slane %v6744_v23, 5 }
 0x3ee   : > { %v6752_v61 = vrot.slane %v6750_v50, 5  ;;  %v6756_v51 = vrot.slane %v6754_v7, 4  ;;  %v6760_v8 = vshll.u32 %v18198_v6, 16  ;;  %v6765_v62 = vshrl.u32 %v18202_v22, 16 }
 0x3ef   : > { %v6729_v54 = vsel %vm15847_vm2, %v6724_v0, %v6728_v24  ;;  %v6734_v44 = vrot.slane %v6733_v63, 4  ;;  %v6747_v42 = vor.u32 %v6746_v43, %v6743_v27  ;;  %v6768_v18 = vshll.u32 %v18202_v22, 16 }
 0x3f0   : > { %14185 = vmatmul.mubr.bf16.gmra.mrb[40].mxu1 %v12727_v38  ;;  %v6757_v45 = vor.u32 %v6756_v51, %v6752_v61  ;;  %v6762_v25 = vrot.slane %v6760_v8, 5  ;;  %v6767_v41 = vrot.slane %v6765_v62, 4  ;;  %v6774_v60 = vshll.u32 %v18204_v47, 16  ;;  %v18228_v38 = vld [vmem:[#allocation2 + $0xbc] sm:$0x1] }
 0x3f1   : > { %v6739_v3 = vsel %vm15847_vm2, %v6734_v44, %v6738_v2  ;;  %v6748_v40 = vrot.slane %v6747_v42, 4  ;;  %v6770_v59 = vrot.slane %v6768_v18, 5  ;;  %v6778_v20 = vshrl.u32 %v18204_v47, 16 }
 0x3f2   : > { %v12728_v24 = vcombine.low %v6729_v54, %v6739_v3  ;;  %v6758_v39 = vrot.slane %v6757_v45, 4  ;;  %v6776_v23 = vrot.slane %v6774_v60, 5  ;;  %v6784_v46 = vshll.u32 %v18210_v49, 16 }
 0x3f3   : > { %v6753_v27 = vsel %vm15847_vm2, %v6748_v40, %v6752_v61  ;;  %v6771_v50 = vor.u32 %v6770_v59, %v6767_v41  ;;  %v6780_v7 = vrot.slane %v6778_v20, 4  ;;  %v6789_v0 = vshrl.u32 %v18214_v17, 16 }
 0x3f4   : > { %14188 = vmatprep.mubr.bf16.mxu1 %v12728_v24  ;;  %v6763_v2 = vsel %vm15847_vm2, %v6758_v39, %v6762_v25  ;;  %v6786_v63 = vrot.slane %v6784_v46, 5  ;;  %v6792_v43 = vshll.u32 %v18214_v17, 16  ;;  %v6798_v51 = vshll.u32 %v18219_v10, 16 }
 0x3f5   : > { %v12729_v8 = vcombine.low %v6753_v27, %v6763_v2  ;;  %v6772_v62 = vrot.slane %v6771_v50, 4  ;;  %v6781_v54 = vor.u32 %v6780_v7, %v6776_v23  ;;  %v6791_v44 = vrot.slane %v6789_v0, 4  ;;  %v7418_v0 = vld [vmem:[#allocation2 + $0x84] sm:$0xe]  ;;  %v7419_v7 = vld [vmem:[#allocation2 + $0x90] sm:$0xe] }
 0x3f6   : > { %v6794_v61 = vrot.slane %v6792_v43, 5  ;;  %v6800_v42 = vrot.slane %v6798_v51, 5  ;;  %v6802_v18 = vshrl.u32 %v18219_v10, 16  ;;  %v6808_v45 = vshll.u32 %v18228_v38, 16  ;;  %v7416_v51 = vld [vmem:[#allocation2 + $0x6c] sm:$0xe] }
 0x3f7   : > { %v6777_v41 = vsel %vm15847_vm2, %v6772_v62, %v6776_v23  ;;  %v6782_v60 = vrot.slane %v6781_v54, 4  ;;  %v12746_v20 = vcombine.low %v18057_v31, %v18075_v12  ;;  %v12747_v27 = vcombine.low %v18086_v4, %v18084_v34  ;;  %v18277_v62 = vld [vmem:[#allocation2 + $0x28] sm:$0xf]  ;;  %v7420_v50 = vld [vmem:[#allocation2 + $0x9c] sm:$0xe]  ;;  %v15377_v31 = vld [vmem:[#allocation3 + $0xb8] sm:$0xff]  }
 0x3f8   : > { %14189 = vmatmul.mubr.bf16.gmra.mrb[44].mxu1 %v12729_v8  ;;  %v6795_v25 = vor.u32 %v6794_v61, %v6791_v44  ;;  %v6804_v3 = vrot.slane %v6802_v18, 4  ;;  %v6810_v59 = vrot.slane %v6808_v45, 5  ;;  %v12748_v23 = vcombine.low %v18101_v21, %v18110_v13  ;;  %v15504_v44 = vld [vmem:[#allocation2] sm:$0xf]  ;;  %v18265_v61 = vld [vmem:[#allocation2 + $0x4] sm:$0xf] }
 0x3f9   : > { %v6787_v40 = vsel %vm15847_vm2, %v6782_v60, %v6786_v63  ;;  %v7413_v45 = vld [vmem:[#allocation2 + $0x48] sm:$0xe]  ;;  %v15506_v60 = vld [vmem:[#allocation2 + $0xc] sm:$0xf]  ;;  %v7516_v43 = vrot.slane %v18123_v57, 5  ;;  %v7523_v57 = vrot.slane %v18132_v32, 5  ;;  %v19818_v4 = vcombine.low %v18174_v56, %v18179_v5 }
 0x3fa   : > { %v12730_v24 = vcombine.low %v6777_v41, %v6787_v40  ;;  %v6796_v39 = vrot.slane %v6795_v25, 4  ;;  %v6805_v46 = vor.u32 %v6804_v3, %v6800_v42  ;;  %v7414_v41 = vld [vmem:[#allocation2 + $0x54] sm:$0xe]  ;;  %v18268_v25 = vld [vmem:[#allocation2 + $0x10] sm:$0xf]  ;;  %v7457_v21 = vrot.slane %v18265_v61, 5 }
 0x3fb   : > { %v12741_v3 = vcombine.low %v15506_v60, %v18268_v25  ;;  %v15508_v40 = vld [vmem:[#allocation2 + $0x18] sm:$0xf]  ;;  %v7464_v56 = vrot.slane %v18268_v25, 5 }
 0x3fc   : > { %14192 = vmatprep.mubr.bf16.mxu1 %v12730_v24  ;;  %v6801_v2 = vsel %vm15847_vm2, %v6796_v39, %v6800_v42  ;;  %v6806_v63 = vrot.slane %v6805_v46, 4  ;;  %v12740_v42 = vcombine.low %v15504_v44, %v18265_v61  ;;  %v18271_v24 = vld [vmem:[#allocation2 + $0x1c] sm:$0xf]  ;;  %v15359_v39 = vld [vmem:[#allocation3 + $0x88] sm:$0xff]   ;;  %v7499_v46 = vrot.slane %v18075_v12, 5 }
 0x3fd   : > { %v7506_v44 = vrot.slane %v18084_v34, 5  ;;  %v15378_v12 = vld [vmem:[#allocation3 + $0xc0] sm:$0xff]   ;;  %v19817_v34 = vcombine.low %v18163_v52, %v18158_v36  ;;  %v15513_v61 = vld [vmem:[#allocation2 + $0x14] sm:$0x1] }
 0x3fe   : > { %v6811_v54 = vsel %vm15847_vm2, %v6806_v63, %v6810_v59  ;;  %v12742_v59 = vcombine.low %v15508_v40, %v18271_v24  ;;  %v12770_v63 = vrot.slane %v7413_v45, 9  ;;  %v7501_v8 = vrot.slane %v7499_v46, 4  ;;  %v15362_v40 = vld [vmem:[#allocation3 + $0x90] sm:$0xff]  }
 0x3ff   : > { %v12731_v18 = vcombine.low %v6801_v2, %v6811_v54  ;;  %v7502_v2 = vrot.slane %v18081_v55, 5  ;;  %v12771_v54 = vrot.slane %v7414_v41, 9  ;;  %v7508_v41 = vrot.slane %v7506_v44, 4 }
 0x400   : > { %v18283_v45 = vsel %vm16013_vm5, %v12770_v63, %v7499_v46 }
 0x401   : > { %14193 = vmatmul.mubr.bf16.gmra.mrb[48].mxu1 %v12731_v18  ;;  %v15510_v18 = vld [vmem:[#allocation2 + $0x24] sm:$0xf]  ;;  %v18287_v55 = vsel %vm16013_vm5, %v12771_v54, %v7506_v44  ;;  %v12773_v54 = vrot.slane %v7416_v51, 9  ;;  %v7417_v44 = vld [vmem:[#allocation2 + $0x78] sm:$0xe] }
 0x402   : > { %14212 = vmatprep.mubr.bf16.mxu1 %v12740_v42  ;;  %v7415_v42 = vld [vmem:[#allocation2 + $0x60] sm:$0xe]  ;;  %v12743_v60 = vcombine.low %v15510_v18, %v18277_v62  ;;  %v18292_v18 = vsel %vm16013_vm5, %v7501_v8, %v7502_v2  ;;  %v12744_v8 = vcombine.low %v17987_v37, %v18018_v1  ;;  %v15365_v37 = vld [vmem:[#allocation3 + $0x98] sm:$0xff]   ;;  %v12774_v32 = vrot.slane %v7417_v44, 9 }
 0x403   : > { %v7534_v2 = vrot.slane %v18158_v36, 5 }
 0x409   : > { %14213 = vmatmul.mubr.bf16.vlgmr.msra.gmra.mrb[20].mxu1 %v12741_v3  ;;  %v7509_v3 = vrot.slane %v18095_v30, 5  ;;  %v7520_v30 = vrot.slane %v18121_v33, 5 }
 0x40a   : > { %14216 = vmatprep.mubr.bf16.mxu1 %v12742_v59  ;;  %14245 = vmatpush3.bf16.msra.mxu1 %v18034_v15  ;;  %v12772_v59 = vrot.slane %v7415_v42, 9  ;;  %v7513_v15 = vrot.slane %v18110_v13, 5  ;;  %v7407_v13 = vld [vmem:[#allocation2] sm:$0xe] }
 0x40b   : > { %14246 = vmatprep.subr.bf16.mxu1 %v15359_v39  ;;  %v18300_v63 = vsel %vm16013_vm5, %v7508_v41, %v7509_v3  ;;  %v18314_v51 = vsel %vm16013_vm5, %v12773_v54, %v7520_v30  ;;  %v7522_v41 = vrot.slane %v7520_v30, 4  ;;  %v7527_v3 = vrot.slane %v18147_v11, 5 }
 0x40c   : > { %v7515_v42 = vrot.slane %v7513_v15, 4  ;;  %v18310_v46 = vsel %vm16013_vm5, %v12772_v59, %v7513_v15  ;;  %v12775_v30 = vrot.slane %v7418_v0, 9 }
 0x40d   : > { %v18327_v15 = vsel %vm16013_vm5, %v7522_v41, %v7523_v57  ;;  %v7529_v54 = vrot.slane %v7527_v3, 4  ;;  %v18333_v44 = vsel %vm16013_vm5, %v12774_v32, %v7527_v3  ;;  %v7544_v41 = vrot.slane %v18183_v16, 5  ;;  %v15368_v3 = vld [vmem:[#allocation3 + $0xa0] sm:$0xff]   ;;  %v7421_v16 = vld [vmem:[#allocation2 + $0xa8] sm:$0xe] }
 0x40e   : > { %14247 = vmatpush3.bf16.msra.mxu1 %v15359_v39  ;;  %v18319_v1 = vsel %vm16013_vm5, %v7515_v42, %v7516_v43  ;;  %v7530_v39 = vrot.slane %v18153_v14, 5  ;;  %v7536_v14 = vrot.slane %v7534_v2, 4  ;;  %v7537_v42 = vrot.slane %v18168_v26, 5 }
 0x40f   : > { %14248 = vmatprep.subr.bf16.mxu1 %v15362_v40  ;;  %v18342_v0 = vsel %vm16013_vm5, %v12775_v30, %v7534_v2  ;;  %v7548_v32 = vrot.slane %v18194_v9, 5  ;;  %v7551_v30 = vrot.slane %v18198_v6, 5  ;;  %v12745_v43 = vcombine.low %v18024_v19, %v18026_v28  ;;  %v15371_v28 = vld [vmem:[#allocation3 + $0xa8] sm:$0xff]  }
 0x410   : > { %v18338_v57 = vsel %vm16013_vm5, %v7529_v54, %v7530_v39  ;;  %v12777_v54 = vrot.slane %v7420_v50, 9  ;;  %v7558_v50 = vrot.slane %v18210_v49, 5  ;;  %v7562_v19 = vrot.slane %v18219_v10, 5 }
 0x411   : > { %14217 = vmatmul.mubr.bf16.gmra.mrb[24].mxu1 %v12743_v60  ;;  %v7541_v60 = vrot.slane %v18179_v5, 5  ;;  %v7565_v49 = vrot.slane %v18228_v38, 5  ;;  %v7471_v5 = vrot.slane %v18271_v24, 5 }
 0x412   : > { %14220 = vmatprep.mubr.bf16.mxu1 %v12744_v8  ;;  %14249 = vmatpush3.bf16.msra.mxu1 %v15362_v40  ;;  %v18350_v40 = vsel %vm16013_vm5, %v7536_v14, %v7537_v42  ;;  %v12776_v8 = vrot.slane %v7419_v7, 9  ;;  %v7550_v14 = vrot.slane %v7548_v32, 4  ;;  %v7555_v7 = vrot.slane %v18204_v47, 5  ;;  %v7422_v42 = vld [vmem:[#allocation2 + $0xb4] sm:$0xe] }
 0x413   : > { %14250 = vmatprep.subr.bf16.mxu1 %v15365_v37  ;;  %v7543_v39 = vrot.slane %v7541_v60, 4  ;;  %v18369_v6 = vsel %vm16013_vm5, %v12777_v54, %v7548_v32  ;;  %v12779_v32 = vrot.slane %v7422_v42, 9  ;;  %v7564_v54 = vrot.slane %v7562_v19, 4 }
 0x414   : > { %v18360_v26 = vsel %vm16013_vm5, %v12776_v8, %v7541_v60  ;;  %v12778_v8 = vrot.slane %v7421_v16, 9  ;;  %v15374_v16 = vld [vmem:[#allocation3 + $0xb0] sm:$0xff]   ;;  %v7467_v42 = vrot.slane %v15513_v61, 5  ;;  %v15381_v61 = vld [vmem:[#allocation3 + $0xd8] sm:$0xff]  }
 0x415   : > { %v18365_v2 = vsel %vm16013_vm5, %v7543_v39, %v7544_v41  ;;  %v7557_v41 = vrot.slane %v7555_v7, 4  ;;  %v18397_v38 = vsel %vm16013_vm5, %v12779_v32, %v7562_v19  ;;  %v7409_v19 = vld [vmem:[#allocation2 + $0x18] sm:$0xe] }
 0x416   : > { %14251 = vmatpush3.bf16.msra.mxu1 %v15365_v37  ;;  %v18377_v37 = vsel %vm16013_vm5, %v7550_v14, %v7551_v30  ;;  %v18384_v59 = vsel %vm16013_vm5, %v12778_v8, %v7555_v7  ;;  %v15512_v7 = vld [vmem:[#allocation2 + $0x8] sm:$0x1]  ;;  %v12766_v25 = vrot.slane %v7409_v19, 9 }
 0x417   : > { %14252 = vmatprep.subr.bf16.mxu1 %v15368_v3  ;;  %v18388_v60 = vsel %vm16013_vm5, %v7557_v41, %v7558_v50  ;;  %v7466_v50 = vrot.slane %v7464_v56, 4 }
 0x419   : > { %14221 = vmatmul.mubr.bf16.gmra.mrb[28].mxu1 %v12745_v43  ;;  %v18401_v43 = vsel %vm16013_vm5, %v7564_v54, %v7565_v49  ;;  %v7468_v41 = vsel %vm16013_vm5, %v7466_v50, %v7467_v42  ;;  %v7472_v54 = vsel %vm16013_vm5, %v12766_v25, %v7471_v5  ;;  %v15379_v49 = vld [vmem:[#allocation3 + $0xc8] sm:$0xff]   ;;  %v15382_v50 = vld [vmem:[#allocation3 + $0xe0] sm:$0xff]  }
 0x41a   : > { %14224 = vmatprep.mubr.bf16.mxu1 %v12746_v20  ;;  %14253 = vmatpush3.bf16.msra.mxu1 %v15368_v3  ;;  %v19815_v20 = vcombine.low %v18119_v48, %v18121_v33  ;;  %v19816_v3 = vcombine.low %v18137_v53, %v18147_v11  ;;  %v7460_v48 = vrot.slane %v15512_v7, 5  ;;  %v19819_v33 = vcombine.low %v18189_v35, %v18194_v9  ;;  %v7408_v9 = vld [vmem:[#allocation2 + $0xc] sm:$0xe]  ;;  %v15383_v25 = vld [vmem:[#allocation3 + $0xe8] sm:$0xff]  }
 0x41b   : > { %14254 = vmatprep.subr.bf16.mxu1 %v15371_v28  ;;  %v19820_v53 = vcombine.low %v18202_v22, %v18204_v47  ;;  %v19821_v35 = vcombine.low %v18214_v17, %v18219_v10  ;;  %v15514_v22 = vld [vmem:[#allocation2 + $0x20] sm:$0x1]  ;;  %v12765_v8 = vrot.slane %v7408_v9, 9  ;;  %v7478_v17 = vrot.slane %v18277_v62, 5  ;;  %v15380_v7 = vld [vmem:[#allocation3 + $0xd0] sm:$0xff]  }
 0x41c   : > { %v7474_v47 = vrot.slane %v15514_v22, 5  ;;  %v7412_v22 = vld [vmem:[#allocation2 + $0x3c] sm:$0xe] }
 0x41d   : > { %v7465_v32 = vsel %vm16013_vm5, %v12765_v8, %v7464_v56  ;;  %v12769_v19 = vrot.slane %v7412_v22, 9 }
 0x41e   : > { %14255 = vmatpush3.bf16.msra.mxu1 %v15371_v28  ;;  %v7473_v28 = vrot.slane %v7471_v5, 4  ;;  %v12781_v10 = vcombine.low %v7465_v32, %v7468_v41  ;;  %v15384_v32 = vld [vmem:[#allocation3 + $0xf0] sm:$0xff]  }
 0x41f   : > { %14256 = vmatprep.subr.bf16.mxu1 %v15374_v16 }
 0x420   : > { %v7475_v24 = vsel %vm16013_vm5, %v7473_v28, %v7474_v47 }
 0x421   : > { %14225 = vmatmul.mubr.bf16.gmra.mrb[32].mxu1 %v12747_v27  ;;  %v12764_v27 = vrot.slane %v7407_v13, 9 }
 0x422   : > { %14228 = vmatprep.mubr.bf16.mxu1 %v12748_v23  ;;  %14257 = vmatpush3.bf16.msra.mxu1 %v15374_v16  ;;  %v7459_v23 = vrot.slane %v7457_v21, 4  ;;  %v15515_v16 = vld [vmem:[#allocation2 + $0x34] sm:$0xf] }
 0x423   : > { %14258 = vmatprep.subr.bf16.mxu1 %v15377_v31  ;;  %v7458_v11 = vsel %vm16013_vm5, %v12764_v27, %v7457_v21  ;;  %v15517_v21 = vld [vmem:[#allocation2 + $0x38] sm:$0x1]  ;;  %v7480_v27 = vrot.slane %v7478_v17, 4 }
 0x424   : > { %v7461_v36 = vsel %vm16013_vm5, %v7459_v23, %v7460_v48  ;;  %v7488_v13 = vrot.slane %v15517_v21, 5  ;;  %v7411_v23 = vld [vmem:[#allocation2 + $0x30] sm:$0xe]  ;;  %v18481_v21 = vld [vmem:[#allocation2 + $0x50] sm:$0x1] }
 0x425   : > { %v12780_v52 = vcombine.low %v7458_v11, %v7461_v36 }
 0x426   : > { %14259 = vmatpush3.bf16.msra.mxu1 %v15377_v31  ;;  %v7485_v31 = vrot.slane %v15515_v16, 5  ;;  %v9033_v16 = vld [vmem:[#allocation2 + $0x30] sm:$0xe] }
 0x427   : > { %14292 = vmatprep.subr.bf16.mxu1 %v15378_v12 }
 0x428   : > { %v7487_v62 = vrot.slane %v7485_v31, 4 }
 0x429   : > { %14229 = vmatmul.mubr.bf16.gmra.mrb[36].mxu1 %v19815_v20  ;;  %v12782_v20 = vcombine.low %v7472_v54, %v7475_v24  ;;  %v19822_v24 = vcombine.low %v18283_v45, %v18292_v18  ;;  %v18467_v54 = vld [vmem:[#allocation2 + $0x34] sm:$0xf]  ;;  %v18473_v45 = vld [vmem:[#allocation2 + $0x44] sm:$0x1]  ;;  %v18475_v18 = vld [vmem:[#allocation2 + $0x4c] sm:$0xf] }
 0x42a   : > { %14232 = vmatprep.mubr.bf16.mxu1 %v19816_v3  ;;  %v15516_v3 = vld [vmem:[#allocation2 + $0x2c] sm:$0x1]  ;;  %v7489_v11 = vsel %vm16013_vm5, %v7487_v62, %v7488_v13  ;;  %v9117_v62 = vrot.slane %v18467_v54, 5 }
 0x431   : > { %14233 = vmatmul.mubr.bf16.gmra.mrb[40].mxu1 %v19817_v34  ;;  %v7481_v34 = vrot.slane %v15516_v3, 5  ;;  %v18471_v3 = vld [vmem:[#allocation2 + $0x40] sm:$0xf] }
 0x432   : > { %14236 = vmatprep.mubr.bf16.mxu1 %v19818_v4  ;;  %v7410_v4 = vld [vmem:[#allocation2 + $0x24] sm:$0xe] }
 0x433   : > { %v12767_v48 = vrot.slane %v7410_v4, 9  ;;  %v19823_v4 = vcombine.low %v18287_v55, %v18300_v63  ;;  %v18490_v55 = vld [vmem:[#allocation3 + $0x100] sm:$0xff]  }
 0x434   : > { %v18492_v63 = vld [vmem:[#allocation2 + $0x5c] sm:$0x1] }
 0x435   : > { %v7479_v36 = vsel %vm16013_vm5, %v12767_v48, %v7478_v17  ;;  %v18463_v17 = vld [vmem:[#allocation2 + $0x28] sm:$0xf]  ;;  %v19824_v48 = vcombine.low %v18310_v46, %v18319_v1  ;;  %v9119_v46 = vrot.slane %v9117_v62, 4 }
 0x439   : > { %14237 = vmatmul.mubr.bf16.gmra.mrb[44].mxu1 %v19819_v33  ;;  %v7482_v33 = vsel %vm16013_vm5, %v7480_v27, %v7481_v34  ;;  %v9110_v34 = vrot.slane %v18463_v17, 5 }
 0x43a   : > { %14240 = vmatprep.mubr.bf16.mxu1 %v19820_v53  ;;  %v12768_v53 = vrot.slane %v7411_v23, 9  ;;  %v12855_v23 = vrot.slane %v9033_v16, 9 }
 0x43c   : > { %v7486_v5 = vsel %vm16013_vm5, %v12768_v53, %v7485_v31  ;;  %v15385_v31 = vld [vmem:[#allocation3 + $0xf8] sm:$0xff]   ;;  %v9112_v53 = vrot.slane %v9110_v34, 4 }
 0x43d   : > { %v12784_v42 = vcombine.low %v7486_v5, %v7489_v11  ;;  %v9035_v11 = vld [vmem:[#allocation2 + $0x48] sm:$0xe]  ;;  %v9124_v5 = vrot.slane %v18471_v3, 5 }
 0x441   : > { %14241 = vmatmul.mubr.bf16.gmra.mrb[48].mxu1 %v19821_v35  ;;  %v15519_v35 = vld [vmem:[#allocation2 + $0x44] sm:$0x1] }
 0x442   : > { %14260 = vmatprep.mubr.bf16.mxu1 %v12780_v52  ;;  %v15518_v52 = vld [vmem:[#allocation2 + $0x40] sm:$0xf]  ;;  %v7495_v9 = vrot.slane %v15519_v35, 5  ;;  %v18509_v35 = vld [vmem:[#allocation2 + $0x64] sm:$0xf] }
 0x443   : > { %v7492_v56 = vrot.slane %v15518_v52, 5  ;;  %v18500_v52 = vsel %vm16013_vm5, %v12855_v23, %v9117_v62  ;;  %v9145_v62 = vrot.slane %v18509_v35, 5 }
 0x445   : > { %v7494_v47 = vrot.slane %v7492_v56, 4  ;;  %v7493_v8 = vsel %vm16013_vm5, %v12769_v19, %v7492_v56  ;;  %v9037_v19 = vld [vmem:[#allocation2 + $0x60] sm:$0xe] }
 0x446   : > { %v12859_v23 = vrot.slane %v9037_v19, 9 }
 0x447   : > { %v7496_v28 = vsel %vm16013_vm5, %v7494_v47, %v7495_v9  ;;  %v12857_v47 = vrot.slane %v9035_v11, 9  ;;  %v8311_v11 = vld [vmem:[#allocation2 + $0x98] sm:$0x1]  ;;  %v8314_v9 = vld [vmem:[#allocation2 + $0xa4] sm:$0x1] }
 0x448   : > { %v12785_v41 = vcombine.low %v7493_v8, %v7496_v28  ;;  %v18518_v28 = vld [vmem:[#allocation2 + $0x68] sm:$0x1]  ;;  %v18520_v8 = vld [vmem:[#allocation2 + $0x70] sm:$0xf] }
 0x449   : > { %14261 = vmatmul.mubr.bf16.vlgmr.msra.gmra.mrb[20].mxu1 %v12781_v10  ;;  %v18465_v10 = vld [vmem:[#allocation2 + $0x2c] sm:$0x1]  ;;  %v9148_v19 = vrot.slane %v18518_v28, 5 }
 0x44a   : > { %14264 = vmatprep.mubr.bf16.mxu1 %v12782_v20  ;;  %14293 = vmatpush3.bf16.msra.mxu1 %v15378_v12  ;;  %v12783_v12 = vcombine.low %v7479_v36, %v7482_v33  ;;  %v18469_v20 = vld [vmem:[#allocation2 + $0x38] sm:$0x1]  ;;  %v9113_v27 = vrot.slane %v18465_v10, 5 }
 0x44b   : > { %14294 = vmatprep.subr.bf16.mxu1 %v15379_v49  ;;  %v18488_v33 = vld [vmem:[#allocation2 + $0x58] sm:$0xf]  ;;  %v9120_v1 = vrot.slane %v18469_v20, 5 }
 0x44c   : > { %v18505_v56 = vsel %vm16013_vm5, %v9112_v53, %v9113_v27  ;;  %v9141_v27 = vrot.slane %v18492_v63, 5  ;;  %v18546_v53 = vld [vmem:[#allocation2 + $0x7c] sm:$0xf] }
 0x44d   : > { %v18515_v22 = vsel %vm16013_vm5, %v9119_v46, %v9120_v1 }
 0x44e   : > { %14295 = vmatpush3.bf16.msra.mxu1 %v15379_v49  ;;  %v9032_v49 = vld [vmem:[#allocation2 + $0x24] sm:$0xe] }
 0x44f   : > { %14296 = vmatprep.subr.bf16.mxu1 %v15380_v7  ;;  %v12854_v13 = vrot.slane %v9032_v49, 9  ;;  %v18530_v49 = vld [vmem:[#allocation2 + $0x74] sm:$0x1] }
 0x451   : > { %14265 = vmatmul.mubr.bf16.gmra.mrb[24].mxu1 %v12783_v12  ;;  %v18496_v36 = vsel %vm16013_vm5, %v12854_v13, %v9110_v34 }
 0x452   : > { %14268 = vmatprep.mubr.bf16.mxu1 %v12784_v42  ;;  %14297 = vmatpush3.bf16.msra.mxu1 %v15380_v7  ;;  %v9034_v7 = vld [vmem:[#allocation2 + $0x3c] sm:$0xe]  ;;  %v9036_v42 = vld [vmem:[#allocation2 + $0x54] sm:$0xe] }
 0x453   : > { %14298 = vmatprep.subr.bf16.mxu1 %v15381_v61  ;;  %v12856_v12 = vrot.slane %v9034_v7, 9  ;;  %v12858_v34 = vrot.slane %v9036_v42, 9  ;;  %v9038_v7 = vld [vmem:[#allocation2 + $0x6c] sm:$0xe]  ;;  %v9041_v42 = vld [vmem:[#allocation2 + $0x90] sm:$0xe] }
 0x456   : > { %14299 = vmatpush3.bf16.msra.mxu1 %v15381_v61  ;;  %v9127_v61 = vrot.slane %v18473_v45, 5 }
 0x457   : > { %14300 = vmatprep.subr.bf16.mxu1 %v15382_v50 }
 0x459   : > { %14269 = vmatmul.mubr.bf16.gmra.mrb[28].mxu1 %v12785_v41  ;;  %v18592_v41 = vld [vmem:[#allocation2 + $0xa0] sm:$0xf] }
 0x45a   : > { %14272 = vmatprep.mubr.bf16.mxu1 %v19822_v24  ;;  %14301 = vmatpush3.bf16.msra.mxu1 %v15382_v50  ;;  %v9131_v50 = vrot.slane %v18475_v18, 5  ;;  %v9126_v24 = vrot.slane %v9124_v5, 4 }
 0x45b   : > { %14302 = vmatprep.subr.bf16.mxu1 %v15383_v25 }
 0x45c   : > { %v18534_v16 = vsel %vm16013_vm5, %v12857_v47, %v9131_v50  ;;  %v18539_v13 = vsel %vm16013_vm5, %v9126_v24, %v9127_v61  ;;  %v19830_v61 = vcombine.low %v18333_v44, %v18338_v57  ;;  %v18569_v47 = vsel %vm16013_vm5, %v12859_v23, %v9145_v62  ;;  %v18572_v24 = vld [vmem:[#allocation2 + $0x8c] sm:$0x1] }
 0x45d   : > { %19825 = vst [vmem:[#allocation11_spill] sm:$0xff] %v18534_v16  ;;  %19826 = vst [vmem:[#allocation12_spill] sm:$0xff] %v18539_v13  ;;  %v12860_v57 = vrot.slane %v9038_v7, 9  ;;  %v9169_v30 = vrot.slane %v18572_v24, 5  ;;  %v10674_v13 = vld [vmem:[#allocation2 + $0x54] sm:$0xe] }
 0x45e   : > { %14303 = vmatpush3.bf16.msra.mxu1 %v15383_v25  ;;  %v18526_v25 = vsel %vm16013_vm5, %v12856_v12, %v9124_v5  ;;  %v9039_v5 = vld [vmem:[#allocation2 + $0x78] sm:$0xe]  ;;  %19831 = vst [vmem:[#allocation13_spill] sm:$0xff] %v18569_v47  ;;  %v9042_v47 = vld [vmem:[#allocation2 + $0x9c] sm:$0xe] }
 0x45f   : > { %14304 = vmatprep.subr.bf16.mxu1 %v15384_v32 }
 0x461   : > { %14273 = vmatmul.mubr.bf16.gmra.mrb[32].mxu1 %v19823_v4  ;;  %v9138_v4 = vrot.slane %v18488_v33, 5 }
 0x462   : > { %14276 = vmatprep.mubr.bf16.mxu1 %v19824_v48  ;;  %14305 = vmatpush3.bf16.msra.mxu1 %v15384_v32  ;;  %v9134_v32 = vrot.slane %v18481_v21, 5  ;;  %v19827_v48 = vcombine.low %v18314_v51, %v18327_v15  ;;  %v18561_v51 = vld [vmem:[#allocation2 + $0x80] sm:$0x1]  ;;  %v18563_v15 = vld [vmem:[#allocation2 + $0x88] sm:$0xf] }
 0x463   : > { %14306 = vmatprep.subr.bf16.mxu1 %v15385_v31  ;;  %v18556_v1 = vsel %vm16013_vm5, %v12858_v34, %v9138_v4  ;;  %v9140_v12 = vrot.slane %v9138_v4, 4  ;;  %v18580_v34 = vld [vmem:[#allocation2 + $0x94] sm:$0xf] }
 0x464   : > { %19829 = vst [vmem:[#allocation9_spill] sm:$0xff] %v18556_v1  ;;  %v9173_v39 = vrot.slane %v18580_v34, 5 }
 0x465   : > { %v18576_v44 = vsel %vm16013_vm5, %v9140_v12, %v9141_v27  ;;  %v9162_v12 = vrot.slane %v18561_v51, 5 }
 0x466   : > { %14307 = vmatpush3.bf16.msra.mxu1 %v15385_v31  ;;  %v9133_v31 = vrot.slane %v9131_v50, 4  ;;  %v9147_v50 = vrot.slane %v9145_v62, 4  ;;  %19832 = vst [vmem:[#allocation14_spill] sm:$0xff] %v18576_v44  ;;  %v12861_v62 = vrot.slane %v9039_v5, 9 }
 0x467   : > { %14340 = vmatprep.subr.bf16.mxu1 %v18490_v55 }
 0x468   : > { %v18552_v46 = vsel %vm16013_vm5, %v9133_v31, %v9134_v32  ;;  %v9152_v32 = vrot.slane %v18520_v8, 5  ;;  %v9155_v31 = vrot.slane %v18530_v49, 5  ;;  %v18586_v23 = vsel %vm16013_vm5, %v9147_v50, %v9148_v19 }
 0x469   : > { %14277 = vmatmul.mubr.bf16.gmra.mrb[36].mxu1 %v19827_v48  ;;  %19828 = vst [vmem:[#allocation10_spill] sm:$0xff] %v18552_v46  ;;  %19833 = vst [vmem:[#allocation15_spill] sm:$0xff] %v18586_v23  ;;  %v9159_v48 = vrot.slane %v18546_v53, 5  ;;  %v9166_v19 = vrot.slane %v18563_v15, 5  ;;  %v8316_v23 = vld [vmem:[#allocation2 + $0xac] sm:$0xf] }
 0x46a   : > { %14280 = vmatprep.mubr.bf16.mxu1 %v19830_v61  ;;  %v9040_v61 = vld [vmem:[#allocation2 + $0x84] sm:$0xe]  ;;  %v9154_v7 = vrot.slane %v9152_v32, 4  ;;  %v18596_v4 = vsel %vm16013_vm5, %v12860_v57, %v9152_v32  ;;  %v9175_v57 = vrot.slane %v9173_v39, 4 }
 0x46b   : > { %19834 = vst [vmem:[#allocation16_spill] sm:$0xff] %v18596_v4  ;;  %v18600_v5 = vsel %vm16013_vm5, %v12861_v62, %v9159_v48  ;;  %v9161_v50 = vrot.slane %v9159_v48, 4  ;;  %v12862_v14 = vrot.slane %v9040_v61, 9  ;;  %v9168_v62 = vrot.slane %v9166_v19, 4  ;;  %v8317_v61 = vld [vmem:[#allocation2 + $0xb0] sm:$0x1] }
 0x46c   : > { %19835 = vst [vmem:[#allocation17_spill] sm:$0xff] %v18600_v5  ;;  %v18605_v27 = vsel %vm16013_vm5, %v9154_v7, %v9155_v31  ;;  %v12863_v48 = vrot.slane %v9041_v42, 9  ;;  %v19838_v31 = vcombine.low %v18342_v0, %v18350_v40  ;;  %v9043_v4 = vld [vmem:[#allocation2 + $0xa8] sm:$0xe]  ;;  %v8319_v42 = vld [vmem:[#allocation2 + $0xb8] sm:$0xf] }
 0x46d   : > { %19836 = vst [vmem:[#allocation18_spill] sm:$0xff] %v18605_v27  ;;  %v18613_v32 = vsel %vm16013_vm5, %v9161_v50, %v9162_v12  ;;  %v18622_v44 = vsel %vm16013_vm5, %v12862_v14, %v9166_v19  ;;  %v9176_v27 = vrot.slane %v8311_v11, 5  ;;  %v19840_v12 = vcombine.low %v18360_v26, %v18365_v2  ;;  %v8320_v19 = vld [vmem:[#allocation2 + $0xbc] sm:$0x1]  ;;  %v9044_v7 = vld [vmem:[#allocation2 + $0xb4] sm:$0xe] }
 0x46e   : > { %19837 = vst [vmem:[#allocation19_spill] sm:$0xff] %v18613_v32  ;;  %19839 = vst [vmem:[#allocation20_spill] sm:$0xff] %v18622_v44  ;;  %v18629_v0 = vsel %vm16013_vm5, %v9168_v62, %v9169_v30  ;;  %v18633_v40 = vsel %vm16013_vm5, %v12863_v48, %v9173_v39  ;;  %v9180_v50 = vrot.slane %v18592_v41, 5  ;;  %v9183_v14 = vrot.slane %v8314_v9, 5  ;;  %v8323_v32 = vld [vmem:[#allocation2 + $0xc8] sm:$0x1] }
 0x46f   : > { %19841 = vst [vmem:[#allocation21_spill] sm:$0xff] %v18629_v0  ;;  %19842 = vst [vmem:[#allocation22_spill] sm:$0xff] %v18633_v40  ;;  %v18640_v26 = vsel %vm16013_vm5, %v9175_v57, %v9176_v27  ;;  %v12864_v2 = vrot.slane %v9042_v47, 9  ;;  %v12865_v39 = vrot.slane %v9043_v4, 9  ;;  %v9190_v48 = vrot.slane %v8317_v61, 5  ;;  %v15408_v46 = vld [vmem:[#allocation2 + $0xc0] sm:$0xff]  }
 0x470   : > { %19843 = vst [vmem:[#allocation23_spill] sm:$0xff] %v18640_v26  ;;  %v9182_v62 = vrot.slane %v9180_v50, 4  ;;  %v9194_v11 = vrot.slane %v8319_v42, 5  ;;  %v9045_v0 = vld [vmem:[#allocation2 + $0xc0] sm:$0xe]  ;;  %v9204_v30 = vrot.slane %v8323_v32, 5 }
 0x471   : > { %14281 = vmatmul.mubr.bf16.gmra.mrb[40].mxu1 %v19838_v31  ;;  %v8322_v31 = vld [vmem:[#allocation2 + $0xc4] sm:$0xf]  ;;  %v18646_v9 = vsel %vm16013_vm5, %v12864_v2, %v9180_v50  ;;  %v12866_v50 = vrot.slane %v9044_v7, 9  ;;  %v19851_v7 = vcombine.low %v18384_v59, %v18388_v60  ;;  %v15387_v59 = vld [vmem:[#allocation2 + $0x18] sm:$0xff]   ;;  %v18696_v2 = vld [vmem:[#allocation2 + $0x20] sm:$0x1] }
 0x472   : > { %14284 = vmatprep.mubr.bf16.mxu1 %v19840_v12  ;;  %v9187_v12 = vrot.slane %v8316_v23, 5  ;;  %19844 = vst [vmem:[#allocation24_spill] sm:$0xff] %v18646_v9  ;;  %v18650_v27 = vsel %vm16013_vm5, %v9182_v62, %v9183_v14  ;;  %v9197_v23 = vrot.slane %v8320_v19, 5  ;;  %v9201_v4 = vrot.slane %v8322_v31, 5  ;;  %v15386_v31 = vld [vmem:[#allocation2 + $0xc] sm:$0xff]   ;;  %v15391_v60 = vld [vmem:[#allocation3 + $0x108] sm:$0xff]  }
 0x473   : > { %19845 = vst [vmem:[#allocation25_spill] sm:$0xff] %v18650_v27  ;;  %v9196_v42 = vrot.slane %v9194_v11, 4  ;;  %v12867_v14 = vrot.slane %v9045_v0, 9  ;;  %v18669_v19 = vsel %vm16013_vm5, %v12866_v50, %v9194_v11  ;;  %v19854_v11 = vcombine.low %v18397_v38, %v18401_v43  ;;  %v15392_v38 = vld [vmem:[#allocation2 + $0x3c] sm:$0xff]   ;;  %v8279_v43 = vld [vmem:[#allocation2 + $0x18] sm:$0xf] }
 0x474   : > { %v9189_v5 = vrot.slane %v9187_v12, 4  ;;  %v18654_v47 = vsel %vm16013_vm5, %v12865_v39, %v9187_v12  ;;  %v9203_v62 = vrot.slane %v9201_v4, 4  ;;  %v19848_v12 = vcombine.low %v18369_v6, %v18377_v37  ;;  %19849 = vst [vmem:[#allocation28_spill] sm:$0xff] %v18669_v19  ;;  %v15389_v39 = vld [vmem:[#allocation2 + $0x24] sm:$0xff]  }
 0x475   : > { %19846 = vst [vmem:[#allocation26_spill] sm:$0xff] %v18654_v47  ;;  %v18682_v32 = vsel %vm16013_vm5, %v12867_v14, %v9201_v4  ;;  %v15397_v14 = vld [vmem:[#allocation3 + $0x118] sm:$0xff]  }
 0x476   : > { %v18660_v61 = vsel %vm16013_vm5, %v9189_v5, %v9190_v48  ;;  %v18673_v5 = vsel %vm16013_vm5, %v9196_v42, %v9197_v23  ;;  %19852 = vst [vmem:[#allocation30_spill] sm:$0xff] %v18682_v32  ;;  %v18686_v6 = vsel %vm16013_vm5, %v9203_v62, %v9204_v30  ;;  %v15394_v48 = vld [vmem:[#allocation3 + $0x110] sm:$0xff]   ;;  %v8277_v23 = vld [vmem:[#allocation2 + $0x10] sm:$0xf] }
 0x477   : > { %19847 = vst [vmem:[#allocation27_spill] sm:$0xff] %v18660_v61  ;;  %19850 = vst [vmem:[#allocation29_spill] sm:$0xff] %v18673_v5  ;;  %v8276_v30 = vld [vmem:[#allocation2 + $0xc] sm:$0xf]  ;;  %v15390_v42 = vld [vmem:[#allocation2 + $0x30] sm:$0xff]   ;;  %v8334_v62 = vshll.u32 %v8277_v23, 16 }
 0x478   : > { %19853 = vst [vmem:[#allocation31_spill] sm:$0xff] %v18686_v6  ;;  %v8325_v4 = vshrl.u32 %v8276_v30, 16  ;;  %v8328_v50 = vshll.u32 %v8276_v30, 16  ;;  %v15395_v6 = vld [vmem:[#allocation2 + $0x54] sm:$0xff]   ;;  %v8285_v61 = vld [vmem:[#allocation2 + $0x30] sm:$0xf] }
 0x479   : > { %14285 = vmatmul.mubr.bf16.gmra.mrb[44].mxu1 %v19848_v12  ;;  %v8338_v12 = vshrl.u32 %v8277_v23, 16  ;;  %v8336_v30 = vrot.slane %v8334_v62, 5  ;;  %v15393_v23 = vld [vmem:[#allocation2 + $0x48] sm:$0xff]   ;;  %v8368_v62 = vshll.u32 %v18696_v2, 16  ;;  %v15409_v47 = vld [vmem:[#allocation3 + $0x138] sm:$0xff]  }
 0x47a   : > { %14288 = vmatprep.mubr.bf16.mxu1 %v19851_v7  ;;  %v8327_v7 = vrot.slane %v8325_v4, 4 }
 0x47b   : > { %v8340_v37 = vrot.slane %v8338_v12, 4  ;;  %v18702_v19 = vrot.slane %v8368_v62, 5  ;;  %v8400_v62 = vshll.u32 %v8285_v61, 16 }
 0x481   : > { %14289 = vmatmul.mubr.bf16.gmra.mrb[48].mxu1 %v19854_v11  ;;  %v8280_v11 = vld [vmem:[#allocation2 + $0x1c] sm:$0xf] }
 0x482   : > { %14308 = vmatprep.mubr.bf16.mxu1 %v15386_v31  ;;  %v8330_v31 = vrot.slane %v8328_v50, 5  ;;  %v8362_v57 = vshrl.u32 %v8280_v11, 16 }
 0x484   : > { %v8331_v0 = vor.u32 %v8330_v31, %v8327_v7  ;;  %v8364_v7 = vrot.slane %v8362_v57, 4  ;;  %v15396_v57 = vld [vmem:[#allocation2 + $0x60] sm:$0xff]  }
 0x489   : > { %14309 = vmatmul.mubr.bf16.vlgmr.msra.gmra.mrb[20].mxu1 %v15387_v59  ;;  %v8349_v59 = vshrl.u32 %v8279_v43, 16 }
 0x48a   : > { %14312 = vmatprep.mubr.bf16.mxu1 %v15389_v39  ;;  %14341 = vmatpush3.bf16.msra.mxu1 %v18490_v55  ;;  %v15400_v55 = vld [vmem:[#allocation3 + $0x120] sm:$0xff]   ;;  %v18694_v39 = vld [vmem:[#allocation2 + $0x14] sm:$0x1] }
 0x48b   : > { %14342 = vmatprep.subr.bf16.mxu1 %v15391_v60  ;;  %v8351_v4 = vrot.slane %v8349_v59, 4  ;;  %v8344_v32 = vshll.u32 %v18694_v39, 16 }
 0x48e   : > { %14343 = vmatpush3.bf16.msra.mxu1 %v15391_v60  ;;  %v8352_v60 = vshll.u32 %v8279_v43, 16  ;;  %v8341_v43 = vor.u32 %v8340_v37, %v8336_v30 }
 0x48f   : > { %14344 = vmatprep.subr.bf16.mxu1 %v15394_v48 }
 0x490   : > { %v8354_v50 = vrot.slane %v8352_v60, 5  ;;  %v8346_v60 = vrot.slane %v8344_v32, 5  ;;  %v8382_v32 = vshll.u32 %v18463_v17, 16 }
 0x491   : > { %14313 = vmatmul.mubr.bf16.gmra.mrb[24].mxu1 %v15390_v42  ;;  %v8358_v42 = vshll.u32 %v8280_v11, 16  ;;  %v15406_v11 = vld [vmem:[#allocation3 + $0x130] sm:$0xff]  }
 0x492   : > { %14316 = vmatprep.mubr.bf16.mxu1 %v15392_v38  ;;  %14345 = vmatpush3.bf16.msra.mxu1 %v15394_v48  ;;  %v15403_v48 = vld [vmem:[#allocation3 + $0x128] sm:$0xff]   ;;  %v8355_v5 = vor.u32 %v8354_v50, %v8351_v4  ;;  %v8386_v50 = vshrl.u32 %v18463_v17, 16 }
 0x493   : > { %14346 = vmatprep.subr.bf16.mxu1 %v15397_v14  ;;  %v8282_v38 = vld [vmem:[#allocation2 + $0x24] sm:$0xf]  ;;  %v18700_v12 = vrot.slane %v8358_v42, 5  ;;  %v8291_v42 = vld [vmem:[#allocation2 + $0x48] sm:$0xf] }
 0x494   : > { %v8373_v31 = vshrl.u32 %v8282_v38, 16  ;;  %v8376_v59 = vshll.u32 %v8282_v38, 16  ;;  %v18707_v27 = vrot.slane %v8355_v5, 4  ;;  %v8392_v38 = vshll.u32 %v18465_v10, 16 }
 0x495   : > { %v8445_v9 = vshrl.u32 %v8291_v42, 16  ;;  %v8448_v26 = vshll.u32 %v8291_v42, 16 }
 0x496   : > { %14347 = vmatpush3.bf16.msra.mxu1 %v15397_v14  ;;  %v8332_v14 = vrot.slane %v8331_v0, 4  ;;  %v8375_v0 = vrot.slane %v8373_v31, 4  ;;  %v8378_v4 = vrot.slane %v8376_v59, 5  ;;  %v8361_v10 = vsel %vm15847_vm2, %v18707_v27, %v18700_v12 }
 0x497   : > { %14348 = vmatprep.subr.bf16.mxu1 %v15400_v55  ;;  %v8447_v27 = vrot.slane %v8445_v9, 4 }
 0x498   : > { %v8337_v37 = vsel %vm15847_vm2, %v8332_v14, %v8336_v30  ;;  %v8406_v14 = vshll.u32 %v18467_v54, 16 }
 0x499   : > { %14317 = vmatmul.mubr.bf16.gmra.mrb[28].mxu1 %v15393_v23  ;;  %v8342_v23 = vrot.slane %v8341_v43, 4  ;;  %v8397_v43 = vshrl.u32 %v8285_v61, 16  ;;  %v18722_v61 = vld [vmem:[#allocation3 + $0x140] sm:$0xff]  }
 0x49a   : > { %14320 = vmatprep.mubr.bf16.mxu1 %v15395_v6  ;;  %14349 = vmatpush3.bf16.msra.mxu1 %v15400_v55  ;;  %v8365_v6 = vor.u32 %v8364_v7, %v18700_v12  ;;  %v8288_v55 = vld [vmem:[#allocation2 + $0x3c] sm:$0xf]  ;;  %v8410_v7 = vshrl.u32 %v18467_v54, 16  ;;  %v8388_v54 = vrot.slane %v8386_v50, 4  ;;  %v18728_v42 = vrot.slane %v8406_v14, 5  ;;  %v15401_v14 = vld [vmem:[#allocation2 + $0x84] sm:$0xff]  }
 0x49b   : > { %14350 = vmatprep.subr.bf16.mxu1 %v15403_v48  ;;  %v8347_v30 = vsel %vm15847_vm2, %v8342_v23, %v8346_v60  ;;  %v8421_v5 = vshrl.u32 %v8288_v55, 16  ;;  %v8424_v31 = vshll.u32 %v8288_v55, 16  ;;  %v8379_v60 = vor.u32 %v8378_v4, %v8375_v0 }
 0x49c   : > { %v18716_v59 = vcombine.low %v8337_v37, %v8347_v30  ;;  %v8366_v17 = vrot.slane %v8365_v6, 4  ;;  %v18724_v23 = vrot.slane %v8382_v32, 5  ;;  %v8399_v55 = vrot.slane %v8397_v43, 4  ;;  %v8294_v6 = vld [vmem:[#allocation2 + $0x54] sm:$0xf]  ;;  %v15399_v32 = vld [vmem:[#allocation2 + $0x78] sm:$0xff]  }
 0x49d   : > { %v8434_v37 = vshrl.u32 %v18471_v3, 16  ;;  %v8423_v30 = vrot.slane %v8421_v5, 4  ;;  %v8426_v40 = vrot.slane %v8424_v31, 5  ;;  %v8450_v12 = vrot.slane %v8448_v26, 5 }
 0x49e   : > { %14351 = vmatpush3.bf16.msra.mxu1 %v15403_v48  ;;  %v15398_v48 = vld [vmem:[#allocation2 + $0x6c] sm:$0xff]   ;;  %v8454_v0 = vshll.u32 %v18475_v18, 16  ;;  %v8458_v4 = vshrl.u32 %v18475_v18, 16  ;;  %v8371_v50 = vsel %vm15847_vm2, %v8366_v17, %v18702_v19  ;;  %v8469_v43 = vshrl.u32 %v8294_v6, 16 }
 0x49f   : > { %14352 = vmatprep.subr.bf16.mxu1 %v15406_v11  ;;  %v8389_v26 = vor.u32 %v8388_v54, %v18724_v23  ;;  %v8416_v19 = vshll.u32 %v18469_v20, 16  ;;  %v8440_v31 = vshll.u32 %v18473_v45, 16  ;;  %v8451_v17 = vor.u32 %v8450_v12, %v8447_v27 }
 0x4a0   : > { %v8460_v44 = vrot.slane %v8458_v4, 4  ;;  %v8478_v54 = vshll.u32 %v18488_v33, 16  ;;  %v8464_v27 = vshll.u32 %v18481_v21, 16 }
 0x4a1   : > { %14321 = vmatmul.mubr.bf16.gmra.mrb[32].mxu1 %v15396_v57  ;;  %v8402_v57 = vrot.slane %v8400_v62, 5  ;;  %v8472_v62 = vshll.u32 %v8294_v6, 16  ;;  %v8456_v6 = vrot.slane %v8454_v0, 5  ;;  %v8442_v0 = vrot.slane %v8440_v31, 5 }
 0x4a2   : > { %14324 = vmatprep.mubr.bf16.mxu1 %v15398_v48  ;;  %14353 = vmatpush3.bf16.msra.mxu1 %v15406_v11  ;;  %v8430_v11 = vshll.u32 %v18471_v3, 16  ;;  %v8412_v48 = vrot.slane %v8410_v7, 4  ;;  %v18736_v3 = vrot.slane %v8392_v38, 5  ;;  %v18738_v7 = vrot.slane %v8379_v60, 4 }
 0x4a3   : > { %14354 = vmatprep.subr.bf16.mxu1 %v15409_v47  ;;  %v8403_v18 = vor.u32 %v8402_v57, %v8399_v55  ;;  %v8427_v38 = vor.u32 %v8426_v40, %v8423_v30  ;;  %v8471_v60 = vrot.slane %v8469_v43, 4  ;;  %v8474_v1 = vrot.slane %v8472_v62, 5  ;;  %v8297_v40 = vld [vmem:[#allocation2 + $0x60] sm:$0xf] }
 0x4a4   : > { %v18741_v9 = vrot.slane %v8430_v11, 5  ;;  %v8413_v5 = vor.u32 %v8412_v48, %v18728_v42  ;;  %v8482_v11 = vshrl.u32 %v18488_v33, 16  ;;  %v8385_v20 = vsel %vm15847_vm2, %v18738_v7, %v18724_v23  ;;  %v15404_v23 = vld [vmem:[#allocation2 + $0x9c] sm:$0xff]  }
 0x4a5   : > { %v8390_v55 = vrot.slane %v8389_v26, 4  ;;  %v8404_v57 = vrot.slane %v8403_v18, 4  ;;  %v8418_v30 = vrot.slane %v8416_v19, 5  ;;  %v8428_v12 = vrot.slane %v8427_v38, 4 }
 0x4a6   : > { %14355 = vmatpush3.bf16.msra.mxu1 %v15409_v47  ;;  %v8436_v47 = vrot.slane %v8434_v37, 4  ;;  %v18748_v37 = vcombine.low %v8361_v10, %v8371_v50  ;;  %v8414_v48 = vrot.slane %v8413_v5, 4  ;;  %v8452_v4 = vrot.slane %v8451_v17, 4  ;;  %v15402_v10 = vld [vmem:[#allocation2 + $0x90] sm:$0xff]   ;;  %v8300_v5 = vld [vmem:[#allocation2 + $0x6c] sm:$0xf] }
 0x4a7   : > { %14388 = vmatprep.subr.bf16.mxu1 %v18722_v61  ;;  %v8461_v33 = vor.u32 %v8460_v44, %v8456_v6  ;;  %v18756_v50 = vrot.slane %v8478_v54, 5  ;;  %v8484_v43 = vrot.slane %v8482_v11, 4  ;;  %v8493_v62 = vshrl.u32 %v8297_v40, 16  ;;  %v18781_v54 = vld [vmem:[#allocation2 + $0x1c] sm:$0xf] }
 0x4a8   : > { %v8437_v45 = vor.u32 %v8436_v47, %v18741_v9  ;;  %v8496_v7 = vshll.u32 %v8297_v40, 16  ;;  %v8502_v26 = vshll.u32 %v18509_v35, 16  ;;  %v8506_v47 = vshrl.u32 %v18509_v35, 16  ;;  %19855 = vst [vmem:[#allocation32_spill] sm:$0xff] %v18781_v54  ;;  %v18789_v40 = vld [vmem:[#allocation2 + $0x20] sm:$0x1] }
 0x4a9   : > { %14325 = vmatmul.mubr.bf16.gmra.mrb[36].mxu1 %v15399_v32  ;;  %v8475_v32 = vor.u32 %v8474_v1, %v8471_v60  ;;  %v8395_v21 = vsel %vm15847_vm2, %v8390_v55, %v18736_v3  ;;  %v8409_v1 = vsel %vm15847_vm2, %v8404_v57, %v18728_v42  ;;  %v8419_v44 = vsel %vm15847_vm2, %v8414_v48, %v8418_v30  ;;  %v18799_v30 = vld [vmem:[#allocation2 + $0x28] sm:$0xf] }
 0x4aa   : > { %14328 = vmatprep.mubr.bf16.mxu1 %v15401_v14  ;;  %v8438_v14 = vrot.slane %v8437_v45, 4  ;;  %v8466_v18 = vrot.slane %v8464_v27, 5  ;;  %v8433_v19 = vsel %vm15847_vm2, %v8428_v12, %v18741_v9  ;;  %v8457_v3 = vsel %vm15847_vm2, %v8452_v4, %v8456_v6  ;;  %19856 = vst [vmem:[#allocation33_spill] sm:$0xff] %v18789_v40  ;;  %19857 = vst [vmem:[#allocation34_spill] sm:$0xff] %v18799_v30  ;;  %v18801_v27 = vld [vmem:[#allocation2 + $0x2c] sm:$0x1] }
 0x4ab   : > { %v8488_v31 = vshll.u32 %v18492_v63, 16  ;;  %v8462_v38 = vrot.slane %v8461_v33, 4  ;;  %v18776_v42 = vrot.slane %v8475_v32, 4  ;;  %v8485_v17 = vor.u32 %v8484_v43, %v18756_v50  ;;  %19858 = vst [vmem:[#allocation35_spill] sm:$0xff] %v18801_v27  ;;  %v10669_v12 = vld [vmem:[#allocation2 + $0x18] sm:$0xe] }
 0x4ac   : > { %v8443_v35 = vsel %vm15847_vm2, %v8438_v14, %v8442_v0  ;;  %v18779_v60 = vrot.slane %v8493_v62, 4  ;;  %v18783_v11 = vrot.slane %v8496_v7, 5  ;;  %v18785_v9 = vrot.slane %v8502_v26, 5  ;;  %v15405_v0 = vld [vmem:[#allocation2 + $0xa8] sm:$0xff]   ;;  %v10670_v32 = vld [vmem:[#allocation2 + $0x24] sm:$0xe] }
 0x4ad   : > { %v18787_v55 = vrot.slane %v8506_v47, 4  ;;  %v8517_v45 = vshrl.u32 %v8300_v5, 16  ;;  %v18791_v6 = vcombine.low %v8385_v20, %v8395_v21  ;;  %v18793_v63 = vcombine.low %v8409_v1, %v8419_v44  ;;  %v15407_v43 = vld [vmem:[#allocation2 + $0xb4] sm:$0xff]   ;;  %v10672_v47 = vld [vmem:[#allocation2 + $0x3c] sm:$0xe] }
 0x4ae   : > { %v18795_v57 = vcombine.low %v8433_v19, %v8443_v35  ;;  %v8467_v48 = vsel %vm15847_vm2, %v8462_v38, %v8466_v18  ;;  %v18805_v33 = vrot.slane %v8488_v31, 5  ;;  %v8526_v20 = vshll.u32 %v18520_v8, 16  ;;  %v18814_v14 = vld [vmem:[#allocation2 + $0x34] sm:$0xf]  ;;  %v18825_v18 = vld [vmem:[#allocation2 + $0x38] sm:$0x1] }
 0x4af   : > { %v18803_v4 = vcombine.low %v8457_v3, %v8467_v48  ;;  %19859 = vst [vmem:[#allocation36_spill] sm:$0xff] %v18814_v14  ;;  %v10735_v7 = vrot.slane %v18781_v54, 5  ;;  %v10738_v26 = vrot.slane %v18789_v40, 5  ;;  %v18823_v44 = vrot.slane %v8517_v45, 4  ;;  %19860 = vst [vmem:[#allocation37_spill] sm:$0xff] %v18825_v18 }
 0x4b0   : > { %v9926_v19 = vld [vmem:[#allocation2 + $0x44] sm:$0x1]  ;;  %v18829_v35 = vld [vmem:[#allocation2 + $0x78] sm:$0xf]  ;;  %v12940_v3 = vrot.slane %v10669_v12, 9  ;;  %v12941_v38 = vrot.slane %v10670_v32, 9 }
 0x4b1   : > { %14329 = vmatmul.mubr.bf16.gmra.mrb[40].mxu1 %v15402_v10  ;;  %v8520_v10 = vshll.u32 %v8300_v5, 16  ;;  %v18827_v5 = vld [vmem:[#allocation2 + $0x40] sm:$0xf]  ;;  %v10737_v31 = vrot.slane %v10735_v7, 4  ;;  %v10671_v48 = vld [vmem:[#allocation2 + $0x30] sm:$0xe] }
 0x4b2   : > { %14332 = vmatprep.mubr.bf16.mxu1 %v15404_v23  ;;  %v18812_v23 = vrot.slane %v8485_v17, 4  ;;  %19861 = vst [vmem:[#allocation38_spill] sm:$0xff] %v18827_v5  ;;  %v10742_v17 = vrot.slane %v18799_v30, 5  ;;  %v18834_v62 = vrot.slane %v8526_v20, 5  ;;  %v10745_v1 = vrot.slane %v18801_v27, 5 }
 0x4b3   : > { %v18832_v21 = vrot.slane %v8520_v10, 5  ;;  %v18838_v40 = vld [vmem:[#allocation2 + $0x4c] sm:$0xf]  ;;  %v18842_v12 = vsel %vm16013_vm5, %v12940_v3, %v10735_v7  ;;  %v18846_v32 = vsel %vm16013_vm5, %v10737_v31, %v10738_v26  ;;  %v9932_v45 = vld [vmem:[#allocation2 + $0x5c] sm:$0x1]  ;;  %v12942_v30 = vrot.slane %v10671_v48, 9 }
 0x4b4   : > { %19862 = vst [vmem:[#allocation39_spill] sm:$0xff] %v18838_v40  ;;  %19863 = vst [vmem:[#allocation40_spill] sm:$0xff] %v18842_v12  ;;  %v18850_v10 = vsel %vm16013_vm5, %v12941_v38, %v10742_v17  ;;  %v10744_v20 = vrot.slane %v10742_v17, 4  ;;  %v10749_v54 = vrot.slane %v18814_v14, 5  ;;  %v10752_v7 = vrot.slane %v18825_v18, 5 }
 0x4b5   : > { %19864 = vst [vmem:[#allocation41_spill] sm:$0xff] %v18846_v32  ;;  %19865 = vst [vmem:[#allocation42_spill] sm:$0xff] %v18850_v10  ;;  %v12943_v3 = vrot.slane %v10672_v47, 9  ;;  %v10756_v31 = vrot.slane %v18827_v5, 5  ;;  %v10759_v38 = vrot.slane %v9926_v19, 5 }
 0x4b6   : > { %v18860_v26 = vsel %vm16013_vm5, %v10744_v20, %v10745_v1  ;;  %v10673_v17 = vld [vmem:[#allocation2 + $0x48] sm:$0xe]  ;;  %v18865_v27 = vld [vmem:[#allocation2 + $0x64] sm:$0xf]  ;;  %v10751_v32 = vrot.slane %v10749_v54, 4  ;;  %v18872_v47 = vsel %vm16013_vm5, %v12942_v30, %v10749_v54 }
 0x4b7   : > { %19867 = vst [vmem:[#allocation44_spill] sm:$0xff] %v18860_v26  ;;  %v9935_v1 = vld [vmem:[#allocation2 + $0x68] sm:$0x1]  ;;  %v9937_v20 = vld [vmem:[#allocation2 + $0x70] sm:$0xf]  ;;  %19868 = vst [vmem:[#allocation45_spill] sm:$0xff] %v18872_v47  ;;  %v18876_v19 = vsel %vm16013_vm5, %v12943_v3, %v10756_v31 }
 0x4b8   : > { %19869 = vst [vmem:[#allocation46_spill] sm:$0xff] %v18876_v19  ;;  %v10758_v16 = vrot.slane %v10756_v31, 4  ;;  %v18880_v5 = vsel %vm16013_vm5, %v10751_v32, %v10752_v7  ;;  %v12944_v48 = vrot.slane %v10673_v17, 9  ;;  %v10763_v26 = vrot.slane %v18838_v40, 5  ;;  %v10675_v10 = vld [vmem:[#allocation2 + $0x60] sm:$0xe] }
 0x4b9   : > { %14333 = vmatmul.mubr.bf16.gmra.mrb[44].mxu1 %v15405_v0  ;;  %v9929_v0 = vld [vmem:[#allocation2 + $0x50] sm:$0x1]  ;;  %19870 = vst [vmem:[#allocation47_spill] sm:$0xff] %v18880_v5  ;;  %v9938_v18 = vld [vmem:[#allocation2 + $0x74] sm:$0x1]  ;;  %v10773_v31 = vrot.slane %v9932_v45, 5 }
 0x4ba   : > { %14336 = vmatprep.mubr.bf16.mxu1 %v15407_v43  ;;  %v18852_v43 = vld [vmem:[#allocation2 + $0x58] sm:$0xf]  ;;  %v10766_v12 = vrot.slane %v9929_v0, 5  ;;  %v18887_v30 = vsel %vm16013_vm5, %v10758_v16, %v10759_v38  ;;  %v10676_v14 = vld [vmem:[#allocation2 + $0x6c] sm:$0xe]  ;;  %v10765_v7 = vrot.slane %v10763_v26, 4 }
 0x4bb   : > { %19866 = vst [vmem:[#allocation43_spill] sm:$0xff] %v18852_v43  ;;  %19871 = vst [vmem:[#allocation48_spill] sm:$0xff] %v18887_v30  ;;  %v10770_v3 = vrot.slane %v18852_v43, 5  ;;  %v9940_v32 = vld [vmem:[#allocation2 + $0x7c] sm:$0xf]  ;;  %v12945_v17 = vrot.slane %v10674_v13, 9 }
 0x4bc   : > { %v9941_v54 = vld [vmem:[#allocation2 + $0x80] sm:$0x1]  ;;  %v9943_v5 = vld [vmem:[#allocation2 + $0x88] sm:$0xf]  ;;  %v12946_v38 = vrot.slane %v10675_v10, 9  ;;  %v10777_v47 = vrot.slane %v18865_v27, 5 }
 0x4bd   : > { %v10772_v16 = vrot.slane %v10770_v3, 4  ;;  %v10780_v45 = vrot.slane %v9935_v1, 5  ;;  %v12947_v43 = vrot.slane %v10676_v14, 9  ;;  %v10784_v40 = vrot.slane %v9937_v20, 5  ;;  %v10677_v30 = vld [vmem:[#allocation2 + $0x78] sm:$0xe] }
 0x4be   : > { %v10787_v0 = vrot.slane %v9938_v18, 5  ;;  %v9944_v19 = vld [vmem:[#allocation2 + $0x8c] sm:$0x1]  ;;  %v10779_v1 = vrot.slane %v10777_v47, 4  ;;  %v18916_v18 = vsel %vm16013_vm5, %v12946_v38, %v10777_v47  ;;  %v10791_v13 = vrot.slane %v9940_v32, 5 }
 0x4bf   : > { %v18910_v10 = vsel %vm16013_vm5, %v10772_v16, %v10773_v31  ;;  %v18920_v20 = vsel %vm16013_vm5, %v12947_v43, %v10784_v40  ;;  %v12948_v16 = vrot.slane %v10677_v30, 9  ;;  %v9949_v14 = vld [vmem:[#allocation2 + $0xa0] sm:$0xf]  ;;  %v10801_v38 = vrot.slane %v9944_v19, 5 }
 0x4c0   : > { %19874 = vst [vmem:[#allocation51_spill] sm:$0xff] %v18910_v10  ;;  %v18924_v31 = vsel %vm16013_vm5, %v10779_v1, %v10780_v45  ;;  %v9950_v10 = vld [vmem:[#allocation2 + $0xa4] sm:$0x1]  ;;  %v10793_v30 = vrot.slane %v10791_v13, 4  ;;  %v10680_v1 = vld [vmem:[#allocation2 + $0x9c] sm:$0xe] }
 0x4c1   : > { %14337 = vmatmul.mubr.bf16.gmra.mrb[48].mxu1 %v15408_v46  ;;  %v18895_v46 = vsel %vm16013_vm5, %v12944_v48, %v10763_v26  ;;  %v9946_v48 = vld [vmem:[#allocation2 + $0x94] sm:$0xf]  ;;  %v18906_v26 = vsel %vm16013_vm5, %v12945_v17, %v10770_v3  ;;  %v10678_v3 = vld [vmem:[#allocation2 + $0x84] sm:$0xe]  ;;  %19875 = vst [vmem:[#allocation52_spill] sm:$0xff] %v18924_v31 }
 0x4c2   : > { %14356 = vmatprep.mubr.bf16.mxu1 %v18716_v59  ;;  %19872 = vst [vmem:[#allocation49_spill] sm:$0xff] %v18895_v46  ;;  %v18900_v59 = vsel %vm16013_vm5, %v10765_v7, %v10766_v12  ;;  %v9947_v12 = vld [vmem:[#allocation2 + $0x98] sm:$0x1]  ;;  %v10786_v7 = vrot.slane %v10784_v40, 4  ;;  %v15411_v17 = vld [vmem:[#allocation3 + $0x148] sm:$0xff]   ;;  %v10798_v40 = vrot.slane %v9943_v5, 5 }
 0x4c3   : > { %19873 = vst [vmem:[#allocation50_spill] sm:$0xff] %v18900_v59  ;;  %v10794_v59 = vrot.slane %v9941_v54, 5  ;;  %v10679_v46 = vld [vmem:[#allocation2 + $0x90] sm:$0xe]  ;;  %v18937_v54 = vsel %vm16013_vm5, %v12948_v16, %v10791_v13  ;;  %v12949_v32 = vrot.slane %v10678_v3, 9  ;;  %v10805_v19 = vrot.slane %v9946_v48, 5 }
 0x4c4   : > { %v18930_v43 = vsel %vm16013_vm5, %v10786_v7, %v10787_v0  ;;  %v9952_v0 = vld [vmem:[#allocation2 + $0xac] sm:$0xf]  ;;  %v10800_v7 = vrot.slane %v10798_v40, 4  ;;  %v12950_v5 = vrot.slane %v10679_v46, 9  ;;  %v10808_v47 = vrot.slane %v9947_v12, 5 }
 0x4c5   : > { %19876 = vst [vmem:[#allocation53_spill] sm:$0xff] %v18930_v43  ;;  %v9953_v31 = vld [vmem:[#allocation2 + $0xb0] sm:$0x1]  ;;  %v18943_v45 = vsel %vm16013_vm5, %v10793_v30, %v10794_v59  ;;  %v18947_v13 = vsel %vm16013_vm5, %v12949_v32, %v10798_v40  ;;  %v10812_v3 = vrot.slane %v9949_v14, 5  ;;  %v9955_v16 = vld [vmem:[#allocation2 + $0xb8] sm:$0xf]  ;;  %v8523_v59 = vor.u32 %v18832_v21, %v18823_v44 }
 0x4c6   : > { %19877 = vst [vmem:[#allocation54_spill] sm:$0xff] %v18943_v45  ;;  %19878 = vst [vmem:[#allocation55_spill] sm:$0xff] %v18947_v13  ;;  %v18953_v48 = vsel %vm16013_vm5, %v10800_v7, %v10801_v38  ;;  %v10807_v12 = vrot.slane %v10805_v19, 4  ;;  %v12951_v43 = vrot.slane %v10680_v1, 9  ;;  %v9958_v30 = vld [vmem:[#allocation2 + $0xc4] sm:$0xf] }
 0x4c7   : > { %19879 = vst [vmem:[#allocation56_spill] sm:$0xff] %v18953_v48  ;;  %v10814_v14 = vrot.slane %v10812_v3, 4  ;;  %v10681_v32 = vld [vmem:[#allocation2 + $0xa8] sm:$0xe]  ;;  %v9959_v46 = vld [vmem:[#allocation2 + $0xc8] sm:$0x1] }
 0x4c8   : > { %v18965_v38 = vsel %vm16013_vm5, %v10807_v12, %v10808_v47  ;;  %v18969_v1 = vsel %vm16013_vm5, %v12951_v43, %v10812_v3  ;;  %v10819_v21 = vrot.slane %v9952_v0, 5  ;;  %v10822_v44 = vrot.slane %v9953_v31, 5  ;;  %v10682_v7 = vld [vmem:[#allocation2 + $0xb4] sm:$0xe]  ;;  %v10683_v47 = vld [vmem:[#allocation2 + $0xc0] sm:$0xe] }
 0x4c9   : > { %14357 = vmatmul.mubr.bf16.vlgmr.msra.gmra.mrb[20].mxu1 %v18748_v37  ;;  %v15412_v37 = vld [vmem:[#allocation3 + $0x150] sm:$0xff]   ;;  %19880 = vst [vmem:[#allocation57_spill] sm:$0xff] %v18965_v38  ;;  %v15413_v40 = vld [vmem:[#allocation3 + $0x158] sm:$0xff]   ;;  %v19881_v12 = vshrl.u32 %v18520_v8, 16  ;;  %v12952_v31 = vrot.slane %v10681_v32, 9  ;;  %v12953_v3 = vrot.slane %v10682_v7, 9 }
 0x4ca   : > { %14360 = vmatprep.mubr.bf16.mxu1 %v18791_v6  ;;  %14389 = vmatpush3.bf16.msra.mxu1 %v18722_v61  ;;  %v10815_v6 = vrot.slane %v9950_v10, 5  ;;  %v9956_v61 = vld [vmem:[#allocation2 + $0xbc] sm:$0x1]  ;;  %v18961_v10 = vsel %vm16013_vm5, %v12950_v5, %v10805_v19  ;;  %v10826_v19 = vrot.slane %v9955_v16, 5  ;;  %v10821_v0 = vrot.slane %v10819_v21, 4 }
 0x4cb   : > { %14390 = vmatprep.subr.bf16.mxu1 %v15411_v17  ;;  %v10829_v48 = vrot.slane %v9956_v61, 5  ;;  %v8532_v13 = vrot.slane %v19881_v12, 4  ;;  %v10833_v5 = vrot.slane %v9958_v30, 5  ;;  %v10836_v38 = vrot.slane %v9959_v46, 5  ;;  %v8306_v16 = vld [vmem:[#allocation2 + $0x84] sm:$0xf] }
 0x4cc   : > { %v10828_v45 = vrot.slane %v10826_v19, 4  ;;  %v18986_v8 = vsel %vm16013_vm5, %v12952_v31, %v10819_v21  ;;  %v18990_v61 = vsel %vm16013_vm5, %v10821_v0, %v10822_v44  ;;  %v19882_v32 = vshrl.u32 %v18829_v35, 16 }
 0x4cd   : > { %v12968_v46 = vcombine.low %v18986_v8, %v18990_v61  ;;  %v10835_v30 = vrot.slane %v10833_v5, 4  ;;  %v19883_v44 = vshll.u32 %v18829_v35, 16  ;;  %v8565_v31 = vshrl.u32 %v8306_v16, 16 }
 0x4ce   : > { %14391 = vmatpush3.bf16.msra.mxu1 %v15411_v17  ;;  %v18975_v17 = vsel %vm16013_vm5, %v10814_v14, %v10815_v6  ;;  %v8550_v6 = vshll.u32 %v18546_v53, 16  ;;  %v12954_v14 = vrot.slane %v10683_v47, 9  ;;  %v8543_v21 = vrot.slane %v19882_v32, 4 }
 0x4cf   : > { %14392 = vmatprep.subr.bf16.mxu1 %v15412_v37  ;;  %v12967_v43 = vcombine.low %v18969_v1, %v18975_v17  ;;  %v8546_v7 = vrot.slane %v19883_v44, 5  ;;  %v8554_v47 = vshrl.u32 %v18546_v53, 16  ;;  %v8568_v0 = vshll.u32 %v8306_v16, 16  ;;  %v12982_v17 = vld [vmem:[%s15806_s25 + $0x1c] sm:$0xf] }
 0x4d0   : > { %v8491_v35 = vsel %vm15847_vm2, %v18812_v23, %v18805_v33  ;;  %v19884_v53 = vor.u32 %v18783_v11, %v18779_v60  ;;  %v8574_v33 = vshll.u32 %v18563_v15, 16  ;;  %v8578_v60 = vshrl.u32 %v18563_v15, 16  ;;  %v8309_v11 = vld [vmem:[#allocation2 + $0x90] sm:$0xf] }
 0x4d1   : > { %14361 = vmatmul.mubr.bf16.gmra.mrb[24].mxu1 %v18793_v63  ;;  %v15414_v63 = vld [vmem:[#allocation3 + $0x160] sm:$0xff]   ;;  %v19887_v23 = vor.u32 %v18787_v55, %v18785_v9  ;;  %v8524_v32 = vrot.slane %v8523_v59, 4  ;;  %v19888_v44 = vshll.u32 %v18530_v49, 16  ;;  %v8589_v49 = vshrl.u32 %v8309_v11, 16 }
 0x4d2   : > { %14364 = vmatprep.mubr.bf16.mxu1 %v18795_v57  ;;  %14393 = vmatpush3.bf16.msra.mxu1 %v15412_v37  ;;  %v18996_v57 = vsel %vm16013_vm5, %v12953_v3, %v10826_v19  ;;  %v19000_v37 = vsel %vm16013_vm5, %v10828_v45, %v10829_v48  ;;  %v19011_v19 = vsel %vm16013_vm5, %v12954_v14, %v10833_v5  ;;  %v8500_v48 = vrot.slane %v19884_v53, 4 }
 0x4d3   : > { %14394 = vmatprep.subr.bf16.mxu1 %v15413_v40  ;;  %v12969_v12 = vcombine.low %v18996_v57, %v19000_v37  ;;  %v19015_v45 = vsel %vm16013_vm5, %v10835_v30, %v10836_v38  ;;  %v19885_v3 = vshll.u32 %v18518_v28, 16  ;;  %v19886_v38 = vsel %vm15847_vm2, %v18776_v42, %v18756_v50  ;;  %v15415_v28 = vld [vmem:[#allocation3 + $0x168] sm:$0xff]  }
 0x4d4   : > { %v12970_v5 = vcombine.low %v19011_v19, %v19015_v45  ;;  %v12834_v14 = vcombine.low %v19886_v38, %v8491_v35  ;;  %v8533_v30 = vor.u32 %v8532_v13, %v18834_v62  ;;  %v8538_v53 = vrot.slane %v19888_v44, 5  ;;  %v8312_v38 = vld [vmem:[#allocation2 + $0x9c] sm:$0xf]  ;;  %v15417_v44 = vld [vmem:[#allocation3 + $0x178] sm:$0xff]  }
 0x4d5   : > { %v8514_v16 = vrot.slane %v19885_v3, 5  ;;  %v8547_v3 = vor.u32 %v8546_v7, %v8543_v21  ;;  %v19042_v50 = vrot.slane %v8550_v6, 5  ;;  %v8556_v42 = vrot.slane %v8554_v47, 4  ;;  %v15416_v47 = vld [vmem:[#allocation3 + $0x170] sm:$0xff]  }
 0x4d6   : > { %14395 = vmatpush3.bf16.msra.mxu1 %v15413_v40  ;;  %v8510_v40 = vrot.slane %v19887_v23, 4  ;;  %v8567_v13 = vrot.slane %v8565_v31, 4  ;;  %v8570_v35 = vrot.slane %v8568_v0, 5  ;;  %v8505_v15 = vsel %vm15847_vm2, %v8500_v48, %v18785_v9 }
 0x4d7   : > { %14396 = vmatprep.subr.bf16.mxu1 %v15414_v63  ;;  %v8592_v59 = vshll.u32 %v8309_v11, 16  ;;  %v8534_v21 = vrot.slane %v8533_v30, 4  ;;  %v19050_v6 = vrot.slane %v8574_v33, 5  ;;  %v8580_v7 = vrot.slane %v8578_v60, 4 }
 0x4d8   : > { %v8515_v55 = vsel %vm15847_vm2, %v8510_v40, %v8514_v16  ;;  %v8529_v31 = vsel %vm15847_vm2, %v8524_v32, %v18834_v62  ;;  %v8548_v0 = vrot.slane %v8547_v3, 4  ;;  %v8613_v9 = vshrl.u32 %v8312_v38, 16 }
 0x4d9   : > { %14365 = vmatmul.mubr.bf16.gmra.mrb[28].mxu1 %v18803_v4  ;;  %v8560_v4 = vshll.u32 %v18561_v51, 16  ;;  %v8616_v48 = vshll.u32 %v8312_v38, 16  ;;  %v8557_v16 = vor.u32 %v8556_v42, %v19042_v50  ;;  %v8584_v51 = vshll.u32 %v18572_v24, 16 }
 0x4da   : > { %14368 = vmatprep.mubr.bf16.mxu1 %v12834_v14  ;;  %14397 = vmatpush3.bf16.msra.mxu1 %v15414_v63  ;;  %v8539_v63 = vsel %vm15847_vm2, %v8534_v21, %v8538_v53  ;;  %v8571_v14 = vor.u32 %v8570_v35, %v8567_v13  ;;  %v8591_v30 = vrot.slane %v8589_v49, 4  ;;  %v8594_v33 = vrot.slane %v8592_v59, 5  ;;  %v8315_v13 = vld [vmem:[#allocation2 + $0xa8] sm:$0xf]  ;;  %v8318_v59 = vld [vmem:[#allocation2 + $0xb4] sm:$0xf] }
 0x4db   : > { %14398 = vmatprep.subr.bf16.mxu1 %v15415_v28  ;;  %v8598_v60 = vshll.u32 %v18580_v34, 16  ;;  %v8602_v11 = vshrl.u32 %v18580_v34, 16  ;;  %v12835_v23 = vcombine.low %v8505_v15, %v8515_v55  ;;  %v12836_v62 = vcombine.low %v8529_v31, %v8539_v63  ;;  %v19069_v31 = vld [vmem:[#allocation3 + $0x180] sm:$0xff]  }
 0x4dc   : > { %v8562_v40 = vrot.slane %v8560_v4, 5  ;;  %v8581_v32 = vor.u32 %v8580_v7, %v19050_v6  ;;  %v8615_v53 = vrot.slane %v8613_v9, 4  ;;  %v8618_v3 = vrot.slane %v8616_v48, 5  ;;  %v15520_v9 = vld [vmem:[#allocation2 + $0x98] sm:$0x1] }
 0x4dd   : > { %v8622_v42 = vshll.u32 %v18592_v41, 16  ;;  %v8626_v24 = vshrl.u32 %v18592_v41, 16  ;;  %v8553_v34 = vsel %vm15847_vm2, %v8548_v0, %v19042_v50  ;;  %v8572_v35 = vrot.slane %v8571_v14, 4 }
 0x4de   : > { %14399 = vmatpush3.bf16.msra.mxu1 %v15415_v28  ;;  %v8558_v28 = vrot.slane %v8557_v16, 4  ;;  %v8586_v38 = vrot.slane %v8584_v51, 5  ;;  %v8595_v15 = vor.u32 %v8594_v33, %v8591_v30  ;;  %v8600_v55 = vrot.slane %v8598_v60, 5 }
 0x4df   : > { %14400 = vmatprep.subr.bf16.mxu1 %v15416_v47  ;;  %v8604_v49 = vrot.slane %v8602_v11, 4  ;;  %v8582_v4 = vrot.slane %v8581_v32, 4  ;;  %v8637_v41 = vshrl.u32 %v8315_v13, 16  ;;  %v8640_v7 = vshll.u32 %v8315_v13, 16  ;;  %v15521_v11 = vld [vmem:[#allocation2 + $0xa4] sm:$0x1] }
 0x4e0   : > { %v8563_v21 = vsel %vm15847_vm2, %v8558_v28, %v8562_v40  ;;  %v8608_v50 = vshll.u32 %v15520_v9, 16  ;;  %v8619_v0 = vor.u32 %v8618_v3, %v8615_v53  ;;  %v8624_v48 = vrot.slane %v8622_v42, 5  ;;  %v15522_v32 = vld [vmem:[#allocation2 + $0xac] sm:$0xf] }
 0x4e1   : > { %14369 = vmatmul.mubr.bf16.gmra.mrb[32].mxu1 %v12835_v23  ;;  %v8628_v63 = vrot.slane %v8626_v24, 4  ;;  %v12837_v16 = vcombine.low %v8553_v34, %v8563_v21  ;;  %v8577_v14 = vsel %vm15847_vm2, %v8572_v35, %v19050_v6  ;;  %v8664_v51 = vshll.u32 %v8318_v59, 16  ;;  %v15523_v35 = vld [vmem:[#allocation2 + $0xb8] sm:$0xf] }
 0x4e2   : > { %14372 = vmatprep.mubr.bf16.mxu1 %v12836_v62  ;;  %14401 = vmatpush3.bf16.msra.mxu1 %v15416_v47  ;;  %v8661_v47 = vshrl.u32 %v8318_v59, 16  ;;  %v8587_v30 = vsel %vm15847_vm2, %v8582_v4, %v8586_v38  ;;  %v8596_v33 = vrot.slane %v8595_v15, 4  ;;  %v8605_v60 = vor.u32 %v8604_v49, %v8600_v55  ;;  %v8321_v49 = vld [vmem:[#allocation2 + $0xc0] sm:$0xf] }
 0x4e3   : > { %14402 = vmatprep.subr.bf16.mxu1 %v15417_v44  ;;  %v8632_v23 = vshll.u32 %v15521_v11, 16  ;;  %v8639_v62 = vrot.slane %v8637_v41, 4  ;;  %v8642_v40 = vrot.slane %v8640_v7, 5  ;;  %v8646_v53 = vshll.u32 %v15522_v32, 16 }
 0x4e4   : > { %v8650_v3 = vshrl.u32 %v15522_v32, 16  ;;  %v12838_v42 = vcombine.low %v8577_v14, %v8587_v30  ;;  %v8610_v24 = vrot.slane %v8608_v50, 5  ;;  %v8620_v6 = vrot.slane %v8619_v0, 4 }
 0x4e5   : > { %v8629_v13 = vor.u32 %v8628_v63, %v8624_v48  ;;  %v8663_v34 = vrot.slane %v8661_v47, 4  ;;  %v8666_v28 = vrot.slane %v8664_v51, 5  ;;  %v8670_v38 = vshll.u32 %v15523_v35, 16 }
 0x4e6   : > { %14403 = vmatpush3.bf16.msra.mxu1 %v15417_v44  ;;  %v8674_v15 = vshrl.u32 %v15523_v35, 16  ;;  %v8606_v44 = vrot.slane %v8605_v60, 4  ;;  %v8634_v59 = vrot.slane %v8632_v23, 5  ;;  %v8601_v21 = vsel %vm15847_vm2, %v8596_v33, %v8600_v55  ;;  %v15524_v55 = vld [vmem:[#allocation2 + $0xb0] sm:$0x1] }
 0x4e7   : > { %14436 = vmatprep.subr.bf16.mxu1 %v19069_v31  ;;  %v8643_v4 = vor.u32 %v8642_v40, %v8639_v62  ;;  %v8648_v41 = vrot.slane %v8646_v53, 5  ;;  %v8652_v7 = vrot.slane %v8650_v3, 4  ;;  %v8625_v9 = vsel %vm15847_vm2, %v8620_v6, %v8624_v48  ;;  %v15525_v40 = vld [vmem:[#allocation2 + $0xbc] sm:$0x1]  ;;  %v15526_v3 = vld [vmem:[#allocation2 + $0xc4] sm:$0xf] }
 0x4e8   : > { %v8630_v50 = vrot.slane %v8629_v13, 4  ;;  %v8685_v0 = vshrl.u32 %v8321_v49, 16  ;;  %v8688_v63 = vshll.u32 %v8321_v49, 16  ;;  %v8667_v14 = vor.u32 %v8666_v28, %v8663_v34 }
 0x4e9   : > { %14373 = vmatmul.mubr.bf16.gmra.mrb[36].mxu1 %v12837_v16  ;;  %v8611_v16 = vsel %vm15847_vm2, %v8606_v44, %v8610_v24  ;;  %v8672_v47 = vrot.slane %v8670_v38, 5  ;;  %v8676_v51 = vrot.slane %v8674_v15, 4  ;;  %v8656_v33 = vshll.u32 %v15524_v55, 16 }
 0x4ea   : > { %14376 = vmatprep.mubr.bf16.mxu1 %v12838_v42  ;;  %v12839_v30 = vcombine.low %v8601_v21, %v8611_v16  ;;  %v8635_v60 = vsel %vm15847_vm2, %v8630_v50, %v8634_v59  ;;  %v8644_v23 = vrot.slane %v8643_v4, 4  ;;  %v8653_v62 = vor.u32 %v8652_v7, %v8648_v41  ;;  %v15527_v7 = vld [vmem:[#allocation2 + $0xc8] sm:$0x1] }
 0x4eb   : > { %v12840_v11 = vcombine.low %v8625_v9, %v8635_v60  ;;  %v8680_v48 = vshll.u32 %v15525_v40, 16  ;;  %v8687_v32 = vrot.slane %v8685_v0, 4  ;;  %v8690_v53 = vrot.slane %v8688_v63, 5  ;;  %v15528_v63 = vld [vmem:[#allocation2 + $0x10] sm:$0xf] }
 0x4ec   : > { %v8694_v42 = vshll.u32 %v15526_v3, 16  ;;  %v8698_v6 = vshrl.u32 %v15526_v3, 16  ;;  %v8668_v24 = vrot.slane %v8667_v14, 4  ;;  %v8677_v13 = vor.u32 %v8676_v51, %v8672_v47  ;;  %v9030_v60 = vld [vmem:[#allocation2 + $0xc] sm:$0xe] }
 0x4ed   : > { %v8658_v34 = vrot.slane %v8656_v33, 5  ;;  %v8649_v28 = vsel %vm15847_vm2, %v8644_v23, %v8648_v41  ;;  %v8682_v35 = vrot.slane %v8680_v48, 5  ;;  %v8654_v38 = vrot.slane %v8653_v62, 4  ;;  %v15529_v48 = vld [vmem:[#allocation2 + $0x1c] sm:$0xf] }
 0x4ee   : > { %v8691_v15 = vor.u32 %v8690_v53, %v8687_v32  ;;  %v8696_v49 = vrot.slane %v8694_v42, 5  ;;  %v8700_v44 = vrot.slane %v8698_v6, 4  ;;  %v8673_v59 = vsel %vm15847_vm2, %v8668_v24, %v8672_v47  ;;  %v9031_v6 = vld [vmem:[#allocation2 + $0x18] sm:$0xe] }
 0x4ef   : > { %v8678_v21 = vrot.slane %v8677_v13, 4  ;;  %v8659_v4 = vsel %vm15847_vm2, %v8654_v38, %v8658_v34  ;;  %v8704_v9 = vshll.u32 %v15527_v7, 16  ;;  %v9096_v41 = vrot.slane %v15528_v63, 5  ;;  %v15419_v38 = vld [vmem:[#allocation3 + $0x188] sm:$0xff]   ;;  %v19900_v63 = vld [vmem:[#allocation15_spill] sm:$0xff] }
 0x4f0   : > { %v12841_v50 = vcombine.low %v8649_v28, %v8659_v4  ;;  %v8692_v14 = vrot.slane %v8691_v15, 4  ;;  %v8701_v51 = vor.u32 %v8700_v44, %v8696_v49  ;;  %v12852_v23 = vrot.slane %v9030_v60, 9  ;;  %v15422_v4 = vld [vmem:[#allocation3 + $0x1a0] sm:$0xff]   ;;  %v19906_v60 = vld [vmem:[#allocation19_spill] sm:$0xff] }
 0x4f1   : > { %14377 = vmatmul.mubr.bf16.gmra.mrb[40].mxu1 %v12839_v30  ;;  %v8683_v0 = vsel %vm15847_vm2, %v8678_v21, %v8682_v35  ;;  %v9099_v30 = vrot.slane %v18694_v39, 5  ;;  %v8706_v47 = vrot.slane %v8704_v9, 5  ;;  %v9098_v55 = vrot.slane %v9096_v41, 4  ;;  %v19896_v9 = vld [vmem:[#allocation9_spill] sm:$0xff] }
 0x4f2   : > { %14380 = vmatprep.mubr.bf16.mxu1 %v12840_v11  ;;  %v12842_v16 = vcombine.low %v8673_v59, %v8683_v0  ;;  %v8697_v33 = vsel %vm15847_vm2, %v8692_v14, %v8696_v49  ;;  %v8702_v11 = vrot.slane %v8701_v51, 4  ;;  %v9103_v32 = vrot.slane %v15529_v48, 5  ;;  %v15421_v49 = vld [vmem:[#allocation3 + $0x198] sm:$0xff]   ;;  %v19903_v14 = vld [vmem:[#allocation18_spill] sm:$0xff] }
 0x4f3   : > { %v9100_v62 = vsel %vm16013_vm5, %v9098_v55, %v9099_v30  ;;  %v9097_v39 = vsel %vm16013_vm5, %v12852_v23, %v9096_v41  ;;  %v9106_v42 = vrot.slane %v18696_v2, 5  ;;  %v12853_v13 = vrot.slane %v9031_v6, 9  ;;  %v15420_v2 = vld [vmem:[#allocation3 + $0x190] sm:$0xff]   ;;  %v19891_v59 = vld [vmem:[#allocation12_spill] sm:$0xff]  ;;  %v15428_v30 = vld [vmem:[#allocation3 + $0x1c0] sm:$0xff]  }
 0x4f4   : > { %v8707_v40 = vsel %vm15847_vm2, %v8702_v11, %v8706_v47  ;;  %v12868_v3 = vcombine.low %v9097_v39, %v9100_v62  ;;  %v9105_v24 = vrot.slane %v9103_v32, 4  ;;  %v19889_v15 = vcombine.low %v18496_v36, %v18505_v56  ;;  %v15423_v36 = vld [vmem:[#allocation3 + $0x1a8] sm:$0xff]   ;;  %v19893_v56 = vld [vmem:[#allocation11_spill] sm:$0xff]  ;;  %v19905_v47 = vld [vmem:[#allocation17_spill] sm:$0xff] }
 0x4f5   : > { %v12843_v53 = vcombine.low %v8697_v33, %v8707_v40  ;;  %v9104_v28 = vsel %vm16013_vm5, %v12853_v13, %v9103_v32  ;;  %v19890_v44 = vcombine.low %v18500_v52, %v18515_v22  ;;  %v19892_v21 = vcombine.low %v18526_v25, %v19891_v59  ;;  %v15424_v52 = vld [vmem:[#allocation3 + $0x1b0] sm:$0xff]   ;;  %v15425_v22 = vld [vmem:[#allocation3 + $0x1b8] sm:$0xff]   ;;  %v19899_v25 = vld [vmem:[#allocation13_spill] sm:$0xff] }
 0x4f6   : > { %v9107_v34 = vsel %vm16013_vm5, %v9105_v24, %v9106_v42  ;;  %v19901_v41 = vcombine.low %v19899_v25, %v19900_v63  ;;  %v19907_v55 = vcombine.low %v19905_v47, %v19906_v60  ;;  %v19908_v33 = vld [vmem:[#allocation20_spill] sm:$0xff]  ;;  %v19909_v11 = vld [vmem:[#allocation21_spill] sm:$0xff]  ;;  %v19911_v62 = vld [vmem:[#allocation22_spill] sm:$0xff]  ;;  %v11264_v37 = vshll.u32 %v12982_v17, 16 }
 0x4f7   : > { %v12869_v35 = vcombine.low %v9104_v28, %v9107_v34  ;;  %v19910_v23 = vcombine.low %v19908_v33, %v19909_v11  ;;  %v19912_v40 = vld [vmem:[#allocation23_spill] sm:$0xff]  ;;  %v19914_v32 = vld [vmem:[#allocation24_spill] sm:$0xff]  ;;  %v19921_v13 = vld [vmem:[#allocation29_spill] sm:$0xff] }
 0x4f8   : > { %v19913_v48 = vcombine.low %v19911_v62, %v19912_v40  ;;  %v19918_v42 = vld [vmem:[#allocation27_spill] sm:$0xff]  ;;  %v19920_v24 = vld [vmem:[#allocation28_spill] sm:$0xff]  ;;  %v15426_v28 = vld [vmem:[#allocation2 + $0x18] sm:$0xff]  }
 0x4f9   : > { %14381 = vmatmul.mubr.bf16.gmra.mrb[44].mxu1 %v12841_v50  ;;  %v19897_v50 = vld [vmem:[#allocation14_spill] sm:$0xff]  ;;  %v19922_v34 = vcombine.low %v19920_v24, %v19921_v13  ;;  %v15434_v59 = vld [vmem:[#allocation3 + $0x1d0] sm:$0xff]   ;;  %v9915_v25 = vld [vmem:[#allocation2 + $0x18] sm:$0xf] }
 0x4fa   : > { %14384 = vmatprep.mubr.bf16.mxu1 %v12842_v16  ;;  %v19898_v0 = vcombine.low %v19896_v9, %v19897_v50  ;;  %v19902_v16 = vld [vmem:[#allocation16_spill] sm:$0xff]  ;;  %v15435_v9 = vld [vmem:[#allocation2 + $0x60] sm:$0xff]   ;;  %v15446_v50 = vld [vmem:[#allocation3 + $0x1f0] sm:$0xff]  }
 0x4fb   : > { %v19904_v51 = vcombine.low %v19902_v16, %v19903_v14  ;;  %v19150_v63 = vld [vmem:[#allocation3 + $0x200] sm:$0xff]   ;;  %v9967_v16 = vshll.u32 %v9915_v25, 16  ;;  %v15439_v14 = vld [vmem:[#allocation2 + $0x84] sm:$0xff]   ;;  %v19926_v47 = vld [vmem:[#allocation32_spill] sm:$0xff] }
 0x4fc   : > { %v9973_v60 = vshll.u32 %v19926_v47, 16  ;;  %v19927_v40 = vld [vmem:[#allocation34_spill] sm:$0xff] }
 0x4fd   : > { %v9969_v11 = vrot.slane %v9967_v16, 5 }
 0x501   : > { %14385 = vmatmul.mubr.bf16.gmra.mrb[48].mxu1 %v12843_v53  ;;  %v19915_v53 = vld [vmem:[#allocation25_spill] sm:$0xff] }
 0x502   : > { %14404 = vmatprep.mubr.bf16.mxu1 %v12868_v3  ;;  %v19916_v39 = vcombine.low %v19914_v32, %v19915_v53  ;;  %v19917_v3 = vld [vmem:[#allocation26_spill] sm:$0xff]  ;;  %v10001_v32 = vshrl.u32 %v19927_v40, 16  ;;  %v9975_v53 = vrot.slane %v9973_v60, 5 }
 0x503   : > { %v19919_v6 = vcombine.low %v19917_v3, %v19918_v42  ;;  %v15442_v42 = vld [vmem:[#allocation2 + $0x9c] sm:$0xff]  }
 0x509   : > { %14405 = vmatmul.mubr.bf16.vlgmr.msra.gmra.mrb[20].mxu1 %v12869_v35  ;;  %v19923_v35 = vld [vmem:[#allocation30_spill] sm:$0xff] }
 0x50a   : > { %14408 = vmatprep.mubr.bf16.mxu1 %v19889_v15  ;;  %14437 = vmatpush3.bf16.msra.mxu1 %v19069_v31  ;;  %v19894_v31 = vld [vmem:[#allocation10_spill] sm:$0xff] }
 0x50b   : > { %14438 = vmatprep.subr.bf16.mxu1 %v15419_v38  ;;  %v19895_v7 = vcombine.low %v19893_v56, %v19894_v31  ;;  %v15440_v56 = vld [vmem:[#allocation3 + $0x1e0] sm:$0xff]  }
 0x50c   : > { %v15433_v31 = vld [vmem:[#allocation2 + $0x54] sm:$0xff]  }
 0x50e   : > { %14439 = vmatpush3.bf16.msra.mxu1 %v15419_v38  ;;  %v19924_v38 = vld [vmem:[#allocation31_spill] sm:$0xff] }
 0x50f   : > { %14440 = vmatprep.subr.bf16.mxu1 %v15420_v2  ;;  %v19925_v15 = vcombine.low %v19923_v35, %v19924_v38  ;;  %v15444_v35 = vld [vmem:[#allocation2 + $0xa8] sm:$0xff]  }
 0x511   : > { %14409 = vmatmul.mubr.bf16.gmra.mrb[24].mxu1 %v19890_v44  ;;  %v15429_v44 = vld [vmem:[#allocation2 + $0x30] sm:$0xff]  }
 0x512   : > { %14412 = vmatprep.mubr.bf16.mxu1 %v19892_v21  ;;  %14441 = vmatpush3.bf16.msra.mxu1 %v15420_v2  ;;  %v15427_v2 = vld [vmem:[#allocation2 + $0x24] sm:$0xff]   ;;  %v15430_v21 = vld [vmem:[#allocation2 + $0x3c] sm:$0xff]  }
 0x513   : > { %14442 = vmatprep.subr.bf16.mxu1 %v15421_v49 }
 0x516   : > { %14443 = vmatpush3.bf16.msra.mxu1 %v15421_v49  ;;  %v15431_v49 = vld [vmem:[#allocation3 + $0x1c8] sm:$0xff]  }
 0x517   : > { %14444 = vmatprep.subr.bf16.mxu1 %v15422_v4 }
 0x519   : > { %14413 = vmatmul.mubr.bf16.gmra.mrb[28].mxu1 %v19895_v7  ;;  %v15443_v7 = vld [vmem:[#allocation3 + $0x1e8] sm:$0xff]  }
 0x51a   : > { %14416 = vmatprep.mubr.bf16.mxu1 %v19898_v0  ;;  %14445 = vmatpush3.bf16.msra.mxu1 %v15422_v4  ;;  %v15437_v4 = vld [vmem:[#allocation3 + $0x1d8] sm:$0xff]  }
 0x51b   : > { %14446 = vmatprep.subr.bf16.mxu1 %v15423_v36  ;;  %v15436_v0 = vld [vmem:[#allocation2 + $0x6c] sm:$0xff]  }
 0x51e   : > { %14447 = vmatpush3.bf16.msra.mxu1 %v15423_v36  ;;  %v15432_v36 = vld [vmem:[#allocation2 + $0x48] sm:$0xff]  }
 0x51f   : > { %14448 = vmatprep.subr.bf16.mxu1 %v15424_v52 }
 0x521   : > { %14417 = vmatmul.mubr.bf16.gmra.mrb[32].mxu1 %v19901_v41  ;;  %v9964_v41 = vshrl.u32 %v9915_v25, 16 }
 0x522   : > { %14420 = vmatprep.mubr.bf16.mxu1 %v19904_v51  ;;  %14449 = vmatpush3.bf16.msra.mxu1 %v15424_v52  ;;  %v15449_v52 = vld [vmem:[#allocation3 + $0x1f8] sm:$0xff]  }
 0x523   : > { %14450 = vmatprep.subr.bf16.mxu1 %v15425_v22  ;;  %v15441_v51 = vld [vmem:[#allocation2 + $0x90] sm:$0xff]   ;;  %v9966_v33 = vrot.slane %v9964_v41, 4 }
 0x525   : > { %v9970_v3 = vor.u32 %v9969_v11, %v9966_v33  ;;  %v15447_v33 = vld [vmem:[#allocation2 + $0xc0] sm:$0xff]  }
 0x526   : > { %14451 = vmatpush3.bf16.msra.mxu1 %v15425_v22  ;;  %v15438_v22 = vld [vmem:[#allocation2 + $0x78] sm:$0xff]  }
 0x527   : > { %14484 = vmatprep.subr.bf16.mxu1 %v15428_v30 }
 0x529   : > { %14421 = vmatmul.mubr.bf16.gmra.mrb[36].mxu1 %v19907_v55  ;;  %v9977_v55 = vshrl.u32 %v19926_v47, 16 }
 0x52a   : > { %14424 = vmatprep.mubr.bf16.mxu1 %v19910_v23 }
 0x531   : > { %14425 = vmatmul.mubr.bf16.gmra.mrb[40].mxu1 %v19913_v48  ;;  %v9997_v48 = vshll.u32 %v19927_v40, 16 }
 0x532   : > { %14428 = vmatprep.mubr.bf16.mxu1 %v19916_v39  ;;  %v9979_v39 = vrot.slane %v9977_v55, 4 }
 0x533   : > { %v19158_v38 = vrot.slane %v9997_v48, 5 }
 0x539   : > { %14429 = vmatmul.mubr.bf16.gmra.mrb[44].mxu1 %v19919_v6  ;;  %v19928_v6 = vld [vmem:[#allocation33_spill] sm:$0xff] }
 0x53a   : > { %14432 = vmatprep.mubr.bf16.mxu1 %v19922_v34  ;;  %v9983_v24 = vshll.u32 %v19928_v6, 16 }
 0x541   : > { %14433 = vmatmul.mubr.bf16.gmra.mrb[48].mxu1 %v19925_v15  ;;  %v10003_v15 = vrot.slane %v10001_v32, 4 }
 0x542   : > { %14452 = vmatprep.mubr.bf16.mxu1 %v15426_v28  ;;  %v9921_v28 = vld [vmem:[#allocation2 + $0x30] sm:$0xf] }
 0x549   : > { %14453 = vmatmul.mubr.bf16.vlgmr.msra.gmra.mrb[20].mxu1 %v15427_v2  ;;  %v9980_v2 = vor.u32 %v9979_v39, %v9975_v53 }
 0x54a   : > { %14456 = vmatprep.mubr.bf16.mxu1 %v15429_v44  ;;  %14485 = vmatpush3.bf16.msra.mxu1 %v15428_v30  ;;  %v9918_v30 = vld [vmem:[#allocation2 + $0x24] sm:$0xf]  ;;  %v19929_v44 = vld [vmem:[#allocation35_spill] sm:$0xff] }
 0x54b   : > { %14486 = vmatprep.subr.bf16.mxu1 %v15431_v49  ;;  %v9988_v23 = vshrl.u32 %v9918_v30, 16  ;;  %v9991_v62 = vshll.u32 %v9918_v30, 16 }
 0x54d   : > { %v9990_v13 = vrot.slane %v9988_v23, 4  ;;  %v9993_v34 = vrot.slane %v9991_v62, 5  ;;  %v19931_v23 = vld [vmem:[#allocation37_spill] sm:$0xff] }
 0x54e   : > { %14487 = vmatpush3.bf16.msra.mxu1 %v15431_v49  ;;  %v9971_v49 = vrot.slane %v9970_v3, 4  ;;  %v10031_v62 = vshll.u32 %v19931_v23, 16  ;;  %v19171_v3 = vld [vmem:[#allocation2 + $0xd0] sm:$0xf] }
 0x54f   : > { %14488 = vmatprep.subr.bf16.mxu1 %v15434_v59 }
 0x550   : > { %v9976_v25 = vsel %vm15847_vm2, %v9971_v49, %v9975_v53 }
 0x551   : > { %14457 = vmatmul.mubr.bf16.gmra.mrb[24].mxu1 %v15430_v21  ;;  %v10012_v21 = vshrl.u32 %v9921_v28, 16 }
 0x552   : > { %14460 = vmatprep.mubr.bf16.mxu1 %v15432_v36  ;;  %14489 = vmatpush3.bf16.msra.mxu1 %v15434_v59  ;;  %v10007_v59 = vshll.u32 %v19929_v44, 16  ;;  %v9985_v36 = vrot.slane %v9983_v24, 5  ;;  %v19932_v24 = vld [vmem:[#allocation38_spill] sm:$0xff] }
 0x553   : > { %14490 = vmatprep.subr.bf16.mxu1 %v15437_v4  ;;  %v10014_v16 = vrot.slane %v10012_v21, 4  ;;  %v10049_v49 = vshrl.u32 %v19932_v24, 16 }
 0x554   : > { %v10009_v41 = vrot.slane %v10007_v59, 5 }
 0x556   : > { %14491 = vmatpush3.bf16.msra.mxu1 %v15437_v4  ;;  %v10015_v4 = vshll.u32 %v9921_v28, 16  ;;  %v10840_v28 = vrot.slane %v19171_v3, 5 }
 0x557   : > { %14492 = vmatprep.subr.bf16.mxu1 %v15440_v56 }
 0x559   : > { %14461 = vmatmul.mubr.bf16.gmra.mrb[28].mxu1 %v15433_v31  ;;  %v10004_v31 = vor.u32 %v10003_v15, %v19158_v38 }
 0x55a   : > { %14464 = vmatprep.mubr.bf16.mxu1 %v15435_v9  ;;  %14493 = vmatpush3.bf16.msra.mxu1 %v15440_v56  ;;  %v9994_v56 = vor.u32 %v9993_v34, %v9990_v13  ;;  %v9981_v9 = vrot.slane %v9980_v2, 4  ;;  %v10045_v13 = vshll.u32 %v19932_v24, 16  ;;  %v10684_v34 = vld [vmem:[#allocation2 + $0xcc] sm:$0xe] }
 0x55b   : > { %14494 = vmatprep.subr.bf16.mxu1 %v15443_v7  ;;  %v10005_v11 = vrot.slane %v10004_v31, 4  ;;  %v12955_v44 = vrot.slane %v10684_v34, 9 }
 0x55c   : > { %v9986_v30 = vsel %vm15847_vm2, %v9981_v9, %v9985_v36  ;;  %v9995_v47 = vrot.slane %v9994_v56, 4  ;;  %v10842_v36 = vrot.slane %v10840_v28, 4  ;;  %v15448_v56 = vld [vmem:[#allocation2 + $0xcc] sm:$0xff]  }
 0x55d   : > { %v12916_v32 = vcombine.low %v9976_v25, %v9986_v30  ;;  %v10051_v30 = vrot.slane %v10049_v49, 4 }
 0x55e   : > { %14495 = vmatpush3.bf16.msra.mxu1 %v15443_v7  ;;  %v9924_v7 = vld [vmem:[#allocation2 + $0x3c] sm:$0xf]  ;;  %v10000_v59 = vsel %vm15847_vm2, %v9995_v47, %v19158_v38  ;;  %v10033_v38 = vrot.slane %v10031_v62, 5  ;;  %v9933_v47 = vld [vmem:[#allocation2 + $0x60] sm:$0xf] }
 0x55f   : > { %14496 = vmatprep.subr.bf16.mxu1 %v15446_v50  ;;  %v10036_v60 = vshrl.u32 %v9924_v7, 16  ;;  %v10039_v55 = vshll.u32 %v9924_v7, 16  ;;  %v19933_v7 = vld [vmem:[#allocation39_spill] sm:$0xff]  ;;  %v10111_v34 = vshll.u32 %v9933_v47, 16 }
 0x560   : > { %v10069_v9 = vshll.u32 %v19933_v7, 16 }
 0x561   : > { %14465 = vmatmul.mubr.bf16.gmra.mrb[32].mxu1 %v15436_v0  ;;  %v10038_v15 = vrot.slane %v10036_v60, 4  ;;  %v10041_v2 = vrot.slane %v10039_v55, 5 }
 0x562   : > { %14468 = vmatprep.mubr.bf16.mxu1 %v15438_v22  ;;  %14497 = vmatpush3.bf16.msra.mxu1 %v15446_v50  ;;  %v19930_v50 = vld [vmem:[#allocation36_spill] sm:$0xff]  ;;  %v9927_v22 = vld [vmem:[#allocation2 + $0x48] sm:$0xf] }
 0x563   : > { %14498 = vmatprep.subr.bf16.mxu1 %v15449_v52  ;;  %v10021_v0 = vshll.u32 %v19930_v50, 16  ;;  %v10060_v40 = vshrl.u32 %v9927_v22, 16  ;;  %v10063_v48 = vshll.u32 %v9927_v22, 16  ;;  %v10010_v22 = vsel %vm15847_vm2, %v10005_v11, %v10009_v41  ;;  %v15530_v11 = vld [vmem:[#allocation2 + $0x44] sm:$0x1] }
 0x564   : > { %v12917_v55 = vcombine.low %v10000_v59, %v10010_v22  ;;  %v10055_v62 = vshll.u32 %v15530_v11, 16 }
 0x565   : > { %v19169_v39 = vrot.slane %v10021_v0, 5  ;;  %v10062_v21 = vrot.slane %v10060_v40, 4  ;;  %v9930_v0 = vld [vmem:[#allocation2 + $0x54] sm:$0xf] }
 0x566   : > { %14499 = vmatpush3.bf16.msra.mxu1 %v15449_v52  ;;  %v10025_v52 = vshrl.u32 %v19930_v50, 16  ;;  %v10073_v50 = vshrl.u32 %v19933_v7, 16  ;;  %v10084_v23 = vshrl.u32 %v9930_v0, 16  ;;  %v10087_v40 = vshll.u32 %v9930_v0, 16 }
 0x567   : > { %14532 = vmatprep.subr.bf16.mxu1 %v19150_v63  ;;  %v10121_v7 = vshrl.u32 %v18865_v27, 16  ;;  %v10113_v0 = vrot.slane %v10111_v34, 5 }
 0x568   : > { %v10027_v53 = vrot.slane %v10025_v52, 4  ;;  %v19187_v52 = vsel %vm16013_vm5, %v12955_v44, %v10840_v28  ;;  %v10075_v58 = vrot.slane %v10073_v50, 4  ;;  %v15531_v44 = vld [vmem:[#allocation2 + $0x50] sm:$0x1] }
 0x569   : > { %14469 = vmatmul.mubr.bf16.gmra.mrb[36].mxu1 %v15439_v14  ;;  %v10017_v14 = vrot.slane %v10015_v4, 5  ;;  %v10065_v4 = vrot.slane %v10063_v48, 5  ;;  %v10071_v48 = vrot.slane %v10069_v9, 5  ;;  %v10079_v59 = vshll.u32 %v15531_v44, 16 }
 0x56a   : > { %14472 = vmatprep.mubr.bf16.mxu1 %v15441_v51  ;;  %v15445_v51 = vld [vmem:[#allocation2 + $0xb4] sm:$0xff]   ;;  %v10028_v31 = vor.u32 %v10027_v53, %v19169_v39  ;;  %v19934_v53 = vld [vmem:[#allocation43_spill] sm:$0xff] }
 0x56b   : > { %v10018_v6 = vor.u32 %v10017_v14, %v10014_v16  ;;  %v10042_v14 = vor.u32 %v10041_v2, %v10038_v15  ;;  %v10097_v24 = vshrl.u32 %v19934_v53, 16 }
 0x56c   : > { %v10029_v41 = vrot.slane %v10028_v31, 4  ;;  %v10117_v31 = vshll.u32 %v18865_v27, 16 }
 0x56d   : > { %v10019_v25 = vrot.slane %v10018_v6, 4  ;;  %v10093_v6 = vshll.u32 %v19934_v53, 16  ;;  %v10043_v15 = vrot.slane %v10042_v14, 4  ;;  %v9939_v53 = vld [vmem:[#allocation2 + $0x78] sm:$0xf] }
 0x56f   : > { %v10024_v28 = vsel %vm15847_vm2, %v10019_v25, %v19169_v39  ;;  %v19209_v9 = vrot.slane %v10093_v6, 5  ;;  %v10099_v39 = vrot.slane %v10097_v24, 4 }
 0x571   : > { %14473 = vmatmul.mubr.bf16.gmra.mrb[40].mxu1 %v15442_v42  ;;  %v19173_v42 = vld [vmem:[#allocation2 + $0xd4] sm:$0x1]  ;;  %v10100_v6 = vor.u32 %v10099_v39, %v19209_v9 }
 0x572   : > { %14476 = vmatprep.mubr.bf16.mxu1 %v15444_v35  ;;  %v10843_v35 = vrot.slane %v19173_v42, 5 }
 0x574   : > { %v19193_v16 = vsel %vm16013_vm5, %v10842_v36, %v10843_v35  ;;  %v10034_v35 = vsel %vm15847_vm2, %v10029_v41, %v10033_v38  ;;  %v10057_v36 = vrot.slane %v10055_v62, 5  ;;  %v15451_v38 = vld [vmem:[#allocation3 + $0x208] sm:$0xff]   ;;  %v15532_v41 = vld [vmem:[#allocation2 + $0x5c] sm:$0x1]  ;;  %v19216_v62 = vrot.slane %v10117_v31, 5 }
 0x575   : > { %v12971_v60 = vcombine.low %v19187_v52, %v19193_v16  ;;  %v12918_v22 = vcombine.low %v10024_v28, %v10034_v35  ;;  %v10103_v11 = vshll.u32 %v15532_v41, 16  ;;  %v15534_v28 = vld [vmem:[#allocation2 + $0x68] sm:$0x1]  ;;  %v10101_v31 = vrot.slane %v10100_v6, 4 }
 0x576   : > { %v10127_v35 = vshll.u32 %v15534_v28, 16 }
 0x579   : > { %14477 = vmatmul.mubr.bf16.gmra.mrb[44].mxu1 %v15445_v51  ;;  %v19195_v51 = vrot.slane %v10045_v13, 5  ;;  %v10108_v13 = vshrl.u32 %v9933_v47, 16 }
 0x57a   : > { %14480 = vmatprep.mubr.bf16.mxu1 %v15447_v33  ;;  %v10066_v33 = vor.u32 %v10065_v4, %v10062_v21  ;;  %v10089_v21 = vrot.slane %v10087_v40, 5  ;;  %v9936_v4 = vld [vmem:[#allocation2 + $0x6c] sm:$0xf] }
 0x57b   : > { %v10052_v2 = vor.u32 %v10051_v30, %v19195_v51  ;;  %v10110_v50 = vrot.slane %v10108_v13, 4  ;;  %v10132_v14 = vshrl.u32 %v9936_v4, 16  ;;  %v10135_v30 = vshll.u32 %v9936_v4, 16 }
 0x57c   : > { %v10067_v49 = vrot.slane %v10066_v33, 4  ;;  %v10048_v47 = vsel %vm15847_vm2, %v10043_v15, %v19195_v51  ;;  %v15533_v51 = vld [vmem:[#allocation2 + $0x70] sm:$0xf]  ;;  %v10105_v4 = vrot.slane %v10103_v11, 5 }
 0x57d   : > { %v10053_v25 = vrot.slane %v10052_v2, 4  ;;  %v10114_v24 = vor.u32 %v10113_v0, %v10110_v50  ;;  %v10141_v13 = vshll.u32 %v15533_v51, 16  ;;  %v10145_v34 = vshrl.u32 %v15533_v51, 16  ;;  %v9942_v50 = vld [vmem:[#allocation2 + $0x84] sm:$0xf] }
 0x57e   : > { %v10072_v33 = vsel %vm15847_vm2, %v10067_v49, %v10071_v48  ;;  %v10134_v15 = vrot.slane %v10132_v14, 4  ;;  %v10137_v2 = vrot.slane %v10135_v30, 5  ;;  %v10129_v0 = vrot.slane %v10127_v35, 5  ;;  %v15535_v14 = vld [vmem:[#allocation2 + $0x7c] sm:$0xf] }
 0x57f   : > { %v10147_v39 = vrot.slane %v10145_v34, 4  ;;  %v10165_v30 = vshll.u32 %v15535_v14, 16  ;;  %v10106_v11 = vsel %vm15847_vm2, %v10101_v31, %v10105_v4  ;;  %v10183_v6 = vshll.u32 %v9942_v50, 16  ;;  %v15539_v4 = vld [vmem:[#allocation2 + $0x94] sm:$0xf] }
 0x581   : > { %14481 = vmatmul.mubr.bf16.gmra.mrb[48].mxu1 %v15448_v56  ;;  %v10076_v56 = vor.u32 %v10075_v58, %v10071_v48  ;;  %v10123_v58 = vrot.slane %v10121_v7, 4  ;;  %v10058_v48 = vsel %vm15847_vm2, %v10053_v25, %v10057_v36  ;;  %v10115_v36 = vrot.slane %v10114_v24, 4  ;;  %v15453_v25 = vld [vmem:[#allocation3 + $0x218] sm:$0xff]  }
 0x582   : > { %14500 = vmatprep.mubr.bf16.mxu1 %v12916_v32  ;;  %v10086_v32 = vrot.slane %v10084_v23, 4  ;;  %v10081_v23 = vrot.slane %v10079_v59, 5  ;;  %v10159_v59 = vshll.u32 %v9939_v53, 16  ;;  %v19225_v7 = vrot.slane %v10141_v13, 5 }
 0x583   : > { %v10077_v27 = vrot.slane %v10076_v56, 4  ;;  %v10124_v56 = vor.u32 %v10123_v58, %v19216_v62  ;;  %v10120_v24 = vsel %vm15847_vm2, %v10115_v36, %v19216_v62  ;;  %v19238_v28 = vrot.slane %v10165_v30, 5  ;;  %v9948_v30 = vld [vmem:[#allocation2 + $0x9c] sm:$0xf] }
 0x584   : > { %v10090_v40 = vor.u32 %v10089_v21, %v10086_v32  ;;  %v12919_v32 = vcombine.low %v10048_v47, %v10058_v48  ;;  %v10161_v41 = vrot.slane %v10159_v59, 5  ;;  %v10148_v51 = vor.u32 %v10147_v39, %v19225_v7  ;;  %v15538_v59 = vld [vmem:[#allocation2 + $0x88] sm:$0xf] }
 0x585   : > { %v10082_v49 = vsel %vm15847_vm2, %v10077_v27, %v10081_v23  ;;  %v10169_v23 = vshrl.u32 %v15535_v14, 16  ;;  %v10125_v58 = vrot.slane %v10124_v56, 4  ;;  %v10189_v62 = vshll.u32 %v15538_v59, 16 }
 0x586   : > { %v10091_v44 = vrot.slane %v10090_v40, 4  ;;  %v12920_v21 = vcombine.low %v10072_v33, %v10082_v49  ;;  %v9945_v40 = vld [vmem:[#allocation2 + $0x90] sm:$0xf]  ;;  %v15536_v33 = vld [vmem:[#allocation2 + $0x74] sm:$0x1]  ;;  %v10213_v56 = vshll.u32 %v15539_v4, 16 }
 0x587   : > { %v10207_v13 = vshll.u32 %v9945_v40, 16  ;;  %v10130_v34 = vsel %vm15847_vm2, %v10125_v58, %v10129_v0  ;;  %v10171_v35 = vrot.slane %v10169_v23, 4  ;;  %v10149_v31 = vrot.slane %v10148_v51, 4  ;;  %v15455_v23 = vld [vmem:[#allocation3 + $0x228] sm:$0xff]   ;;  %v9951_v58 = vld [vmem:[#allocation2 + $0xa8] sm:$0xf] }
 0x588   : > { %v10096_v47 = vsel %vm15847_vm2, %v10091_v44, %v19209_v9  ;;  %v10204_v9 = vshrl.u32 %v9945_v40, 16  ;;  %v15537_v44 = vld [vmem:[#allocation2 + $0x80] sm:$0x1]  ;;  %v10231_v51 = vshll.u32 %v9948_v30, 16 }
 0x589   : > { %14501 = vmatmul.mubr.bf16.vlgmr.msra.gmra.mrb[20].mxu1 %v12917_v55  ;;  %v15452_v55 = vld [vmem:[#allocation3 + $0x210] sm:$0xff]   ;;  %v10209_v39 = vrot.slane %v10207_v13, 5  ;;  %v12921_v0 = vcombine.low %v10096_v47, %v10106_v11  ;;  %v10172_v14 = vor.u32 %v10171_v35, %v19238_v28  ;;  %v19248_v11 = vrot.slane %v10213_v56, 5  ;;  %v15540_v13 = vld [vmem:[#allocation2 + $0xa0] sm:$0xf] }
 0x58a   : > { %14504 = vmatprep.mubr.bf16.mxu1 %v12918_v22  ;;  %14533 = vmatpush3.bf16.msra.mxu1 %v19150_v63  ;;  %v10156_v63 = vshrl.u32 %v9939_v53, 16  ;;  %v10138_v22 = vor.u32 %v10137_v2, %v10134_v15  ;;  %v10180_v53 = vshrl.u32 %v9942_v50, 16  ;;  %v15454_v15 = vld [vmem:[#allocation3 + $0x220] sm:$0xff]   ;;  %v10206_v36 = vrot.slane %v10204_v9, 4  ;;  %v15456_v35 = vld [vmem:[#allocation3 + $0x230] sm:$0xff]  }
 0x58b   : > { %14534 = vmatprep.subr.bf16.mxu1 %v15451_v38  ;;  %v10217_v50 = vshrl.u32 %v15539_v4, 16  ;;  %v10173_v9 = vrot.slane %v10172_v14, 4  ;;  %v15457_v14 = vld [vmem:[#allocation3 + $0x238] sm:$0xff]  }
 0x58c   : > { %v10158_v27 = vrot.slane %v10156_v63, 4  ;;  %v10139_v48 = vrot.slane %v10138_v22, 4  ;;  %v10175_v63 = vshll.u32 %v15537_v44, 16  ;;  %v12922_v22 = vcombine.low %v10120_v24, %v10130_v34 }
 0x58d   : > { %v10228_v24 = vshrl.u32 %v9948_v30, 16  ;;  %v10237_v34 = vshll.u32 %v15540_v13, 16 }
 0x58e   : > { %14535 = vmatpush3.bf16.msra.mxu1 %v15451_v38  ;;  %v10151_v38 = vshll.u32 %v15536_v33, 16  ;;  %v10162_v49 = vor.u32 %v10161_v41, %v10158_v27  ;;  %v10144_v40 = vsel %vm15847_vm2, %v10139_v48, %v19225_v7  ;;  %v10177_v27 = vrot.slane %v10175_v63, 5 }
 0x58f   : > { %14536 = vmatprep.subr.bf16.mxu1 %v15452_v55  ;;  %v19246_v41 = vrot.slane %v10189_v62, 5  ;;  %v10241_v48 = vshrl.u32 %v15540_v13, 16  ;;  %v10252_v63 = vshrl.u32 %v9951_v58, 16 }
 0x590   : > { %v10153_v2 = vrot.slane %v10151_v38, 5  ;;  %v10163_v38 = vrot.slane %v10162_v49, 4  ;;  %v15541_v49 = vld [vmem:[#allocation2 + $0x8c] sm:$0x1] }
 0x591   : > { %14505 = vmatmul.mubr.bf16.gmra.mrb[24].mxu1 %v12919_v32  ;;  %v10185_v32 = vrot.slane %v10183_v6, 5  ;;  %v10219_v6 = vrot.slane %v10217_v50, 4  ;;  %v10199_v44 = vshll.u32 %v15541_v49, 16  ;;  %v15543_v50 = vld [vmem:[#allocation2 + $0xac] sm:$0xf] }
 0x592   : > { %14508 = vmatprep.mubr.bf16.mxu1 %v12920_v21  ;;  %14537 = vmatpush3.bf16.msra.mxu1 %v15452_v55  ;;  %v10182_v55 = vrot.slane %v10180_v53, 4  ;;  %v10193_v21 = vshrl.u32 %v15538_v59, 16  ;;  %v10154_v33 = vsel %vm15847_vm2, %v10149_v31, %v10153_v2  ;;  %v10210_v53 = vor.u32 %v10209_v39, %v10206_v36 }
 0x593   : > { %14538 = vmatprep.subr.bf16.mxu1 %v15453_v25  ;;  %v12923_v7 = vcombine.low %v10144_v40, %v10154_v33  ;;  %v10168_v2 = vsel %vm15847_vm2, %v10163_v38, %v19238_v28  ;;  %v10255_v59 = vshll.u32 %v9951_v58, 16  ;;  %v10220_v56 = vor.u32 %v10219_v6, %v19248_v11  ;;  %v15544_v6 = vld [vmem:[#allocation2 + $0xa4] sm:$0x1] }
 0x594   : > { %v10195_v47 = vrot.slane %v10193_v21, 4  ;;  %v10211_v4 = vrot.slane %v10210_v53, 4  ;;  %v10230_v31 = vrot.slane %v10228_v24, 4  ;;  %v10233_v36 = vrot.slane %v10231_v51, 5  ;;  %v9957_v51 = vld [vmem:[#allocation2 + $0xc0] sm:$0xf] }
 0x595   : > { %v19257_v39 = vrot.slane %v10237_v34, 5  ;;  %v10243_v28 = vrot.slane %v10241_v48, 4  ;;  %v10254_v40 = vrot.slane %v10252_v63, 4  ;;  %v10257_v33 = vrot.slane %v10255_v59, 5 }
 0x596   : > { %14539 = vmatpush3.bf16.msra.mxu1 %v15453_v25  ;;  %v10186_v25 = vor.u32 %v10185_v32, %v10182_v55  ;;  %v10196_v55 = vor.u32 %v10195_v47, %v19246_v41  ;;  %v15542_v32 = vld [vmem:[#allocation2 + $0x98] sm:$0x1]  ;;  %v9954_v47 = vld [vmem:[#allocation2 + $0xb4] sm:$0xf]  ;;  %v10216_v58 = vsel %vm15847_vm2, %v10211_v4, %v19248_v11  ;;  %v10234_v53 = vor.u32 %v10233_v36, %v10230_v31  ;;  %v9960_v36 = vld [vmem:[#allocation2 + $0xcc] sm:$0xf] }
 0x597   : > { %14540 = vmatprep.subr.bf16.mxu1 %v15454_v15  ;;  %v10223_v21 = vshll.u32 %v15542_v32, 16  ;;  %v10247_v24 = vshll.u32 %v15544_v6, 16  ;;  %v10276_v48 = vshrl.u32 %v9954_v47, 16  ;;  %v10303_v63 = vshll.u32 %v9957_v51, 16 }
 0x598   : > { %v10187_v62 = vrot.slane %v10186_v25, 4 }
 0x599   : > { %14509 = vmatmul.mubr.bf16.gmra.mrb[28].mxu1 %v12921_v0  ;;  %v10261_v0 = vshll.u32 %v15543_v50, 16  ;;  %v10225_v25 = vrot.slane %v10223_v21, 5  ;;  %v15545_v21 = vld [vmem:[#allocation2 + $0xb0] sm:$0x1] }
 0x59a   : > { %14512 = vmatprep.mubr.bf16.mxu1 %v12922_v22  ;;  %14541 = vmatpush3.bf16.msra.mxu1 %v15454_v15  ;;  %v10178_v15 = vsel %vm15847_vm2, %v10173_v9, %v10177_v27  ;;  %v10265_v22 = vshrl.u32 %v15543_v50, 16  ;;  %v10192_v38 = vsel %vm15847_vm2, %v10187_v62, %v19246_v41  ;;  %v10201_v27 = vrot.slane %v10199_v44, 5 }
 0x59b   : > { %14542 = vmatprep.subr.bf16.mxu1 %v15455_v23  ;;  %v12924_v30 = vcombine.low %v10168_v2, %v10178_v15  ;;  %v10221_v9 = vrot.slane %v10220_v56, 4  ;;  %v10263_v13 = vrot.slane %v10261_v0, 5  ;;  %v10258_v41 = vor.u32 %v10257_v33, %v10254_v40  ;;  %v15546_v56 = vld [vmem:[#allocation2 + $0xb8] sm:$0xf]  ;;  %v15547_v33 = vld [vmem:[#allocation2 + $0xc4] sm:$0xf] }
 0x59c   : > { %v10267_v34 = vrot.slane %v10265_v22, 4  ;;  %v10279_v2 = vshll.u32 %v9954_v47, 16  ;;  %v10300_v44 = vshrl.u32 %v9957_v51, 16  ;;  %v10249_v62 = vrot.slane %v10247_v24, 5 }
 0x59d   : > { %v10226_v11 = vsel %vm15847_vm2, %v10221_v9, %v10225_v25  ;;  %v10271_v4 = vshll.u32 %v15545_v21, 16  ;;  %v10285_v31 = vshll.u32 %v15546_v56, 16  ;;  %v10278_v50 = vrot.slane %v10276_v48, 4 }
 0x59e   : > { %14543 = vmatpush3.bf16.msra.mxu1 %v15455_v23  ;;  %v10197_v23 = vrot.slane %v10196_v55, 4  ;;  %v12926_v15 = vcombine.low %v10216_v58, %v10226_v11  ;;  %v10268_v32 = vor.u32 %v10267_v34, %v10263_v13  ;;  %v10281_v0 = vrot.slane %v10279_v2, 5  ;;  %v15548_v34 = vld [vmem:[#allocation2 + $0xbc] sm:$0x1] }
 0x59f   : > { %14544 = vmatprep.subr.bf16.mxu1 %v15456_v35  ;;  %v10289_v22 = vshrl.u32 %v15546_v56, 16  ;;  %v10305_v40 = vrot.slane %v10303_v63, 5  ;;  %v10324_v25 = vshrl.u32 %v9960_v36, 16  ;;  %v10333_v47 = vshll.u32 %v19171_v3, 16 }
 0x5a0   : > { %v10202_v49 = vsel %vm15847_vm2, %v10197_v23, %v10201_v27  ;;  %v10313_v27 = vshrl.u32 %v15547_v33, 16  ;;  %v10337_v23 = vshrl.u32 %v19171_v3, 16  ;;  %v10273_v6 = vrot.slane %v10271_v4, 5 }
 0x5a1   : > { %14513 = vmatmul.mubr.bf16.gmra.mrb[32].mxu1 %v12923_v7  ;;  %v10244_v7 = vor.u32 %v10243_v28, %v19257_v39  ;;  %v12925_v59 = vcombine.low %v10192_v38, %v10202_v49  ;;  %v10259_v28 = vrot.slane %v10258_v41, 4  ;;  %v10309_v38 = vshll.u32 %v15547_v33, 16 }
 0x5a2   : > { %14516 = vmatprep.mubr.bf16.mxu1 %v12924_v30  ;;  %14545 = vmatpush3.bf16.msra.mxu1 %v15456_v35  ;;  %v10235_v35 = vrot.slane %v10234_v53, 4  ;;  %v10302_v30 = vrot.slane %v10300_v44, 4  ;;  %v10287_v24 = vrot.slane %v10285_v31, 5  ;;  %v10269_v51 = vrot.slane %v10268_v32, 4 }
 0x5a3   : > { %14546 = vmatprep.subr.bf16.mxu1 %v15457_v14  ;;  %v10245_v55 = vrot.slane %v10244_v7, 4  ;;  %v10282_v9 = vor.u32 %v10281_v0, %v10278_v50  ;;  %v10291_v7 = vrot.slane %v10289_v22, 4  ;;  %v10295_v41 = vshll.u32 %v15548_v34, 16 }
 0x5a4   : > { %v10240_v58 = vsel %vm15847_vm2, %v10235_v35, %v19257_v39  ;;  %v10264_v48 = vsel %vm15847_vm2, %v10259_v28, %v10263_v13  ;;  %v10306_v2 = vor.u32 %v10305_v40, %v10302_v30  ;;  %v10311_v49 = vrot.slane %v10309_v38, 5  ;;  %v15549_v35 = vld [vmem:[#allocation2 + $0xc8] sm:$0x1] }
 0x5a5   : > { %v10250_v53 = vsel %vm15847_vm2, %v10245_v55, %v10249_v62  ;;  %v10315_v3 = vrot.slane %v10313_v27, 4  ;;  %v10326_v11 = vrot.slane %v10324_v25, 4  ;;  %v10335_v63 = vrot.slane %v10333_v47, 5 }
 0x5a6   : > { %14547 = vmatpush3.bf16.msra.mxu1 %v15457_v14  ;;  %v10327_v14 = vshll.u32 %v9960_v36, 16  ;;  %v10339_v39 = vrot.slane %v10337_v23, 4  ;;  %v10319_v62 = vshll.u32 %v15549_v35, 16  ;;  %v10283_v32 = vrot.slane %v10282_v9, 4  ;;  %v19938_v9 = vld [vmem:[#allocation42_spill] sm:$0xff]  ;;  %v19952_v35 = vld [vmem:[#allocation52_spill] sm:$0xff] }
 0x5a7   : > { %v10292_v21 = vor.u32 %v10291_v7, %v10287_v24  ;;  %v10307_v4 = vrot.slane %v10306_v2, 4  ;;  %v10316_v56 = vor.u32 %v10315_v3, %v10311_v49  ;;  %v10297_v13 = vrot.slane %v10295_v41, 5  ;;  %v19939_v7 = vld [vmem:[#allocation44_spill] sm:$0xff]  ;;  %v19941_v41 = vld [vmem:[#allocation45_spill] sm:$0xff] }
 0x5a8   : > { %v10329_v44 = vrot.slane %v10327_v14, 5  ;;  %v10340_v36 = vor.u32 %v10339_v39, %v10335_v63  ;;  %v10343_v28 = vshll.u32 %v19173_v42, 16  ;;  %v10321_v50 = vrot.slane %v10319_v62, 5  ;;  %v19945_v3 = vld [vmem:[#allocation48_spill] sm:$0xff] }
 0x5a9   : > { %14517 = vmatmul.mubr.bf16.gmra.mrb[36].mxu1 %v12925_v59  ;;  %v12927_v59 = vcombine.low %v10240_v58, %v10250_v53  ;;  %v10288_v0 = vsel %vm15847_vm2, %v10283_v32, %v10287_v24  ;;  %v10293_v22 = vrot.slane %v10292_v21, 4  ;;  %v10312_v30 = vsel %vm15847_vm2, %v10307_v4, %v10311_v49  ;;  %v19936_v24 = vld [vmem:[#allocation41_spill] sm:$0xff]  ;;  %v19944_v49 = vld [vmem:[#allocation46_spill] sm:$0xff] }
 0x5aa   : > { %14520 = vmatprep.mubr.bf16.mxu1 %v12926_v15  ;;  %v10274_v15 = vsel %vm15847_vm2, %v10269_v51, %v10273_v6  ;;  %v10330_v31 = vor.u32 %v10329_v44, %v10326_v11  ;;  %v10317_v40 = vrot.slane %v10316_v56, 4  ;;  %v10341_v27 = vrot.slane %v10340_v36, 4  ;;  %v19935_v6 = vld [vmem:[#allocation40_spill] sm:$0xff]  ;;  %v19947_v44 = vld [vmem:[#allocation49_spill] sm:$0xff]  ;;  %v19956_v21 = vld [vmem:[#allocation54_spill] sm:$0xff] }
 0x5ab   : > { %v12928_v55 = vcombine.low %v10264_v48, %v10274_v15  ;;  %v10298_v33 = vsel %vm15847_vm2, %v10293_v22, %v10297_v13  ;;  %v10345_v25 = vrot.slane %v10343_v28, 5  ;;  %v19937_v51 = vcombine.low %v19935_v6, %v19936_v24  ;;  %v19942_v48 = vld [vmem:[#allocation47_spill] sm:$0xff]  ;;  %v19959_v13 = vld [vmem:[#allocation56_spill] sm:$0xff]  ;;  %v12991_v22 = vld [vmem:[%s15806_s25 + $0x40] sm:$0xf] }
 0x5ac   : > { %v10331_v38 = vrot.slane %v10330_v31, 4  ;;  %v12929_v14 = vcombine.low %v10288_v0, %v10298_v33  ;;  %v10322_v47 = vsel %vm15847_vm2, %v10317_v40, %v10321_v50  ;;  %v19940_v34 = vcombine.low %v19938_v9, %v19939_v7  ;;  %v19958_v56 = vld [vmem:[#allocation55_spill] sm:$0xff] }
 0x5ad   : > { %v12930_v42 = vcombine.low %v10312_v30, %v10322_v47  ;;  %v10346_v58 = vsel %vm15847_vm2, %v10341_v27, %v10345_v25  ;;  %v19943_v2 = vcombine.low %v19941_v41, %v19942_v48  ;;  %v19946_v11 = vcombine.low %v19944_v49, %v19945_v3  ;;  %v12987_v30 = vld [vmem:[%s15806_s25 + $0x30] sm:$0xf]  ;;  %v12988_v25 = vld [vmem:[%s15806_s25 + $0x34] sm:$0xf]  ;;  %v12983_v47 = vld [vmem:[%s15806_s25 + $0x20] sm:$0x1] }
 0x5ae   : > { %v10336_v23 = vsel %vm15847_vm2, %v10331_v38, %v10335_v63  ;;  %v19948_v63 = vld [vmem:[#allocation50_spill] sm:$0xff]  ;;  %v19953_v62 = vcombine.low %v18916_v18, %v19952_v35  ;;  %v19957_v4 = vcombine.low %v18937_v54, %v19956_v21  ;;  %v19960_v31 = vcombine.low %v19958_v56, %v19959_v13  ;;  %v12981_v54 = vld [vmem:[%s15806_s25 + $0x18] sm:$0xf] }
 0x5af   : > { %v12931_v53 = vcombine.low %v10336_v23, %v10346_v58  ;;  %v19949_v39 = vcombine.low %v19947_v44, %v19948_v63  ;;  %v12984_v18 = vld [vmem:[%s15806_s25 + $0x24] sm:$0xf]  ;;  %v11258_v57 = vshll.u32 %v12981_v54, 16  ;;  %v11266_v40 = vrot.slane %v11264_v37, 5 }
 0x5b0   : > { %v11282_v1 = vshll.u32 %v12984_v18, 16  ;;  %v11336_v58 = vshll.u32 %v12991_v22, 16  ;;  %v11340_v6 = vshrl.u32 %v12991_v22, 16  ;;  %v11306_v24 = vshll.u32 %v12987_v30, 16  ;;  %v12992_v63 = vld [vmem:[%s15806_s25 + $0x44] sm:$0x1] }
 0x5b1   : > { %14521 = vmatmul.mubr.bf16.gmra.mrb[40].mxu1 %v12927_v59  ;;  %v19950_v59 = vld [vmem:[#allocation51_spill] sm:$0xff]  ;;  %v11260_v0 = vrot.slane %v11258_v57, 5  ;;  %v11316_v9 = vshrl.u32 %v12988_v25, 16  ;;  %v11274_v41 = vshll.u32 %v12983_v47, 16  ;;  %v11346_v56 = vshll.u32 %v12992_v63, 16 }
 0x5b2   : > { %14524 = vmatprep.mubr.bf16.mxu1 %v12928_v55  ;;  %v19951_v15 = vcombine.low %v18906_v26, %v19950_v59  ;;  %v19954_v55 = vld [vmem:[#allocation53_spill] sm:$0xff]  ;;  %v11284_v52 = vrot.slane %v11282_v1, 5 }
 0x5b3   : > { %v19955_v32 = vcombine.low %v18920_v20, %v19954_v55  ;;  %v19961_v26 = vld [vmem:[#allocation57_spill] sm:$0xff]  ;;  %v12985_v20 = vld [vmem:[%s15806_s25 + $0x28] sm:$0xf]  ;;  %v11318_v35 = vrot.slane %v11316_v9, 4 }
 0x5b4   : > { %v19962_v36 = vcombine.low %v18961_v10, %v19961_v26  ;;  %v11279_v10 = vshrl.u32 %v12984_v18, 16  ;;  %v11288_v8 = vshll.u32 %v12985_v20, 16  ;;  %v11292_v61 = vshrl.u32 %v12985_v20, 16  ;;  %v12997_v26 = vld [vmem:[%s15806_s25 + $0x58] sm:$0xf] }
 0x5b5   : > { %v11384_v57 = vshll.u32 %v12997_v26, 16 }
 0x5b6   : > { %v11290_v16 = vrot.slane %v11288_v8, 5  ;;  %v11294_v28 = vrot.slane %v11292_v61, 4 }
 0x5b7   : > { %v19392_v47 = vrot.slane %v11384_v57, 5 }
 0x5b9   : > { %14525 = vmatmul.mubr.bf16.gmra.mrb[44].mxu1 %v12929_v14 }
 0x5ba   : > { %14528 = vmatprep.mubr.bf16.mxu1 %v12930_v42  ;;  %v11295_v42 = vor.u32 %v11294_v28, %v11290_v16 }
 0x5bc   : > { %v11296_v49 = vrot.slane %v11295_v42, 4 }
 0x5c1   : > { %14529 = vmatmul.mubr.bf16.gmra.mrb[48].mxu1 %v12931_v53  ;;  %v11303_v53 = vshrl.u32 %v12987_v30, 16 }
 0x5c2   : > { %14548 = vmatprep.mubr.bf16.mxu1 %v19937_v51  ;;  %v11312_v51 = vshll.u32 %v12988_v25, 16 }
 0x5c3   : > { %v11305_v44 = vrot.slane %v11303_v53, 4 }
 0x5c4   : > { %v19353_v59 = vrot.slane %v11312_v51, 5 }
 0x5c9   : > { %14549 = vmatmul.mubr.bf16.vlgmr.msra.gmra.mrb[20].mxu1 %v19940_v34 }
 0x5ca   : > { %14552 = vmatprep.mubr.bf16.mxu1 %v19943_v2 }
 0x5d1   : > { %14553 = vmatmul.mubr.bf16.gmra.mrb[24].mxu1 %v19946_v11  ;;  %v11338_v11 = vrot.slane %v11336_v58, 5 }
 0x5d2   : > { %14556 = vmatprep.mubr.bf16.mxu1 %v19949_v39  ;;  %v11308_v39 = vrot.slane %v11306_v24, 5  ;;  %v12998_v24 = vld [vmem:[%s15806_s25 + $0x5c] sm:$0x1] }
 0x5d4   : > { %v11309_v18 = vor.u32 %v11308_v39, %v11305_v44  ;;  %v11394_v39 = vshll.u32 %v12998_v24, 16 }
 0x5d9   : > { %14557 = vmatmul.mubr.bf16.gmra.mrb[28].mxu1 %v19951_v15  ;;  %v11342_v15 = vrot.slane %v11340_v6, 4 }
 0x5da   : > { %14560 = vmatprep.mubr.bf16.mxu1 %v19953_v62 }
 0x5db   : > { %v11343_v20 = vor.u32 %v11342_v15, %v11338_v11 }
 0x5e1   : > { %14561 = vmatmul.mubr.bf16.gmra.mrb[32].mxu1 %v19955_v32  ;;  %v11276_v32 = vrot.slane %v11274_v41, 5 }
 0x5e2   : > { %14564 = vmatprep.mubr.bf16.mxu1 %v19957_v4  ;;  %v12989_v4 = vld [vmem:[%s15806_s25 + $0x38] sm:$0x1] }
 0x5e9   : > { %14565 = vmatmul.mubr.bf16.gmra.mrb[36].mxu1 %v19960_v31  ;;  %v12996_v31 = vld [vmem:[%s15806_s25 + $0x54] sm:$0xf] }
 0x5ea   : > { %14568 = vmatprep.mubr.bf16.mxu1 %v19962_v36  ;;  %v12993_v36 = vld [vmem:[%s15806_s25 + $0x48] sm:$0xf]  ;;  %v11375_v61 = vshrl.u32 %v12996_v31, 16 }
 0x5eb   : > { %v11351_v37 = vshrl.u32 %v12993_v36, 16 }
 0x5ec   : > { %v11377_v25 = vrot.slane %v11375_v61, 4 }
 0x5ed   : > { %v11353_v42 = vrot.slane %v11351_v37, 4  ;;  %v13005_v37 = vld [vmem:[%s15806_s25 + $0x78] sm:$0xf] }
 0x5f1   : > { %14569 = vmatmul.mubr.bf16.gmra.mrb[40].mxu1 %v12967_v43  ;;  %v12990_v43 = vld [vmem:[%s15806_s25 + $0x3c] sm:$0xf] }
 0x5f2   : > { %14572 = vmatprep.mubr.bf16.mxu1 %v12968_v46  ;;  %v11255_v46 = vshrl.u32 %v12981_v54, 16  ;;  %v11327_v19 = vshrl.u32 %v12990_v43, 16  ;;  %v11330_v45 = vshll.u32 %v12990_v43, 16  ;;  %v11319_v54 = vor.u32 %v11318_v35, %v19353_v59 }
 0x5f4   : > { %v11257_v50 = vrot.slane %v11255_v46, 4  ;;  %v11329_v38 = vrot.slane %v11327_v19, 4  ;;  %v11332_v27 = vrot.slane %v11330_v45, 5  ;;  %v11378_v46 = vshll.u32 %v12996_v31, 16 }
 0x5f5   : > { %v19372_v19 = vrot.slane %v11346_v56, 5  ;;  %v11388_v45 = vshrl.u32 %v12997_v26, 16 }
 0x5f6   : > { %v11261_v7 = vor.u32 %v11260_v0, %v11257_v50  ;;  %v11333_v48 = vor.u32 %v11332_v27, %v11329_v38  ;;  %v12994_v50 = vld [vmem:[%s15806_s25 + $0x4c] sm:$0xf]  ;;  %v13003_v38 = vld [vmem:[%s15806_s25 + $0x70] sm:$0xf]  ;;  %v12999_v27 = vld [vmem:[%s15806_s25 + $0x60] sm:$0xf] }
 0x5f7   : > { %v11360_v53 = vshll.u32 %v12994_v50, 16  ;;  %v11364_v6 = vshrl.u32 %v12994_v50, 16  ;;  %v11390_v51 = vrot.slane %v11388_v45, 4  ;;  %v11399_v41 = vshrl.u32 %v12999_v27, 16 }
 0x5f8   : > { %v11262_v62 = vrot.slane %v11261_v7, 4  ;;  %v11334_v21 = vrot.slane %v11333_v48, 4  ;;  %v11436_v48 = vshrl.u32 %v13003_v38, 16 }
 0x5f9   : > { %14573 = vmatmul.mubr.bf16.gmra.mrb[44].mxu1 %v12969_v12  ;;  %v11268_v12 = vshrl.u32 %v12982_v17, 16  ;;  %v19403_v35 = vrot.slane %v11360_v53, 5 }
 0x5fa   : > { %14576 = vmatprep.mubr.bf16.mxu1 %v12970_v5  ;;  %v11281_v5 = vrot.slane %v11279_v10, 4  ;;  %v11322_v10 = vshll.u32 %v12989_v4, 16  ;;  %v11267_v1 = vsel %vm15847_vm2, %v11262_v62, %v11266_v40  ;;  %v11339_v8 = vsel %vm15847_vm2, %v11334_v21, %v11338_v11  ;;  %v12995_v21 = vld [vmem:[%s15806_s25 + $0x50] sm:$0x1] }
 0x5fb   : > { %v11270_v33 = vrot.slane %v11268_v12, 4  ;;  %v19381_v0 = vunpack.c.l.bf16 %v11267_v1  ;;  %v11391_v62 = vor.u32 %v11390_v51, %v19392_v47  ;;  %v13001_v1 = vld [vmem:[%s15806_s25 + $0x68] sm:$0x1]  ;;  %v11370_v57 = vshll.u32 %v12995_v21, 16 }
 0x5fc   : > { %v11285_v14 = vor.u32 %v11284_v52, %v11281_v5  ;;  %v11354_v5 = vshll.u32 %v12993_v36, 16  ;;  %v11310_v52 = vrot.slane %v11309_v18, 4  ;;  %v19378_v28 = vrot.slane %v11322_v10, 5  ;;  %v13004_v36 = vld [vmem:[%s15806_s25 + $0x74] sm:$0x1] }
 0x5fd   : > { %v11271_v34 = vor.u32 %v11270_v33, %v11266_v40  ;;  %v19387_v40 = vunpack.c.l.bf16 %v11339_v8  ;;  %v13002_v33 = vld [vmem:[%s15806_s25 + $0x6c] sm:$0xf]  ;;  %v11438_v18 = vrot.slane %v11436_v48, 4  ;;  %v11392_v61 = vrot.slane %v11391_v62, 4 }
 0x5fe   : > { %v11286_v2 = vrot.slane %v11285_v14, 4  ;;  %v11380_v14 = vrot.slane %v11378_v46, 5  ;;  %v11356_v58 = vrot.slane %v11354_v5, 5  ;;  %v11423_v9 = vshrl.u32 %v13002_v33, 16 }
 0x5ff   : > { %v11272_v55 = vrot.slane %v11271_v34, 4  ;;  %v11426_v7 = vshll.u32 %v13002_v33, 16  ;;  %v11432_v34 = vshll.u32 %v13003_v38, 16  ;;  %v11315_v11 = vsel %vm15847_vm2, %v11310_v52, %v19353_v59 }
 0x600   : > { %v11291_v13 = vsel %vm15847_vm2, %v11286_v2, %v11290_v16  ;;  %v19374_v16 = vrot.slane %v11343_v20, 4  ;;  %v11402_v2 = vshll.u32 %v12999_v27, 16  ;;  %v11381_v63 = vor.u32 %v11380_v14, %v11377_v25 }
 0x601   : > { %14577 = vmatmul.mubr.bf16.gmra.mrb[48].mxu1 %v12971_v60  ;;  %v12986_v60 = vld [vmem:[%s15806_s25 + $0x2c] sm:$0x1]  ;;  %v11277_v43 = vsel %vm15847_vm2, %v11272_v55, %v11276_v32  ;;  %v19370_v12 = vunpack.c.l.bf16 %v11291_v13  ;;  %v11357_v15 = vor.u32 %v11356_v58, %v11353_v42  ;;  %v11366_v55 = vrot.slane %v11364_v6, 4  ;;  %v13008_v32 = vld [vmem:[%s15806_s25 + $0x84] sm:$0xf] }
 0x602   : > { %v11298_v23 = vshll.u32 %v12986_v60, 16  ;;  %v19376_v60 = vrot.slane %v11319_v54, 4  ;;  %v19385_v30 = vunpack.c.l.bf16 %v11277_v43  ;;  %v11349_v44 = vsel %vm15847_vm2, %v19374_v16, %v19372_v19  ;;  %v13009_v16 = vld [vmem:[%s15806_s25 + $0x88] sm:$0xf] }
 0x603   : > { %v11425_v4 = vrot.slane %v11423_v9, 4  ;;  %v11428_v56 = vrot.slane %v11426_v7, 5  ;;  %v19408_v59 = vrot.slane %v11432_v34, 5  ;;  %v11401_v13 = vrot.slane %v11399_v41, 4 }
 0x604   : > { %v11300_v3 = vrot.slane %v11298_v23, 5  ;;  %v13000_v23 = vld [vmem:[%s15806_s25 + $0x64] sm:$0xf]  ;;  %v11404_v31 = vrot.slane %v11402_v2, 5  ;;  %v19413_v54 = vunpack.c.l.bf16 %v11315_v11  ;;  %v11325_v10 = vsel %vm15847_vm2, %v19376_v60, %v19378_v28 }
 0x605   : > { %v11474_v43 = vshll.u32 %v13008_v32, 16  ;;  %v11382_v8 = vrot.slane %v11381_v63, 4  ;;  %v11396_v46 = vrot.slane %v11394_v39, 5  ;;  %v11358_v19 = vrot.slane %v11357_v15, 4 }
 0x606   : > { %v11301_v17 = vsel %vm15847_vm2, %v11296_v49, %v11300_v3  ;;  %v11408_v49 = vshll.u32 %v13000_v23, 16  ;;  %v11412_v3 = vshrl.u32 %v13000_v23, 16  ;;  %v11367_v45 = vor.u32 %v11366_v55, %v19403_v35 }
 0x607   : > { %v19383_v22 = vunpack.c.l.bf16 %v11301_v17  ;;  %v11471_v17 = vshrl.u32 %v13008_v32, 16  ;;  %v11429_v5 = vor.u32 %v11428_v56, %v11425_v4  ;;  %v11442_v52 = vshll.u32 %v13004_v36, 16  ;;  %v13010_v4 = vld [vmem:[%s15806_s25 + $0x8c] sm:$0x1]  ;;  %v13014_v36 = vld [vmem:[%s15806_s25 + $0x9c] sm:$0xf] }
 0x608   : > { %v19410_v26 = vrot.slane %v11408_v49, 5  ;;  %v11414_v20 = vrot.slane %v11412_v3, 4  ;;  %v11405_v50 = vor.u32 %v11404_v31, %v11401_v13  ;;  %v11439_v33 = vor.u32 %v11438_v18, %v19408_v59  ;;  %v19459_v18 = vld [vmem:[%s19708_s4] ss:$0 sm:$0xff] }
 0x609   : > { %v11418_v60 = vshll.u32 %v13001_v1, 16  ;;  %v11473_v28 = vrot.slane %v11471_v17, 4  ;;  %v11476_v27 = vrot.slane %v11474_v43, 5  ;;  %v11447_v25 = vshrl.u32 %v13005_v37, 16  ;;  %v13007_v17 = vld [vmem:[%s15806_s25 + $0x80] sm:$0x1] }
 0x60a   : > { %v11415_v38 = vor.u32 %v11414_v20, %v19410_v26  ;;  %v11450_v14 = vshll.u32 %v13005_v37, 16  ;;  %v11387_v42 = vsel %vm15847_vm2, %v11382_v8, %v19392_v47  ;;  %v11372_v23 = vrot.slane %v11370_v57, 5  ;;  %v13006_v47 = vld [vmem:[%s15806_s25 + $0x7c] sm:$0xf] }
 0x60b   : > { %v11480_v58 = vshll.u32 %v13009_v16, 16  ;;  %v11484_v53 = vshrl.u32 %v13009_v16, 16  ;;  %v11363_v6 = vsel %vm15847_vm2, %v11358_v19, %v19403_v35  ;;  %v11397_v24 = vsel %vm15847_vm2, %v11392_v61, %v11396_v46 }
 0x60c   : > { %v11368_v51 = vrot.slane %v11367_v45, 4  ;;  %v11430_v9 = vrot.slane %v11429_v5, 4  ;;  %v11406_v7 = vrot.slane %v11405_v50, 4  ;;  %v11440_v34 = vrot.slane %v11439_v33, 4 }
 0x60d   : > { %v11444_v41 = vrot.slane %v11442_v52, 5  ;;  %v11420_v48 = vrot.slane %v11418_v60, 5  ;;  %v11416_v2 = vrot.slane %v11415_v38, 4  ;;  %v11477_v49 = vor.u32 %v11476_v27, %v11473_v28 }
 0x60e   : > { %v11449_v3 = vrot.slane %v11447_v25, 4  ;;  %v11452_v11 = vrot.slane %v11450_v14, 5  ;;  %v19434_v63 = vunpack.c.l.bf16 %v11349_v44  ;;  %v19436_v39 = vunpack.c.l.bf16 %v11325_v10  ;;  %v13015_v14 = vld [vmem:[%s15806_s25 + $0xa0] sm:$0xf] }
 0x60f   : > { %v11482_v15 = vrot.slane %v11480_v58, 5  ;;  %v11486_v35 = vrot.slane %v11484_v53, 4  ;;  %v19438_v62 = vunpack.c.l.bf16 %v11387_v42  ;;  %v19440_v55 = vunpack.c.l.bf16 %v11397_v24 }
 0x610   : > { %v11373_v32 = vsel %vm15847_vm2, %v11368_v51, %v11372_v23  ;;  %v11435_v21 = vsel %vm15847_vm2, %v11430_v9, %v19408_v59  ;;  %v19448_v56 = vunpack.c.l.bf16 %v11363_v6  ;;  %v11411_v44 = vsel %vm15847_vm2, %v11406_v7, %v19410_v26 }
 0x611   : > { %v11445_v13 = vsel %vm15847_vm2, %v11440_v34, %v11444_v41  ;;  %v11456_v31 = vshll.u32 %v13006_v47, 16  ;;  %v11421_v59 = vsel %vm15847_vm2, %v11416_v2, %v11420_v48  ;;  %v11478_v20 = vrot.slane %v11477_v49, 4  ;;  %v13011_v34 = vld [vmem:[%s15806_s25 + $0x90] sm:$0xf] }
 0x612   : > { %v11453_v10 = vor.u32 %v11452_v11, %v11449_v3  ;;  %v11460_v1 = vshrl.u32 %v13006_v47, 16  ;;  %v19464_v43 = vunpack.c.l.bf16 %v11373_v32  ;;  %v19466_v26 = vunpack.c.l.bf16 %v11435_v21  ;;  %v13012_v11 = vld [vmem:[%s15806_s25 + $0x94] sm:$0xf] }
 0x613   : > { %v11487_v8 = vor.u32 %v11486_v35, %v11482_v15  ;;  %v11490_v61 = vshll.u32 %v13010_v4, 16  ;;  %v19468_v57 = vunpack.c.l.bf16 %v11411_v44  ;;  %v19470_v37 = vunpack.c.l.bf16 %v11445_v13 }
 0x614   : > { %v11519_v19 = vshrl.u32 %v13014_v36, 16  ;;  %v11522_v45 = vshll.u32 %v13014_v36, 16  ;;  %v19473_v16 = vunpack.c.l.bf16 %v11421_v59  ;;  %v19475_v50 = vrot.slane %v11456_v31, 5 }
 0x615   : > { %v11466_v33 = vshll.u32 %v13007_v17, 16  ;;  %v11483_v28 = vsel %vm15847_vm2, %v11478_v20, %v11482_v15  ;;  %v11454_v27 = vrot.slane %v11453_v10, 4  ;;  %v11462_v25 = vrot.slane %v11460_v1, 4 }
 0x616   : > { %v11488_v53 = vrot.slane %v11487_v8, 4  ;;  %v11492_v6 = vrot.slane %v11490_v61, 5  ;;  %v11521_v9 = vrot.slane %v11519_v19, 4  ;;  %v11524_v7 = vrot.slane %v11522_v45, 5 }
 0x617   : > { %v19490_v48 = vunpack.c.l.bf16 %v11483_v28  ;;  %v11528_v2 = vshll.u32 %v13015_v14, 16  ;;  %v11463_v47 = vor.u32 %v11462_v25, %v19475_v50  ;;  %v11532_v3 = vshrl.u32 %v13015_v14, 16  ;;  %v13013_v25 = vld [vmem:[%s15806_s25 + $0x98] sm:$0x1] }
 0x618   : > { %v11495_v32 = vshrl.u32 %v13011_v34, 16  ;;  %v11525_v13 = vor.u32 %v11524_v7, %v11521_v9  ;;  %v11504_v10 = vshll.u32 %v13012_v11, 16  ;;  %v11508_v61 = vshrl.u32 %v13012_v11, 16 }
 0x619   : > { %v11530_v20 = vrot.slane %v11528_v2, 5  ;;  %v11534_v19 = vrot.slane %v11532_v3, 4 }
 0x61a   : > { %v11526_v28 = vrot.slane %v11525_v13, 4 }
 0x69c   : > { %v14550_v46 = vpop.f32.mrb[20].mxu1 }
 0x69d   : > { %v11176_v5 = vadd.f32 %v14550_v46, %v19459_v18  ;;  %v11008_v52 = vpop.f32.mrb[21].mxu1  ;;  %v13016_v46 = vld [vmem:[%s15806_s25 + $0xa4] sm:$0x1] }
 0x69e   : > { %v11174_v38 = vadd.f32 %v19459_v18, %v11008_v52  ;;  %v14551_v60 = vpop.f32.mrb[22].mxu1 }
 0x69f   : > { %v11704_v42 = vadd.f32 %v19370_v12, %v11176_v5  ;;  %v11177_v23 = vadd.f32 %v14551_v60, %v19459_v18  ;;  %v11011_v58 = vpop.f32.mrb[23].mxu1  ;;  %v19492_v12 = vrot.slane %v11466_v33, 5  ;;  %v11497_v33 = vrot.slane %v11495_v32, 4 }
 0x6a0   : > { %v11702_v24 = vadd.f32 %v19381_v0, %v11174_v38  ;;  %v11175_v51 = vadd.f32 %v19459_v18, %v11011_v58  ;;  %v11459_v0 = vsel %vm15847_vm2, %v11454_v27, %v19475_v50  ;;  %v11464_v50 = vrot.slane %v11463_v47, 4 }
 0x6a1   : > { %v11705_v41 = vadd.f32 %v19383_v22, %v11177_v23  ;;  %v11736_v15 = vmax.f32 %v11704_v42, 0.0  ;;  %v11493_v22 = vsel %vm15847_vm2, %v11488_v53, %v11492_v6  ;;  %v19515_v42 = vunpack.c.l.bf16 %v11459_v0 }
 0x6a2   : > { %v11703_v49 = vadd.f32 %v19385_v30, %v11175_v51  ;;  %v11734_v21 = vmax.f32 %v11702_v24, 0.0  ;;  %v11498_v30 = vshll.u32 %v13011_v34, 16  ;;  %v19517_v23 = vunpack.c.l.bf16 %v11493_v22  ;;  %v13020_v51 = vld [vmem:[%s15806_s25 + $0xb4] sm:$0xf] }
 0x6a3   : > { %v11737_v35 = vmax.f32 %v11705_v41, 0.0  ;;  %v19520_v53 = vrot.slane %v11504_v10, 5  ;;  %v11535_v6 = vor.u32 %v11534_v19, %v11530_v20  ;;  %v11510_v24 = vrot.slane %v11508_v61, 4 }
 0x6a4   : > { %v11735_v4 = vmax.f32 %v11703_v49, 0.0  ;;  %v14554_v44 = vpop.f32.mrb[24].mxu1  ;;  %v11500_v27 = vrot.slane %v11498_v30, 5  ;;  %v11469_v7 = vsel %vm15847_vm2, %v11464_v50, %v19492_v12  ;;  %v11514_v34 = vshll.u32 %v13013_v25, 16 }
 0x6a5   : > { %v13143_v31 = vpack.c.bf16 %v11737_v35, %v11736_v15  ;;  %v11180_v36 = vadd.f32 %v14554_v44, %v19459_v18  ;;  %v11024_v59 = vpop.f32.mrb[25].mxu1  ;;  %v11567_v15 = vshrl.u32 %v13020_v51, 16  ;;  %v11536_v32 = vrot.slane %v11535_v6, 4 }
 0x6a6   : > { %v13138_v1 = vpack.c.bf16 %v11735_v4, %v11734_v21  ;;  %v11178_v17 = vadd.f32 %v19459_v18, %v11024_v59  ;;  %v14555_v8 = vpop.f32.mrb[26].mxu1  ;;  %v11501_v49 = vor.u32 %v11500_v27, %v11497_v33  ;;  %v11511_v21 = vor.u32 %v11510_v24, %v19520_v53  ;;  %v13021_v4 = vld [vmem:[%s15806_s25 + $0xb8] sm:$0xf] }
 0x6a7   : > { %13215 = vst [vmem:[%s19505_s15 + $0x8] sm:$0xff] %v13143_v31   ;;  %v11708_v45 = vadd.f32 %v19387_v40, %v11180_v36  ;;  %v11181_v5 = vadd.f32 %v14555_v8, %v19459_v18  ;;  %v11027_v52 = vpop.f32.mrb[27].mxu1  ;;  %v11538_v40 = vshll.u32 %v13016_v46, 16  ;;  %v19535_v31 = vunpack.c.l.bf16 %v11469_v7 }
 0x6a8   : > { %13139 = vst [vmem:[%s19505_s15] sm:$0xff] %v13138_v1   ;;  %v11706_v38 = vadd.f32 %v19413_v54, %v11178_v17  ;;  %v11179_v60 = vadd.f32 %v19459_v18, %v11027_v52  ;;  %v11570_v36 = vshll.u32 %v13020_v51, 16  ;;  %v11502_v1 = vrot.slane %v11501_v49, 4  ;;  %v13017_v17 = vld [vmem:[%s15806_s25 + $0xa8] sm:$0xf] }
 0x6a9   : > { %v11709_v14 = vadd.f32 %v19434_v63, %v11181_v5  ;;  %v11740_v54 = vmax.f32 %v11708_v45, 0.0  ;;  %v11540_v11 = vrot.slane %v11538_v40, 5  ;;  %v11516_v61 = vrot.slane %v11514_v34, 5 }
 0x6aa   : > { %v11707_v58 = vadd.f32 %v19436_v39, %v11179_v60  ;;  %v11738_v63 = vmax.f32 %v11706_v38, 0.0  ;;  %v11531_v39 = vsel %vm15847_vm2, %v11526_v28, %v11530_v20  ;;  %v11576_v46 = vshll.u32 %v13021_v4, 16  ;;  %v13018_v38 = vld [vmem:[%s15806_s25 + $0xac] sm:$0xf] }
 0x6ab   : > { %v11741_v9 = vmax.f32 %v11709_v14, 0.0  ;;  %v19540_v10 = vunpack.c.l.bf16 %v11531_v39  ;;  %v11541_v45 = vsel %vm15847_vm2, %v11536_v32, %v11540_v11  ;;  %v11512_v5 = vrot.slane %v11511_v21, 4 }
 0x6ac   : > { %v11739_v41 = vmax.f32 %v11707_v58, 0.0  ;;  %v14558_v2 = vpop.f32.mrb[28].mxu1  ;;  %v11580_v52 = vshrl.u32 %v13021_v4, 16  ;;  %v11572_v33 = vrot.slane %v11570_v36, 5  ;;  %v11543_v60 = vshrl.u32 %v13017_v17, 16 }
 0x6ad   : > { %v13153_v0 = vpack.c.bf16 %v11741_v9, %v11740_v54  ;;  %v11184_v47 = vadd.f32 %v14558_v2, %v19459_v18  ;;  %v11040_v3 = vpop.f32.mrb[29].mxu1  ;;  %v11507_v25 = vsel %vm15847_vm2, %v11502_v1, %v19520_v53  ;;  %v19552_v6 = vunpack.c.l.bf16 %v11541_v45 }
 0x6ae   : > { %v13148_v35 = vpack.c.bf16 %v11739_v41, %v11738_v63  ;;  %v11182_v12 = vadd.f32 %v19459_v18, %v11040_v3  ;;  %v14559_v22 = vpop.f32.mrb[30].mxu1  ;;  %v19554_v24 = vrot.slane %v11576_v46, 5  ;;  %v11552_v7 = vshll.u32 %v13018_v38, 16  ;;  %v13022_v63 = vld [vmem:[%s15806_s25 + $0xbc] sm:$0x1] }
 0x6af   : > { %13217 = vst [vmem:[%s19505_s15 + $0x18] sm:$0xff] %v13153_v0   ;;  %v11712_v44 = vadd.f32 %v19438_v62, %v11184_v47  ;;  %v11185_v13 = vadd.f32 %v14559_v22, %v19459_v18  ;;  %v11043_v30 = vpop.f32.mrb[31].mxu1  ;;  %v11569_v62 = vrot.slane %v11567_v15, 4  ;;  %v11556_v34 = vshrl.u32 %v13018_v38, 16  ;;  %v13019_v0 = vld [vmem:[%s15806_s25 + $0xb0] sm:$0x1] }
 0x6b0   : > { %13216 = vst [vmem:[%s19505_s15 + $0x10] sm:$0xff] %v13148_v35   ;;  %v11710_v59 = vadd.f32 %v19448_v56, %v11182_v12  ;;  %v11183_v20 = vadd.f32 %v19459_v18, %v11043_v30  ;;  %v19561_v39 = vunpack.c.l.bf16 %v11507_v25  ;;  %v11545_v11 = vrot.slane %v11543_v60, 4  ;;  %v13026_v35 = vld [vmem:[%s15806_s25 + $0xcc] sm:$0xf] }
 0x6b1   : > { %v11713_v8 = vadd.f32 %v19440_v55, %v11185_v13  ;;  %v11744_v56 = vmax.f32 %v11712_v44, 0.0  ;;  %v11573_v49 = vor.u32 %v11572_v33, %v11569_v62  ;;  %v11582_v22 = vrot.slane %v11580_v52, 4  ;;  %v13023_v33 = vld [vmem:[%s15806_s25 + $0xc0] sm:$0xf] }
 0x6b2   : > { %v11711_v19 = vadd.f32 %v19464_v43, %v11183_v20  ;;  %v11742_v28 = vmax.f32 %v11710_v59, 0.0  ;;  %v11546_v43 = vshll.u32 %v13017_v17, 16  ;;  %v11586_v32 = vshll.u32 %v13022_v63, 16 }
 0x6b3   : > { %v11745_v50 = vmax.f32 %v11713_v8, 0.0  ;;  %v19572_v4 = vrot.slane %v11552_v7, 5  ;;  %v11558_v44 = vrot.slane %v11556_v34, 4  ;;  %v11562_v13 = vshll.u32 %v13019_v0, 16 }
 0x6b4   : > { %v11743_v27 = vmax.f32 %v11711_v19, 0.0  ;;  %v14562_v55 = vpop.f32.mrb[32].mxu1  ;;  %v11548_v15 = vrot.slane %v11546_v43, 5  ;;  %v19574_v36 = vrot.slane %v11573_v49, 4  ;;  %v11615_v59 = vshrl.u32 %v13026_v35, 16 }
 0x6b5   : > { %v13163_v14 = vpack.c.bf16 %v11745_v50, %v11744_v56  ;;  %v11188_v40 = vadd.f32 %v14562_v55, %v19459_v18  ;;  %v11056_v58 = vpop.f32.mrb[33].mxu1  ;;  %v11583_v46 = vor.u32 %v11582_v22, %v19554_v24  ;;  %v19580_v19 = vrot.slane %v11586_v32, 5  ;;  %v13027_v55 = vld [vmem:[%s15806_s25 + $0xd0] sm:$0xf] }
 0x6b6   : > { %v13158_v51 = vpack.c.bf16 %v11743_v27, %v11742_v28  ;;  %v11186_v54 = vadd.f32 %v19459_v18, %v11056_v58  ;;  %v14563_v9 = vpop.f32.mrb[34].mxu1  ;;  %v11549_v8 = vor.u32 %v11548_v15, %v11545_v11  ;;  %v11559_v56 = vor.u32 %v11558_v44, %v19572_v4 }
 0x6b7   : > { %13219 = vst [vmem:[%s19505_s15 + $0x28] sm:$0xff] %v13163_v14   ;;  %v11716_v53 = vadd.f32 %v19466_v26, %v11188_v40  ;;  %v11189_v41 = vadd.f32 %v14563_v9, %v19459_v18  ;;  %v11059_v2 = vpop.f32.mrb[35].mxu1  ;;  %v11517_v26 = vsel %vm15847_vm2, %v11512_v5, %v11516_v61  ;;  %v19584_v50 = vrot.slane %v11562_v13, 5 }
 0x6b8   : > { %13218 = vst [vmem:[%s19505_s15 + $0x20] sm:$0xff] %v13158_v51   ;;  %v11714_v47 = vadd.f32 %v19468_v57, %v11186_v54  ;;  %v11187_v3 = vadd.f32 %v19459_v18, %v11059_v2  ;;  %v19576_v17 = vunpack.c.l.bf16 %v11517_v26  ;;  %v11579_v27 = vsel %vm15847_vm2, %v19574_v36, %v19554_v24  ;;  %v13024_v51 = vld [vmem:[%s15806_s25 + $0xc4] sm:$0xf] }
 0x6b9   : > { %v11717_v12 = vadd.f32 %v19470_v37, %v11189_v41  ;;  %v11748_v30 = vmax.f32 %v11716_v53, 0.0  ;;  %v19595_v25 = vrot.slane %v11615_v59, 4  ;;  %v11550_v40 = vrot.slane %v11549_v8, 4  ;;  %v13028_v59 = vld [vmem:[%s15806_s25 + $0xd4] sm:$0x1] }
 0x6ba   : > { %v11715_v21 = vadd.f32 %v19473_v16, %v11187_v3  ;;  %v11746_v20 = vmax.f32 %v11714_v47, 0.0  ;;  %v11618_v58 = vshll.u32 %v13026_v35, 16  ;;  %v11584_v54 = vrot.slane %v11583_v46, 4 }
 0x6bb   : > { %v11749_v57 = vmax.f32 %v11717_v12, 0.0  ;;  %v11591_v9 = vshrl.u32 %v13023_v33, 16  ;;  %v11594_v7 = vshll.u32 %v13023_v33, 16  ;;  %v11560_v63 = vrot.slane %v11559_v56, 4 }
 0x6bc   : > { %v11747_v37 = vmax.f32 %v11715_v21, 0.0  ;;  %v14566_v1 = vpop.f32.mrb[36].mxu1  ;;  %v11624_v24 = vshll.u32 %v13027_v55, 16  ;;  %v11628_v53 = vshrl.u32 %v13027_v55, 16  ;;  %v11600_v49 = vshll.u32 %v13024_v51, 16 }
 0x6bd   : > { %v13173_v61 = vpack.c.bf16 %v11749_v57, %v11748_v30  ;;  %v11192_v16 = vadd.f32 %v14566_v1, %v19459_v18  ;;  %v11072_v62 = vpop.f32.mrb[37].mxu1  ;;  %v11604_v0 = vshrl.u32 %v13024_v51, 16  ;;  %v11620_v11 = vrot.slane %v11618_v58, 5 }
 0x6be   : > { %v13168_v45 = vpack.c.bf16 %v11747_v37, %v11746_v20  ;;  %v11190_v5 = vadd.f32 %v19459_v18, %v11072_v62  ;;  %v14567_v52 = vpop.f32.mrb[38].mxu1  ;;  %v11593_v12 = vrot.slane %v11591_v9, 4  ;;  %v11596_v26 = vrot.slane %v11594_v7, 5 }
 0x6bf   : > { %13221 = vst [vmem:[%s19505_s15 + $0x38] sm:$0xff] %v13173_v61   ;;  %v11720_v38 = vadd.f32 %v19490_v48, %v11192_v16  ;;  %v11193_v60 = vadd.f32 %v14567_v52, %v19459_v18  ;;  %v11075_v28 = vpop.f32.mrb[39].mxu1  ;;  %v11626_v44 = vrot.slane %v11624_v24, 5  ;;  %v11630_v13 = vrot.slane %v11628_v53, 4  ;;  %v13025_v16 = vld [vmem:[%s15806_s25 + $0xc8] sm:$0x1] }
 0x6c0   : > { %13220 = vst [vmem:[%s19505_s15 + $0x30] sm:$0xff] %v13168_v45   ;;  %v11718_v43 = vadd.f32 %v19515_v42, %v11190_v5  ;;  %v11191_v14 = vadd.f32 %v19459_v18, %v11075_v28  ;;  %v11602_v36 = vrot.slane %v11600_v49, 5  ;;  %v11606_v20 = vrot.slane %v11604_v0, 4  ;;  %s13134_s25 = sshll.u32 %s15652_s21, 11  ;;  %s19658_s21 = scalar_lea.sflag [#allocation5], %s244_s13 }
 0x6c1   : > { %v11721_v48 = vadd.f32 %v19517_v23, %v11193_v60  ;;  %v11752_v41 = vmax.f32 %v11720_v38, 0.0  ;;  %v11555_v23 = vsel %vm15847_vm2, %v11550_v40, %v19572_v4  ;;  %v11696_v8 = vunpack.c.l.bf16 %v11579_v27  ;;  %s19650_s8 = scalar_lea.hbm %s19709_s5, %s13134_s25 }
 0x6c2   : > { %v11719_v34 = vadd.f32 %v19535_v31, %v11191_v14  ;;  %v11750_v42 = vmax.f32 %v11718_v43, 0.0  ;;  %v11621_v61 = vor.u32 %v11620_v11, %v19595_v25  ;;  %v11694_v46 = vunpack.c.l.bf16 %v11555_v23 }
 0x6c3   : > { %v11753_v2 = vmax.f32 %v11721_v48, 0.0  ;;  %v11597_v45 = vor.u32 %v11596_v26, %v11593_v12  ;;  %v11631_v52 = vor.u32 %v11630_v13, %v11626_v44  ;;  %v11634_v56 = vshll.u32 %v13028_v59, 16 }
 0x6c4   : > { %v11751_v47 = vmax.f32 %v11719_v34, 0.0  ;;  %v14570_v3 = vpop.f32.mrb[40].mxu1  ;;  %v11607_v60 = vor.u32 %v11606_v20, %v11602_v36  ;;  %v11610_v28 = vshll.u32 %v13025_v16, 16  ;;  %v11622_v43 = vrot.slane %v11621_v61, 4 }
 0x6c5   : > { %v13183_v15 = vpack.c.bf16 %v11753_v2, %v11752_v41  ;;  %v11196_v31 = vadd.f32 %v14570_v3, %v19459_v18  ;;  %v11088_v35 = vpop.f32.mrb[41].mxu1  ;;  %v11598_v58 = vrot.slane %v11597_v45, 4  ;;  %v11636_v9 = vrot.slane %v11634_v56, 5 }
 0x6c6   : > { %v13178_v22 = vpack.c.bf16 %v11751_v47, %v11750_v42  ;;  %v11194_v32 = vadd.f32 %v19459_v18, %v11088_v35  ;;  %v14571_v21 = vpop.f32.mrb[42].mxu1  ;;  %v11608_v24 = vrot.slane %v11607_v60, 4  ;;  %v11612_v53 = vrot.slane %v11610_v28, 5 }
 0x6c7   : > { %13223 = vst [vmem:[%s19505_s15 + $0x48] sm:$0xff] %v13183_v15   ;;  %v11724_v30 = vadd.f32 %v19540_v10, %v11196_v31  ;;  %v11197_v4 = vadd.f32 %v14571_v21, %v19459_v18  ;;  %v11091_v57 = vpop.f32.mrb[43].mxu1  ;;  %v11589_v10 = vsel %vm15847_vm2, %v11584_v54, %v19580_v19  ;;  %v11632_v54 = vrot.slane %v11631_v52, 4 }
 0x6c8   : > { %13222 = vst [vmem:[%s19505_s15 + $0x40] sm:$0xff] %v13178_v22   ;;  %v11722_v37 = vadd.f32 %v19561_v39, %v11194_v32  ;;  %v11195_v1 = vadd.f32 %v19459_v18, %v11091_v57  ;;  %v11565_v39 = vsel %vm15847_vm2, %v11560_v63, %v19584_v50  ;;  %v11697_v25 = vunpack.c.l.bf16 %v11589_v10 }
 0x6c9   : > { %v11725_v62 = vadd.f32 %v19552_v6, %v11197_v4  ;;  %v11756_v33 = vmax.f32 %v11724_v30, 0.0  ;;  %v11695_v40 = vunpack.c.l.bf16 %v11565_v39  ;;  %v11627_v49 = vsel %vm15847_vm2, %v11622_v43, %v11626_v44 }
 0x6ca   : > { %v11723_v5 = vadd.f32 %v19576_v17, %v11195_v1  ;;  %v11754_v6 = vmax.f32 %v11722_v37, 0.0  ;;  %v11603_v42 = vsel %vm15847_vm2, %v11598_v58, %v11602_v36  ;;  %v11637_v3 = vsel %vm15847_vm2, %v11632_v54, %v11636_v9 }
 0x6cb   : > { %v11757_v38 = vmax.f32 %v11725_v62, 0.0  ;;  %v11700_v15 = vunpack.c.l.bf16 %v11627_v49  ;;  %v11613_v31 = vsel %vm15847_vm2, %v11608_v24, %v11612_v53  ;;  %v11698_v22 = vunpack.c.l.bf16 %v11603_v42 }
 0x6cc   : > { %v11755_v27 = vmax.f32 %v11723_v5, 0.0  ;;  %v14574_v55 = vpop.f32.mrb[44].mxu1  ;;  %v11701_v13 = vunpack.c.l.bf16 %v11637_v3  ;;  %v11699_v36 = vunpack.c.l.bf16 %v11613_v31 }
 0x6cd   : > { %v13193_v19 = vpack.c.bf16 %v11757_v38, %v11756_v33  ;;  %v11200_v17 = vadd.f32 %v14574_v55, %v19459_v18  ;;  %v11104_v14 = vpop.f32.mrb[45].mxu1 }
 0x6ce   : > { %v13188_v50 = vpack.c.bf16 %v11755_v27, %v11754_v6  ;;  %v11198_v51 = vadd.f32 %v19459_v18, %v11104_v14  ;;  %v14575_v48 = vpop.f32.mrb[46].mxu1 }
 0x6cf   : > { %13225 = vst [vmem:[%s19505_s15 + $0x58] sm:$0xff] %v13193_v19   ;;  %v11728_v7 = vadd.f32 %v11696_v8, %v11200_v17  ;;  %v11201_v34 = vadd.f32 %v14575_v48, %v19459_v18  ;;  %v11107_v63 = vpop.f32.mrb[47].mxu1 }
 0x6d0   : > { %13224 = vst [vmem:[%s19505_s15 + $0x50] sm:$0xff] %v13188_v50   ;;  %v11726_v41 = vadd.f32 %v11694_v46, %v11198_v51  ;;  %v11199_v2 = vadd.f32 %v19459_v18, %v11107_v63 }
 0x6d1   : > { %v11729_v0 = vadd.f32 %v11697_v25, %v11201_v34  ;;  %v11760_v23 = vmax.f32 %v11728_v7, 0.0 }
 0x6d2   : > { %v11727_v47 = vadd.f32 %v11695_v40, %v11199_v2  ;;  %v11758_v35 = vmax.f32 %v11726_v41, 0.0 }
 0x6d3   : > { %v11761_v11 = vmax.f32 %v11729_v0, 0.0 }
 0x6d4   : > { %v11759_v12 = vmax.f32 %v11727_v47, 0.0  ;;  %v14578_v26 = vpop.f32.mrb[48].mxu1 }
 0x6d5   : > { %v13203_v32 = vpack.c.bf16 %v11761_v11, %v11760_v23  ;;  %v11204_v21 = vadd.f32 %v14578_v26, %v19459_v18  ;;  %v11120_v44 = vpop.f32.mrb[49].mxu1 }
 0x6d6   : > { %v13198_v30 = vpack.c.bf16 %v11759_v12, %v11758_v35  ;;  %v11202_v4 = vadd.f32 %v19459_v18, %v11120_v44  ;;  %v14579_v57 = vpop.f32.mrb[50].mxu1 }
 0x6d7   : > { %13227 = vst [vmem:[%s19505_s15 + $0x68] sm:$0xff] %v13203_v32   ;;  %v11732_v29 = vadd.f32 %v11700_v15, %v11204_v21  ;;  %v11205_v59 = vadd.f32 %v14579_v57, %v19459_v18  ;;  %v11123_v20 = vpop.f32.mrb[51].mxu1 }
 0x6d8   : > { %13226 = vst [vmem:[%s19505_s15 + $0x60] sm:$0xff] %v13198_v30   ;;  %v11730_v37 = vadd.f32 %v11698_v22, %v11202_v4  ;;  %v11203_v1 = vadd.f32 %v19459_v18, %v11123_v20 }
 0x6d9   : > { %v11733_v8 = vadd.f32 %v11701_v13, %v11205_v59  ;;  %v11764_v16 = vmax.f32 %v11732_v29, 0.0 }
 0x6da   : > { %v11731_v61 = vadd.f32 %v11699_v36, %v11203_v1  ;;  %v11762_v46 = vmax.f32 %v11730_v37, 0.0 }
 0x6db   : > { %v11765_v62 = vmax.f32 %v11733_v8, 0.0 }
 0x6dc   : > { %v11763_v10 = vmax.f32 %v11731_v61, 0.0 }
 0x6dd   : > { %v13213_v45 = vpack.c.bf16 %v11765_v62, %v11764_v16 }
 0x6de   : > { %v13208_v18 = vpack.c.bf16 %v11763_v10, %v11762_v46 }
 0x6df   : > { %13229 = vst [vmem:[%s19505_s15 + $0x78] sm:$0xff] %v13213_v45  }
 0x6e0   : > { %13228 = vst [vmem:[%s19505_s15 + $0x70] sm:$0xff] %v13208_v18  }
 0x6e1   : > { %15591 = shalt.err (!%p15588_p6)
}
 0x6e2   : > { %s15592_s29 = scalar_lea.hbm %s19650_s8, 2048  ;;  %s15596_s13 = scalar_lea.hbm %s19709_s5, 4096 }
 0x6e3   : > { %p15593_p7 = scmp.ne.s32.totalorder %s19650_s8, %s15592_s29  ;;  %p15597_p0 = scmp.lt.u32.totalorder %s19650_s8, %s19709_s5 }
 0x6e4   : > { %p15598_p2 = scmp.lt.u32.totalorder %s15596_s13, %s15592_s29  ;;  %p15600_p8 = scmp.lt.u32.totalorder %s15592_s29, %s19650_s8 }
 0x6e5   : > { %p15594_p9 = pnand %p15593_p7, %p19963_p10 }
 0x6e6   : > { %p15599_p4 = por %p15598_p2, %p15597_p0 }
 0x6e7   : > { %p15595_p12 = pneg %p15594_p9 }
 0x6e8   : > { %p15601_p11 = por %p15600_p8, %p15599_p4 }
 0x6ea   : > { %p15602_p13 = pnand %p15601_p11, %p15595_p12 }
 0x6ec   : > { %15605 = shalt.err (!%p15602_p13)
}
 0x6ed   : > { %s15667_s25 = smov 64   ;;  %s15668_s16 = smov 4  }
 0x6ee   : > { %15145 = dma.vmem_to_hbm [thread:$0]  (%p19963_p10), %s19652_s11, 2048, %s19650_s8, %s19658_s21, %s15667_s25, %s15667_s25, %s15668_s16  }
 0x6ef PF: > { %p15157_p1 = scmp.ge.s32.totalorder %s15660_s23, 2  ;;  %s11958_s7 = sand.u32 1, %s15640_s18  }
 0x6f0   : > { %p19964_p3 = scmp.ne.s32.totalorder %s19777_s30, 0  ;;  %s11959_s10 = scalar_lea.sflag [#allocation5], %s11958_s7 }
 0x6f2   : > { %p15152_p5 = pnand %p15157_p1, %p19964_p3 }
 0x6f4   : > { %15635 = dma.done.wait (!%p15152_p5), %s11959_s10, 2048  }
 0x6f5   : > { %15637 = vsyncadd (!%p15152_p5), %s11959_s10, 4294965248  ;;  %s19_s23 = sadd.s32 1, %s15660_s23   ;;  %s19965_s18 = smov %s15644_s19 }
 0x6f6   : > { %p16_p6 = scmp.ge.s32.totalorder %s19_s23, 4   ;;  %s19966_s19 = smov %s15648_s20 }
 0x6f7   : > { %s19967_s20 = smov %s15752_s6  ;;  %s19968_s21 = smov %s15656_s22 }
 0x6f8   : > { %s19969_s22 = smov %s19971_s26  ;;  %18 = sbr.rel (!%p16_p6) target bundleno = 5 (0x5), region = 106 }
 0x6ff   :  { %11964 = vsyncpa [#allocation4], 1 }
 0x700   :  { %11966 = vsyncpa [#allocation4 + $0x1], 1 }
 0x701   :  { %11967 = vsyncpa [#allocation5], 1 }
 0x702   :  { %11969 = vsyncpa [#allocation5 + $0x1], 1 }

</bundles_post_ra>
